<compile_context>
chip_gen: v7x
topology: tpu7x:2x2x1
jax: 0.10.0
libtpu: 0.0.40
codegen_flags: <defaults>
</compile_context>

<pallas_src>
import math
import numpy as np
import jax
import jax.numpy as jnp
from jax import lax
from jax.experimental import pallas as pl
from jax.experimental.pallas import tpu as pltpu


# ----------------------- module configuration (matches __init__ semantics) -----------
IMAGE_SIZE = 16                 # image_size
TEMPORAL_DOWNSCALE = 4          # temporal_downscale
POSITIONAL_CHANNELS = 48        # positional_channels (must be % 3 == 0)
POSITIONAL_MULTIPLIER = 1.0
SUPER_RESOLUTION = 2            # render at image_size * super_resolution, area-pool down
STD_DISPLACEMENT = 0.0104
STD_MOTION = 0.1


# ----------------------------- faithful JAX port of get_motion -----------------------
def get_motion(verts, temporal_downscale):
    # verts: (b, t, n, v) -> motion (b, t, n, 2), matching the torch reference.
    b, t = verts.shape[:2]
    if t % temporal_downscale == 1:
        zeros = jnp.zeros_like(verts[:, :1, :, :2])
        return jnp.concatenate([zeros, get_motion(verts[:, 1:], temporal_downscale)], axis=1)
    v2 = verts[..., :2].reshape(b, t // temporal_downscale, temporal_downscale,
                                verts.shape[2], 2)
    motion = v2[:, :, temporal_downscale - 1:temporal_downscale] - v2
    return motion.reshape(b, t, verts.shape[2], 2)


# temporal_subsample realized through explicit group indices (select = last of group,
# flatten = all frames of group concatenated channel-wise), including t % td == 1.
def _build_groups(t, td):
    if t % td == 1:
        groups = [[0] * td]
        base, n = 1, (t - 1) // td
    else:
        assert t % td == 0, "t must be divisible by temporal_downscale (or remainder 1)"
        groups, base, n = [], 0, t // td
    for g in range(n):
        groups.append([base + g * td + s for s in range(td)])
    return groups


def _area_pool_matrix(h_in, h_out):
    """(h_in*h_in, h_out*h_out) matrix implementing exact integer-factor 'area' pooling."""
    k = h_in // h_out
    assert k * h_out == h_in
    m = np.zeros((h_in * h_in, h_out * h_out), np.float32)
    inv = 1.0 / (k * k)
    for rh in range(h_in):
        for rw in range(h_in):
            m[rh * h_in + rw, (rh // k) * h_out + (rw // k)] = inv
    return m


# ------------------------------------ Pallas kernel -----------------------------------
def _make_kernel(F, td, n_freq, c_pad, pad, hr_sq, o_sq, pos_mult):
    ln2 = math.log(2.0)

    def kernel(sel_ref, mot_ref, mg_ref, isref_ref, bhr_ref, p_ref, out_ref):
        sel = sel_ref[...]                          # (F, 8, HrSq) f32: uv(3), motion(2), off(3)
        mg = mg_ref[...]                            # (F, td, HrSq) bf16 coverage masks
        msel = mg[:, td - 1:td, :]                  # (F, 1, HrSq) selected-frame mask

        # --- PositionalEncoding: per coord [sin(x*2^k), cos(x*2^k)], k < n_freq -------
        # Arguments in f32 (bf16 would lose ~0.5 abs at the 2^7 octave); results -> bf16.
        uv3 = sel[:, 0:3, :] * pos_mult                                      # (F, 3, HrSq)
        freqs = jnp.exp(
            lax.broadcasted_iota(jnp.int32, (n_freq, 1), 0).astype(jnp.float32) * ln2)
        arg = uv3[:, :, None, :] * freqs[None, None, :, :]                   # (F, 3, nf, HrSq)
        sc = jnp.concatenate([jnp.sin(arg).astype(jnp.bfloat16),
                              jnp.cos(arg).astype(jnp.bfloat16)], axis=2)    # (F, 3, 2nf, HrSq)
        pos = jnp.concatenate([sc[:, c] for c in range(3)], axis=1)          # (F, 6nf, HrSq)

        # --- build the full (F, c_pad, HrSq) LHS: pooling of every output channel rides
        #     one single MXU matmul against the area-pooling matrix ----------------------
        parts = [pos * msel]                                                 # masked pos-enc
        motv = mot_ref[...]                                                  # (F, 2(td-1), HrSq)
        for s in range(td - 1):                                              # masked motion,
            parts.append(motv[:, 2 * s:2 * s + 2, :] * mg[:, s:s + 1, :])    # temporal 'flatten'
        parts.append(sel[:, 3:5, :].astype(jnp.bfloat16) * msel)             # selected motion
        parts.append(sel[:, 5:8, :].astype(jnp.bfloat16) * msel)             # masked offsets
        parts.append(jnp.broadcast_to(isref_ref[...].astype(jnp.bfloat16),
                                      (F, 1, hr_sq)))                        # ref-frame mask
        parts.append(bhr_ref[...])                       # border (block-constant -> exact pool)
        if pad:
            parts.append(jnp.zeros((F, pad, hr_sq), jnp.bfloat16))

        lhs = jnp.concatenate(parts, axis=1)                                 # (F, c_pad, HrSq)

        # --- F.interpolate(mode='area') for ALL frames & channels: one matmul ----------
        pooled = jnp.dot(lhs.reshape(F * c_pad, hr_sq), p_ref[...],
                         preferred_element_type=jnp.float32)                 # (F*c_pad, OSq)

        # single aligned full-block store (channel dim padded to a multiple of 8)
        out_ref[...] = pooled.reshape(F, c_pad, o_sq)

    return kernel


# ------------------------------------ wrapper ------------------------------------------
def cap_conditioning(control, conditioned=True, *,
                     image_size=IMAGE_SIZE, temporal_downscale=TEMPORAL_DOWNSCALE,
                     positional_channels=POSITIONAL_CHANNELS,
                     positional_multiplier=POSITIONAL_MULTIPLIER,
                     super_resolution=SUPER_RESOLUTION,
                     std_displacement=STD_DISPLACEMENT, std_motion=STD_MOTION,
                     frames_per_block=8):
    verts = control['verts']            # (b, t, n, 3)
    offsets = control['offsets']        # (b, t, n, 3)
    is_ref = control['is_reference']    # (b, t) 0/1
    b, t = verts.shape[:2]
    gt_z = control.get('z', None)
    img, td, sr = image_size, temporal_downscale, super_resolution
    assert td >= 2

    if not conditioned:
        total_channels = positional_channels + 1 + 1 + 3   # + ref + border + displacements
        condition = jnp.zeros((b, t, img, img, total_channels), jnp.float32)
        if gt_z is not None:
            gt_z = gt_z * 0.0
        return {'condition': condition, 'gt_z': gt_z, 'is_ref': is_ref}

    # preprocessing that would feed the renderer as per-vertex props
    motion = get_motion(verts, td) / std_motion
    off_sc = offsets / std_displacement
    _vertex_prop = jnp.concatenate([motion, off_sc], axis=-1)  # noqa: F841
    # TODO(synk): self.renderer.render (differentiable mesh rasterization, renderer is None
    # in __init__) has no Pallas equivalent; the rendered uv+prop image and coverage mask
    # are taken as inputs ('rendered', 'render_mask') instead of rasterizing _vertex_prop.

    rendered = control['rendered']      # (b*t, Hr, Wr, 8) channels-last
    rmask = control['render_mask']      # (b*t, Hr, Wr, 1)
    Hr = img * sr
    HrSq, OSq = Hr * Hr, img * img
    assert rendered.shape[1] == Hr and rendered.shape[2] == Hr

    border = control['mask']            # (b, t, 1, Hm, Hm)
    Hm = border.shape[-1]
    kb = Hm // img
    assert kb * img == Hm

    groups = _build_groups(t, td)
    t_out = len(groups)
    B_out = b * t_out

    if t % td == 0:
        # contiguous groups -> pure reshapes, no HBM gather
        r6 = rendered.reshape(b, t_out, td, Hr, Hr, 8)
        sel_frames = r6[:, :, td - 1].reshape(B_out, Hr, Hr, 8)
        ns_motion = r6[:, :, :td - 1, :, :, 3:5].reshape(B_out, td - 1, Hr, Hr, 2)
        mask_grp = rmask.reshape(b, t_out, td, Hr, Hr).reshape(B_out, td, Hr, Hr)
        border_sel = border.reshape(b, t_out, td, Hm, Hm)[:, :, td - 1].reshape(B_out, Hm, Hm)
        isref_sel = is_ref.reshape(b, t_out, td)[:, :, td - 1].reshape(B_out)
    else:
        grp = np.asarray(groups, np.int32)                                  # (t_out, td)
        gf = jnp.asarray((np.arange(b)[:, None, None] * t + grp[None]).reshape(B_out, td))
        sel_idx = gf[:, -1]
        sel_frames = rendered[sel_idx]                                      # (B_out, Hr, Hr, 8)
        ns_motion = rendered[gf[:, :td - 1].reshape(-1)][..., 3:5].reshape(
            B_out, td - 1, Hr, Hr, 2)
        mask_grp = rmask.reshape(b * t, Hr, Hr)[gf.reshape(-1)].reshape(B_out, td, Hr, Hr)
        border_sel = border.reshape(b * t, Hm, Hm)[sel_idx]
        isref_sel = is_ref.reshape(b * t)[sel_idx]

    # channels-first, spatial flattened into the lane axis (lane-dense, 1024 lanes).
    # uv stream stays f32 (posenc argument precision); motion/masks/border go bf16.
    sel8 = jnp.transpose(sel_frames, (0, 3, 1, 2)).reshape(B_out, 8, HrSq).astype(jnp.float32)
    mot = jnp.transpose(ns_motion, (0, 1, 4, 2, 3)).reshape(
        B_out, 2 * (td - 1), HrSq).astype(jnp.bfloat16)
    mg = mask_grp.reshape(B_out, td, HrSq).astype(jnp.bfloat16)
    isref3 = isref_sel.reshape(B_out, 1, 1).astype(jnp.float32)

    # border: exact area pool (XLA reshape-mean, any Hm % img == 0), then block-constant
    # upsample to Hr so it rides the single pooling matmul exactly (no Pb matrix).
    bp = border_sel.reshape(B_out, img, kb, img, kb).astype(jnp.float32).mean(axis=(2, 4))
    bhr = jnp.broadcast_to(bp[:, :, None, :, None], (B_out, img, sr, img, sr))
    bhr = bhr.reshape(B_out, 1, HrSq).astype(jnp.bfloat16)

    n_freq = positional_channels // 3 // 2
    cc = positional_channels + 2 * td + 3                   # pos + flattened motion + offsets
    c_out = cc + 1 + 1                                      # + ref mask + border mask
    c_pad = ((c_out + 7) // 8) * 8                          # aligned output channel count
    pad = c_pad - c_out

    # >= 2 grid blocks whenever possible so the parallel axis shards v7x's 2 TensorCores
    F = max(1, min(frames_per_block, -(-B_out // 2)))
    num_blocks = -(-B_out // F)
    B_pad = num_blocks * F
    if B_pad != B_out:
        p0 = B_pad - B_out
        sel8 = jnp.pad(sel8, ((0, p0), (0, 0), (0, 0)))
        mot = jnp.pad(mot, ((0, p0), (0, 0), (0, 0)))
        mg = jnp.pad(mg, ((0, p0), (0, 0), (0, 0)))
        isref3 = jnp.pad(isref3, ((0, p0), (0, 0), (0, 0)))
        bhr = jnp.pad(bhr, ((0, p0), (0, 0), (0, 0)))

    # pooling matrix passed as an input (kernels may not capture array constants); values
    # 0 and 1/sr^2 are exact in bf16 -> single-pass bf16 MXU matmul.
    P = jnp.asarray(_area_pool_matrix(Hr, img), jnp.bfloat16)    # (HrSq, OSq)

    kernel = _make_kernel(F, td, n_freq, c_pad, pad, HrSq, OSq, float(positional_multiplier))

    out = pl.pallas_call(
        kernel,
        out_shape=jax.ShapeDtypeStruct((B_pad, c_pad, OSq), jnp.float32),
        grid_spec=pltpu.PrefetchScalarGridSpec(
            num_scalar_prefetch=0,
            grid=(num_blocks,),
            in_specs=[
                pl.BlockSpec((F, 8, HrSq), lambda i: (i, 0, 0)),              # selected frame
                pl.BlockSpec((F, 2 * (td - 1), HrSq), lambda i: (i, 0, 0)),   # non-sel motion
                pl.BlockSpec((F, td, HrSq), lambda i: (i, 0, 0)),             # coverage masks
                pl.BlockSpec((F, 1, 1), lambda i: (i, 0, 0)),                 # is_reference
                pl.BlockSpec((F, 1, HrSq), lambda i: (i, 0, 0)),              # border (upsampled)
                pl.BlockSpec((HrSq, OSq), lambda i: (0, 0)),                  # area-pool matrix
            ],
            out_specs=pl.BlockSpec((F, c_pad, OSq), lambda i: (i, 0, 0)),
        ),
        compiler_params=pltpu.CompilerParams(
            dimension_semantics=("parallel",),
            vmem_limit_bytes=48 * 1024 * 1024,
        ),
    )(sel8, mot, mg, isref3, bhr, P)

    out = out[:B_out, :c_out]                                # drop frame + channel padding
    condition = jnp.transpose(out, (0, 2, 1)).reshape(b, t_out, img, img, c_out)
    return {'condition': condition, 'gt_z': gt_z, 'is_ref': is_ref}


# ----------------------------- pure-JAX reference for validation -----------------------
def _reference(control, *, img, td, sr, pos_mult, n_freq):
    rendered = control['rendered']
    rmask = control['render_mask']
    border = control['mask']
    is_ref = control['is_reference']
    b, t = is_ref.shape
    H = img * sr
    freqs = 2.0 ** jnp.arange(n_freq, dtype=jnp.float32)

    uv = rendered[..., :3] * pos_mult
    pos_xyz = uv[..., None] * freqs
    pos = jnp.concatenate([jnp.sin(pos_xyz), jnp.cos(pos_xyz)], axis=-1)
    pos = pos.reshape(b * t, H, H, 3 * 2 * n_freq) * rmask
    mot = rendered[..., 3:5] * rmask
    off = rendered[..., 5:8] * rmask

    groups = _build_groups(t, td)
    t_out = len(groups)
    sel = jnp.asarray([g[-1] for g in groups])

    def unflat(x):
        return x.reshape((b, t) + x.shape[1:])

    pos, mot, off = unflat(pos), unflat(mot), unflat(off)
    pos_s, off_s = pos[:, sel], off[:, sel]
    mot_f = jnp.concatenate(
        [mot[:, jnp.asarray([g[s] for g in groups])] for s in range(td)], axis=-1)
    cond = jnp.concatenate([pos_s, mot_f, off_s], axis=-1)
    c = cond.shape[-1]
    cond = cond.reshape(b, t_out, img, sr, img, sr, c).mean(axis=(3, 5))

    refch = jnp.broadcast_to(
        is_ref.astype(jnp.float32)[:, sel][:, :, None, None, None],
        (b, t_out, img, img, 1))
    Hm = border.shape[-1]
    kb = Hm // img
    loss = border[:, sel, 0].reshape(b, t_out, img, kb, img, kb).mean(axis=(3, 5))[..., None]
    return jnp.concatenate([cond, refch, loss], axis=-1)


if __name__ == "__main__":
    key = jax.random.PRNGKey(0)
    b, t, n_verts = 2, 8, 12
    img = IMAGE_SIZE
    Hr = img * SUPER_RESOLUTION
    ks = jax.random.split(key, 5)

    verts = jax.random.uniform(ks[0], (b, t, n_verts, 3), jnp.float32)
    offsets = jax.random.normal(ks[1], (b, t, n_verts, 3), jnp.float32) * 0.01
    is_ref = jnp.zeros((b, t), jnp.int32).at[:, 0].set(1)
    rendered = jax.random.uniform(ks[2], (b * t, Hr, Hr, 8), jnp.float32)
    render_mask = (jax.random.uniform(ks[3], (b * t, Hr, Hr, 1)) > 0.3).astype(jnp.float32)
    border = (jax.random.uniform(ks[4], (b, t, 1, Hr, Hr)) > 0.1).astype(jnp.float32)

    control = {
        'verts': verts, 'offsets': offsets, 'is_reference': is_ref,
        'rendered': rendered, 'render_mask': render_mask, 'mask': border,
    }

    out = cap_conditioning(control, conditioned=True)
    cond = jax.block_until_ready(out['condition'])

    expected_c = POSITIONAL_CHANNELS + 2 * TEMPORAL_DOWNSCALE + 3 + 1 + 1
    assert cond.shape == (b, t // TEMPORAL_DOWNSCALE, img, img, expected_c), cond.shape
    assert bool(jnp.all(jnp.isfinite(cond)))

    ref = _reference(control, img=img, td=TEMPORAL_DOWNSCALE, sr=SUPER_RESOLUTION,
                     pos_mult=POSITIONAL_MULTIPLIER, n_freq=POSITIONAL_CHANNELS // 6)
    # tolerance: area pooling runs on the MXU with a bf16 LHS / bf16 pooling matrix
    np.testing.assert_allclose(np.asarray(cond), np.asarray(ref), rtol=2e-2, atol=2e-2)

    print("KERNEL_OK")
</pallas_src>

<mosaic_0001>
module attributes {stable_mosaic.version = 11 : i64} {
  func.func @kernel(%arg0: i32, %arg1: memref<2x8x1024xf32, #tpu.memory_space<vmem>>, %arg2: memref<2x6x1024xbf16, #tpu.memory_space<vmem>>, %arg3: memref<2x4x1024xbf16, #tpu.memory_space<vmem>>, %arg4: memref<2x1x1xf32, #tpu.memory_space<vmem>>, %arg5: memref<2x1x1024xbf16, #tpu.memory_space<vmem>>, %arg6: memref<1024x256xbf16, #tpu.memory_space<vmem>>, %arg7: memref<2x64x256xf32, #tpu.memory_space<vmem>>) attributes {dimension_semantics = [#tpu.dimension_semantics<parallel>], iteration_bounds = array<i64: 2>, scalar_prefetch = 0 : i64, scratch_operands = 0 : i64, tpu.core_type = #tpu.core_type<tc>, window_params = [{transform_indices = @transform_0, window_bounds = array<i64: 2, 8, 1024>}, {transform_indices = @transform_1, window_bounds = array<i64: 2, 6, 1024>}, {transform_indices = @transform_2, window_bounds = array<i64: 2, 4, 1024>}, {transform_indices = @transform_3, window_bounds = array<i64: 2, 1, 1>}, {transform_indices = @transform_4, window_bounds = array<i64: 2, 1, 1024>}, {pipeline_mode = #tpu.pipeline_mode<synchronous>, transform_indices = @transform_5, window_bounds = array<i64: 1024, 256>}, {transform_indices = @transform_6, window_bounds = array<i64: 2, 64, 256>}]} {
    %c0 = arith.constant 0 : index
    %c0_0 = arith.constant 0 : index
    %c0_1 = arith.constant 0 : index
    %0 = vector.load %arg1[%c0, %c0_0, %c0_1] : memref<2x8x1024xf32, #tpu.memory_space<vmem>>, vector<2x8x1024xf32>
    %c0_2 = arith.constant 0 : index
    %c0_3 = arith.constant 0 : index
    %c0_4 = arith.constant 0 : index
    %1 = vector.load %arg3[%c0_2, %c0_3, %c0_4] : memref<2x4x1024xbf16, #tpu.memory_space<vmem>>, vector<2x4x1024xbf16>
    %2 = vector.extract_strided_slice %1 {offsets = [0, 3, 0], sizes = [2, 1, 1024], strides = [1, 1, 1]} : vector<2x4x1024xbf16> to vector<2x1x1024xbf16>
    %3 = vector.extract_strided_slice %0 {offsets = [0, 0, 0], sizes = [2, 3, 1024], strides = [1, 1, 1]} : vector<2x8x1024xf32> to vector<2x3x1024xf32>
    %cst = arith.constant 1.000000e+00 : f32
    %4 = vector.broadcast %cst : f32 to vector<2x3x1024xf32>
    %5 = arith.mulf %3, %4 : vector<2x3x1024xf32>
    %6 = tpu.iota {dimensions = array<i32: 0>} : vector<8x1xi32>
    %7 = arith.sitofp %6 : vector<8x1xi32> to vector<8x1xf32>
    %cst_5 = arith.constant 0.693147182 : f32
    %8 = vector.broadcast %cst_5 : f32 to vector<8x1xf32>
    %9 = arith.mulf %7, %8 : vector<8x1xf32>
    %10 = math.exp %9 : vector<8x1xf32>
    %11 = vector.shape_cast %5 : vector<2x3x1024xf32> to vector<2x3x1x1024xf32>
    %12 = vector.shape_cast %10 : vector<8x1xf32> to vector<1x1x8x1xf32>
    %13 = vector.broadcast %11 : vector<2x3x1x1024xf32> to vector<2x3x8x1024xf32>
    %14 = vector.broadcast %12 : vector<1x1x8x1xf32> to vector<2x3x8x1024xf32>
    %15 = arith.mulf %13, %14 : vector<2x3x8x1024xf32>
    %16 = math.sin %15 : vector<2x3x8x1024xf32>
    %17 = arith.truncf %16 : vector<2x3x8x1024xf32> to vector<2x3x8x1024xbf16>
    %18 = math.cos %15 : vector<2x3x8x1024xf32>
    %19 = arith.truncf %18 : vector<2x3x8x1024xf32> to vector<2x3x8x1024xbf16>
    %20 = tpu.concatenate %17, %19 in 2 : vector<2x3x8x1024xbf16>, vector<2x3x8x1024xbf16> -> vector<2x3x16x1024xbf16>
    %21 = vector.extract_strided_slice %20 {offsets = [0, 0, 0, 0], sizes = [2, 1, 16, 1024], strides = [1, 1, 1, 1]} : vector<2x3x16x1024xbf16> to vector<2x1x16x1024xbf16>
    %22 = vector.shape_cast %21 : vector<2x1x16x1024xbf16> to vector<2x16x1024xbf16>
    %23 = vector.extract_strided_slice %20 {offsets = [0, 1, 0, 0], sizes = [2, 1, 16, 1024], strides = [1, 1, 1, 1]} : vector<2x3x16x1024xbf16> to vector<2x1x16x1024xbf16>
    %24 = vector.shape_cast %23 : vector<2x1x16x1024xbf16> to vector<2x16x1024xbf16>
    %25 = vector.extract_strided_slice %20 {offsets = [0, 2, 0, 0], sizes = [2, 1, 16, 1024], strides = [1, 1, 1, 1]} : vector<2x3x16x1024xbf16> to vector<2x1x16x1024xbf16>
    %26 = vector.shape_cast %25 : vector<2x1x16x1024xbf16> to vector<2x16x1024xbf16>
    %27 = tpu.concatenate %22, %24, %26 in 1 : vector<2x16x1024xbf16>, vector<2x16x1024xbf16>, vector<2x16x1024xbf16> -> vector<2x48x1024xbf16>
    %28 = vector.broadcast %2 : vector<2x1x1024xbf16> to vector<2x48x1024xbf16>
    %29 = arith.mulf %27, %28 : vector<2x48x1024xbf16>
    %c0_6 = arith.constant 0 : index
    %c0_7 = arith.constant 0 : index
    %c0_8 = arith.constant 0 : index
    %30 = vector.load %arg2[%c0_6, %c0_7, %c0_8] : memref<2x6x1024xbf16, #tpu.memory_space<vmem>>, vector<2x6x1024xbf16>
    %31 = vector.extract_strided_slice %30 {offsets = [0, 0, 0], sizes = [2, 2, 1024], strides = [1, 1, 1]} : vector<2x6x1024xbf16> to vector<2x2x1024xbf16>
    %32 = vector.extract_strided_slice %1 {offsets = [0, 0, 0], sizes = [2, 1, 1024], strides = [1, 1, 1]} : vector<2x4x1024xbf16> to vector<2x1x1024xbf16>
    %33 = vector.broadcast %32 : vector<2x1x1024xbf16> to vector<2x2x1024xbf16>
    %34 = arith.mulf %31, %33 : vector<2x2x1024xbf16>
    %35 = vector.extract_strided_slice %30 {offsets = [0, 2, 0], sizes = [2, 2, 1024], strides = [1, 1, 1]} : vector<2x6x1024xbf16> to vector<2x2x1024xbf16>
    %36 = vector.extract_strided_slice %1 {offsets = [0, 1, 0], sizes = [2, 1, 1024], strides = [1, 1, 1]} : vector<2x4x1024xbf16> to vector<2x1x1024xbf16>
    %37 = vector.broadcast %36 : vector<2x1x1024xbf16> to vector<2x2x1024xbf16>
    %38 = arith.mulf %35, %37 : vector<2x2x1024xbf16>
    %39 = vector.extract_strided_slice %30 {offsets = [0, 4, 0], sizes = [2, 2, 1024], strides = [1, 1, 1]} : vector<2x6x1024xbf16> to vector<2x2x1024xbf16>
    %40 = vector.extract_strided_slice %1 {offsets = [0, 2, 0], sizes = [2, 1, 1024], strides = [1, 1, 1]} : vector<2x4x1024xbf16> to vector<2x1x1024xbf16>
    %41 = vector.broadcast %40 : vector<2x1x1024xbf16> to vector<2x2x1024xbf16>
    %42 = arith.mulf %39, %41 : vector<2x2x1024xbf16>
    %43 = vector.extract_strided_slice %0 {offsets = [0, 3, 0], sizes = [2, 2, 1024], strides = [1, 1, 1]} : vector<2x8x1024xf32> to vector<2x2x1024xf32>
    %44 = arith.truncf %43 : vector<2x2x1024xf32> to vector<2x2x1024xbf16>
    %45 = vector.broadcast %2 : vector<2x1x1024xbf16> to vector<2x2x1024xbf16>
    %46 = arith.mulf %44, %45 : vector<2x2x1024xbf16>
    %47 = vector.extract_strided_slice %0 {offsets = [0, 5, 0], sizes = [2, 3, 1024], strides = [1, 1, 1]} : vector<2x8x1024xf32> to vector<2x3x1024xf32>
    %48 = arith.truncf %47 : vector<2x3x1024xf32> to vector<2x3x1024xbf16>
    %49 = vector.broadcast %2 : vector<2x1x1024xbf16> to vector<2x3x1024xbf16>
    %50 = arith.mulf %48, %49 : vector<2x3x1024xbf16>
    %c0_9 = arith.constant 0 : index
    %c0_10 = arith.constant 0 : index
    %c0_11 = arith.constant 0 : index
    %51 = vector.load %arg4[%c0_9, %c0_10, %c0_11] : memref<2x1x1xf32, #tpu.memory_space<vmem>>, vector<2x1x1xf32>
    %52 = arith.truncf %51 : vector<2x1x1xf32> to vector<2x1x1xbf16>
    %53 = vector.shape_cast %52 : vector<2x1x1xbf16> to vector<2x1x1xbf16>
    %54 = vector.broadcast %53 : vector<2x1x1xbf16> to vector<2x1x1024xbf16>
    %c0_12 = arith.constant 0 : index
    %c0_13 = arith.constant 0 : index
    %c0_14 = arith.constant 0 : index
    %55 = vector.load %arg5[%c0_12, %c0_13, %c0_14] : memref<2x1x1024xbf16, #tpu.memory_space<vmem>>, vector<2x1x1024xbf16>
    %cst_15 = arith.constant 0.000000e+00 : bf16
    %56 = vector.broadcast %cst_15 : bf16 to vector<2x3x1024xbf16>
    %57 = tpu.concatenate %29, %34, %38, %42, %46, %50, %54, %55, %56 in 1 : vector<2x48x1024xbf16>, vector<2x2x1024xbf16>, vector<2x2x1024xbf16>, vector<2x2x1024xbf16>, vector<2x2x1024xbf16>, vector<2x3x1024xbf16>, vector<2x1x1024xbf16>, vector<2x1x1024xbf16>, vector<2x3x1024xbf16> -> vector<2x64x1024xbf16>
    %58 = vector.shape_cast %57 : vector<2x64x1024xbf16> to vector<128x1024xbf16>
    %c0_16 = arith.constant 0 : index
    %c0_17 = arith.constant 0 : index
    %59 = vector.load %arg6[%c0_16, %c0_17] : memref<1024x256xbf16, #tpu.memory_space<vmem>>, vector<1024x256xbf16>
    %cst_18 = arith.constant dense<0.000000e+00> : vector<128x256xf32>
    %60 = tpu.matmul %58, %59, %cst_18 {dimension_numbers = #tpu.dot_dimension_numbers<[1], [0], [0], [1], [0, 0, 1, 1], [], []>} : vector<128x1024xbf16>, vector<1024x256xbf16>, vector<128x256xf32> -> vector<128x256xf32>
    %61 = vector.shape_cast %60 : vector<128x256xf32> to vector<2x64x256xf32>
    %c0_19 = arith.constant 0 : index
    %c0_20 = arith.constant 0 : index
    %c0_21 = arith.constant 0 : index
    %62 = vector.load %arg7[%c0_19, %c0_20, %c0_21] : memref<2x64x256xf32, #tpu.memory_space<vmem>>, vector<2x64x256xf32>
    tpu.vector_store %arg7[%c0_19, %c0_20, %c0_21], %61 {strides = array<i32>} : memref<2x64x256xf32, #tpu.memory_space<vmem>>, vector<2x64x256xf32>,
    return
  }
  func.func @transform_0(%arg0: i32) -> (i32, i32, i32) {
    %c0_i32 = arith.constant 0 : i32
    %c0_i32_0 = arith.constant 0 : i32
    %c0_i32_1 = arith.constant 0 : i32
    return %arg0, %c0_i32, %c0_i32_0 : i32, i32, i32
  }
  func.func @transform_1(%arg0: i32) -> (i32, i32, i32) {
    %c0_i32 = arith.constant 0 : i32
    %c0_i32_0 = arith.constant 0 : i32
    %c0_i32_1 = arith.constant 0 : i32
    return %arg0, %c0_i32, %c0_i32_0 : i32, i32, i32
  }
  func.func @transform_2(%arg0: i32) -> (i32, i32, i32) {
    %c0_i32 = arith.constant 0 : i32
    %c0_i32_0 = arith.constant 0 : i32
    %c0_i32_1 = arith.constant 0 : i32
    return %arg0, %c0_i32, %c0_i32_0 : i32, i32, i32
  }
  func.func @transform_3(%arg0: i32) -> (i32, i32, i32) {
    %c0_i32 = arith.constant 0 : i32
    %c0_i32_0 = arith.constant 0 : i32
    %c0_i32_1 = arith.constant 0 : i32
    return %arg0, %c0_i32, %c0_i32_0 : i32, i32, i32
  }
  func.func @transform_4(%arg0: i32) -> (i32, i32, i32) {
    %c0_i32 = arith.constant 0 : i32
    %c0_i32_0 = arith.constant 0 : i32
    %c0_i32_1 = arith.constant 0 : i32
    return %arg0, %c0_i32, %c0_i32_0 : i32, i32, i32
  }
  func.func @transform_5(%arg0: i32) -> (i32, i32) {
    %c0_i32 = arith.constant 0 : i32
    %c0_i32_0 = arith.constant 0 : i32
    %c0_i32_1 = arith.constant 0 : i32
    return %c0_i32, %c0_i32_0 : i32, i32
  }
  func.func @transform_6(%arg0: i32) -> (i32, i32, i32) {
    %c0_i32 = arith.constant 0 : i32
    %c0_i32_0 = arith.constant 0 : i32
    %c0_i32_1 = arith.constant 0 : i32
    return %arg0, %c0_i32, %c0_i32_0 : i32, i32, i32
  }
}

</mosaic_0001>

<bundles_post_ra>
// kernel: tpu_custom_call.1
= control target key start
LH: loop header
LB: loop body
LE: loop exit
PB: predicated region body
PF: predicated region fallthrough
CT: control target
= control target key end

     0   :  { %11 = vsyncpa [#allocation3], 0  ;;  %s21880_s0 = inlined_call_operand.vmem [shape: f32[4,8,1024], index: 0, kind: input, shape index: {}]   ;;  %s21881_s1 = inlined_call_operand.vmem [shape: bf16[4,6,1024], index: 1, kind: input, shape index: {}]   ;;  %s21882_s2 = inlined_call_operand.hbm [shape: bf16[4,4,1024], index: 2, kind: input, shape index: {}]   ;;  %s21883_s3 = inlined_call_operand.vmem [shape: f32[4,1,1], index: 3, kind: input, shape index: {}]   ;;  %s21884_s4 = inlined_call_operand.vmem [shape: bf16[4,1,1024], index: 4, kind: input, shape index: {}]   ;;  %s21885_s5 = inlined_call_operand.hbm [shape: bf16[1024,256], index: 5, kind: input, shape index: {}]   ;;  %s21886_s6 = inlined_call_operand.hbm [shape: f32[4,64,256], index: 6, kind: output, shape index: {}]  }
   0x1   :  { %13 = vsyncpa [#allocation3 + $0x1], 0 }
   0x2   :  { %14 = vsyncpa [#allocation6], 0 }
   0x3   :  { %15 = vsyncpa [#allocation4], 0 }
   0x4   :  { %17 = vsyncpa [#allocation4 + $0x1], 0  ;;  %s15445_s21 = smov 0   ;;  %s15447_s22 = smov 0  }
   0x5   :  { %s15449_s23 = smov 0   ;;  %s15451_s24 = smov 0  }
   0x6 LB: > { %s15466_s25 = sadd.s32 4294967295, %s15390_s24   ;;  %s13860_s26 = sadd.s32 4294967294, %s15390_s24   ;;  %s15390_s24 = sphi %s15451_s24, %s22289_s24   ;;  %s15386_s23 = sphi %s15449_s23, %s22288_s23   ;;  %s15382_s22 = sphi %s15447_s22, %s22287_s22   ;;  %s15378_s21 = sphi %s15445_s21, %s22286_s21  }
   0x7   : > { %p95_p0 = scmp.ne.s32.totalorder %s15382_s22, %s15378_s21  ;;  %p21887_p1 = scmp.eq.s32.totalorder %s15466_s25, 0 }
   0x8   : > { %p198_p3 = scmp.eq.s32.totalorder %s13860_s26, 1  ;;  %p13861_p5 = scmp.ge.s32.totalorder %s15390_s24, 1 }
   0x9   : > { %p15475_p4 = por %p21887_p1, %p95_p0  ;;  %p205_p7 = scmp.lt.s32.totalorder %s15390_s24, 3 }
   0xa   : > { %p15480_p6 = por %p198_p3, %p95_p0  ;;  %s15392_s30 = smov [#allocation5]  }
   0xb   : > { %s21971_s27 = scalar_select %p15475_p4, 1, 0 }
   0xc   : > { %s21972_s28 = scalar_select %p15480_p6, 1, 0 }
   0xd   : > { %p15485_p8 = pnand %p13861_p5, %p205_p7  ;;  %s217_s7 = sshll.u32 %s15392_s30, 4  ;;  %s15489_s7 = int_to_ptr.vmem [resolvable:$true] %s217_s7 }
   0xe   : > { %s15501_s9 = sadd.s32 1, %s15390_s24   ;;  %s82_s10 = sadd.s32 1, %s15386_s23 }
   0xf   : > { %s21973_s29 = scalar_select %p15485_p8, 1, 0 }
  0x10   : > { %p14773_p9 = pneg %p15485_p8  ;;  %s79_s11 = ssub.s32 %s15390_s24, %s15501_s9 }
  0x11   : > { %s15262_s14 = scalar_lea.hbm %s21885_s5, 16384 }
  0x12   : > { %p15496_p11 = pnand %p14773_p9, %p21887_p1  ;;  %p15263_p12 = scmp.ne.s32.totalorder %s21885_s5, %s15262_s14 }
  0x13   : > { %p15269_p5 = scmp.lt.u32.totalorder %s15262_s14, %s21885_s5 }
  0x14   : > { %p15264_p13 = pneg %p15496_p11 }
  0x16   : > { %p15265_p0 = pnand %p15264_p13, %p15263_p12 }
  0x18   : > { %p15266_p3 = pneg %p15265_p0 }
  0x1a   : > { %p15271_p7 = pnand %p15269_p5, %p15266_p3 }
  0x1c   : > { %15274 = shalt.err (!%p15271_p7)
}
  0x1d   : > { %s15275_s19 = scalar_lea.vmem %s15489_s7, 16384  ;;  %p15283_p2 = scmp.lt.s32.totalorder %s15489_s7, %s15489_s7 }
  0x1e   : > { %p15276_p9 = scmp.ne.s32.totalorder %s15489_s7, %s15275_s19  ;;  %p15284_p6 = scmp.lt.s32.totalorder %s15275_s19, %s15275_s19 }
  0x20   : > { %p15278_p10 = pnand %p15276_p9, %p15264_p13  ;;  %p15285_p4 = por %p15284_p6, %p15283_p2 }
  0x22   : > { %p15279_p1 = pneg %p15278_p10 }
  0x24   : > { %p15286_p8 = pnand %p15285_p4, %p15279_p1 }
  0x26   : > { %15289 = shalt.err (!%p15286_p8)
}
  0x27   : > { %s15393_s20 = smov 128   ;;  %s15394_s26 = smov 8  }
  0x28   : > { %14776 = dma.hbm_to_vmem [thread:$0]  (!%p15496_p11), %s21885_s5, 16384, %s15489_s7, [#allocation6], %s15393_s20, %s15393_s20, %s15394_s26  }
  0x29   : > { %p80_p2 = scmp.eq.s32.totalorder %s79_s11, 0  ;;  %p89_p1 = scmp.ne.s32.totalorder %s15386_s23, %s15382_s22 }
  0x2a   : > { %p90_p4 = scmp.eq.s32.totalorder %s15390_s24, 0  ;;  %p14786_p6 = scmp.lt.s32.totalorder %s15390_s24, 2 }
  0x2b   : > { %s15532_s13 = scalar_select %p80_p2, %s15386_s23, %s82_s10  }
  0x2c   : > { %p91_p8 = por %p90_p4, %p89_p1  ;;  %p21975_p10 = scmp.eq.s32.totalorder %s15466_s25, 1 }
  0x2d   : > { %s251_s15 = sand.u32 1, %s15386_s23   ;;  %s14472_s16 = sshll.u32 %s15390_s24, 9 }
  0x2e   : > { %p15536_p12 = por %p21975_p10, %p89_p1  ;;  %s13864_s17 = sshll.u32 %s251_s15, 5 }
  0x2f   : > { %s15545_s19 = scalar_lea.hbm %s21882_s2, %s14472_s16  ;;  %s255_s7 = scalar_lea.vmem [#allocation2], %s13864_s17 }
  0x30   : > { %s263_s10 = sshll.u32 %s255_s7, 4  ;;  %p15547_p11 = pnand %p14786_p6, %p91_p8  ;;  %s15551_s10 = int_to_ptr.vmem [resolvable:$true] %s263_s10 }
  0x31   : > { %s15553_s20 = scalar_lea.sflag [#allocation3], %s251_s15  ;;  %s15290_s26 = scalar_lea.hbm %s15545_s19, 512 }
  0x32   : > { %p15291_p13 = scmp.ne.s32.totalorder %s15545_s19, %s15290_s26  ;;  %p15292_p0 = pneg %p15547_p11 }
  0x33   : > { %s15295_s16 = scalar_lea.hbm %s21882_s2, 1024  ;;  %p15296_p7 = scmp.lt.u32.totalorder %s15545_s19, %s21882_s2 }
  0x34   : > { %p15293_p3 = pnand %p15292_p0, %p15291_p13  ;;  %p15297_p9 = scmp.lt.u32.totalorder %s15295_s16, %s15290_s26 }
  0x35   : > { %p15299_p1 = scmp.lt.u32.totalorder %s15290_s26, %s15545_s19 }
  0x36   : > { %p15294_p5 = pneg %p15293_p3  ;;  %p15298_p2 = por %p15297_p9, %p15296_p7 }
  0x38   : > { %p15300_p4 = por %p15299_p1, %p15298_p2 }
  0x3a   : > { %p15301_p6 = pnand %p15300_p4, %p15294_p5 }
  0x3c   : > { %15304 = shalt.err (!%p15301_p6)
}
  0x3d   : > { %s15305_s15 = scalar_lea.vmem %s15551_s10, 512  ;;  %s15395_s18 = smov [#allocation2]  }
  0x3e   : > { %p15306_p8 = scmp.ne.s32.totalorder %s15551_s10, %s15305_s15  ;;  %s15310_s7 = sshll.u32 %s15395_s18, 4  ;;  %s15311_s7 = int_to_ptr.vmem [resolvable:$false] %s15310_s7 }
  0x3f   : > { %s15312_s30 = scalar_lea.vmem %s15311_s7, 1024  ;;  %p15313_p3 = scmp.lt.s32.totalorder %s15551_s10, %s15311_s7 }
  0x40   : > { %p15308_p10 = pnand %p15306_p8, %p15292_p0  ;;  %p15314_p7 = scmp.lt.s32.totalorder %s15312_s30, %s15305_s15 }
  0x42   : > { %p15309_p13 = pneg %p15308_p10  ;;  %p15315_p9 = por %p15314_p7, %p15313_p3 }
  0x44   : > { %p15316_p2 = pnand %p15315_p9, %p15309_p13 }
  0x46   : > { %15319 = shalt.err (!%p15316_p2)
}
  0x47   : > { %s15396_s26 = smov 256   ;;  %s15397_s12 = smov 16  }
  0x48   : > { %14780 = dma.hbm_to_vmem [thread:$0]  (!%p15547_p11), %s15545_s19, 512, %s15551_s10, %s15553_s20, %s15396_s26, %s15396_s26, %s15397_s12  }
  0x49   : > { %p21978_p0 = scmp.ne.s32.totalorder %s21973_s29, 0 }
  0x4b   : > { %292 = sbr.rel (%p21978_p0) target bundleno = 1897 (0x769), region = 44 }
  0x52   : > { %s15584_s16 = sand.u32 1, %s15382_s22   ;;  %p21979_p5 = scmp.ne.s32.totalorder %s21971_s27, 0 }
  0x53   : > { %s13869_s17 = sshll.u32 %s15584_s16, 5  ;;  %s295_s8 = scalar_lea.sflag [#allocation3], %s15584_s16 }
  0x54   : > { %s15588_s15 = scalar_lea.vmem [#allocation2], %s13869_s17 }
  0x55   : > { %15365 = dma.done.wait (%p21979_p5), %s295_s8, 512  }
  0x56   : > { %15367 = vsyncadd (%p21979_p5), %s295_s8, 4294966784  ;;  %p21980_p11 = scmp.eq.s32.totalorder %s15466_s25, 0 }
  0x58   : > { %15369 = dma.done.wait (%p21980_p11), [#allocation6], 16384   ;;  %p21981_p1 = pmov %p21980_p11 }
  0x59   : > { %s13872_s29 = sshll.u32 %s15466_s25, 1  ;;  %v15398_v0 = vmov 0   ;;  %v14838_v1 = vld [vmem:[#allocation5 + $0x4] ss:$8 sps:$4 sm:$0xff]   ;;  %v14842_v6 = vld [vmem:[#allocation5] ss:$8 sps:$4 sm:$0xff]   ;;  %v400_v32 = vlaneseq }
  0x5a   : > { %15371 = vsyncadd (%p21981_p1), [#allocation6], 4294950912  ;;  %14837 = vset.pattern.permute.xlu0 %v15398_v0  ;;  %p353_p4 = scmp.lt.s32.totalorder %s13872_s29, 3  ;;  %13233 = vmatprep.subr.bf16.mxu1 %v14838_v1  ;;  %v14840_v5 = vld [vmem:[#allocation5 + $0x204] ss:$8 sps:$4 sm:$0xff]   ;;  %s15407_s12 = smov [#allocation7]  }
  0x5b   : > { %v14843_v7 = vld [vmem:[#allocation5 + $0x200] ss:$8 sps:$4 sm:$0xff]   ;;  %13459 = vmatprep.subr.bf16.mxu0 %v14840_v5  ;;  %v14844_v9 = vld [vmem:[#allocation5 + $0x14] ss:$8 sps:$4 sm:$0xff]   ;;  %13234 = vmatpush1.bf16.msra.mxu1 %v14842_v6  ;;  %v14848_v11 = vld [vmem:[#allocation5 + $0x10] ss:$8 sps:$4 sm:$0xff]  }
  0x5c   : > { %s22291_s29 = smov (!%p353_p4, %s13872_s29), 3  ;;  %13460 = vmatpush1.bf16.msra.mxu0 %v14843_v7  ;;  %v14846_v10 = vld [vmem:[#allocation5 + $0x214] ss:$8 sps:$4 sm:$0xff]   ;;  %v14849_v12 = vld [vmem:[#allocation5 + $0x210] ss:$8 sps:$4 sm:$0xff]   ;;  %13235 = vmatprep.subr.bf16.mxu1 %v14844_v9  ;;  %v15605_v36 = vshrl.u32 %v400_v32, 7 }
  0x5d   : > { %s370_s11 = scalar_lea.vmem %s21883_s3, %s22291_s29  ;;  %v14850_v13 = vld [vmem:[#allocation5 + $0x24] ss:$8 sps:$4 sm:$0xff]   ;;  %13461 = vmatprep.subr.bf16.mxu0 %v14846_v10  ;;  %v14854_v15 = vld [vmem:[#allocation5 + $0x20] ss:$8 sps:$4 sm:$0xff]   ;;  %v14856_v17 = vld [vmem:[#allocation5 + $0x34] ss:$8 sps:$4 sm:$0xff]  }
  0x5e   : > { %v11845_v2 = vld [vmem:[%s370_s11] sm:$0x1]  ;;  %v11846_v3 = vld [vmem:[%s370_s11 + $0x1] sm:$0x1]  ;;  %v14852_v14 = vld [vmem:[#allocation5 + $0x224] ss:$8 sps:$4 sm:$0xff]   ;;  %v402_v42 = vcvt.s32.f32 %v15605_v36 }
  0x5f   : > { %v11847_v4 = vpack.c.bf16 %v11845_v2, %v11845_v2  ;;  %v11848_v8 = vpack.c.bf16 %v11846_v3, %v11846_v3  ;;  %13236 = vmatpush1.bf16.msra.mxu1 %v14848_v11  ;;  %v14855_v16 = vld [vmem:[#allocation5 + $0x220] ss:$8 sps:$4 sm:$0xff]   ;;  %v14858_v18 = vld [vmem:[#allocation5 + $0x234] ss:$8 sps:$4 sm:$0xff]   ;;  %v14860_v19 = vld [vmem:[#allocation5 + $0x30] ss:$8 sps:$4 sm:$0xff]  }
  0x60   : > { %13462 = vmatpush1.bf16.msra.mxu0 %v14849_v12  ;;  %13237 = vmatprep.subr.bf16.mxu1 %v14850_v13  ;;  %v14861_v20 = vld [vmem:[#allocation5 + $0x230] ss:$8 sps:$4 sm:$0xff]   ;;  %v14862_v21 = vld [vmem:[#allocation5 + $0x44] ss:$8 sps:$4 sm:$0xff]   ;;  %v14866_v23 = vld [vmem:[#allocation5 + $0x40] ss:$8 sps:$4 sm:$0xff]  }
  0x61   : > { %11851 = vperm.xlu0 %14837, %v11847_v4   ;;  %13463 = vmatprep.subr.bf16.mxu0 %v14852_v14  ;;  %v14864_v22 = vld [vmem:[#allocation5 + $0x244] ss:$8 sps:$4 sm:$0xff]   ;;  %v14867_v24 = vld [vmem:[#allocation5 + $0x240] ss:$8 sps:$4 sm:$0xff]   ;;  %v14868_v25 = vld [vmem:[#allocation5 + $0x54] ss:$8 sps:$4 sm:$0xff]  }
  0x62   : > { %v14870_v26 = vld [vmem:[#allocation5 + $0x254] ss:$8 sps:$4 sm:$0xff]   ;;  %v14872_v27 = vld [vmem:[#allocation5 + $0x50] ss:$8 sps:$4 sm:$0xff]   ;;  %v14874_v29 = vld [vmem:[#allocation5 + $0x64] ss:$8 sps:$4 sm:$0xff]  }
  0x63   : > { %13238 = vmatpush1.bf16.msra.mxu1 %v14854_v15  ;;  %v14873_v28 = vld [vmem:[#allocation5 + $0x250] ss:$8 sps:$4 sm:$0xff]   ;;  %v14876_v30 = vld [vmem:[#allocation5 + $0x264] ss:$8 sps:$4 sm:$0xff]   ;;  %v14878_v31 = vld [vmem:[#allocation5 + $0x60] ss:$8 sps:$4 sm:$0xff]  }
  0x64   : > { %13464 = vmatpush1.bf16.msra.mxu0 %v14855_v16  ;;  %13239 = vmatprep.subr.bf16.mxu1 %v14856_v17  ;;  %v14879_v33 = vld [vmem:[#allocation5 + $0x260] ss:$8 sps:$4 sm:$0xff]   ;;  %v14880_v34 = vld [vmem:[#allocation5 + $0x74] ss:$8 sps:$4 sm:$0xff]   ;;  %21982 = vst [vmem:[#allocation11_spill] sm:$0xff] %v15605_v36  ;;  %s14473_s27 = sshll.u32 %s22291_s29, 6 }
  0x65   : > { %11855 = vperm.xlu0 %14837, %v11848_v8   ;;  %13465 = vmatprep.subr.bf16.mxu0 %v14858_v18  ;;  %v14882_v35 = vld [vmem:[#allocation5 + $0x274] ss:$8 sps:$4 sm:$0xff]   ;;  %v14884_v37 = vld [vmem:[#allocation5 + $0x70] ss:$8 sps:$4 sm:$0xff]   ;;  %v14886_v39 = vld [vmem:[#allocation5 + $0x84] ss:$8 sps:$4 sm:$0xff]   ;;  %s15612_s7 = scalar_lea.vmem %s21880_s0, %s14473_s27 }
  0x66   : > { %v14885_v38 = vld [vmem:[#allocation5 + $0x270] ss:$8 sps:$4 sm:$0xff]   ;;  %v14888_v40 = vld [vmem:[#allocation5 + $0x284] ss:$8 sps:$4 sm:$0xff]   ;;  %v14890_v41 = vld [vmem:[#allocation5 + $0x80] ss:$8 sps:$4 sm:$0xff]  }
  0x67   : > { %13240 = vmatpush1.bf16.msra.mxu1 %v14860_v19  ;;  %v14891_v43 = vld [vmem:[#allocation5 + $0x280] ss:$8 sps:$4 sm:$0xff]   ;;  %v14892_v44 = vld [vmem:[#allocation5 + $0x94] ss:$8 sps:$4 sm:$0xff]   ;;  %v15399_v46 = vmov 1966171168  }
  0x68   : > { %13466 = vmatpush1.bf16.msra.mxu0 %v14861_v20  ;;  %13241 = vmatprep.subr.bf16.mxu1 %v14862_v21  ;;  %v14894_v45 = vld [vmem:[#allocation5 + $0x294] ss:$8 sps:$4 sm:$0xff]   ;;  %v427_v47 = vunpack.c.l.s4 %v15399_v46  ;;  %v15400_v48 = vmov 1983009808   ;;  %v403_v50 = vmul.f32 0.6931472, %v402_v42 }
  0x69   : > { %13467 = vmatprep.subr.bf16.mxu0 %v14864_v22  ;;  %v11171_v49 = vunpack.c.l.s4 %v15400_v48  ;;  %v14896_v51 = vld [vmem:[#allocation5 + $0x90] ss:$8 sps:$4 sm:$0xff]   ;;  %v14898_v53 = vld [vmem:[#allocation5 + $0xa4] ss:$8 sps:$4 sm:$0xff]   ;;  %v14902_v57 = vld [vmem:[#allocation5 + $0xa0] ss:$8 sps:$4 sm:$0xff]  }
  0x6a   : > { %v14897_v52 = vld [vmem:[#allocation5 + $0x290] ss:$8 sps:$4 sm:$0xff]   ;;  %v14900_v54 = vld [vmem:[#allocation5 + $0x2a4] ss:$8 sps:$4 sm:$0xff]   ;;  %v428_v55 = vunpack.c.0.s8 %v427_v47  ;;  %v14903_v58 = vld [vmem:[#allocation5 + $0x2a0] ss:$8 sps:$4 sm:$0xff]  }
  0x6b   : > { %13242 = vmatpush1.bf16.msra.mxu1 %v14866_v23  ;;  %v11172_v56 = vunpack.c.0.s8 %v11171_v49  ;;  %v404_v59 = vmul.f32 1.442695, %v403_v50  ;;  %v14904_v60 = vld [vmem:[#allocation5 + $0xb4] ss:$8 sps:$4 sm:$0xff]   ;;  %v14908_v63 = vld [vmem:[#allocation5 + $0xb0] ss:$8 sps:$4 sm:$0xff]  }
  0x6c   : > { %13468 = vmatpush1.bf16.msra.mxu0 %v14867_v24  ;;  %13243 = vmatprep.subr.bf16.mxu1 %v14868_v25  ;;  %v14906_v61 = vld [vmem:[#allocation5 + $0x2b4] ss:$8 sps:$4 sm:$0xff]   ;;  %v15615_v62 = vsub.s32 %v428_v55, %v15605_v36  ;;  %v14909_v0 = vld [vmem:[#allocation5 + $0x2b0] ss:$8 sps:$4 sm:$0xff]   ;;  %v380_v1 = vld [vmem:[%s15612_s7] sm:$0xff]  ;;  %v15632_v19 = vsub.s32 0, %v15605_v36 }
  0x6d   : > { %13469 = vmatprep.subr.bf16.mxu0 %v14870_v26  ;;  %v381_v2 = vld [vmem:[%s15612_s7 + $0x8] sm:$0xff]  ;;  %v15620_v3 = vsub.s32 %v11172_v56, %v15605_v36  ;;  %v382_v5 = vld [vmem:[%s15612_s7 + $0x10] sm:$0xff]  ;;  %v383_v6 = vld [vmem:[%s15612_s7 + $0x18] sm:$0xff]  ;;  %15044 = vpow2.f32 %v404_v59  ;;  %v15637_v24 = vsub.s32 1, %v15605_v36  ;;  %s14474_s30 = sshll.u32 %s22291_s29, 5  ;;  %s13880_s8 = sshll.u32 %s22291_s29, 3 }
  0x6e   : > { %v14910_v4 = vld [vmem:[#allocation5 + $0xc4] ss:$8 sps:$4 sm:$0xff]   ;;  %v422_v8 = vcombine.low %v380_v1, %v381_v2  ;;  %v386_v10 = vld [vmem:[%s15612_s7 + $0x30] sm:$0xff]  ;;  %v387_v11 = vld [vmem:[%s15612_s7 + $0x38] sm:$0xff]  ;;  %v423_v12 = vcombine.low %v382_v5, %v383_v6  ;;  %s16639_s17 = scalar_lea.vmem %s21881_s1, %s14474_s30  ;;  %s16925_s10 = scalar_lea.vmem %s21884_s4, %s13880_s8 }
  0x6f   : > { %13244 = vmatpush1.bf16.msra.mxu1 %v14872_v27  ;;  %21983 = vst [vmem:[#allocation12_spill] sm:$0xff] %v15620_v3  ;;  %v384_v7 = vld [vmem:[%s15612_s7 + $0x20] sm:$0xff]  ;;  %v385_v9 = vld [vmem:[%s15612_s7 + $0x28] sm:$0xff]  ;;  %v425_v16 = vcombine.low %v386_v10, %v387_v11  ;;  %v14916_v25 = vld [vmem:[#allocation5 + $0xd4] ss:$8 sps:$4 sm:$0xff]   ;;  %s14476_s27 = sshll.u32 %s15466_s25, 12 }
  0x70   : > { %13470 = vmatpush1.bf16.msra.mxu0 %v14873_v28  ;;  %13245 = vmatprep.subr.bf16.mxu1 %v14874_v29  ;;  %v14912_v13 = vld [vmem:[#allocation5 + $0x2c4] ss:$8 sps:$4 sm:$0xff]   ;;  %v424_v15 = vcombine.low %v384_v7, %v385_v9  ;;  %v432_v17 = vrot.slane %v422_v8, %v15615_v62  ;;  %v439_v18 = vrot.slane %v423_v12, %v15615_v62  ;;  %v14914_v20 = vld [vmem:[#allocation5 + $0xc0] ss:$8 sps:$4 sm:$0xff]   ;;  %v14918_v26 = vld [vmem:[#allocation5 + $0x2d4] ss:$8 sps:$4 sm:$0xff]   ;;  %s21831_s30 = scalar_lea.hbm %s21886_s6, %s14476_s27 }
  0x71   : > { %13471 = vmatprep.subr.bf16.mxu0 %v14876_v30  ;;  %v15258_v14 = vld.sshfl [vmem:[%s15588_s15] sm:$0xff pattern:$0x76325410]  ;;  %v453_v23 = vrot.slane %v425_v16, %v15615_v62  ;;  %v15259_v42 = vld.sshfl [vmem:[%s15588_s15 + $0x8] sm:$0xff pattern:$0x76325410] }
  0x72   : > { %v14915_v21 = vld [vmem:[#allocation5 + $0x2c0] ss:$8 sps:$4 sm:$0xff]   ;;  %v446_v22 = vrot.slane %v424_v15, %v15615_v62  ;;  %v454_v27 = vcombine.low %v432_v17, %v439_v18  ;;  %v455_v28 = vcombine.high %v432_v17, %v439_v18  ;;  %v11184_v29 = vcombine.high %v15258_v14, %v15258_v14  ;;  %v14932_v8 = vld [vmem:[#allocation5 + $0xf0] ss:$8 sps:$4 sm:$0xff]   ;;  %v14941_v17 = vld [vmem:[#allocation5 + $0x104] ss:$8 sps:$4 sm:$0xff]  }
  0x73   : > { %13246 = vmatpush1.bf16.msra.mxu1 %v14878_v31  ;;  %v11238_v30 = vshrl.u32 %v15258_v14, 16  ;;  %v14926_v56 = vld [vmem:[#allocation5 + $0xe0] ss:$8 sps:$4 sm:$0xff]   ;;  %v14933_v9 = vld [vmem:[#allocation5 + $0x2f0] ss:$8 sps:$4 sm:$0xff]   ;;  %v11201_v12 = vcombine.high %v15259_v42, %v15259_v42  ;;  %v11445_v15 = vpack.i.b16 %v15259_v42, %v15259_v42  ;;  %s13718_s25 = scalar_lea.sflag [#allocation4], %s15584_s16 }
  0x74   : > { %13472 = vmatpush1.bf16.msra.mxu0 %v14879_v33  ;;  %13247 = vmatprep.subr.bf16.mxu1 %v14880_v34  ;;  %v456_v31 = vcombine.low %v446_v22, %v453_v23  ;;  %v457_v32 = vcombine.high %v446_v22, %v453_v23  ;;  %v11421_v33 = vpack.i.b16 %v15258_v14, %v15258_v14  ;;  %v15640_v34 = vsub.s32 5, %v15605_v36 }
  0x75   : > { %13473 = vmatprep.subr.bf16.mxu0 %v14882_v35  ;;  %v14920_v35 = vld [vmem:[#allocation5 + $0xd0] ss:$8 sps:$4 sm:$0xff]   ;;  %v11427_v48 = vpack.i.b16 %v11184_v29, %v11184_v29 }
  0x76   : > { %v485_v46 = vrot.slane %v457_v32, %v15615_v62  ;;  %v11426_v47 = vrot.slane %v11421_v33, %v15632_v19 }
  0x77   : > { %13248 = vmatpush1.bf16.msra.mxu1 %v14884_v37  ;;  %v14921_v37 = vld [vmem:[#allocation5 + $0x2d0] ss:$8 sps:$4 sm:$0xff]   ;;  %v15661_v55 = vpop.eup %15044 }
  0x78   : > { %13474 = vmatpush1.bf16.msra.mxu0 %v14885_v38  ;;  %13249 = vmatprep.subr.bf16.mxu1 %v14886_v39  ;;  %v464_v38 = vrot.slane %v454_v27, %v15615_v62  ;;  %v471_v39 = vrot.slane %v455_v28, %v15615_v62  ;;  %v11450_v28 = vrot.slane %v11445_v15, %v15632_v19 }
  0x79   : > { %13475 = vmatprep.subr.bf16.mxu0 %v14888_v40  ;;  %v15644_v40 = vpack.i.b16 %v11238_v30, %v11238_v30 }
  0x7b   : > { %13250 = vmatpush1.bf16.msra.mxu1 %v14890_v41  ;;  %v11246_v41 = vshrl.u32 %v11184_v29, 16  ;;  %v11576_v50 = vrot.slane %v15644_v40, %v15632_v19  ;;  %v11451_v29 = vpack.i.b16 %v11201_v12, %v11201_v12 }
  0x7c   : > { %13476 = vmatpush1.bf16.msra.mxu0 %v14891_v43  ;;  %13251 = vmatprep.subr.bf16.mxu1 %v14892_v44  ;;  %v14922_v43 = vld [vmem:[#allocation5 + $0xe4] ss:$8 sps:$4 sm:$0xff]  }
  0x7d   : > { %13477 = vmatprep.subr.bf16.mxu0 %v14894_v45  ;;  %v14924_v44 = vld [vmem:[#allocation5 + $0x2e4] ss:$8 sps:$4 sm:$0xff]   ;;  %v478_v45 = vrot.slane %v456_v31, %v15615_v62  ;;  %v15650_v49 = vpack.i.b16 %v11246_v41, %v11246_v41 }
  0x7f   : > { %13252 = vmatpush1.bf16.msra.mxu1 %v14896_v51  ;;  %v11696_v51 = vrot.slane %v11421_v33, %v15637_v24  ;;  %v11580_v59 = vrot.slane %v15650_v49, %v15632_v19 }
  0x80   : > { %13478 = vmatpush1.bf16.msra.mxu0 %v14897_v52  ;;  %13253 = vmatprep.subr.bf16.mxu1 %v14898_v53  ;;  %v15655_v52 = vcombine.low %v464_v38, %v478_v45  ;;  %v15657_v53 = vcombine.high %v464_v38, %v478_v45  ;;  %v11712_v38 = vrot.slane %v11445_v15, %v15637_v24 }
  0x81   : > { %13479 = vmatprep.subr.bf16.mxu0 %v14900_v54  ;;  %v15659_v54 = vcombine.low %v471_v39, %v485_v46  ;;  %v11716_v39 = vrot.slane %v11451_v29, %v15637_v24 }
  0x82   : > { %21984 = vst [vmem:[#allocation13_spill] sm:$0xff] %v15655_v52  ;;  %21985 = vst [vmem:[#allocation14_spill] sm:$0xff] %v15657_v53  ;;  %v579_v1 = vrot.slane %v15655_v52, %v15640_v34 }
  0x83   : > { %13254 = vmatpush1.bf16.msra.mxu1 %v14902_v57  ;;  %21986 = vst [vmem:[#allocation15_spill] sm:$0xff] %v15659_v54  ;;  %v14927_v57 = vld [vmem:[#allocation5 + $0x2e0] ss:$8 sps:$4 sm:$0xff]   ;;  %v15707_v45 = vcombine.low %v11712_v38, %v11716_v39 }
  0x84   : > { %13480 = vmatpush1.bf16.msra.mxu0 %v14903_v58  ;;  %13255 = vmatprep.subr.bf16.mxu1 %v14904_v60  ;;  %v11432_v58 = vrot.slane %v11427_v48, %v15632_v19  ;;  %v11700_v60 = vrot.slane %v11427_v48, %v15637_v24  ;;  %v15681_v7 = vmul.f32 %v15661_v55, %v579_v1  ;;  %v21900_v1 = vmov 2102212464  }
  0x85   : > { %13481 = vmatprep.subr.bf16.mxu0 %v14906_v61  ;;  %v14928_v61 = vld [vmem:[#allocation5 + $0xf4] ss:$8 sps:$4 sm:$0xff]  }
  0x86   : > { %v15671_v2 = vcombine.low %v11426_v47, %v11432_v58  ;;  %v15675_v5 = vcombine.low %v11696_v51, %v11700_v60  ;;  %v1364_v14 = vand.u32 2147483647, %v15681_v7  ;;  %v1367_v18 = vand.u32 2139095040, %v15681_v7 }
  0x87   : > { %13256 = vmatpush1.bf16.msra.mxu1 %v14908_v63  ;;  %v14930_v63 = vld [vmem:[#allocation5 + $0x2f4] ss:$8 sps:$4 sm:$0xff]   ;;  %v21906_v58 = vmov 683565275   ;;  %v21891_v60 = vmov 2475754826  }
  0x88   : > { %13482 = vmatpush1.bf16.msra.mxu0 %v14909_v0  ;;  %13257 = vmatprep.subr.bf16.mxu1 %v14910_v4  ;;  %v563_v0 = vrot.slane %v15655_v52, %v15637_v24  ;;  %v15673_v4 = vcombine.low %v11576_v50, %v11580_v59  ;;  %v1368_v23 = vshrl.u32 %v1367_v18, 23  ;;  %v15693_v27 = vand.u32 8388607, %v1364_v14 }
  0x89   : > { %13483 = vmatprep.subr.bf16.mxu0 %v14912_v13  ;;  %v11270_v13 = vshrl.u32 %v15259_v42, 16  ;;  %vm1366_vm15 = vcmp.lt.s32.totalorder %v15681_v7, 0 }
  0x8a   : > { %v15678_v6 = vmul.f32 %v15661_v55, %v563_v0  ;;  %v13901_v31 = vadd.s32 4294967169, %v1368_v23  ;;  %v1372_v51 = vor.u32 8388608, %v15693_v27 }
  0x8b   : > { %13258 = vmatpush1.bf16.msra.mxu1 %v14914_v20  ;;  %v14945_v20 = vld [vmem:[#allocation5 + $0x304] ss:$8 sps:$4 sm:$0xff]  }
  0x8c   : > { %13484 = vmatpush1.bf16.msra.mxu0 %v14915_v21  ;;  %13259 = vmatprep.subr.bf16.mxu1 %v14916_v25  ;;  %v948_v10 = vand.u32 2147483647, %v15678_v6  ;;  %v951_v11 = vand.u32 2139095040, %v15678_v6  ;;  %v15689_v25 = vpack.i.b16 %v11270_v13, %v11270_v13  ;;  %v1374_v41 = vadd.s32 1, %v13901_v31 }
  0x8d   : > { %13485 = vmatprep.subr.bf16.mxu0 %v14918_v26  ;;  %v11278_v26 = vshrl.u32 %v11201_v12, 16  ;;  %vm950_vm13 = vcmp.lt.s32.totalorder %v15678_v6, 0 }
  0x8e   : > { %v952_v16 = vshrl.u32 %v951_v11, 23  ;;  %v955_v21 = vand.u32 8388607, %v948_v10  ;;  %v11592_v33 = vrot.slane %v15689_v25, %v15632_v19  ;;  %vm1375_vm1 = vcmp.gt.s32.totalorder %v1374_v41, 0 }
  0x8f   : > { %13260 = vmatpush1.bf16.msra.mxu1 %v14920_v35  ;;  %v15696_v32 = vpack.i.b16 %v11278_v26, %v11278_v26  ;;  %v1376_v12 = vsel %vm1375_vm1, %v1374_v41, 0  ;;  %vm15799_vm14 = vcmp.le.f32.partialorder %v948_v10, 0.7853982 }
  0x90   : > { %13486 = vmatpush1.bf16.msra.mxu0 %v14921_v37  ;;  %13261 = vmatprep.subr.bf16.mxu1 %v14922_v43  ;;  %v13885_v22 = vadd.s32 4294967169, %v952_v16  ;;  %v956_v35 = vor.u32 8388608, %v955_v21  ;;  %v11456_v37 = vrot.slane %v11451_v29, %v15632_v19  ;;  %v1378_v31 = vand.u32 31, %v1376_v12 }
  0x91   : > { %13487 = vmatprep.subr.bf16.mxu0 %v14924_v44  ;;  %v11596_v42 = vrot.slane %v15696_v32, %v15632_v19 }
  0x92   : > { %v958_v30 = vadd.s32 1, %v13885_v22  ;;  %v15705_v44 = vcombine.low %v11450_v28, %v11456_v37  ;;  %v15711_v50 = vshll.u32 %v956_v35, 8 }
  0x93   : > { %13262 = vmatpush1.bf16.msra.mxu1 %v14926_v56  ;;  %v15709_v48 = vcombine.low %v11592_v33, %v11596_v42  ;;  %v559_v56 = vrot.slane %v15655_v52, %v15632_v19 }
  0x94   : > { %13488 = vmatpush1.bf16.msra.mxu0 %v14927_v57  ;;  %13263 = vmatprep.subr.bf16.mxu1 %v14928_v61  ;;  %vm959_vm0 = vcmp.gt.s32.totalorder %v958_v30, 0 }
  0x95   : > { %13489 = vmatprep.subr.bf16.mxu0 %v14930_v63  ;;  %v960_v43 = vsel %vm959_vm0, %v958_v30, 0  ;;  %v21893_v63 = vmov 2131351028   ;;  %v1377_v30 = vshrl.u32 %v1376_v12, 5 }
  0x96   : > { %v961_v46 = vshrl.u32 %v960_v43, 5  ;;  %v962_v47 = vand.u32 31, %v960_v43  ;;  %v1379_v43 = vsub.s32 32, %v1378_v31 }
  0x97   : > { %13264 = vmatpush1.bf16.msra.mxu1 %v14932_v8  ;;  %vm1396_vm6 = vcmp.lt.s32.totalorder %v1377_v30, 1  ;;  %vm1397_vm8 = vcmp.lt.s32.totalorder %v1377_v30, 2  ;;  %vm1398_vm9 = vcmp.lt.s32.totalorder %v1377_v30, 3  ;;  %vm1399_vm10 = vcmp.lt.s32.totalorder %v1377_v30, 4 }
  0x98   : > { %13490 = vmatpush1.bf16.msra.mxu0 %v14933_v9  ;;  %13346 = vmatprep.subr.bf16.mxu1 %v14941_v17  ;;  %v963_v57 = vsub.s32 32, %v962_v47  ;;  %v965_v59 = vshll.u32 %v21906_v58, %v962_v47  ;;  %v968_v61 = vshll.u32 %v21891_v60, %v962_v47  ;;  %v971_v0 = vshll.u32 %v21893_v63, %v962_v47 }
  0x99   : > { %13572 = vmatprep.subr.bf16.mxu0 %v14945_v20  ;;  %v974_v8 = vshll.u32 %v21900_v1, %v962_v47  ;;  %v21902_v9 = vmov 920167782   ;;  %vm980_vm2 = vcmp.lt.s32.totalorder %v961_v46, 1  ;;  %v21896_v20 = vmov 1326507024  }
  0x9a   : > { %v977_v11 = vshll.u32 %v21902_v9, %v962_v47  ;;  %v964_v13 = vshrl.u32 %v21906_v58, %v963_v57  ;;  %v966_v15 = vshrl.u32 %v21891_v60, %v963_v57  ;;  %v969_v16 = vshrl.u32 %v21893_v63, %v963_v57 }
  0x9b   : > { %v972_v17 = vshrl.u32 %v21900_v1, %v963_v57  ;;  %v975_v18 = vshrl.u32 %v21902_v9, %v963_v57  ;;  %v978_v21 = vshrl.u32 %v21896_v20, %v963_v57  ;;  %vm981_vm3 = vcmp.lt.s32.totalorder %v961_v46, 2 }
  0x9c   : > { %vm982_vm4 = vcmp.lt.s32.totalorder %v961_v46, 3  ;;  %v967_v22 = vor.u32 %v966_v15, %v965_v59  ;;  %v970_v23 = vor.u32 %v969_v16, %v968_v61  ;;  %vm983_vm5 = vcmp.lt.s32.totalorder %v961_v46, 4 }
  0x9d   : > { %v973_v26 = vor.u32 %v972_v17, %v971_v0  ;;  %v976_v28 = vor.u32 %v975_v18, %v974_v8  ;;  %v979_v29 = vor.u32 %v978_v21, %v977_v11  ;;  %v1381_v61 = vshll.u32 %v21906_v58, %v1378_v31 }
  0x9e   : > { %v984_v33 = vsel %vm980_vm2, %v964_v13, %v967_v22  ;;  %v988_v37 = vsel %vm980_vm2, %v967_v22, %v970_v23  ;;  %v1380_v12 = vshrl.u32 %v21906_v58, %v1379_v43  ;;  %v1382_v18 = vshrl.u32 %v21891_v60, %v1379_v43 }
  0x9f   : > { %v985_v35 = vsel %vm983_vm5, %v973_v26, 2102212464  ;;  %v992_v38 = vsel %vm980_vm2, %v970_v23, %v973_v26  ;;  %v989_v41 = vsel %vm983_vm5, %v976_v28, 920167782  ;;  %v993_v42 = vsel %vm983_vm5, %v979_v29, 1326507024 }
  0xa0   : > { %v986_v39 = vsel %vm982_vm4, %v970_v23, %v985_v35  ;;  %v990_v57 = vsel %vm982_vm4, %v973_v26, %v989_v41  ;;  %v994_v59 = vsel %vm982_vm4, %v976_v28, %v993_v42  ;;  %v1384_v21 = vshll.u32 %v21891_v60, %v1378_v31 }
  0xa1   : > { %v987_v47 = vsel %vm981_vm3, %v984_v33, %v986_v39  ;;  %v991_v0 = vsel %vm981_vm3, %v988_v37, %v990_v57  ;;  %v995_v8 = vsel %vm981_vm3, %v992_v38, %v994_v59  ;;  %v1385_v46 = vshrl.u32 %v21893_v63, %v1379_v43 }
  0xa2   : > { %v1003_v11 = vmul.u32 %v15711_v50, %v987_v47  ;;  %v15741_v13 = vmul.u32.u64.low %v15711_v50, %v995_v8  ;;  %v15742_v15 = vmul.u32.u64.high %v15711_v50, %v995_v8, %v15741_v13  ;;  %v1387_v22 = vshll.u32 %v21893_v63, %v1378_v31 }
  0xa3   : > { %v15745_v16 = vmul.u32.u64.low %v15711_v50, %v991_v0  ;;  %v15746_v17 = vmul.u32.u64.high %v15711_v50, %v991_v0, %v15745_v16  ;;  %v1388_v23 = vshrl.u32 %v21900_v1, %v1379_v43  ;;  %v1390_v26 = vshll.u32 %v21900_v1, %v1378_v31 }
  0xa4   : > { %v1391_v28 = vshrl.u32 %v21902_v9, %v1379_v43  ;;  %v1393_v29 = vshll.u32 %v21902_v9, %v1378_v31  ;;  %v1383_v33 = vor.u32 %v1382_v18, %v1381_v61  ;;  %v1386_v50 = vor.u32 %v1385_v46, %v1384_v21 }
  0xa5   : > { %v1394_v35 = vshrl.u32 %v21896_v20, %v1379_v43  ;;  %vm1005_vm7 = vc.u32 %v15742_v15, %v15745_v16  ;;  %v1006_v37 = vadd.s32 1, %v15746_v17  ;;  %v1389_v38 = vor.u32 %v1388_v23, %v1387_v22 }
  0xa6   : > { %v1412_v39 = vshll.u32 %v1372_v51, 8  ;;  %v1392_v41 = vor.u32 %v1391_v28, %v1390_v26  ;;  %v1400_v47 = vsel %vm1396_vm6, %v1380_v12, %v1383_v33  ;;  %v1404_v43 = vsel %vm1396_vm6, %v1383_v33, %v1386_v50 }
  0xa7   : > { %v1395_v42 = vor.u32 %v1394_v35, %v1393_v29  ;;  %v1007_v31 = vsel %vm1005_vm7, %v1006_v37, %v15746_v17  ;;  %v1401_v59 = vsel %vm1399_vm10, %v1389_v38, 2102212464  ;;  %v1408_v0 = vsel %vm1396_vm6, %v1386_v50, %v1389_v38 }
  0xa8   : > { %v1008_v57 = vadd.s32 %v1007_v31, %v1003_v11  ;;  %v1405_v61 = vsel %vm1399_vm10, %v1392_v41, 920167782  ;;  %v1402_v8 = vsel %vm1398_vm9, %v1386_v50, %v1401_v59  ;;  %v15771_v51 = vmul.f32 %v15661_v55, %v559_v56 }
  0xa9   : > { %v1406_v13 = vsel %vm1398_vm9, %v1389_v38, %v1405_v61  ;;  %v1409_v27 = vsel %vm1399_vm10, %v1395_v42, 1326507024  ;;  %v1403_v21 = vsel %vm1397_vm8, %v1400_v47, %v1402_v8  ;;  %v15788_v61 = vsub.s32 4, %v15605_v36 }
  0xaa   : > { %v1009_v17 = vadd.s32 536870912, %v1008_v57  ;;  %v1407_v18 = vsel %vm1397_vm8, %v1404_v43, %v1406_v13  ;;  %v1410_v12 = vsel %vm1398_vm9, %v1392_v41, %v1409_v27  ;;  %v847_v29 = vand.u32 2139095040, %v15771_v51 }
  0xab   : > { %v1411_v11 = vsel %vm1397_vm8, %v1408_v0, %v1410_v12  ;;  %v15776_v46 = vmul.u32.u64.low %v1412_v39, %v1407_v18  ;;  %v15777_v22 = vmul.u32.u64.high %v1412_v39, %v1407_v18, %v15776_v46  ;;  %v1419_v56 = vmul.u32 %v1412_v39, %v1403_v21 }
  0xac   : > { %v1010_v23 = vshrl.u32 %v1009_v17, 30  ;;  %v15779_v26 = vmul.u32.u64.low %v1412_v39, %v1411_v11  ;;  %v15780_v28 = vmul.u32.u64.high %v1412_v39, %v1411_v11, %v15779_v26  ;;  %v848_v35 = vshrl.u32 %v847_v29, 23 }
  0xad   : > { %v1422_v50 = vadd.s32 1, %v15777_v22  ;;  %v21890_v31 = vand.u32 2147483647, %v15771_v51  ;;  %v575_v12 = vrot.slane %v15655_v52, %v15788_v61  ;;  %vm15839_vm5 = vcmp.le.f32.partialorder %v1364_v14, 0.7853982 }
  0xae   : > { %v1011_v33 = vshll.u32 %v1010_v23, 30  ;;  %vm1421_vm11 = vc.u32 %v15780_v28, %v15776_v46  ;;  %v13881_v38 = vadd.s32 4294967169, %v848_v35  ;;  %v1034_v59 = vsub.s32 4, %v1010_v23 }
  0xaf   : > { %v1423_v30 = vsel %vm1421_vm11, %v1422_v50, %v15777_v22  ;;  %v1004_v22 = vadd.s32 %v15745_v16, %v15742_v15  ;;  %vm1040_vm7 = vweird.f32 %v15678_v6 }
  0xb0   : > { %v1012_v37 = vsub.s32 %v1008_v57, %v1011_v33  ;;  %v1424_v42 = vadd.s32 %v1423_v30, %v1419_v56  ;;  %v854_v47 = vadd.s32 1, %v13881_v38  ;;  %v851_v57 = vand.u32 8388607, %v21890_v31 }
  0xb1   : > { %v1035_v17 = vsel %vm950_vm13, %v1034_v59, %v1010_v23  ;;  %v1420_v56 = vadd.s32 %v15776_v46, %v15780_v28  ;;  %v15814_v38 = vmul.f32 %v15661_v55, %v575_v12 }
  0xb2   : > { %v1014_v41 = vsub.s32 0, %v1012_v37  ;;  %v1425_v39 = vadd.s32 536870912, %v1424_v42  ;;  %vm855_vm12 = vcmp.gt.s32.totalorder %v854_v47, 0  ;;  %v852_v26 = vor.u32 8388608, %v851_v57 }
  0xb3   : > { %v856_v13 = vsel %vm855_vm12, %v854_v47, 0  ;;  %v15808_v33 = vsel %vm15799_vm14, 0, %v1035_v17  ;;  %v1263_v12 = vand.u32 2139095040, %v15814_v38 }
  0xb4   : > { %v13886_v43 = vmin.u32 %v1014_v41, %v1012_v37  ;;  %v1426_v8 = vshrl.u32 %v1425_v39, 30  ;;  %v858_v18 = vand.u32 31, %v856_v13  ;;  %v15822_v28 = vadd.s32 3, %v15808_v33 }
  0xb5   : > { %v15867_v21 = vand.u32 3, %v15808_v33 }
  0xb6   : > { %v1016_v0 = vclz %v13886_v43  ;;  %v1427_v11 = vshll.u32 %v1426_v8, 30  ;;  %v859_v29 = vsub.s32 32, %v858_v18  ;;  %v1450_v16 = vsub.s32 4, %v1426_v8 }
  0xb7   : > { %v861_v41 = vshll.u32 %v21906_v58, %v858_v18  ;;  %v864_v47 = vshll.u32 %v21891_v60, %v858_v18  ;;  %v867_v17 = vshll.u32 %v21893_v63, %v858_v18  ;;  %vm6081_vm8 = vcmp.lt.s32.totalorder %v15867_v21, 2 }
  0xb8   : > { %v13887_v27 = vadd.s32 4294967294, %v1016_v0  ;;  %v15811_v10 = vsub.s32 %v1424_v42, %v1427_v11  ;;  %v862_v39 = vshrl.u32 %v21891_v60, %v859_v29  ;;  %v865_v46 = vshrl.u32 %v21893_v63, %v859_v29 }
  0xb9   : > { %v857_v42 = vshrl.u32 %v856_v13, 5  ;;  %v15825_v0 = vshll.u32 %v852_v26, 8  ;;  %v868_v13 = vshrl.u32 %v21900_v1, %v859_v29  ;;  %v874_v63 = vshrl.u32 %v21896_v20, %v859_v29 }
  0xba   : > { %vm13888_vm0 = vcmp.lt.s32.totalorder %v13887_v27, 0  ;;  %v1430_v15 = vsub.s32 0, %v15811_v10  ;;  %v866_v60 = vor.u32 %v865_v46, %v864_v47  ;;  %vm6082_vm10 = vcmp.eq.s32.totalorder %v15867_v21, 0 }
  0xbb   : > { %v1019_v23 = vsel %vm13888_vm0, 0, %v13887_v27  ;;  %vm876_vm1 = vcmp.lt.s32.totalorder %v857_v42, 1  ;;  %vm877_vm3 = vcmp.lt.s32.totalorder %v857_v42, 2  ;;  %vm878_vm4 = vcmp.lt.s32.totalorder %v857_v42, 3 }
  0xbc   : > { %v1020_v50 = vsub.s32 32, %v1019_v23  ;;  %v1021_v35 = vshll.u32 %v1012_v37, %v1019_v23  ;;  %v1024_v30 = vsub.s32 4294967266, %v1019_v23  ;;  %v13902_v37 = vmin.u32 %v1430_v15, %v15811_v10 }
  0xbd   : > { %v860_v23 = vshrl.u32 %v21906_v58, %v859_v29  ;;  %v871_v15 = vshrl.u32 %v21902_v9, %v859_v29  ;;  %vm879_vm6 = vcmp.lt.s32.totalorder %v857_v42, 4  ;;  %vm6085_vm11 = vcmp.eq.s32.totalorder %v15867_v21, 2 }
  0xbe   : > { %v1022_v43 = vshrl.u32 %v1004_v22, %v1020_v50  ;;  %v1025_v59 = vadd.s32 127, %v1024_v30  ;;  %v1432_v11 = vclz %v13902_v37  ;;  %v1451_v22 = vsel %vm1366_vm15, %v1450_v16, %v1426_v8 }
  0xbf   : > { %v863_v50 = vor.u32 %v862_v39, %v861_v41  ;;  %v869_v37 = vor.u32 %v868_v13, %v867_v17  ;;  %vm21965_vm0 = vcmask 1043456  }
  0xc0   : > { %v1023_v57 = vor.u32 %v1022_v43, %v1021_v35  ;;  %v1026_v27 = vshll.u32 %v1025_v59, 23  ;;  %v13903_v26 = vadd.s32 4294967294, %v1432_v11  ;;  %v870_v35 = vshll.u32 %v21900_v1, %v858_v18 }
  0xc1   : > { %v873_v43 = vshll.u32 %v21902_v9, %v858_v18  ;;  %v880_v29 = vsel %vm876_vm1, %v860_v23, %v863_v50  ;;  %v881_v17 = vsel %vm879_vm6, %v869_v37, 2102212464 }
  0xc2   : > { %v1027_v30 = vor.u32 4788187, %v1026_v27  ;;  %v1030_v31 = vcvt.s32.f32 %v1023_v57  ;;  %vm13904_vm2 = vcmp.lt.s32.totalorder %v13903_v26, 0  ;;  %v872_v8 = vor.u32 %v871_v15, %v870_v35 }
  0xc3   : > { %v1435_v47 = vsel %vm13904_vm2, 0, %v13903_v26  ;;  %v875_v39 = vor.u32 %v874_v63, %v873_v43  ;;  %v882_v13 = vsel %vm878_vm4, %v866_v60, %v881_v17  ;;  %v888_v35 = vsel %vm876_vm1, %v866_v60, %v869_v37 }
  0xc4   : > { %v1028_v59 = vand.u32 2147483647, %v1027_v30  ;;  %v1436_v18 = vsub.s32 32, %v1435_v47  ;;  %v1437_v46 = vshll.u32 %v15811_v10, %v1435_v47  ;;  %v1440_v57 = vsub.s32 4294967266, %v1435_v47 }
  0xc5   : > { %v885_v11 = vsel %vm879_vm6, %v872_v8, 920167782  ;;  %v883_v10 = vsel %vm877_vm3, %v880_v29, %v882_v13  ;;  %v889_v43 = vsel %vm879_vm6, %v875_v39, 1326507024  ;;  %v1264_v39 = vshrl.u32 %v1263_v12, 23 }
  0xc6   : > { %v1031_v16 = vmul.f32 %v1030_v31, %v1028_v59  ;;  %v884_v31 = vsel %vm876_vm1, %v863_v50, %v866_v60  ;;  %v1438_v14 = vshrl.u32 %v1420_v56, %v1436_v18  ;;  %v1441_v30 = vadd.s32 127, %v1440_v57 }
  0xc7   : > { %v886_v63 = vsel %vm878_vm4, %v869_v37, %v885_v11  ;;  %v890_v59 = vsel %vm878_vm4, %v872_v8, %v889_v43  ;;  %v1042_v8 = vand.u32 3, %v15822_v28  ;;  %v15876_v29 = vrot.slane %v15650_v49, %v15637_v24 }
  0xc8   : > { %v1032_v27 = vxor.u32 2147483648, %v1031_v16  ;;  %v887_v23 = vsel %vm877_vm3, %v884_v31, %v886_v63  ;;  %v1439_v15 = vor.u32 %v1438_v14, %v1437_v46  ;;  %v1442_v56 = vshll.u32 %v1441_v30, 23 }
  0xc9   : > { %v891_v60 = vsel %vm877_vm3, %v888_v35, %v890_v59  ;;  %v1453_v17 = vsel %vm15839_vm5, 0, %v1451_v22  ;;  %v899_v42 = vmul.u32 %v15825_v0, %v883_v10  ;;  %v21895_v31 = vand.u32 2147483647, %v15814_v38 }
  0xca   : > { %v1033_v26 = vsel %vm950_vm13, %v1032_v27, %v1031_v16  ;;  %v15861_v47 = vmul.u32.u64.low %v15825_v0, %v887_v23  ;;  %v15862_v16 = vmul.u32.u64.high %v15825_v0, %v887_v23, %v15861_v47  ;;  %v1443_v18 = vor.u32 4788187, %v1442_v56 }
  0xcb   : > { %v1036_v50 = vsel %vm15799_vm14, %v15678_v6, %v1033_v26  ;;  %v1446_v57 = vcvt.s32.f32 %v1439_v15  ;;  %v15870_v37 = vmul.u32.u64.low %v15825_v0, %v891_v60  ;;  %v15871_v46 = vmul.u32.u64.high %v15825_v0, %v891_v60, %v15870_v37 }
  0xcc   : > { %15046 = vcosq.f32 %v1036_v50  ;;  %v1444_v27 = vand.u32 2147483647, %v1443_v18  ;;  %v902_v33 = vadd.s32 1, %v15862_v16  ;;  %v13897_v11 = vadd.s32 4294967169, %v1264_v39 }
  0xcd   : > { %15048 = vsinq.f32 %v1036_v50  ;;  %v15886_v28 = vrot.slane %v15696_v32, %v15637_v24  ;;  %v595_v49 = vrot.slane %v15659_v54, %v15637_v24  ;;  %v611_v22 = vrot.slane %v15659_v54, %v15640_v34 }
  0xce   : > { %v1447_v12 = vmul.f32 %v1446_v57, %v1444_v27  ;;  %v1457_v0 = vadd.s32 3, %v1453_v17  ;;  %vm901_vm9 = vc.u32 %v15871_v46, %v15861_v47  ;;  %v1270_v14 = vadd.s32 1, %v13897_v11 }
  0xcf   : > { %v903_v32 = vsel %vm901_vm9, %v902_v33, %v15862_v16  ;;  %vm1043_vm12 = vcmp.lt.s32.totalorder %v1042_v8, 2  ;;  %v1267_v63 = vand.u32 8388607, %v21895_v31  ;;  %v15902_v10 = vand.u32 3, %v1453_v17 }
  0xd0   : > { %v1448_v30 = vxor.u32 2147483648, %v1447_v12  ;;  %v904_v13 = vadd.s32 %v903_v32, %v899_v42  ;;  %vm1271_vm13 = vcmp.gt.s32.totalorder %v1270_v14, 0  ;;  %v15905_v35 = vmul.f32 %v15661_v55, %v595_v49 }
  0xd1   : > { %v1272_v23 = vsel %vm1271_vm13, %v1270_v14, 0  ;;  %vm1047_vm14 = vcmp.eq.s32.totalorder %v1042_v8, 2  ;;  %v15910_v56 = vand.u32 3, %v1457_v0  ;;  %vm1044_vm1 = vcmp.eq.s32.totalorder %v1042_v8, 0 }
  0xd2   : > { %v1449_v26 = vsel %vm1366_vm15, %v1448_v30, %v1447_v12  ;;  %v905_v43 = vadd.s32 536870912, %v904_v13  ;;  %v15912_v18 = vand.u32 31, %v1272_v23  ;;  %vm846_vm15 = vcmp.lt.s32.totalorder %v15771_v51, 0 }
  0xd3   : > { %v1452_v15 = vsel %vm15839_vm5, %v15681_v7, %v1449_v26  ;;  %v1268_v37 = vor.u32 8388608, %v1267_v63  ;;  %vm6497_vm2 = vcmp.eq.s32.totalorder %v15902_v10, 2  ;;  %v1783_v27 = vand.u32 2139095040, %v15905_v35 }
  0xd4   : > { %15050 = vcosq.f32 %v1452_v15  ;;  %v906_v60 = vshrl.u32 %v905_v43, 30  ;;  %vm1460_vm3 = vcmp.eq.s32.totalorder %v15910_v56, 0  ;;  %vm1463_vm4 = vcmp.eq.s32.totalorder %v15910_v56, 2 }
  0xd5   : > { %15052 = vsinq.f32 %v1452_v15  ;;  %vm6494_vm5 = vcmp.eq.s32.totalorder %v15902_v10, 0  ;;  %vm1459_vm6 = vcmp.lt.s32.totalorder %v15910_v56, 2  ;;  %vm6493_vm9 = vcmp.lt.s32.totalorder %v15902_v10, 2 }
  0xd6   : > { %v15047_v50 = vpop.eup %15046  ;;  %v907_v33 = vshll.u32 %v906_v60, 30  ;;  %v1275_v49 = vsub.s32 32, %v15912_v18  ;;  %v15931_v0 = vmul.f32 %v15661_v55, %v611_v22  ;;  %v15940_v21 = vshll.u32 %v1268_v37, 8 }
  0xd7   : > { %v15049_v59 = vpop.eup %15048  ;;  %v1048_v16 = vxor.u32 2147483648, %v15047_v50  ;;  %v930_v26 = vsub.s32 4, %v906_v60  ;;  %v900_v22 = vadd.s32 %v15861_v47, %v15871_v46  ;;  %v1277_v43 = vshll.u32 %v21906_v58, %v15912_v18 }
  0xd8   : > { %v1045_v57 = vxor.u32 2147483648, %v15049_v59  ;;  %v15938_v8 = vsub.s32 %v904_v13, %v907_v33  ;;  %v21992_v37 = vmov 2131351028   ;;  %v1284_v46 = vshrl.u32 %v21900_v1, %v1275_v49 }
  0xd9   : > { %v1049_v39 = vsel %vm1047_vm14, %v1048_v16, %v15049_v59  ;;  %v6087_v41 = vsel %vm6085_vm11, %v1048_v16, %v15049_v59  ;;  %v21991_v16 = vmov 2475754826   ;;  %v1283_v47 = vshll.u32 %v21992_v37, %v15912_v18 }
  0xda   : > { %v1046_v17 = vsel %vm1044_vm1, %v15047_v50, %v1045_v57  ;;  %v6084_v42 = vsel %vm6082_vm10, %v15047_v50, %v1045_v57  ;;  %vm1456_vm10 = vweird.f32 %v15681_v7  ;;  %v1784_v50 = vshrl.u32 %v1783_v27, 23 }
  0xdb   : > { %v1050_v11 = vsel %vm1043_vm12, %v1046_v17, %v1049_v39  ;;  %v6088_v12 = vsel %vm6081_vm8, %v6084_v42, %v6087_v41  ;;  %v910_v15 = vsub.s32 0, %v15938_v8  ;;  %v1278_v13 = vshrl.u32 %v21991_v16, %v1275_v49 }
  0xdc   : > { %v1051_v14 = vsel %vm1040_vm7, nan, %v1050_v11  ;;  %v6089_v30 = vsel %vm1040_vm7, nan, %v6088_v12  ;;  %v1280_v57 = vshll.u32 %v21991_v16, %v15912_v18  ;;  %v1281_v39 = vshrl.u32 %v21992_v37, %v1275_v49 }
  0xdd   : > { %v5837_v32 = vpack.c.bf16 %v1051_v14, %v1051_v14  ;;  %v10829_v63 = vpack.c.bf16 %v6089_v30, %v6089_v30  ;;  %v13882_v41 = vmin.u32 %v910_v15, %v15938_v8  ;;  %v15953_v27 = vshrl.u32 %v1272_v23, 5 }
  0xde   : > { %v15051_v17 = vpop.eup %15050  ;;  %v931_v33 = vsel %vm846_vm15, %v930_v26, %v906_v60  ;;  %v1276_v11 = vshrl.u32 %v21906_v58, %v1275_v49  ;;  %v13917_v12 = vadd.s32 4294967169, %v1784_v50  ;;  %v1286_v15 = vshll.u32 %v21900_v1, %v15912_v18 }
  0xdf   : > { %v10925_v59 = vrot.slane %v10829_v63, 4  ;;  %v15053_v14 = vpop.eup %15052  ;;  %v1464_v63 = vxor.u32 2147483648, %v15051_v17  ;;  %v912_v23 = vclz %v13882_v41  ;;  %v1279_v6 = vor.u32 %v1278_v13, %v1277_v43 }
  0xe0   : > { %v1461_v31 = vxor.u32 2147483648, %v15053_v14  ;;  %v1282_v20 = vor.u32 %v1281_v39, %v1280_v57  ;;  %v1287_v3 = vshrl.u32 %v21902_v9, %v1275_v49  ;;  %v1285_v50 = vor.u32 %v1284_v46, %v1283_v47 }
  0xe1   : > { %v10979_v42 = vsel %vm21965_vm0, %v5837_v32, %v10925_v59  ;;  %v1465_v60 = vsel %vm1463_vm4, %v1464_v63, %v15053_v14  ;;  %v6499_v32 = vsel %vm6497_vm2, %v1464_v63, %v15053_v14  ;;  %v13883_v26 = vadd.s32 4294967294, %v912_v23 }
  0xe2   : > { %v11366_v30 = vmul.bf16 %v15876_v29, %v10979_v42  ;;  %v1462_v59 = vsel %vm1460_vm3, %v15051_v17, %v1461_v31  ;;  %v6496_v41 = vsel %vm6494_vm5, %v15051_v17, %v1461_v31  ;;  %v1289_v43 = vshll.u32 %v21902_v9, %v15912_v18 }
  0xe3   : > { %v21993_v13 = vmov 1326507024   ;;  %v1466_v39 = vsel %vm1459_vm6, %v1462_v59, %v1465_v60  ;;  %v6500_v42 = vsel %vm6493_vm9, %v6496_v41, %v6499_v32  ;;  %vm13884_vm7 = vcmp.lt.s32.totalorder %v13883_v26, 0 }
  0xe4   : > { %13265 = vmatprep.mubr.bf16.mxu1 %v11366_v30  ;;  %v1290_v57 = vshrl.u32 %v21993_v13, %v1275_v49  ;;  %v1288_v14 = vor.u32 %v1287_v3, %v1286_v15  ;;  %v1467_v47 = vsel %vm1456_vm10, nan, %v1466_v39  ;;  %v6501_v46 = vsel %vm1456_vm10, nan, %v6500_v42 }
  0xe5   : > { %v21994_v31 = vand.u32 2147483647, %v15771_v51  ;;  %v915_v49 = vsel %vm13884_vm7, 0, %v13883_v26  ;;  %vm1292_vm11 = vcmp.lt.s32.totalorder %v15953_v27, 1  ;;  %v5841_v56 = vpack.c.bf16 %v1467_v47, %v1467_v47 }
  0xe6   : > { %v10833_v10 = vpack.c.bf16 %v6501_v46, %v6501_v46  ;;  %v916_v17 = vsub.s32 32, %v915_v49  ;;  %v917_v3 = vshll.u32 %v15938_v8, %v915_v49  ;;  %v920_v30 = vsub.s32 4294967266, %v915_v49 }
  0xe7   : > { %vm15987_vm8 = vcmp.le.f32.partialorder %v21994_v31, 0.7853982  ;;  %v1291_v63 = vor.u32 %v1290_v57, %v1289_v43  ;;  %vm1294_vm12 = vcmp.lt.s32.totalorder %v15953_v27, 3  ;;  %vm1295_vm13 = vcmp.lt.s32.totalorder %v15953_v27, 4 }
  0xe8   : > { %v10929_v7 = vrot.slane %v10833_v10, 4  ;;  %v918_v23 = vshrl.u32 %v900_v22, %v916_v17  ;;  %vm1293_vm14 = vcmp.lt.s32.totalorder %v15953_v27, 2  ;;  %v1297_v15 = vsel %vm1295_vm13, %v1285_v50, 2102212464 }
  0xe9   : > { %v921_v60 = vadd.s32 127, %v920_v30  ;;  %v1296_v32 = vsel %vm1292_vm11, %v1276_v11, %v1279_v6  ;;  %v1300_v8 = vsel %vm1292_vm11, %v1279_v6, %v1282_v20  ;;  %v1301_v26 = vsel %vm1295_vm13, %v1288_v14, 920167782 }
  0xea   : > { %v10995_v59 = vsel %vm21965_vm0, %v5841_v56, %v10929_v7  ;;  %v919_v41 = vor.u32 %v918_v23, %v917_v3  ;;  %v1298_v22 = vsel %vm1294_vm12, %v1282_v20, %v1297_v15  ;;  %v1302_v43 = vsel %vm1294_vm12, %v1285_v50, %v1301_v26 }
  0xeb   : > { %v11370_v57 = vmul.bf16 %v15886_v28, %v10995_v59  ;;  %v922_v39 = vshll.u32 %v921_v60, 23  ;;  %v1303_v11 = vsel %vm1293_vm14, %v1300_v8, %v1302_v43  ;;  %v1304_v6 = vsel %vm1292_vm11, %v1282_v20, %v1285_v50 }
  0xec   : > { %v1305_v42 = vsel %vm1295_vm13, %v1291_v63, 1326507024  ;;  %v16017_v47 = vmul.u32.u64.low %v15940_v21, %v1303_v11  ;;  %v16018_v46 = vmul.u32.u64.high %v15940_v21, %v1303_v11, %v16017_v47  ;;  %v21997_v31 = vand.u32 2147483647, %v15905_v35 }
  0xed   : > { %13491 = vmatprep.mubr.bf16.mxu0 %v11370_v57  ;;  %v923_v56 = vor.u32 4788187, %v922_v39  ;;  %v926_v10 = vcvt.s32.f32 %v919_v41  ;;  %v1306_v17 = vsel %vm1294_vm12, %v1288_v14, %v1305_v42  ;;  %v1790_v3 = vadd.s32 1, %v13917_v12 }
  0xee   : > { %v1787_v49 = vand.u32 8388607, %v21997_v31  ;;  %v933_v20 = vsel %vm15987_vm8, 0, %v931_v33  ;;  %v1299_v50 = vsel %vm1293_vm14, %v1296_v32, %v1298_v22  ;;  %v1307_v30 = vsel %vm1293_vm14, %v1304_v6, %v1306_v17 }
  0xef   : > { %v2199_v63 = vand.u32 2139095040, %v15931_v0  ;;  %v924_v7 = vand.u32 2147483647, %v923_v56  ;;  %v16033_v23 = vmul.u32.u64.low %v15940_v21, %v1307_v30  ;;  %v16034_v15 = vmul.u32.u64.high %v15940_v21, %v1307_v30, %v16033_v23 }
  0xf0   : > { %vm1791_vm1 = vcmp.gt.s32.totalorder %v1790_v3, 0  ;;  %v1318_v14 = vadd.s32 1, %v16018_v46  ;;  %v16039_v33 = vrot.slane %v15644_v40, %v15637_v24  ;;  %v1315_v32 = vmul.u32 %v15940_v21, %v1299_v50 }
  0xf1   : > { %v1792_v12 = vsel %vm1791_vm1, %v1790_v3, 0  ;;  %v927_v60 = vmul.f32 %v926_v10, %v924_v7  ;;  %v937_v8 = vadd.s32 3, %v933_v20  ;;  %v16042_v26 = vand.u32 3, %v933_v20 }
  0xf2   : > { %v1794_v27 = vand.u32 31, %v1792_v12  ;;  %v1788_v59 = vor.u32 8388608, %v1787_v49  ;;  %v21899_v41 = vand.u32 2147483647, %v15931_v0  ;;  %vm1317_vm2 = vc.u32 %v16034_v15, %v16017_v47 }
  0xf3   : > { %v928_v22 = vxor.u32 2147483648, %v927_v60  ;;  %v2200_v57 = vshrl.u32 %v2199_v63, 23  ;;  %v1319_v39 = vsel %vm1317_vm2, %v1318_v14, %v16018_v46  ;;  %v1793_v31 = vshrl.u32 %v1792_v12, 5 }
  0xf4   : > { %v1795_v43 = vsub.s32 32, %v1794_v27  ;;  %v1797_v40 = vshll.u32 %v21906_v58, %v1794_v27  ;;  %v1800_v11 = vshll.u32 %v21991_v16, %v1794_v27  ;;  %v1803_v21 = vshll.u32 %v21992_v37, %v1794_v27 }
  0xf5   : > { %v929_v6 = vsel %vm846_vm15, %v928_v22, %v927_v60  ;;  %v1320_v42 = vadd.s32 %v1319_v39, %v1315_v32  ;;  %v1806_v17 = vshll.u32 %v21900_v1, %v1794_v27  ;;  %v1809_v7 = vshll.u32 %v21902_v9, %v1794_v27 }
  0xf6   : > { %v1798_v49 = vshrl.u32 %v21991_v16, %v1795_v43  ;;  %v932_v56 = vsel %vm15987_vm8, %v15771_v51, %v929_v6  ;;  %v1801_v10 = vshrl.u32 %v21992_v37, %v1795_v43  ;;  %v1804_v46 = vshrl.u32 %v21900_v1, %v1795_v43 }
  0xf7   : > { %15054 = vcosq.f32 %v932_v56  ;;  %v1321_v3 = vadd.s32 536870912, %v1320_v42  ;;  %v1807_v50 = vshrl.u32 %v21902_v9, %v1795_v43  ;;  %v1810_v18 = vshrl.u32 %v21993_v13, %v1795_v43 }
  0xf8   : > { %v1799_v20 = vor.u32 %v1798_v49, %v1797_v40  ;;  %15056 = vsinq.f32 %v932_v56  ;;  %v1802_v30 = vor.u32 %v1801_v10, %v1800_v11  ;;  %v1805_v63 = vor.u32 %v1804_v46, %v1803_v21 }
  0xf9   : > { %v1322_v23 = vshrl.u32 %v1321_v3, 30  ;;  %v1808_v14 = vor.u32 %v1807_v50, %v1806_v17  ;;  %vm1812_vm15 = vcmp.lt.s32.totalorder %v1793_v31, 1  ;;  %v1796_v12 = vshrl.u32 %v21906_v58, %v1795_v43 }
  0xfa   : > { %vm1814_vm3 = vcmp.lt.s32.totalorder %v1793_v31, 3  ;;  %vm1815_vm4 = vcmp.lt.s32.totalorder %v1793_v31, 4  ;;  %v1828_v60 = vshll.u32 %v1788_v59, 8  ;;  %v1811_v22 = vor.u32 %v1810_v18, %v1809_v7 }
  0xfb   : > { %v1323_v32 = vshll.u32 %v1322_v23, 30  ;;  %vm1813_vm5 = vcmp.lt.s32.totalorder %v1793_v31, 2  ;;  %v1817_v39 = vsel %vm1815_vm4, %v1805_v63, 2102212464  ;;  %vm936_vm6 = vweird.f32 %v15771_v51 }
  0xfc   : > { %v938_v40 = vand.u32 3, %v937_v8  ;;  %vm5978_vm9 = vcmp.lt.s32.totalorder %v16042_v26, 2  ;;  %vm1262_vm10 = vcmp.lt.s32.totalorder %v15814_v38, 0  ;;  %v1820_v27 = vsel %vm1812_vm15, %v1799_v20, %v1802_v30 }
  0xfd   : > { %v1821_v11 = vsel %vm1815_vm4, %v1808_v14, 920167782  ;;  %v16070_v43 = vsub.s32 %v1320_v42, %v1323_v32  ;;  %v1824_v21 = vsel %vm1812_vm15, %v1802_v30, %v1805_v63  ;;  %v13933_v6 = vadd.s32 4294967169, %v2200_v57 }
  0xfe   : > { %v1822_v59 = vsel %vm1814_vm3, %v1805_v63, %v1821_v11  ;;  %v1816_v49 = vsel %vm1812_vm15, %v1796_v12, %v1799_v20  ;;  %v1818_v56 = vsel %vm1814_vm3, %v1802_v30, %v1817_v39  ;;  %v1825_v10 = vsel %vm1815_vm4, %v1811_v22, 1326507024 }
  0xff   : > { %v1823_v8 = vsel %vm1813_vm5, %v1820_v27, %v1822_v59  ;;  %vm5979_vm7 = vcmp.eq.s32.totalorder %v16042_v26, 0  ;;  %vm5982_vm8 = vcmp.eq.s32.totalorder %v16042_v26, 2  ;;  %v1326_v42 = vsub.s32 0, %v16070_v43 }
 0x100   : > { %v1826_v46 = vsel %vm1814_vm3, %v1808_v14, %v1825_v10  ;;  %vm940_vm11 = vcmp.eq.s32.totalorder %v938_v40, 0  ;;  %v16083_v57 = vmul.u32.u64.low %v1828_v60, %v1823_v8  ;;  %v16084_v3 = vmul.u32.u64.high %v1828_v60, %v1823_v8, %v16083_v57 }
 0x101   : > { %v1827_v17 = vsel %vm1813_vm5, %v1824_v21, %v1826_v46  ;;  %v15055_v20 = vpop.eup %15054  ;;  %vm943_vm12 = vcmp.eq.s32.totalorder %v938_v40, 2  ;;  %v13898_v50 = vmin.u32 %v1326_v42, %v16070_v43  ;;  %v1346_v30 = vsub.s32 4, %v1322_v23 }
 0x102   : > { %v1819_v63 = vsel %vm1813_vm5, %v1816_v49, %v1818_v56  ;;  %v15057_v7 = vpop.eup %15056  ;;  %v944_v18 = vxor.u32 2147483648, %v15055_v20  ;;  %v16089_v12 = vmul.u32.u64.low %v1828_v60, %v1827_v17  ;;  %v16090_v32 = vmul.u32.u64.high %v1828_v60, %v1827_v17, %v16089_v12 }
 0x103   : > { %v2206_v14 = vadd.s32 1, %v13933_v6  ;;  %vm939_vm13 = vcmp.lt.s32.totalorder %v938_v40, 2  ;;  %v941_v22 = vxor.u32 2147483648, %v15057_v7  ;;  %v21998_v39 = vand.u32 2147483647, %v15814_v38 }
 0x104   : > { %v1316_v11 = vadd.s32 %v16017_v47, %v16034_v15  ;;  %v1328_v59 = vclz %v13898_v50  ;;  %v945_v31 = vsel %vm943_vm12, %v944_v18, %v15057_v7  ;;  %v5984_v21 = vsel %vm5982_vm8, %v944_v18, %v15057_v7 }
 0x105   : > { %vm16094_vm14 = vcmp.le.f32.partialorder %v21998_v39, 0.7853982  ;;  %v1835_v49 = vmul.u32 %v1828_v60, %v1819_v63  ;;  %v1838_v56 = vadd.s32 1, %v16084_v3  ;;  %v942_v6 = vsel %vm940_vm11, %v15055_v20, %v941_v22 }
 0x106   : > { %v5981_v8 = vsel %vm5979_vm7, %v15055_v20, %v941_v22  ;;  %v13899_v10 = vadd.s32 4294967294, %v1328_v59  ;;  %v1347_v42 = vsel %vm1262_vm10, %v1346_v30, %v1322_v23  ;;  %v946_v46 = vsel %vm939_vm13, %v942_v6, %v945_v31 }
 0x107   : > { %v5985_v47 = vsel %vm5978_vm9, %v5981_v8, %v5984_v21  ;;  %vm1837_vm1 = vc.u32 %v16090_v32, %v16083_v57  ;;  %vm2207_vm2 = vcmp.gt.s32.totalorder %v2206_v14, 0  ;;  %v947_v15 = vsel %vm936_vm6, nan, %v946_v46  ;;  %v14939_v21 = vld [vmem:[#allocation5 + $0x100] ss:$8 sps:$4 sm:$0xff]  }
 0x108   : > { %v5986_v60 = vsel %vm936_vm6, nan, %v5985_v47  ;;  %vm13900_vm15 = vcmp.lt.s32.totalorder %v13899_v10, 0  ;;  %v1839_v40 = vsel %vm1837_vm1, %v1838_v56, %v16084_v3  ;;  %v5836_v17 = vpack.c.bf16 %v947_v15, %v947_v15 }
 0x109   : > { %v10828_v20 = vpack.c.bf16 %v5986_v60, %v5986_v60  ;;  %v1331_v23 = vsel %vm13900_vm15, 0, %v13899_v10  ;;  %v1840_v50 = vadd.s32 %v1839_v40, %v1835_v49  ;;  %v2208_v7 = vsel %vm2207_vm2, %v2206_v14, 0 }
 0x10a   : > { %v1332_v30 = vsub.s32 32, %v1331_v23  ;;  %v1333_v26 = vshll.u32 %v16070_v43, %v1331_v23  ;;  %v1336_v63 = vsub.s32 4294967266, %v1331_v23  ;;  %v2203_v22 = vand.u32 8388607, %v21899_v41 }
 0x10b   : > { %v10924_v18 = vrot.slane %v10828_v20, 4  ;;  %v1841_v12 = vadd.s32 536870912, %v1840_v50  ;;  %v2210_v39 = vand.u32 31, %v2208_v7  ;;  %v591_v3 = vrot.slane %v15659_v54, %v15632_v19  ;;  %v14946_v20 = vld [vmem:[#allocation5 + $0x110] ss:$8 sps:$4 sm:$0xff]  }
 0x10c   : > { %v1334_v51 = vshrl.u32 %v1316_v11, %v1332_v30  ;;  %v1337_v59 = vadd.s32 127, %v1336_v63  ;;  %v607_v31 = vrot.slane %v15659_v54, %v15788_v61  ;;  %v1349_v43 = vsel %vm16094_vm14, 0, %v1347_v42  ;;  %v14948_v11 = vld [vmem:[#allocation5 + $0x114] ss:$8 sps:$4 sm:$0xff]  }
 0x10d   : > { %v10975_v49 = vsel %vm21965_vm0, %v5836_v17, %v10924_v18  ;;  %v16127_v14 = vshrl.u32 %v1841_v12, 30  ;;  %v2211_v10 = vsub.s32 32, %v2210_v39  ;;  %v2204_v47 = vor.u32 8388608, %v2203_v22  ;;  %v14954_v18 = vld [vmem:[#allocation5 + $0x124] ss:$8 sps:$4 sm:$0xff]  }
 0x10e   : > { %v11365_v56 = vmul.bf16 %v16039_v33, %v10975_v49  ;;  %v1335_v6 = vor.u32 %v1334_v51, %v1333_v26  ;;  %v1338_v8 = vshll.u32 %v1337_v59, 23  ;;  %v16132_v40 = vmul.f32 %v15661_v55, %v591_v3 }
 0x10f   : > { %v1843_v46 = vshll.u32 %v16127_v14, 30  ;;  %v16135_v17 = vmul.f32 %v15661_v55, %v607_v31  ;;  %v1353_v42 = vadd.s32 3, %v1349_v43  ;;  %v2213_v30 = vshll.u32 %v21906_v58, %v2210_v39 }
 0x110   : > { %13266 = vmatmul.mubr.bf16.vlgmr.msra.gmra.mrb[0].mxu1 %v11365_v56  ;;  %v1339_v15 = vor.u32 4788187, %v1338_v8  ;;  %v1342_v60 = vcvt.s32.f32 %v1335_v6  ;;  %v2216_v26 = vshll.u32 %v21991_v16, %v2210_v39  ;;  %v2214_v12 = vshrl.u32 %v21991_v16, %v2211_v10 }
 0x111   : > { %13347 = vmatpush1.bf16.msra.mxu1 %v14939_v21  ;;  %v16137_v23 = vsub.s32 %v1840_v50, %v1843_v46  ;;  %v2217_v22 = vshrl.u32 %v21992_v37, %v2211_v10  ;;  %v2222_v51 = vshll.u32 %v21900_v1, %v2210_v39  ;;  %v2209_v3 = vshrl.u32 %v2208_v7, 5  ;;  %v14952_v7 = vld [vmem:[#allocation5 + $0x120] ss:$8 sps:$4 sm:$0xff]  }
 0x112   : > { %v1340_v63 = vand.u32 2147483647, %v1339_v15  ;;  %13348 = vmatprep.subr.bf16.mxu1 %v14948_v11  ;;  %v2219_v31 = vshll.u32 %v21992_v37, %v2210_v39  ;;  %v2220_v50 = vshrl.u32 %v21900_v1, %v2211_v10  ;;  %v2223_v49 = vshrl.u32 %v21902_v9, %v2211_v10 }
 0x113   : > { %v1846_v59 = vsub.s32 0, %v16137_v23  ;;  %v2225_v56 = vshll.u32 %v21902_v9, %v2210_v39  ;;  %v2226_v6 = vshrl.u32 %v21993_v13, %v2211_v10  ;;  %v16150_v8 = vand.u32 3, %v1349_v43 }
 0x114   : > { %v1343_v21 = vmul.f32 %v1342_v60, %v1340_v63  ;;  %v1836_v11 = vadd.s32 %v16083_v57, %v16090_v32  ;;  %v16155_v15 = vshll.u32 %v2204_v47, 8  ;;  %v2215_v60 = vor.u32 %v2214_v12, %v2213_v30 }
 0x115   : > { %13349 = vmatpush1.bf16.msra.mxu1 %v14946_v20  ;;  %v13918_v46 = vmin.u32 %v1846_v59, %v16137_v23  ;;  %v2218_v63 = vor.u32 %v2217_v22, %v2216_v26  ;;  %v2224_v1 = vor.u32 %v2223_v49, %v2222_v51  ;;  %vm1782_vm3 = vcmp.lt.s32.totalorder %v15905_v35, 0 }
 0x116   : > { %v1344_v41 = vxor.u32 2147483648, %v1343_v21  ;;  %13350 = vmatprep.subr.bf16.mxu1 %v14954_v18  ;;  %v1866_v43 = vsub.s32 4, %v16127_v14  ;;  %v2212_v20 = vshrl.u32 %v21906_v58, %v2211_v10  ;;  %v2221_v9 = vor.u32 %v2220_v50, %v2219_v31 }
 0x117   : > { %v1848_v39 = vclz %v13918_v46  ;;  %v2227_v32 = vor.u32 %v2226_v6, %v2225_v56  ;;  %vm2228_vm4 = vcmp.lt.s32.totalorder %v2209_v3, 1  ;;  %vm2230_vm5 = vcmp.lt.s32.totalorder %v2209_v3, 3 }
 0x118   : > { %v1345_v57 = vsel %vm1262_vm10, %v1344_v41, %v1343_v21  ;;  %vm2229_vm6 = vcmp.lt.s32.totalorder %v2209_v3, 2  ;;  %vm2231_vm9 = vcmp.lt.s32.totalorder %v2209_v3, 4  ;;  %v22001_v26 = vand.u32 2147483647, %v15905_v35 }
 0x119   : > { %v1348_v47 = vsel %vm16094_vm14, %v15814_v38, %v1345_v57  ;;  %v13919_v30 = vadd.s32 4294967294, %v1848_v39  ;;  %13351 = vmatpush1.bf16.msra.mxu1 %v14952_v7  ;;  %v2233_v41 = vsel %vm2231_vm9, %v2221_v9, 2102212464  ;;  %v2236_v18 = vsel %vm2228_vm4, %v2215_v60, %v2218_v63 }
 0x11a   : > { %15058 = vcosq.f32 %v1348_v47  ;;  %vm16167_vm7 = vcmp.le.f32.partialorder %v22001_v26, 0.7853982  ;;  %v2237_v12 = vsel %vm2231_vm9, %v2224_v1, 920167782  ;;  %v2232_v27 = vsel %vm2228_vm4, %v2212_v20, %v2215_v60 }
 0x11b   : > { %15060 = vsinq.f32 %v1348_v47  ;;  %vm13920_vm10 = vcmp.lt.s32.totalorder %v13919_v30, 0  ;;  %v2238_v22 = vsel %vm2230_vm5, %v2221_v9, %v2237_v12  ;;  %v2234_v59 = vsel %vm2230_vm5, %v2218_v63, %v2233_v41 }
 0x11c   : > { %v1851_v51 = vsel %vm13920_vm10, 0, %v13919_v30  ;;  %v2239_v31 = vsel %vm2229_vm6, %v2236_v18, %v2238_v22  ;;  %v2240_v50 = vsel %vm2228_vm4, %v2218_v63, %v2221_v9  ;;  %v2241_v6 = vsel %vm2231_vm9, %v2227_v32, 1326507024  ;;  %v14960_v30 = vld [vmem:[#allocation5 + $0x134] ss:$8 sps:$4 sm:$0xff]  }
 0x11d   : > { %v1852_v21 = vsub.s32 32, %v1851_v51  ;;  %v1853_v49 = vshll.u32 %v16137_v23, %v1851_v51  ;;  %v1856_v56 = vsub.s32 4294967266, %v1851_v51  ;;  %v1354_v46 = vand.u32 3, %v1353_v42  ;;  %v14958_v23 = vld [vmem:[#allocation5 + $0x130] ss:$8 sps:$4 sm:$0xff]   ;;  %13352 = vmatprep.subr.bf16.mxu1 %v14960_v30 }
 0x11e   : > { %v2242_v7 = vsel %vm2230_vm5, %v2224_v1, %v2241_v6  ;;  %v16183_v60 = vmul.u32.u64.low %v16155_v15, %v2239_v31  ;;  %v16184_v39 = vmul.u32.u64.high %v16155_v15, %v2239_v31, %v16183_v60  ;;  %vm1352_vm8 = vweird.f32 %v15814_v38  ;;  %13353 = vmatpush1.bf16.msra.mxu1 %v14958_v23 }
 0x11f   : > { %v1854_v20 = vshrl.u32 %v1836_v11, %v1852_v21  ;;  %v1857_v57 = vadd.s32 127, %v1856_v56  ;;  %v2235_v9 = vsel %vm2229_vm6, %v2232_v27, %v2234_v59  ;;  %v2243_v63 = vsel %vm2229_vm6, %v2240_v50, %v2242_v7 }
 0x120   : > { %v1867_v42 = vsel %vm1782_vm3, %v1866_v43, %v16127_v14  ;;  %v16194_v1 = vmul.u32.u64.low %v16155_v15, %v2243_v63  ;;  %v16195_v32 = vmul.u32.u64.high %v16155_v15, %v2243_v63, %v16194_v1  ;;  %v1679_v47 = vand.u32 2139095040, %v16132_v40 }
 0x121   : > { %vm6390_vm11 = vcmp.lt.s32.totalorder %v16150_v8, 2  ;;  %vm6391_vm12 = vcmp.eq.s32.totalorder %v16150_v8, 0  ;;  %v1855_v11 = vor.u32 %v1854_v20, %v1853_v49  ;;  %v1858_v26 = vshll.u32 %v1857_v57, 23 }
 0x122   : > { %vm6394_vm13 = vcmp.eq.s32.totalorder %v16150_v8, 2  ;;  %v2251_v3 = vmul.u32 %v16155_v15, %v2235_v9  ;;  %v2254_v41 = vadd.s32 1, %v16184_v39  ;;  %v1680_v14 = vshrl.u32 %v1679_v47, 23 }
 0x123   : > { %vm1355_vm14 = vcmp.lt.s32.totalorder %v1354_v46, 2  ;;  %v1859_v43 = vor.u32 4788187, %v1858_v26  ;;  %v1862_v18 = vcvt.s32.f32 %v1855_v11  ;;  %v1869_v12 = vsel %vm16167_vm7, 0, %v1867_v42 }
 0x124   : > { %v15059_v27 = vpop.eup %15058  ;;  %vm1356_vm1 = vcmp.eq.s32.totalorder %v1354_v46, 0  ;;  %vm1359_vm2 = vcmp.eq.s32.totalorder %v1354_v46, 2  ;;  %vm2253_vm15 = vc.u32 %v16195_v32, %v16183_v60  ;;  %v13913_v22 = vadd.s32 4294967169, %v1680_v14 }
 0x125   : > { %v15061_v51 = vpop.eup %15060  ;;  %v1360_v15 = vxor.u32 2147483648, %v15059_v27  ;;  %v1860_v59 = vand.u32 2147483647, %v1859_v43  ;;  %v2255_v31 = vsel %vm2253_vm15, %v2254_v41, %v16184_v39  ;;  %v1676_v50 = vand.u32 2147483647, %v16132_v40 }
 0x126   : > { %v1357_v21 = vxor.u32 2147483648, %v15061_v51  ;;  %v1873_v49 = vadd.s32 3, %v1869_v12  ;;  %v2256_v56 = vadd.s32 %v2255_v31, %v2251_v3  ;;  %v1686_v6 = vadd.s32 1, %v13913_v22 }
 0x127   : > { %v1361_v7 = vsel %vm1359_vm2, %v1360_v15, %v15061_v51  ;;  %v6396_v20 = vsel %vm6394_vm13, %v1360_v15, %v15061_v51  ;;  %v1863_v57 = vmul.f32 %v1862_v18, %v1860_v59  ;;  %v16211_v9 = vand.u32 3, %v1869_v12 }
 0x128   : > { %v1358_v63 = vsel %vm1356_vm1, %v15059_v27, %v1357_v21  ;;  %v6393_v23 = vsel %vm6391_vm12, %v15059_v27, %v1357_v21  ;;  %v2257_v42 = vadd.s32 536870912, %v2256_v56  ;;  %vm1687_vm4 = vcmp.gt.s32.totalorder %v1686_v6, 0 }
 0x129   : > { %v1362_v39 = vsel %vm1355_vm14, %v1358_v63, %v1361_v7  ;;  %v6397_v1 = vsel %vm6390_vm11, %v6393_v23, %v6396_v20  ;;  %v1864_v47 = vxor.u32 2147483648, %v1863_v57  ;;  %v1688_v30 = vsel %vm1687_vm4, %v1686_v6, 0  ;;  %v14951_v20 = vld [vmem:[#allocation5 + $0x314] ss:$8 sps:$4 sm:$0xff]  }
 0x12a   : > { %v1363_v11 = vsel %vm1352_vm8, nan, %v1362_v39  ;;  %v6398_v26 = vsel %vm1352_vm8, nan, %v6397_v1  ;;  %v2258_v3 = vshrl.u32 %v2257_v42, 30  ;;  %v1683_v41 = vand.u32 8388607, %v1676_v50 }
 0x12b   : > { %v5840_v14 = vpack.c.bf16 %v1363_v11, %v1363_v11  ;;  %v10832_v43 = vpack.c.bf16 %v6398_v26, %v6398_v26  ;;  %v1865_v46 = vsel %vm1782_vm3, %v1864_v47, %v1863_v57  ;;  %v1690_v18 = vand.u32 31, %v1688_v30 }
 0x12c   : > { %v16229_v8 = vrot.slane %v15689_v25, %v15637_v24  ;;  %v1868_v12 = vsel %vm16167_vm7, %v15905_v35, %v1865_v46  ;;  %v16234_v38 = vand.u32 3, %v1873_v49  ;;  %v2259_v27 = vshll.u32 %v2258_v3, 30  ;;  %v14943_v25 = vld [vmem:[#allocation5 + $0x300] ss:$8 sps:$4 sm:$0xff]  }
 0x12d   : > { %v10928_v22 = vrot.slane %v10832_v43, 4  ;;  %15062 = vcosq.f32 %v1868_v12  ;;  %vm2198_vm5 = vcmp.lt.s32.totalorder %v15931_v0, 0  ;;  %v1691_v51 = vsub.s32 32, %v1690_v18 }
 0x12e   : > { %15064 = vsinq.f32 %v1868_v12  ;;  %v16237_v15 = vsub.s32 %v2256_v56, %v2259_v27  ;;  %v1684_v59 = vor.u32 8388608, %v1683_v41  ;;  %v2095_v31 = vand.u32 2139095040, %v16135_v17  ;;  %v14949_v41 = vld [vmem:[#allocation5 + $0x310] ss:$8 sps:$4 sm:$0xff]  }
 0x12f   : > { %v10991_v21 = vsel %vm21965_vm0, %v5840_v14, %v10928_v22  ;;  %vm6909_vm3 = vcmp.eq.s32.totalorder %v16211_v9, 2  ;;  %v1693_v10 = vshll.u32 %v21906_v58, %v1690_v18  ;;  %v1694_v49 = vshrl.u32 %v21991_v16, %v1691_v51 }
 0x130   : > { %v1696_v6 = vshll.u32 %v21991_v16, %v1690_v18  ;;  %v11369_v7 = vmul.bf16 %v16229_v8, %v10991_v21  ;;  %vm1876_vm6 = vcmp.eq.s32.totalorder %v16234_v38, 0  ;;  %vm6906_vm9 = vcmp.eq.s32.totalorder %v16211_v9, 0 }
 0x131   : > { %v2262_v56 = vsub.s32 0, %v16237_v15  ;;  %v2282_v57 = vsub.s32 4, %v2258_v3  ;;  %v16249_v63 = vshrl.u32 %v1688_v30, 5  ;;  %vm1875_vm7 = vcmp.lt.s32.totalorder %v16234_v38, 2 }
 0x132   : > { %vm1879_vm10 = vcmp.eq.s32.totalorder %v16234_v38, 2  ;;  %vm6905_vm8 = vcmp.lt.s32.totalorder %v16211_v9, 2  ;;  %v1697_v23 = vshrl.u32 %v21992_v37, %v1691_v51  ;;  %v1699_v42 = vshll.u32 %v21992_v37, %v1690_v18  ;;  %13492 = vmatmul.mubr.bf16.vlgmr.msra.gmra.mrb[0].mxu0 %v11369_v7 }
 0x133   : > { %v22004_v39 = vmov 2102212464   ;;  %vm1872_vm11 = vweird.f32 %v15905_v35  ;;  %v2252_v47 = vadd.s32 %v16183_v60, %v16195_v32  ;;  %v13934_v30 = vmin.u32 %v2262_v56, %v16237_v15  ;;  %13573 = vmatpush1.bf16.msra.mxu0 %v14943_v25  ;;  %v14957_v60 = vld [vmem:[#allocation5 + $0x324] ss:$8 sps:$4 sm:$0xff]  }
 0x134   : > { %v1700_v1 = vshrl.u32 %v22004_v39, %v1691_v51  ;;  %v1692_v11 = vshrl.u32 %v21906_v58, %v1691_v51  ;;  %v16262_v26 = vshll.u32 %v1684_v59, 8  ;;  %v1695_v14 = vor.u32 %v1694_v49, %v1693_v10  ;;  %13574 = vmatprep.subr.bf16.mxu0 %v14951_v20 }
 0x135   : > { %v1698_v43 = vor.u32 %v1697_v23, %v1696_v6  ;;  %v1702_v46 = vshll.u32 %v22004_v39, %v1690_v18  ;;  %v16265_v12 = vshrl.u32 %v2095_v31, 23  ;;  %v2264_v27 = vclz %v13934_v30  ;;  %v14955_v6 = vld [vmem:[#allocation5 + $0x320] ss:$8 sps:$4 sm:$0xff]   ;;  %v14966_v30 = vld [vmem:[#allocation5 + $0x144] ss:$8 sps:$4 sm:$0xff]  }
 0x136   : > { %v16269_v22 = vsel %vm2198_vm5, %v2282_v57, %v2258_v3  ;;  %v1701_v32 = vor.u32 %v1700_v1, %v1699_v42  ;;  %vm1708_vm12 = vcmp.lt.s32.totalorder %v16249_v63, 1  ;;  %v22005_v59 = vmov 920167782   ;;  %v14963_v1 = vld [vmem:[#allocation5 + $0x334] ss:$8 sps:$4 sm:$0xff]   ;;  %13354 = vmatprep.subr.bf16.mxu1 %v14966_v30 }
 0x137   : > { %v1703_v21 = vshrl.u32 %v22005_v59, %v1691_v51  ;;  %v1705_v25 = vshll.u32 %v22005_v59, %v1690_v18  ;;  %v1706_v10 = vshrl.u32 %v21993_v13, %v1691_v51  ;;  %vm1709_vm13 = vcmp.lt.s32.totalorder %v16249_v63, 2  ;;  %v15063_v49 = vpop.eup %15062  ;;  %13575 = vmatpush1.bf16.msra.mxu0 %v14949_v41 }
 0x138   : > { %v13935_v31 = vadd.s32 4294967294, %v2264_v27  ;;  %vm1710_vm14 = vcmp.lt.s32.totalorder %v16249_v63, 3  ;;  %vm1711_vm1 = vcmp.lt.s32.totalorder %v16249_v63, 4  ;;  %v1712_v3 = vsel %vm1708_vm12, %v1692_v11, %v1695_v14  ;;  %v15065_v56 = vpop.eup %15064  ;;  %13576 = vmatprep.subr.bf16.mxu0 %v14957_v60  ;;  %v14964_v27 = vld [vmem:[#allocation5 + $0x140] ss:$8 sps:$4 sm:$0xff]  }
 0x139   : > { %v1704_v7 = vor.u32 %v1703_v21, %v1702_v46  ;;  %v1707_v20 = vor.u32 %v1706_v10, %v1705_v25  ;;  %v1713_v18 = vsel %vm1711_vm1, %v1701_v32, 2102212464  ;;  %v1716_v51 = vsel %vm1708_vm12, %v1695_v14, %v1698_v43  ;;  %13355 = vmatpush1.bf16.msra.mxu1 %v14964_v27 }
 0x13a   : > { %v1880_v57 = vxor.u32 2147483648, %v15063_v49  ;;  %vm13936_vm2 = vcmp.lt.s32.totalorder %v13935_v31, 0  ;;  %v1714_v23 = vsel %vm1710_vm14, %v1698_v43, %v1713_v18  ;;  %v1720_v42 = vsel %vm1708_vm12, %v1698_v43, %v1701_v32 }
 0x13b   : > { %v1877_v11 = vxor.u32 2147483648, %v15065_v56  ;;  %v2267_v41 = vsel %vm13936_vm2, 0, %v13935_v31  ;;  %v1715_v46 = vsel %vm1709_vm13, %v1712_v3, %v1714_v23  ;;  %v1717_v14 = vsel %vm1711_vm1, %v1704_v7, 920167782  ;;  %13577 = vmatpush1.bf16.msra.mxu0 %v14955_v6  ;;  %v14961_v23 = vld [vmem:[#allocation5 + $0x330] ss:$8 sps:$4 sm:$0xff]  }
 0x13c   : > { %v1881_v60 = vsel %vm1879_vm10, %v1880_v57, %v15065_v56  ;;  %v6911_v21 = vsel %vm6909_vm3, %v1880_v57, %v15065_v56  ;;  %v2268_v25 = vsub.s32 32, %v2267_v41  ;;  %v2269_v43 = vshll.u32 %v16237_v15, %v2267_v41  ;;  %13578 = vmatprep.subr.bf16.mxu0 %v14963_v1 }
 0x13d   : > { %v1878_v10 = vsel %vm1876_vm6, %v15063_v49, %v1877_v11  ;;  %v6908_v31 = vsel %vm6906_vm9, %v15063_v49, %v1877_v11  ;;  %v2272_v3 = vsub.s32 4294967266, %v2267_v41  ;;  %v1718_v18 = vsel %vm1710_vm14, %v1701_v32, %v1717_v14 }
 0x13e   : > { %v1882_v56 = vsel %vm1875_vm7, %v1878_v10, %v1881_v60  ;;  %v6912_v15 = vsel %vm6905_vm8, %v6908_v31, %v6911_v21  ;;  %v2270_v57 = vshrl.u32 %v2252_v47, %v2268_v25  ;;  %v1719_v30 = vsel %vm1709_vm13, %v1716_v51, %v1718_v18 }
 0x13f   : > { %v1883_v49 = vsel %vm1872_vm11, nan, %v1882_v56  ;;  %v6913_v32 = vsel %vm1872_vm11, nan, %v6912_v15  ;;  %v2273_v6 = vadd.s32 127, %v2272_v3  ;;  %v1721_v11 = vsel %vm1711_vm1, %v1707_v20, 1326507024  ;;  %13579 = vmatpush1.bf16.msra.mxu0 %v14961_v23 }
 0x140   : > { %v5845_v38 = vpack.c.bf16 %v1883_v49, %v1883_v49  ;;  %v10837_v41 = vpack.c.bf16 %v6913_v32, %v6913_v32  ;;  %v2271_v14 = vor.u32 %v2270_v57, %v2269_v43  ;;  %v1722_v9 = vsel %vm1710_vm14, %v1704_v7, %v1721_v11 }
 0x141   : > { %v2274_v47 = vshll.u32 %v2273_v6, 23  ;;  %v1723_v51 = vsel %vm1709_vm13, %v1720_v42, %v1722_v9  ;;  %v16320_v1 = vmul.u32.u64.low %v16262_v26, %v1719_v30  ;;  %v16321_v27 = vmul.u32.u64.high %v16262_v26, %v1719_v30, %v16320_v1 }
 0x142   : > { %v10933_v35 = vrot.slane %v10837_v41, 4  ;;  %v16325_v60 = vmul.u32.u64.low %v16262_v26, %v1723_v51  ;;  %v16326_v20 = vmul.u32.u64.high %v16262_v26, %v1723_v51, %v16325_v60  ;;  %v22006_v21 = vand.u32 2147483647, %v15931_v0 }
 0x143   : > { %v2275_v7 = vor.u32 4788187, %v2274_v47  ;;  %v2278_v63 = vcvt.s32.f32 %v2271_v14  ;;  %v13929_v42 = vadd.s32 4294967169, %v16265_v12  ;;  %v1731_v31 = vmul.u32 %v16262_v26, %v1715_v46 }
 0x144   : > { %vm16330_vm15 = vcmp.le.f32.partialorder %v22006_v21, 0.7853982  ;;  %v11011_v43 = vsel %vm21965_vm0, %v5845_v38, %v10933_v35  ;;  %v1734_v23 = vadd.s32 1, %v16321_v27  ;;  %vm1733_vm4 = vc.u32 %v16326_v20, %v16320_v1 }
 0x145   : > { %v2285_v10 = vsel %vm16330_vm15, 0, %v16269_v22  ;;  %v11374_v3 = vmul.bf16 %v15876_v29, %v11011_v43  ;;  %v2276_v18 = vand.u32 2147483647, %v2275_v7  ;;  %v2102_v56 = vadd.s32 1, %v13929_v42 }
 0x146   : > { %v2092_v15 = vand.u32 2147483647, %v16135_v17  ;;  %v2289_v57 = vadd.s32 3, %v2285_v10  ;;  %v1735_v30 = vsel %vm1733_vm4, %v1734_v23, %v16321_v27  ;;  %v16352_v41 = vand.u32 3, %v2285_v10 }
 0x147   : > { %13275 = vmatprep.mubr.bf16.mxu1 %v11374_v3  ;;  %v2279_v12 = vmul.f32 %v2278_v63, %v2276_v18  ;;  %vm2103_vm3 = vcmp.gt.s32.totalorder %v2102_v56, 0  ;;  %v1736_v22 = vadd.s32 %v1735_v30, %v1731_v31  ;;  %vm1678_vm6 = vcmp.lt.s32.totalorder %v16132_v40, 0 }
 0x148   : > { %v2104_v49 = vsel %vm2103_vm3, %v2102_v56, 0  ;;  %v2099_v6 = vand.u32 8388607, %v2092_v15  ;;  %v16350_v38 = vand.u32 3, %v2289_v57  ;;  %v627_v25 = vrot.slane %v15657_v53, %v15637_v24 }
 0x149   : > { %v2280_v26 = vxor.u32 2147483648, %v2279_v12  ;;  %v2106_v46 = vand.u32 31, %v2104_v49  ;;  %v1737_v32 = vadd.s32 536870912, %v1736_v22  ;;  %v16363_v63 = vshrl.u32 %v2104_v49, 5 }
 0x14a   : > { %vm7321_vm9 = vcmp.eq.s32.totalorder %v16352_v41, 2  ;;  %vm2291_vm7 = vcmp.lt.s32.totalorder %v16350_v38, 2  ;;  %vm7317_vm10 = vcmp.lt.s32.totalorder %v16352_v41, 2  ;;  %v2100_v23 = vor.u32 8388608, %v2099_v6 }
 0x14b   : > { %v2281_v11 = vsel %vm2198_vm5, %v2280_v26, %v2279_v12  ;;  %v2107_v14 = vsub.s32 32, %v2106_v46  ;;  %v1738_v47 = vshrl.u32 %v1737_v32, 30  ;;  %v2109_v51 = vshll.u32 %v21906_v58, %v2106_v46 }
 0x14c   : > { %v2284_v9 = vsel %vm16330_vm15, %v15931_v0, %v2281_v11  ;;  %v2112_v27 = vshll.u32 %v21991_v16, %v2106_v46  ;;  %v2118_v21 = vshll.u32 %v22004_v39, %v2106_v46  ;;  %v2115_v42 = vshll.u32 %v21992_v37, %v2106_v46 }
 0x14d   : > { %15066 = vcosq.f32 %v2284_v9  ;;  %v2110_v35 = vshrl.u32 %v21991_v16, %v2107_v14  ;;  %v2113_v60 = vshrl.u32 %v21992_v37, %v2107_v14  ;;  %v1739_v7 = vshll.u32 %v1738_v47, 30 }
 0x14e   : > { %15068 = vsinq.f32 %v2284_v9  ;;  %v2116_v43 = vshrl.u32 %v22004_v39, %v2107_v14  ;;  %v2119_v10 = vshrl.u32 %v22005_v59, %v2107_v14  ;;  %v2121_v31 = vshll.u32 %v22005_v59, %v2106_v46 }
 0x14f   : > { %vm7318_vm5 = vcmp.eq.s32.totalorder %v16352_v41, 0  ;;  %v16373_v3 = vsub.s32 %v1736_v22, %v1739_v7  ;;  %v2122_v18 = vshrl.u32 %v21993_v13, %v2107_v14  ;;  %v2111_v56 = vor.u32 %v2110_v35, %v2109_v51 }
 0x150   : > { %v2114_v12 = vor.u32 %v2113_v60, %v2112_v27  ;;  %v2120_v57 = vor.u32 %v2119_v10, %v2118_v21  ;;  %vm2288_vm8 = vweird.f32 %v15931_v0  ;;  %v1762_v49 = vsub.s32 4, %v1738_v47  ;;  %v14969_v21 = vld [vmem:[#allocation5 + $0x344] ss:$8 sps:$4 sm:$0xff]  }
 0x151   : > { %v1742_v30 = vsub.s32 0, %v16373_v3  ;;  %vm2124_vm11 = vcmp.lt.s32.totalorder %v16363_v63, 1  ;;  %v16382_v22 = vmul.f32 %v15661_v55, %v627_v25  ;;  %v2108_v26 = vshrl.u32 %v21906_v58, %v2107_v14  ;;  %13580 = vmatprep.subr.bf16.mxu0 %v14969_v21 }
 0x152   : > { %v2117_v46 = vor.u32 %v2116_v43, %v2115_v42  ;;  %v2123_v32 = vor.u32 %v2122_v18, %v2121_v31  ;;  %vm2127_vm12 = vcmp.lt.s32.totalorder %v16363_v63, 4  ;;  %vm2292_vm13 = vcmp.eq.s32.totalorder %v16350_v38, 0 }
 0x153   : > { %vm2295_vm14 = vcmp.eq.s32.totalorder %v16350_v38, 2  ;;  %v13914_v6 = vmin.u32 %v1742_v30, %v16373_v3  ;;  %vm2126_vm1 = vcmp.lt.s32.totalorder %v16363_v63, 3  ;;  %vm2125_vm2 = vcmp.lt.s32.totalorder %v16363_v63, 2 }
 0x154   : > { %v2132_v11 = vsel %vm2124_vm11, %v2111_v56, %v2114_v12  ;;  %v2133_v14 = vsel %vm2127_vm12, %v2120_v57, 920167782  ;;  %v16395_v9 = vshll.u32 %v2100_v23, 8  ;;  %v1732_v51 = vadd.s32 %v16320_v1, %v16326_v20  ;;  %v14967_v20 = vld [vmem:[#allocation5 + $0x340] ss:$8 sps:$4 sm:$0xff]  }
 0x155   : > { %v1744_v27 = vclz %v13914_v6  ;;  %v1763_v35 = vsel %vm1678_vm6, %v1762_v49, %v1738_v47  ;;  %v2615_v60 = vand.u32 2139095040, %v16382_v22  ;;  %v2128_v25 = vsel %vm2124_vm11, %v2108_v26, %v2111_v56  ;;  %13581 = vmatpush1.bf16.msra.mxu0 %v14967_v20 }
 0x156   : > { %v2129_v42 = vsel %vm2127_vm12, %v2117_v46, 2102212464  ;;  %v2134_v43 = vsel %vm2126_vm1, %v2117_v46, %v2133_v14  ;;  %v2137_v1 = vsel %vm2127_vm12, %v2123_v32, 1326507024  ;;  %v2136_v23 = vsel %vm2124_vm11, %v2114_v12, %v2117_v46 }
 0x157   : > { %v15067_v7 = vpop.eup %15066  ;;  %v13915_v47 = vadd.s32 4294967294, %v1744_v27  ;;  %v2135_v18 = vsel %vm2125_vm2, %v2132_v11, %v2134_v43  ;;  %v2138_v30 = vsel %vm2126_vm1, %v2120_v57, %v2137_v1  ;;  %v2130_v46 = vsel %vm2126_vm1, %v2114_v12, %v2129_v42 }
 0x158   : > { %v15069_v10 = vpop.eup %15068  ;;  %v2296_v31 = vxor.u32 2147483648, %v15067_v7  ;;  %v16417_v49 = vmul.u32.u64.low %v16395_v9, %v2135_v18  ;;  %v16418_v26 = vmul.u32.u64.high %v16395_v9, %v2135_v18, %v16417_v49  ;;  %v2139_v27 = vsel %vm2125_vm2, %v2136_v23, %v2138_v30 }
 0x159   : > { %v2293_v56 = vxor.u32 2147483648, %v15069_v10  ;;  %vm13916_vm15 = vcmp.lt.s32.totalorder %v13915_v47, 0  ;;  %v2616_v18 = vshrl.u32 %v2615_v60, 23  ;;  %vm16446_vm4 = vcmp.le.f32.partialorder %v1676_v50, 0.7853982 }
 0x15a   : > { %v2297_v32 = vsel %vm2295_vm14, %v2296_v31, %v15069_v10  ;;  %v7323_v6 = vsel %vm7321_vm9, %v2296_v31, %v15069_v10  ;;  %v1747_v14 = vsel %vm13916_vm15, 0, %v13915_v47  ;;  %v2131_v10 = vsel %vm2125_vm2, %v2128_v25, %v2130_v46 }
 0x15b   : > { %v2294_v11 = vsel %vm2292_vm13, %v15067_v7, %v2293_v56  ;;  %v7320_v57 = vsel %vm7318_vm5, %v15067_v7, %v2293_v56  ;;  %v1748_v1 = vsub.s32 32, %v1747_v14  ;;  %v1749_v20 = vshll.u32 %v16373_v3, %v1747_v14 }
 0x15c   : > { %v2298_v21 = vsel %vm2291_vm7, %v2294_v11, %v2297_v32  ;;  %v7324_v43 = vsel %vm7317_vm10, %v7320_v57, %v7323_v6  ;;  %v1752_v7 = vsub.s32 4294967266, %v1747_v14  ;;  %v2150_v63 = vadd.s32 1, %v16418_v26 }
 0x15d   : > { %v2299_v12 = vsel %vm2288_vm8, nan, %v2298_v21  ;;  %v7325_v42 = vsel %vm2288_vm8, nan, %v7324_v43  ;;  %v1750_v38 = vshrl.u32 %v1732_v51, %v1748_v1  ;;  %v13949_v25 = vadd.s32 4294967169, %v2616_v18 }
 0x15e   : > { %v5849_v31 = vpack.c.bf16 %v2299_v12, %v2299_v12  ;;  %v10841_v47 = vpack.c.bf16 %v7325_v42, %v7325_v42  ;;  %v1753_v3 = vadd.s32 127, %v1752_v7  ;;  %v1765_v51 = vsel %vm16446_vm4, 0, %v1763_v35 }
 0x15f   : > { %v16451_v23 = vmul.u32.u64.low %v16395_v9, %v2139_v27  ;;  %v16452_v56 = vmul.u32.u64.high %v16395_v9, %v2139_v27, %v16451_v23  ;;  %v1751_v30 = vor.u32 %v1750_v38, %v1749_v20  ;;  %v2147_v60 = vmul.u32 %v16395_v9, %v2131_v10 }
 0x160   : > { %v10937_v0 = vrot.slane %v10841_v47, 4  ;;  %v1754_v32 = vshll.u32 %v1753_v3, 23  ;;  %v2612_v50 = vand.u32 2147483647, %v16382_v22  ;;  %v2622_v46 = vadd.s32 1, %v13949_v25 }
 0x161   : > { %v1758_v14 = vcvt.s32.f32 %v1751_v30  ;;  %vm2149_vm3 = vc.u32 %v16452_v56, %v16417_v49  ;;  %v1769_v27 = vadd.s32 3, %v1765_v51  ;;  %v16468_v10 = vand.u32 3, %v1765_v51 }
 0x162   : > { %v11027_v6 = vsel %vm21965_vm0, %v5849_v31, %v10937_v0  ;;  %v1755_v57 = vor.u32 4788187, %v1754_v32  ;;  %v2151_v21 = vsel %vm2149_vm3, %v2150_v63, %v16418_v26  ;;  %vm2623_vm5 = vcmp.gt.s32.totalorder %v2622_v46, 0 }
 0x163   : > { %v11378_v11 = vmul.bf16 %v15886_v28, %v11027_v6  ;;  %v2152_v43 = vadd.s32 %v2151_v21, %v2147_v60  ;;  %v2619_v9 = vand.u32 8388607, %v2612_v50  ;;  %v2624_v1 = vsel %vm2623_vm5, %v2622_v46, 0 }
 0x164   : > { %v1756_v35 = vand.u32 2147483647, %v1755_v57  ;;  %v2626_v20 = vand.u32 31, %v2624_v1  ;;  %v16466_v7 = vand.u32 3, %v1769_v27  ;;  %v643_v47 = vrot.slane %v15657_v53, %v15640_v34 }
 0x165   : > { %13501 = vmatprep.mubr.bf16.mxu0 %v11378_v11  ;;  %v2153_v42 = vadd.s32 536870912, %v2152_v43  ;;  %v2620_v18 = vor.u32 8388608, %v2619_v9  ;;  %v2625_v51 = vshrl.u32 %v2624_v1, 5  ;;  %vm2094_vm9 = vcmp.lt.s32.totalorder %v16135_v17, 0 }
 0x166   : > { %v1759_v12 = vmul.f32 %v1758_v14, %v1756_v35  ;;  %v2627_v31 = vsub.s32 32, %v2626_v20  ;;  %v2629_v3 = vshll.u32 %v21906_v58, %v2626_v20  ;;  %v2632_v0 = vshll.u32 %v21991_v16, %v2626_v20 }
 0x167   : > { %v16472_v38 = vshrl.u32 %v2153_v42, 30  ;;  %v2638_v63 = vshll.u32 %v22004_v39, %v2626_v20  ;;  %v2635_v46 = vshll.u32 %v21992_v37, %v2626_v20  ;;  %v2641_v57 = vshll.u32 %v22005_v59, %v2626_v20 }
 0x168   : > { %v1760_v26 = vxor.u32 2147483648, %v1759_v12  ;;  %v2630_v23 = vshrl.u32 %v21991_v16, %v2627_v31  ;;  %v2633_v30 = vshrl.u32 %v21992_v37, %v2627_v31  ;;  %v2639_v60 = vshrl.u32 %v22005_v59, %v2627_v31 }
 0x169   : > { %v2155_v32 = vshll.u32 %v16472_v38, 30  ;;  %v2636_v11 = vshrl.u32 %v22004_v39, %v2627_v31  ;;  %v2628_v27 = vshrl.u32 %v21906_v58, %v2627_v31  ;;  %v2642_v1 = vshrl.u32 %v21993_v13, %v2627_v31 }
 0x16a   : > { %v1761_v25 = vsel %vm1678_vm6, %v1760_v26, %v1759_v12  ;;  %v2631_v21 = vor.u32 %v2630_v23, %v2629_v3  ;;  %v2634_v35 = vor.u32 %v2633_v30, %v2632_v0  ;;  %v2640_v9 = vor.u32 %v2639_v60, %v2638_v63 }
 0x16b   : > { %v1764_v6 = vsel %vm16446_vm4, %v16132_v40, %v1761_v25  ;;  %v16489_v14 = vsub.s32 %v2152_v43, %v2155_v32  ;;  %vm6806_vm6 = vcmp.eq.s32.totalorder %v16468_v10, 2  ;;  %vm2644_vm7 = vcmp.lt.s32.totalorder %v2625_v51, 1 }
 0x16c   : > { %15070 = vcosq.f32 %v1764_v6  ;;  %v16497_v20 = vmul.f32 %v15661_v55, %v643_v47  ;;  %vm1772_vm10 = vcmp.eq.s32.totalorder %v16466_v7, 0  ;;  %vm6803_vm8 = vcmp.eq.s32.totalorder %v16468_v10, 0 }
 0x16d   : > { %15072 = vsinq.f32 %v1764_v6  ;;  %v2158_v41 = vsub.s32 0, %v16489_v14  ;;  %v2637_v43 = vor.u32 %v2636_v11, %v2635_v46  ;;  %v2643_v12 = vor.u32 %v2642_v1, %v2641_v57 }
 0x16e   : > { %vm2647_vm11 = vcmp.lt.s32.totalorder %v2625_v51, 4  ;;  %vm1771_vm12 = vcmp.lt.s32.totalorder %v16466_v7, 2  ;;  %vm6802_vm13 = vcmp.lt.s32.totalorder %v16468_v10, 2  ;;  %vm2645_vm14 = vcmp.lt.s32.totalorder %v2625_v51, 2 }
 0x16f   : > { %v13930_v42 = vmin.u32 %v2158_v41, %v16489_v14  ;;  %vm2646_vm1 = vcmp.lt.s32.totalorder %v2625_v51, 3  ;;  %v2660_v31 = vshll.u32 %v2620_v18, 8  ;;  %vm1768_vm2 = vweird.f32 %v16132_v40 }
 0x170   : > { %v2648_v47 = vsel %vm2644_vm7, %v2628_v27, %v2631_v21  ;;  %v2649_v26 = vsel %vm2647_vm11, %v2637_v43, 2102212464  ;;  %v2652_v3 = vsel %vm2644_vm7, %v2631_v21, %v2634_v35  ;;  %v2653_v23 = vsel %vm2647_vm11, %v2640_v9, 920167782 }
 0x171   : > { %vm1775_vm15 = vcmp.eq.s32.totalorder %v16466_v7, 2  ;;  %vm16512_vm4 = vcmp.le.f32.partialorder %v2092_v15, 0.7853982  ;;  %v2160_v30 = vclz %v13930_v42  ;;  %v2178_v18 = vsub.s32 4, %v16472_v38 }
 0x172   : > { %v3031_v63 = vand.u32 2139095040, %v16497_v20  ;;  %v2650_v25 = vsel %vm2646_vm1, %v2634_v35, %v2649_v26  ;;  %v2654_v32 = vsel %vm2646_vm1, %v2637_v43, %v2653_v23  ;;  %v2656_v60 = vsel %vm2644_vm7, %v2634_v35, %v2637_v43 }
 0x173   : > { %v2657_v6 = vsel %vm2647_vm11, %v2643_v12, 1326507024  ;;  %v13931_v46 = vadd.s32 4294967294, %v2160_v30  ;;  %v2651_v11 = vsel %vm2645_vm14, %v2648_v47, %v2650_v25  ;;  %v2655_v15 = vsel %vm2645_vm14, %v2652_v3, %v2654_v32 }
 0x174   : > { %v2658_v57 = vsel %vm2646_vm1, %v2640_v9, %v2657_v6  ;;  %v2148_v27 = vadd.s32 %v16417_v49, %v16452_v56  ;;  %v16528_v1 = vmul.u32.u64.low %v2660_v31, %v2655_v15  ;;  %v16529_v41 = vmul.u32.u64.high %v2660_v31, %v2655_v15, %v16528_v1 }
 0x175   : > { %v2659_v21 = vsel %vm2645_vm14, %v2656_v60, %v2658_v57  ;;  %vm13932_vm3 = vcmp.lt.s32.totalorder %v13931_v46, 0  ;;  %v3032_v12 = vshrl.u32 %v3031_v63, 23  ;;  %v2179_v9 = vsel %vm2094_vm9, %v2178_v18, %v16472_v38 }
 0x176   : > { %v15071_v42 = vpop.eup %15070  ;;  %v16532_v35 = vmul.u32.u64.low %v2660_v31, %v2659_v21  ;;  %v16533_v43 = vmul.u32.u64.high %v2660_v31, %v2659_v21, %v16532_v35  ;;  %v2163_v3 = vsel %vm13932_vm3, 0, %v13931_v46  ;;  %v2667_v49 = vmul.u32 %v2660_v31, %v2651_v11 }
 0x177   : > { %v15073_v47 = vpop.eup %15072  ;;  %v1776_v26 = vxor.u32 2147483648, %v15071_v42  ;;  %v2164_v51 = vsub.s32 32, %v2163_v3  ;;  %v2165_v23 = vshll.u32 %v16489_v14, %v2163_v3  ;;  %v2168_v30 = vsub.s32 4294967266, %v2163_v3 }
 0x178   : > { %v1773_v56 = vxor.u32 2147483648, %v15073_v47  ;;  %v2670_v63 = vadd.s32 1, %v16529_v41  ;;  %v13965_v60 = vadd.s32 4294967169, %v3032_v12  ;;  %v2181_v11 = vsel %vm16512_vm4, 0, %v2179_v9 }
 0x179   : > { %v1777_v25 = vsel %vm1775_vm15, %v1776_v26, %v15073_v47  ;;  %v6808_v32 = vsel %vm6806_vm6, %v1776_v26, %v15073_v47  ;;  %v2166_v31 = vshrl.u32 %v2148_v27, %v2164_v51  ;;  %v2169_v18 = vadd.s32 127, %v2168_v30 }
 0x17a   : > { %v1774_v6 = vsel %vm1772_vm10, %v15071_v42, %v1773_v56  ;;  %v6805_v38 = vsel %vm6803_vm8, %v15071_v42, %v1773_v56  ;;  %vm2669_vm5 = vc.u32 %v16533_v43, %v16528_v1  ;;  %v3038_v10 = vadd.s32 1, %v13965_v60 }
 0x17b   : > { %v1778_v14 = vsel %vm1771_vm12, %v1774_v6, %v1777_v25  ;;  %v6809_v46 = vsel %vm6802_vm13, %v6805_v38, %v6808_v32  ;;  %v2167_v27 = vor.u32 %v2166_v31, %v2165_v23  ;;  %v2170_v21 = vshll.u32 %v2169_v18, 23 }
 0x17c   : > { %v1779_v15 = vsel %vm1768_vm2, nan, %v1778_v14  ;;  %v6810_v57 = vsel %vm1768_vm2, nan, %v6809_v46  ;;  %v2671_v35 = vsel %vm2669_vm5, %v2670_v63, %v16529_v41  ;;  %v3028_v9 = vand.u32 2147483647, %v16497_v20 }
 0x17d   : > { %v5844_v42 = vpack.c.bf16 %v1779_v15, %v1779_v15  ;;  %v10836_v7 = vpack.c.bf16 %v6810_v57, %v6810_v57  ;;  %v2171_v12 = vor.u32 4788187, %v2170_v21  ;;  %v2174_v47 = vcvt.s32.f32 %v2167_v27 }
 0x17e   : > { %v2672_v26 = vadd.s32 %v2671_v35, %v2667_v49  ;;  %vm3039_vm6 = vcmp.gt.s32.totalorder %v3038_v10, 0  ;;  %v623_v56 = vrot.slane %v15657_v53, %v15632_v19  ;;  %v2185_v40 = vadd.s32 3, %v2181_v11 }
 0x17f   : > { %v10932_v3 = vrot.slane %v10836_v7, 4  ;;  %v2172_v51 = vand.u32 2147483647, %v2171_v12  ;;  %v3040_v23 = vsel %vm3039_vm6, %v3038_v10, 0  ;;  %v3035_v49 = vand.u32 8388607, %v3028_v9 }
 0x180   : > { %v2673_v30 = vadd.s32 536870912, %v2672_v26  ;;  %v3042_v32 = vand.u32 31, %v3040_v23  ;;  %v16571_v38 = vmul.f32 %v15661_v55, %v623_v56  ;;  %v16573_v18 = vand.u32 3, %v2185_v40 }
 0x181   : > { %v11007_v25 = vsel %vm21965_vm0, %v5844_v42, %v10932_v3  ;;  %v2175_v63 = vmul.f32 %v2174_v47, %v2172_v51  ;;  %v16575_v14 = vand.u32 3, %v2181_v11  ;;  %v3041_v12 = vshrl.u32 %v3040_v23, 5 }
 0x182   : > { %v11373_v41 = vmul.bf16 %v16039_v33, %v11007_v25  ;;  %v16566_v60 = vshrl.u32 %v2673_v30, 30  ;;  %v3043_v6 = vsub.s32 32, %v3042_v32  ;;  %v3045_v15 = vshll.u32 %v21906_v58, %v3042_v32 }
 0x183   : > { %v2176_v31 = vxor.u32 2147483648, %v2175_v63  ;;  %v3048_v27 = vshll.u32 %v21991_v16, %v3042_v32  ;;  %v3054_v21 = vshll.u32 %v22004_v39, %v3042_v32  ;;  %v3051_v47 = vshll.u32 %v21992_v37, %v3042_v32 }
 0x184   : > { %13276 = vmatmul.mubr.bf16.gmra.mrb[4].mxu1 %v11373_v41  ;;  %v2675_v46 = vshll.u32 %v16566_v60, 30  ;;  %v3046_v57 = vshrl.u32 %v21991_v16, %v3043_v6  ;;  %v3049_v35 = vshrl.u32 %v21992_v37, %v3043_v6  ;;  %v3055_v11 = vshrl.u32 %v22005_v59, %v3043_v6 }
 0x185   : > { %v2177_v42 = vsel %vm2094_vm9, %v2176_v31, %v2175_v63  ;;  %v3052_v3 = vshrl.u32 %v22004_v39, %v3043_v6  ;;  %v3036_v51 = vor.u32 8388608, %v3035_v49  ;;  %v3044_v40 = vshrl.u32 %v21906_v58, %v3043_v6 }
 0x186   : > { %v16584_v7 = vsub.s32 %v2672_v26, %v2675_v46  ;;  %v2180_v10 = vsel %vm16512_vm4, %v16135_v17, %v2177_v42  ;;  %v2511_v26 = vand.u32 2139095040, %v16571_v38  ;;  %v3057_v30 = vshll.u32 %v22005_v59, %v3042_v32 }
 0x187   : > { %15074 = vcosq.f32 %v2180_v10  ;;  %v2508_v25 = vand.u32 2147483647, %v16571_v38  ;;  %vm2191_vm9 = vcmp.eq.s32.totalorder %v16573_v18, 2  ;;  %vm7218_vm7 = vcmp.eq.s32.totalorder %v16575_v14, 2 }
 0x188   : > { %v2678_v56 = vsub.s32 0, %v16584_v7  ;;  %15076 = vsinq.f32 %v2180_v10  ;;  %v3047_v23 = vor.u32 %v3046_v57, %v3045_v15  ;;  %v3050_v41 = vor.u32 %v3049_v35, %v3048_v27 }
 0x189   : > { %v3056_v63 = vor.u32 %v3055_v11, %v3054_v21  ;;  %vm2188_vm10 = vcmp.eq.s32.totalorder %v16573_v18, 0  ;;  %vm7215_vm8 = vcmp.eq.s32.totalorder %v16575_v14, 0  ;;  %v2668_v49 = vadd.s32 %v16528_v1, %v16533_v43 }
 0x18a   : > { %v13950_v0 = vmin.u32 %v2678_v56, %v16584_v7  ;;  %v3053_v31 = vor.u32 %v3052_v3, %v3051_v47  ;;  %v3058_v32 = vshrl.u32 %v21993_v13, %v3043_v6  ;;  %vm3060_vm11 = vcmp.lt.s32.totalorder %v3041_v12, 1 }
 0x18b   : > { %vm2187_vm12 = vcmp.lt.s32.totalorder %v16573_v18, 2  ;;  %vm7214_vm13 = vcmp.lt.s32.totalorder %v16575_v14, 2  ;;  %vm3061_vm14 = vcmp.lt.s32.totalorder %v3041_v12, 2  ;;  %v16608_v15 = vshll.u32 %v3036_v51, 8  ;;  %v14976_v14 = vld [vmem:[#allocation5 + $0x160] ss:$8 sps:$4 sm:$0xff]  }
 0x18c   : > { %v2680_v46 = vclz %v13950_v0  ;;  %v2512_v57 = vshrl.u32 %v2511_v26, 23  ;;  %vm2184_vm1 = vweird.f32 %v16135_v17  ;;  %v3059_v27 = vor.u32 %v3058_v32, %v3057_v30 }
 0x18d   : > { %vm3062_vm2 = vcmp.lt.s32.totalorder %v3041_v12, 3  ;;  %vm3063_vm15 = vcmp.lt.s32.totalorder %v3041_v12, 4  ;;  %v3064_v1 = vsel %vm3060_vm11, %v3044_v40, %v3047_v23  ;;  %vm2614_vm4 = vcmp.lt.s32.totalorder %v16382_v22, 0 }
 0x18e   : > { %v13951_v43 = vadd.s32 4294967294, %v2680_v46  ;;  %v3065_v6 = vsel %vm3063_vm15, %v3053_v31, 2102212464  ;;  %v3068_v21 = vsel %vm3060_vm11, %v3047_v23, %v3050_v41  ;;  %v3069_v42 = vsel %vm3063_vm15, %v3056_v63, 920167782 }
 0x18f   : > { %v3066_v35 = vsel %vm3062_vm2, %v3050_v41, %v3065_v6  ;;  %v3070_v11 = vsel %vm3062_vm2, %v3053_v31, %v3069_v42  ;;  %v3072_v10 = vsel %vm3060_vm11, %v3050_v41, %v3053_v31  ;;  %v3073_v47 = vsel %vm3063_vm15, %v3059_v27, 1326507024 }
 0x190   : > { %vm13952_vm3 = vcmp.lt.s32.totalorder %v13951_v43, 0  ;;  %v3067_v3 = vsel %vm3061_vm14, %v3064_v1, %v3066_v35  ;;  %v3071_v56 = vsel %vm3061_vm14, %v3068_v21, %v3070_v11  ;;  %v3074_v51 = vsel %vm3062_vm2, %v3056_v63, %v3073_v47  ;;  %v14970_v11 = vld [vmem:[#allocation5 + $0x150] ss:$8 sps:$4 sm:$0xff]  }
 0x191   : > { %v2683_v26 = vsel %vm13952_vm3, 0, %v13951_v43  ;;  %v3075_v40 = vsel %vm3061_vm14, %v3072_v10, %v3074_v51  ;;  %v16619_v30 = vmul.u32.u64.low %v16608_v15, %v3071_v56  ;;  %v16620_v0 = vmul.u32.u64.high %v16608_v15, %v3071_v56, %v16619_v30  ;;  %v15075_v23 = vpop.eup %15074  ;;  %v14972_v51 = vld [vmem:[#allocation5 + $0x154] ss:$8 sps:$4 sm:$0xff]  }
 0x192   : > { %v2684_v32 = vsub.s32 32, %v2683_v26  ;;  %v2685_v46 = vshll.u32 %v16584_v7, %v2683_v26  ;;  %v2688_v41 = vsub.s32 4294967266, %v2683_v26  ;;  %v2698_v31 = vsub.s32 4, %v16566_v60  ;;  %v15077_v27 = vpop.eup %15076  ;;  %v14973_v26 = vld [vmem:[#allocation5 + $0x350] ss:$8 sps:$4 sm:$0xff]   ;;  %13356 = vmatprep.subr.bf16.mxu1 %v14972_v51 }
 0x193   : > { %v2192_v1 = vxor.u32 2147483648, %v15075_v23  ;;  %v16627_v63 = vmul.u32.u64.low %v16608_v15, %v3075_v40  ;;  %v16628_v43 = vmul.u32.u64.high %v16608_v15, %v3075_v40, %v16627_v63  ;;  %v13945_v12 = vadd.s32 4294967169, %v2512_v57  ;;  %v14975_v40 = vld [vmem:[#allocation5 + $0x354] ss:$8 sps:$4 sm:$0xff]   ;;  %13357 = vmatpush1.bf16.msra.mxu1 %v14970_v11 }
 0x194   : > { %v2189_v6 = vxor.u32 2147483648, %v15077_v27  ;;  %v2686_v21 = vshrl.u32 %v2668_v49, %v2684_v32  ;;  %v2689_v42 = vadd.s32 127, %v2688_v41  ;;  %v3083_v35 = vmul.u32 %v16608_v15, %v3067_v3  ;;  %13582 = vmatprep.subr.bf16.mxu0 %v14975_v40 }
 0x195   : > { %v2193_v7 = vsel %vm2191_vm9, %v2192_v1, %v15077_v27  ;;  %v7220_v10 = vsel %vm7218_vm7, %v2192_v1, %v15077_v27  ;;  %v3086_v47 = vadd.s32 1, %v16620_v0  ;;  %v2518_v56 = vadd.s32 1, %v13945_v12  ;;  %v14978_v1 = vld [vmem:[#allocation5 + $0x164] ss:$8 sps:$4 sm:$0xff]   ;;  %13583 = vmatpush1.bf16.msra.mxu0 %v14973_v26 }
 0x196   : > { %v2190_v49 = vsel %vm2188_vm10, %v15075_v23, %v2189_v6  ;;  %v7217_v15 = vsel %vm7215_vm8, %v15075_v23, %v2189_v6  ;;  %v2687_v57 = vor.u32 %v2686_v21, %v2685_v46  ;;  %v2690_v3 = vshll.u32 %v2689_v42, 23  ;;  %v14982_v23 = vld [vmem:[#allocation5 + $0x364] ss:$8 sps:$4 sm:$0xff]   ;;  %13358 = vmatprep.subr.bf16.mxu1 %v14978_v1  ;;  %v14980_v42 = vld [vmem:[#allocation5 + $0x360] ss:$8 sps:$4 sm:$0xff]  }
 0x197   : > { %v2194_v32 = vsel %vm2187_vm12, %v2190_v49, %v2193_v7  ;;  %v7221_v41 = vsel %vm7214_vm13, %v7217_v15, %v7220_v10  ;;  %v2699_v27 = vsel %vm2614_vm4, %v2698_v31, %v16566_v60  ;;  %vm3085_vm5 = vc.u32 %v16628_v43, %v16619_v30  ;;  %v16659_v6 = vld [vmem:[%s16639_s17] sm:$0x77]  ;;  %13584 = vmatprep.subr.bf16.mxu0 %v14982_v23  ;;  %v16675_v26 = vld [vmem:[%s15612_s7 + $0x8] sm:$0xff]  ;;  %v14988_v1 = vld [vmem:[#allocation5 + $0x374] ss:$8 sps:$4 sm:$0xff]  }
 0x198   : > { %v2195_v46 = vsel %vm2184_vm1, nan, %v2194_v32  ;;  %v7222_v18 = vsel %vm2184_vm1, nan, %v7221_v41  ;;  %v2691_v63 = vor.u32 4788187, %v2690_v3  ;;  %v2694_v12 = vcvt.s32.f32 %v2687_v57  ;;  %13359 = vmatpush1.bf16.msra.mxu1 %v14976_v14 }
 0x199   : > { %v5848_v60 = vpack.c.bf16 %v2195_v46, %v2195_v46  ;;  %v10840_v31 = vpack.c.bf16 %v7222_v18, %v7222_v18  ;;  %v3087_v21 = vsel %vm3085_vm5, %v3086_v47, %v16620_v0  ;;  %vm2519_vm6 = vcmp.gt.s32.totalorder %v2518_v56, 0  ;;  %13585 = vmatpush1.bf16.msra.mxu0 %v14980_v42 }
 0x19a   : > { %vm16664_vm9 = vcmp.le.f32.partialorder %v2612_v50, 0.7853982  ;;  %v2692_v7 = vand.u32 2147483647, %v2691_v63  ;;  %v3088_v11 = vadd.s32 %v3087_v21, %v3083_v35  ;;  %v2520_v10 = vsel %vm2519_vm6, %v2518_v56, 0  ;;  %13586 = vmatprep.subr.bf16.mxu0 %v14988_v1 }
 0x19b   : > { %v10936_v51 = vrot.slane %v10840_v31, 4  ;;  %v2701_v49 = vsel %vm16664_vm9, 0, %v2699_v27  ;;  %v16672_v0 = vand.u32 8388607, %v2508_v25  ;;  %v2522_v47 = vand.u32 31, %v2520_v10 }
 0x19c   : > { %v11814_v50 = vpack.c.bf16 %v16675_v26, %v16675_v26  ;;  %v2695_v15 = vmul.f32 %v2694_v12, %v2692_v7  ;;  %v3089_v57 = vadd.s32 536870912, %v3088_v11  ;;  %v14983_v35 = vld [vmem:[#allocation5 + $0x170] ss:$8 sps:$4 sm:$0xff]   ;;  %v14985_v56 = vld [vmem:[#allocation5 + $0x174] ss:$8 sps:$4 sm:$0xff]   ;;  %v16681_v3 = vmul.bf16 %v15673_v4, %v16659_v6 }
 0x19d   : > { %v11023_v40 = vsel %vm21965_vm0, %v5848_v60, %v10936_v51  ;;  %v2523_v32 = vsub.s32 32, %v2522_v47  ;;  %v639_v41 = vrot.slane %v15657_v53, %v15788_v61  ;;  %v14986_v27 = vld [vmem:[#allocation5 + $0x370] ss:$8 sps:$4 sm:$0xff]   ;;  %v2705_v18 = vadd.s32 3, %v2701_v49  ;;  %13360 = vmatprep.subr.bf16.mxu1 %v14985_v56 }
 0x19e   : > { %v11377_v23 = vmul.bf16 %v16229_v8, %v11023_v40  ;;  %v2696_v46 = vxor.u32 2147483648, %v2695_v15  ;;  %v16687_v63 = vshrl.u32 %v3089_v57, 30  ;;  %v16689_v12 = vand.u32 3, %v2701_v49  ;;  %13361 = vmatpush1.bf16.msra.mxu1 %v14983_v35  ;;  %13587 = vmatpush1.bf16.msra.mxu0 %v14986_v27 }
 0x19f   : > { %v16691_v4 = vshrl.u32 %v2520_v10, 5  ;;  %v2525_v14 = vshll.u32 %v21906_v58, %v2522_v47  ;;  %v2528_v60 = vshll.u32 %v21991_v16, %v2522_v47  ;;  %v2526_v42 = vshrl.u32 %v21991_v16, %v2523_v32 }
 0x1a0   : > { %13502 = vmatmul.mubr.bf16.gmra.mrb[4].mxu0 %v11377_v23  ;;  %v2697_v31 = vsel %vm2614_vm4, %v2696_v46, %v2695_v15  ;;  %v3091_v21 = vshll.u32 %v16687_v63, 30  ;;  %v2529_v7 = vshrl.u32 %v21992_v37, %v2523_v32  ;;  %v2531_v51 = vshll.u32 %v21992_v37, %v2522_v47 }
 0x1a1   : > { %v2700_v10 = vsel %vm16664_vm9, %v16382_v22, %v2697_v31  ;;  %v2532_v49 = vshrl.u32 %v22004_v39, %v2523_v32  ;;  %v2534_v57 = vshll.u32 %v22004_v39, %v2522_v47  ;;  %v16706_v15 = vand.u32 3, %v2705_v18 }
 0x1a2   : > { %15078 = vcosq.f32 %v2700_v10  ;;  %v16708_v56 = vsub.s32 %v3088_v11, %v3091_v21  ;;  %v2535_v40 = vshrl.u32 %v22005_v59, %v2523_v32  ;;  %v2516_v35 = vor.u32 8388608, %v16672_v0 }
 0x1a3   : > { %15080 = vsinq.f32 %v2700_v10  ;;  %v2537_v17 = vshll.u32 %v22005_v59, %v2522_v47  ;;  %v2538_v1 = vshrl.u32 %v21993_v13, %v2523_v32  ;;  %vm7733_vm7 = vcmp.eq.s32.totalorder %v16689_v12, 2 }
 0x1a4   : > { %v3094_v23 = vsub.s32 0, %v16708_v56  ;;  %v2524_v27 = vshrl.u32 %v21906_v58, %v2523_v32  ;;  %v2527_v46 = vor.u32 %v2526_v42, %v2525_v14  ;;  %v2530_v18 = vor.u32 %v2529_v7, %v2528_v60 }
 0x1a5   : > { %vm7730_vm10 = vcmp.eq.s32.totalorder %v16689_v12, 0  ;;  %v2533_v11 = vor.u32 %v2532_v49, %v2531_v51  ;;  %v2536_v31 = vor.u32 %v2535_v40, %v2534_v57  ;;  %v2539_v21 = vor.u32 %v2538_v1, %v2537_v17 }
 0x1a6   : > { %vm2540_vm8 = vcmp.lt.s32.totalorder %v16691_v4, 1  ;;  %vm2707_vm11 = vcmp.lt.s32.totalorder %v16706_v15, 2  ;;  %vm2708_vm12 = vcmp.eq.s32.totalorder %v16706_v15, 0  ;;  %vm2711_vm13 = vcmp.eq.s32.totalorder %v16706_v15, 2 }
 0x1a7   : > { %vm7729_vm14 = vcmp.lt.s32.totalorder %v16689_v12, 2  ;;  %vm3030_vm1 = vcmp.lt.s32.totalorder %v16497_v20, 0  ;;  %v13966_v0 = vmin.u32 %v3094_v23, %v16708_v56  ;;  %vm2704_vm2 = vweird.f32 %v16382_v22 }
 0x1a8   : > { %v3084_v47 = vadd.s32 %v16619_v30, %v16628_v43  ;;  %vm2542_vm15 = vcmp.lt.s32.totalorder %v16691_v4, 3  ;;  %vm2543_vm4 = vcmp.lt.s32.totalorder %v16691_v4, 4  ;;  %v2556_v32 = vshll.u32 %v2516_v35, 8 }
 0x1a9   : > { %v3096_v14 = vclz %v13966_v0  ;;  %vm2541_vm3 = vcmp.lt.s32.totalorder %v16691_v4, 2  ;;  %v2544_v60 = vsel %vm2540_vm8, %v2524_v27, %v2527_v46  ;;  %v2548_v42 = vsel %vm2540_vm8, %v2527_v46, %v2530_v18 }
 0x1aa   : > { %v2545_v7 = vsel %vm2543_vm4, %v2533_v11, 2102212464  ;;  %v2549_v10 = vsel %vm2543_vm4, %v2536_v31, 920167782  ;;  %v2552_v51 = vsel %vm2540_vm8, %v2530_v18, %v2533_v11  ;;  %v2553_v30 = vsel %vm2543_vm4, %v2539_v21, 1326507024 }
 0x1ab   : > { %v13967_v43 = vadd.s32 4294967294, %v3096_v14  ;;  %v2546_v49 = vsel %vm2542_vm15, %v2530_v18, %v2545_v7  ;;  %v2550_v57 = vsel %vm2542_vm15, %v2533_v11, %v2549_v10  ;;  %v2554_v40 = vsel %vm2542_vm15, %v2536_v31, %v2553_v30 }
 0x1ac   : > { %v3114_v35 = vsub.s32 4, %v16687_v63  ;;  %v2551_v17 = vsel %vm2541_vm3, %v2548_v42, %v2550_v57  ;;  %v2555_v1 = vsel %vm2541_vm3, %v2552_v51, %v2554_v40  ;;  %v16746_v23 = vmul.f32 %v15661_v55, %v639_v41  ;;  %v15079_v27 = vpop.eup %15078 }
 0x1ad   : > { %vm13968_vm5 = vcmp.lt.s32.totalorder %v13967_v43, 0  ;;  %v2547_v46 = vsel %vm2541_vm3, %v2544_v60, %v2546_v49  ;;  %v16750_v18 = vmul.u32.u64.low %v2556_v32, %v2555_v1  ;;  %v16751_v11 = vmul.u32.u64.high %v2556_v32, %v2555_v1, %v16750_v18  ;;  %v15081_v31 = vpop.eup %15080 }
 0x1ae   : > { %v2712_v21 = vxor.u32 2147483648, %v15079_v27  ;;  %v3099_v0 = vsel %vm13968_vm5, 0, %v13967_v43  ;;  %v16753_v14 = vmul.u32.u64.low %v2556_v32, %v2551_v17  ;;  %v16754_v42 = vmul.u32.u64.high %v2556_v32, %v2551_v17, %v16753_v14 }
 0x1af   : > { %v2709_v7 = vxor.u32 2147483648, %v15081_v31  ;;  %v3100_v10 = vsub.s32 32, %v3099_v0  ;;  %v3101_v41 = vshll.u32 %v16708_v56, %v3099_v0  ;;  %v3104_v51 = vsub.s32 4294967266, %v3099_v0 }
 0x1b0   : > { %v2713_v30 = vsel %vm2711_vm13, %v2712_v21, %v15081_v31  ;;  %v7735_v4 = vsel %vm7733_vm7, %v2712_v21, %v15081_v31  ;;  %v3115_v60 = vsel %vm3030_vm1, %v3114_v35, %v16687_v63  ;;  %v16767_v43 = vmul.bf16 %v15671_v2, %v16659_v6 }
 0x1b1   : > { %v2710_v49 = vsel %vm2708_vm12, %v15079_v27, %v2709_v7  ;;  %v7732_v56 = vsel %vm7730_vm10, %v15079_v27, %v2709_v7  ;;  %v3102_v57 = vshrl.u32 %v3084_v47, %v3100_v10  ;;  %v3105_v40 = vadd.s32 127, %v3104_v51 }
 0x1b2   : > { %v2714_v17 = vsel %vm2707_vm11, %v2710_v49, %v2713_v30  ;;  %v7736_v1 = vsel %vm7729_vm14, %v7732_v56, %v7735_v4  ;;  %v2563_v18 = vmul.u32 %v2556_v32, %v2547_v46  ;;  %vm2565_vm6 = vc.u32 %v16751_v11, %v16753_v14 }
 0x1b3   : > { %v2715_v2 = vsel %vm2704_vm2, nan, %v2714_v17  ;;  %v7737_v63 = vsel %vm2704_vm2, nan, %v7736_v1  ;;  %v3103_v35 = vor.u32 %v3102_v57, %v3101_v41  ;;  %v3106_v27 = vshll.u32 %v3105_v40, 23  ;;  %v15239_v40 = vld [vmem:[%s15612_s7 + $0x28] sm:$0xff] }
 0x1b4   : > { %v5853_v47 = vpack.c.bf16 %v2715_v2, %v2715_v2  ;;  %v10845_v31 = vpack.c.bf16 %v7737_v63, %v7737_v63  ;;  %v2566_v15 = vadd.s32 1, %v16754_v42  ;;  %v2927_v21 = vand.u32 2139095040, %v16746_v23 }
 0x1b5   : > { %v11830_v12 = vmul.bf16 %v11814_v50, %v15876_v29  ;;  %v3107_v32 = vor.u32 4788187, %v3106_v27  ;;  %v3110_v46 = vcvt.s32.f32 %v3103_v35  ;;  %vm16791_vm9 = vcmp.le.f32.partialorder %v3028_v9, 0.7853982  ;;  %v16811_v35 = vld [vmem:[%s16639_s17 + $0x10] sm:$0x77] }
 0x1b6   : > { %v10941_v0 = vrot.slane %v10845_v31, 4  ;;  %v2567_v7 = vsel %vm2565_vm6, %v2566_v15, %v16754_v42  ;;  %v2928_v10 = vshrl.u32 %v2927_v21, 23  ;;  %v14306_v41 = vcombine.high %v16681_v3, %v16681_v3 }
 0x1b7   : > { %v3108_v51 = vand.u32 2147483647, %v3107_v32  ;;  %v3117_v26 = vsel %vm16791_vm9, 0, %v3115_v60  ;;  %v2568_v50 = vadd.s32 %v2567_v7, %v2563_v18  ;;  %v21904_v4 = vand.u32 2147483647, %v16746_v23 }
 0x1b8   : > { %v11043_v30 = vsel %vm21965_vm0, %v5853_v47, %v10941_v0  ;;  %v13961_v9 = vadd.s32 4294967169, %v2928_v10  ;;  %v14290_v49 = vcombine.high %v16767_v43, %v16767_v43  ;;  %v11818_v17 = vpack.c.bf16 %v15239_v40, %v15239_v40 }
 0x1b9   : > { %v11382_v42 = vmul.bf16 %v15876_v29, %v11043_v30  ;;  %v3111_v56 = vmul.f32 %v3110_v46, %v3108_v51  ;;  %v2569_v57 = vadd.s32 536870912, %v2568_v50  ;;  %v3121_v1 = vadd.s32 3, %v3117_v26 }
 0x1ba   : > { %v2934_v2 = vadd.s32 1, %v13961_v9  ;;  %v16806_v18 = vand.u32 3, %v3117_v26  ;;  %vm21905_vm7 = vcmask 1040384   ;;  %v2931_v27 = vand.u32 8388607, %v21904_v4 }
 0x1bb   : > { %13285 = vmatprep.mubr.bf16.mxu1 %v11382_v42  ;;  %v3112_v60 = vxor.u32 2147483648, %v3111_v56  ;;  %v16808_v63 = vshrl.u32 %v2569_v57, 30  ;;  %v11988_v29 = vshrl.u32 %v11830_v12, 16  ;;  %v16816_v47 = vsel %vm21905_vm7, %v14290_v49, %v14306_v41 }
 0x1bc   : > { %vm2935_vm10 = vcmp.gt.s32.totalorder %v2934_v2, 0  ;;  %v11991_v32 = vshll.u32 %v11830_v12, 16  ;;  %v16826_v7 = vand.u32 3, %v3121_v1  ;;  %v16830_v41 = vmul.bf16 %v15709_v48, %v16811_v35 }
 0x1bd   : > { %v3113_v31 = vsel %vm3030_vm1, %v3112_v60, %v3111_v56  ;;  %v2571_v15 = vshll.u32 %v16808_v63, 30  ;;  %v2936_v21 = vsel %vm2935_vm10, %v2934_v2, 0  ;;  %v16833_v51 = vmul.bf16 %v11818_v17, %v15886_v28 }
 0x1be   : > { %v3116_v0 = vsel %vm16791_vm9, %v16497_v20, %v3113_v31  ;;  %v2938_v10 = vand.u32 31, %v2936_v21  ;;  %v2932_v12 = vor.u32 8388608, %v2931_v27  ;;  %v16839_v22 = vmul.bf16 %v15675_v5, %v16659_v6 }
 0x1bf   : > { %15082 = vcosq.f32 %v3116_v0  ;;  %v16835_v26 = vsub.s32 %v2568_v50, %v2571_v15  ;;  %vm8145_vm8 = vcmp.eq.s32.totalorder %v16806_v18, 2  ;;  %v11990_v49 = vrot.slane %v11988_v29, 6 }
 0x1c0   : > { %15084 = vsinq.f32 %v3116_v0  ;;  %v2939_v30 = vsub.s32 32, %v2938_v10  ;;  %v2941_v48 = vshll.u32 %v21906_v58, %v2938_v10  ;;  %v11993_v42 = vrot.slane %v11991_v32, 7 }
 0x1c1   : > { %v2574_v9 = vsub.s32 0, %v16835_v26  ;;  %vm3124_vm11 = vcmp.eq.s32.totalorder %v16826_v7, 0  ;;  %vm3127_vm12 = vcmp.eq.s32.totalorder %v16826_v7, 2  ;;  %vm8142_vm13 = vcmp.eq.s32.totalorder %v16806_v18, 0 }
 0x1c2   : > { %v2942_v50 = vshrl.u32 %v21991_v16, %v2939_v30  ;;  %v2944_v56 = vshll.u32 %v21991_v16, %v2938_v10  ;;  %v2945_v5 = vshrl.u32 %v21992_v37, %v2939_v30  ;;  %vm3123_vm14 = vcmp.lt.s32.totalorder %v16826_v7, 2 }
 0x1c3   : > { %vm8141_vm1 = vcmp.lt.s32.totalorder %v16806_v18, 2  ;;  %v2564_v6 = vadd.s32 %v16753_v14, %v16751_v11  ;;  %v13946_v57 = vmin.u32 %v2574_v9, %v16835_v26  ;;  %v16855_v40 = vshrl.u32 %v2936_v21, 5 }
 0x1c4   : > { %v2947_v17 = vshll.u32 %v21992_v37, %v2938_v10  ;;  %vm3120_vm2 = vweird.f32 %v16497_v20  ;;  %v2594_v1 = vsub.s32 4, %v16808_v63  ;;  %v2948_v2 = vshrl.u32 %v22004_v39, %v2939_v30 }
 0x1c5   : > { %v16861_v60 = vshll.u32 %v2932_v12, 8  ;;  %v14322_v27 = vcombine.high %v16839_v22, %v16839_v22  ;;  %v2576_v29 = vclz %v13946_v57  ;;  %v2940_v11 = vshrl.u32 %v21906_v58, %v2939_v30 }
 0x1c6   : > { %v2943_v14 = vor.u32 %v2942_v50, %v2941_v48  ;;  %v16866_v31 = vor.u32 %v11993_v42, %v11990_v49  ;;  %v2946_v15 = vor.u32 %v2945_v5, %v2944_v56  ;;  %v2950_v21 = vshll.u32 %v22004_v39, %v2938_v10 }
 0x1c7   : > { %v2951_v32 = vshrl.u32 %v22005_v59, %v2939_v30  ;;  %v2953_v0 = vshll.u32 %v22005_v59, %v2938_v10  ;;  %vm2510_vm15 = vcmp.lt.s32.totalorder %v16571_v38, 0  ;;  %v13947_v12 = vadd.s32 4294967294, %v2576_v29 }
 0x1c8   : > { %v2949_v9 = vor.u32 %v2948_v2, %v2947_v17  ;;  %v2954_v4 = vshrl.u32 %v21993_v13, %v2939_v30  ;;  %vm2956_vm4 = vcmp.lt.s32.totalorder %v16855_v40, 1  ;;  %vm2957_vm3 = vcmp.lt.s32.totalorder %v16855_v40, 2 }
 0x1c9   : > { %v2952_v57 = vor.u32 %v2951_v32, %v2950_v21  ;;  %vm2958_vm5 = vcmp.lt.s32.totalorder %v16855_v40, 3  ;;  %vm2959_vm6 = vcmp.lt.s32.totalorder %v16855_v40, 4  ;;  %vm21934_vm9 = vcmask 1041408   ;;  %v15083_v48 = vpop.eup %15082  ;;  %v11852_v40 = vpop.permute.xlu0 %11851 }
 0x1ca   : > { %vm13948_vm10 = vcmp.lt.s32.totalorder %v13947_v12, 0  ;;  %v2955_v49 = vor.u32 %v2954_v4, %v2953_v0  ;;  %v2960_v10 = vsel %vm2956_vm4, %v2940_v11, %v2943_v14  ;;  %v2961_v42 = vsel %vm2959_vm6, %v2949_v9, 2102212464  ;;  %v15085_v30 = vpop.eup %15084 }
 0x1cb   : > { %v3128_v50 = vxor.u32 2147483648, %v15083_v48  ;;  %v2579_v56 = vsel %vm13948_vm10, 0, %v13947_v12  ;;  %v2964_v5 = vsel %vm2956_vm4, %v2943_v14, %v2946_v15  ;;  %v2965_v17 = vsel %vm2959_vm6, %v2952_v57, 920167782 }
 0x1cc   : > { %v3125_v2 = vxor.u32 2147483648, %v15085_v30  ;;  %vm16887_vm7 = vcmp.le.f32.partialorder %v2508_v25, 0.7853982  ;;  %v2580_v29 = vsub.s32 32, %v2579_v56  ;;  %v2581_v11 = vshll.u32 %v16835_v26, %v2579_v56 }
 0x1cd   : > { %v2584_v21 = vsub.s32 4294967266, %v2579_v56  ;;  %v3129_v32 = vsel %vm3127_vm12, %v3128_v50, %v15085_v30  ;;  %v8147_v14 = vsel %vm8145_vm8, %v3128_v50, %v15085_v30  ;;  %v2962_v0 = vsel %vm2958_vm5, %v2946_v15, %v2961_v42 }
 0x1ce   : > { %v2966_v12 = vsel %vm2958_vm5, %v2949_v9, %v2965_v17  ;;  %v3126_v25 = vsel %vm3124_vm11, %v15083_v48, %v3125_v2  ;;  %v8144_v58 = vsel %vm8142_vm13, %v15083_v48, %v3125_v2  ;;  %v2582_v26 = vshrl.u32 %v2564_v6, %v2580_v29 }
 0x1cf   : > { %v2585_v56 = vadd.s32 127, %v2584_v21  ;;  %v3130_v46 = vsel %vm3123_vm14, %v3126_v25, %v3129_v32  ;;  %v8148_v30 = vsel %vm8141_vm1, %v8144_v58, %v8147_v14  ;;  %v2967_v42 = vsel %vm2957_vm3, %v2964_v5, %v2966_v12  ;;  %v16943_v14 = vld [vmem:[%s16925_s10] sm:$0xff] }
 0x1d0   : > { %v2968_v50 = vsel %vm2956_vm4, %v2946_v15, %v2949_v9  ;;  %v3131_v17 = vsel %vm3120_vm2, nan, %v3130_v46  ;;  %v8149_v6 = vsel %vm3120_vm2, nan, %v8148_v30  ;;  %v2583_v48 = vor.u32 %v2582_v26, %v2581_v11 }
 0x1d1   : > { %v2586_v2 = vshll.u32 %v2585_v56, 23  ;;  %v5857_v29 = vpack.c.bf16 %v3131_v17, %v3131_v17  ;;  %v10849_v7 = vpack.c.bf16 %v8149_v6, %v8149_v6  ;;  %v2595_v58 = vsel %vm2510_vm15, %v2594_v1, %v16808_v63 }
 0x1d2   : > { %v2969_v18 = vsel %vm2959_vm6, %v2955_v49, 1326507024  ;;  %v2590_v20 = vcvt.s32.f32 %v2583_v48  ;;  %v2963_v15 = vsel %vm2957_vm3, %v2960_v10, %v2962_v0  ;;  %v2597_v0 = vsel %vm16887_vm7, 0, %v2595_v58  ;;  %v14995_v58 = vld [vmem:[#allocation5 + $0x184] ss:$8 sps:$4 sm:$0xff]  }
 0x1d3   : > { %v2587_v46 = vor.u32 4788187, %v2586_v2  ;;  %v2970_v9 = vsel %vm2958_vm5, %v2952_v57, %v2969_v18  ;;  %v10945_v5 = vrot.slane %v10849_v7, 4  ;;  %v12268_v57 = vsel %vm21934_vm9, %v16816_v47, %v14322_v27  ;;  %13362 = vmatprep.subr.bf16.mxu1 %v14995_v58 }
 0x1d4   : > { %v2971_v63 = vsel %vm2957_vm3, %v2968_v50, %v2970_v9  ;;  %v16934_v1 = vmul.u32.u64.low %v16861_v60, %v2967_v42  ;;  %v16935_v49 = vmul.u32.u64.high %v16861_v60, %v2967_v42, %v16934_v1  ;;  %v16955_v12 = vrot.slane %v16943_v14, %v15615_v62 }
 0x1d5   : > { %v2588_v11 = vand.u32 2147483647, %v2587_v46  ;;  %v16939_v21 = vmul.u32.u64.low %v16861_v60, %v2971_v63  ;;  %v16940_v32 = vmul.u32.u64.high %v16861_v60, %v2971_v63, %v16939_v21  ;;  %v11059_v10 = vsel %vm21965_vm0, %v5857_v29, %v10945_v5  ;;  %v14993_v46 = vld [vmem:[#allocation5 + $0x180] ss:$8 sps:$4 sm:$0xff]  }
 0x1d6   : > { %vm21933_vm8 = vcmask 1042432   ;;  %v11386_v25 = vmul.bf16 %v15886_v28, %v11059_v10  ;;  %v2979_v56 = vmul.u32 %v16861_v60, %v2963_v15  ;;  %v14310_v47 = vcombine.high %v16830_v41, %v16830_v41  ;;  %13363 = vmatpush1.bf16.msra.mxu1 %v14993_v46  ;;  %v15241_v46 = vld [vmem:[%s15612_s7 + $0x20] sm:$0xff] }
 0x1d7   : > { %v2591_v26 = vmul.f32 %v2590_v20, %v2588_v11  ;;  %v12301_v30 = vsel %vm21933_vm8, %v12268_v57, %v16866_v31  ;;  %v2982_v27 = vadd.s32 1, %v16935_v49  ;;  %v16968_v50 = vmul.bf16 %v15705_v44, %v16811_v35  ;;  %v15240_v11 = vld [vmem:[%s15612_s7] sm:$0xff] }
 0x1d8   : > { %v12332_v42 = vsel %vm21965_vm0, %v12301_v30, %v16866_v31  ;;  %v12107_v17 = vshll.u32 %v11852_v40, 16  ;;  %13511 = vmatprep.mubr.bf16.mxu0 %v11386_v25  ;;  %vm2981_vm11 = vc.u32 %v16940_v32, %v16934_v1  ;;  %v16974_v60 = vrot.slane %v16955_v12, %v15615_v62 }
 0x1d9   : > { %v2592_v28 = vxor.u32 2147483648, %v2591_v26  ;;  %v2601_v6 = vadd.s32 3, %v2597_v0  ;;  %v2983_v48 = vsel %vm2981_vm11, %v2982_v27, %v16935_v49  ;;  %v16979_v31 = vmul.bf16 %v15707_v45, %v16811_v35 }
 0x1da   : > { %22019 = vst [vmem:[#allocation16_spill] sm:$0xff] %v16974_v60  ;;  %v14294_v44 = vcombine.high %v16968_v50, %v16968_v50  ;;  %v2984_v29 = vadd.s32 %v2983_v48, %v2979_v56  ;;  %vm21932_vm12 = vcmask 1045504   ;;  %v12020_v7 = vshrl.u32 %v16833_v51, 16 }
 0x1db   : > { %v2593_v2 = vsel %vm2510_vm15, %v2592_v28, %v2591_v26  ;;  %vm12363_vm13 = vsmask.f32 5376  ;;  %v14326_v45 = vcombine.high %v16979_v31, %v16979_v31  ;;  %v12023_v35 = vshll.u32 %v16833_v51, 16 }
 0x1dc   : > { %v2596_v18 = vsel %vm16887_vm7, %v16571_v38, %v2593_v2  ;;  %v2985_v20 = vadd.s32 536870912, %v2984_v29  ;;  %v12022_v15 = vrot.slane %v12020_v7, 6  ;;  %vm22020_vm14 = vcmask 1040384   ;;  %vm17005_vm7 = vmand %vm21932_vm12, %vm12363_vm13 }
 0x1dd   : > { %15086 = vcosq.f32 %v2596_v18  ;;  %v12233_v9 = vsel %vm22020_vm14, %v14294_v44, %v14310_v47  ;;  %v16993_v5 = vrot.slane %v12107_v17, 3  ;;  %v12025_v63 = vrot.slane %v12023_v35, 7  ;;  %vm22026_vm1 = vmmov %vm22020_vm14 }
 0x1de   : > { %15088 = vsinq.f32 %v2596_v18  ;;  %v12276_v4 = vsel %vm21934_vm9, %v12233_v9, %v14326_v45  ;;  %v16996_v49 = vshrl.u32 %v2985_v20, 30  ;;  %v11813_v21 = vpack.c.bf16 %v15240_v11, %v15240_v11  ;;  %v14998_v18 = vld [vmem:[#allocation5 + $0x384] ss:$8 sps:$4 sm:$0xff]  }
 0x1df   : > { %22021 = vst [vmem:[#allocation17_spill] sm:$0xff] %v16993_v5  ;;  %v14289_v51 = vcombine.low %v16767_v43, %v16767_v43  ;;  %v14321_v57 = vcombine.low %v16839_v22, %v16839_v22  ;;  %v2602_v40 = vand.u32 3, %v2601_v6  ;;  %v7625_v10 = vand.u32 3, %v2597_v0  ;;  %13588 = vmatprep.subr.bf16.mxu0 %v14998_v18  ;;  %v389_v18 = vld [vmem:[%s15612_s7 + $0x48] sm:$0xff] }
 0x1e0   : > { %v22022_v25 = vmov 0  ;;  %v12026_v26 = vor.u32 %v12025_v63, %v12022_v15  ;;  %v2987_v56 = vshll.u32 %v16996_v49, 30  ;;  %v12164_v30 = vcombine.low %v16974_v60, %v16974_v60  ;;  %v14996_v15 = vld [vmem:[#allocation5 + $0x380] ss:$8 sps:$4 sm:$0xff]  }
 0x1e1   : > { %v22023_v25 = vsel %vm17005_vm7, 4294967295, %v22022_v25  ;;  %v11829_v47 = vmul.bf16 %v11813_v21, %v16039_v33  ;;  %v22025_v43 = vcombine.low %v16681_v3, %v16681_v3  ;;  %vm12446_vm2 = vcmask 1046528   ;;  %13589 = vmatpush1.bf16.msra.mxu0 %v14996_v15  ;;  %v391_v15 = vld [vmem:[%s15612_s7 + $0x58] sm:$0xff] }
 0x1e2   : > { %22024 = vst [vmem:[#allocation18_spill] sm:$0xff] %v22023_v25  ;;  %vm12447_vm15 = vsmask.f32 6400  ;;  %v12309_v0 = vsel %vm21933_vm8, %v12276_v4, %v12026_v26  ;;  %v17019_v17 = vsub.s32 %v2984_v29, %v2987_v56  ;;  %v12366_v28 = vsel %vm17005_vm7, %v12332_v42, %v16993_v5 }
 0x1e3   : > { %v12218_v22 = vsel %vm22026_vm1, %v14289_v51, %v22025_v43  ;;  %v17025_v6 = vsel %vm21965_vm0, %v12309_v0, %v12026_v26  ;;  %v11980_v48 = vshrl.u32 %v11829_v47, 16  ;;  %v14309_v3 = vcombine.low %v16830_v41, %v16830_v41  ;;  %vm17035_vm6 = vmand %vm12446_vm2, %vm12447_vm15 }
 0x1e4   : > { %v12266_v27 = vsel %vm21934_vm9, %v12218_v22, %v14321_v57  ;;  %v11983_v44 = vshll.u32 %v11829_v47, 16  ;;  %vm2600_vm4 = vweird.f32 %v16571_v38  ;;  %vm7626_vm3 = vcmp.lt.s32.totalorder %v7625_v10, 2 }
 0x1e5   : > { %vm7627_vm5 = vcmp.eq.s32.totalorder %v7625_v10, 0  ;;  %v2990_v2 = vsub.s32 0, %v17019_v17  ;;  %v17032_v29 = vsel %vm21932_vm12, %v12366_v28, %v12164_v30  ;;  %v22027_v42 = vmov 0 }
 0x1e6   : > { %v22028_v42 = vsel %vm17035_vm6, 4294967295, %v22027_v42  ;;  %v12117_v7 = vcombine.high %v16943_v14, %v16943_v14  ;;  %v11982_v41 = vrot.slane %v11980_v48, 6  ;;  %v11985_v58 = vrot.slane %v11983_v44, 7 }
 0x1e7   : > { %22029 = vst [vmem:[#allocation19_spill] sm:$0xff] %v22028_v42  ;;  %v15087_v45 = vpop.eup %15086  ;;  %vm2607_vm10 = vcmp.eq.s32.totalorder %v2602_v40, 2  ;;  %vm7630_vm11 = vcmp.eq.s32.totalorder %v7625_v10, 2  ;;  %v13962_v35 = vmin.u32 %v2990_v2, %v17019_v17  ;;  %v11817_v20 = vpack.c.bf16 %v15241_v46, %v15241_v46 }
 0x1e8   : > { %v15089_v9 = vpop.eup %15088  ;;  %vm2603_vm13 = vcmp.lt.s32.totalorder %v2602_v40, 2  ;;  %vm2604_vm14 = vcmp.eq.s32.totalorder %v2602_v40, 0  ;;  %v2608_v63 = vxor.u32 2147483648, %v15087_v45  ;;  %v11986_v4 = vor.u32 %v11985_v58, %v11982_v41  ;;  %v388_v58 = vld [vmem:[%s15612_s7 + $0x40] sm:$0xff] }
 0x1e9   : > { %v2605_v11 = vxor.u32 2147483648, %v15089_v9  ;;  %v2980_v14 = vadd.s32 %v16934_v1, %v16940_v32  ;;  %v2992_v21 = vclz %v13962_v35  ;;  %v12450_v51 = vsel %vm17035_vm6, %v17032_v29, 0 }
 0x1ea   : > { %v2609_v57 = vsel %vm2607_vm10, %v2608_v63, %v15089_v9  ;;  %v7632_v26 = vsel %vm7630_vm11, %v2608_v63, %v15089_v9  ;;  %v17051_v56 = vrot.slane %v12117_v7, %v15615_v62  ;;  %v12132_v30 = vcombine.low %v16955_v12, %v16955_v12  ;;  %v392_v9 = vld [vmem:[%s15612_s7 + $0x60] sm:$0xff] }
 0x1eb   : > { %v2606_v47 = vsel %vm2604_vm14, %v15087_v45, %v2605_v11  ;;  %v7629_v43 = vsel %vm7627_vm5, %v15087_v45, %v2605_v11  ;;  %v13963_v1 = vadd.s32 4294967294, %v2992_v21  ;;  %v11833_v32 = vmul.bf16 %v11817_v20, %v16229_v8  ;;  %v390_v20 = vld [vmem:[%s15612_s7 + $0x50] sm:$0xff] }
 0x1ec   : > { %v2610_v22 = vsel %vm2603_vm13, %v2606_v47, %v2609_v57  ;;  %v7633_v0 = vsel %vm7626_vm3, %v7629_v43, %v7632_v26  ;;  %v12299_v28 = vsel %vm21933_vm8, %v12266_v27, %v11986_v4  ;;  %v14293_v48 = vcombine.low %v16968_v50, %v16968_v50  ;;  %v393_v57 = vld [vmem:[%s15612_s7 + $0x68] sm:$0xff]  ;;  %v394_v26 = vld [vmem:[%s15612_s7 + $0x70] sm:$0xff] }
 0x1ed   : > { %v2611_v12 = vsel %vm2600_vm4, nan, %v2610_v22  ;;  %v7634_v44 = vsel %vm2600_vm4, nan, %v7633_v0  ;;  %vm13964_vm1 = vcmp.lt.s32.totalorder %v13963_v1, 0  ;;  %v14325_v40 = vcombine.low %v16979_v31, %v16979_v31 }
 0x1ee   : > { %v5852_v10 = vpack.c.bf16 %v2611_v12, %v2611_v12  ;;  %v10844_v2 = vpack.c.bf16 %v7634_v44, %v7634_v44  ;;  %v2995_v29 = vsel %vm13964_vm1, 0, %v13963_v1  ;;  %v17069_v27 = vrot.slane %v12132_v30, %v15615_v62 }
 0x1ef   : > { %v2996_v50 = vsub.s32 32, %v2995_v29  ;;  %v2997_v7 = vshll.u32 %v17019_v17, %v2995_v29  ;;  %v3000_v41 = vsub.s32 4294967266, %v2995_v29  ;;  %v12330_v38 = vsel %vm21965_vm0, %v12299_v28, %v11986_v4  ;;  %v395_v4 = vld [vmem:[%s15612_s7 + $0x78] sm:$0xff] }
 0x1f0   : > { %22030 = vst [vmem:[#allocation20_spill] sm:$0xff] %v17069_v27  ;;  %v10940_v31 = vrot.slane %v10844_v2, 4  ;;  %v12012_v45 = vshrl.u32 %v11833_v32, 16  ;;  %v12015_v35 = vshll.u32 %v11833_v32, 16  ;;  %vm22031_vm2 = vcmask 1040384  }
 0x1f1   : > { %v12230_v46 = vsel %vm22031_vm2, %v14293_v48, %v14309_v3  ;;  %v2998_v63 = vshrl.u32 %v2980_v14, %v2996_v50  ;;  %v3001_v11 = vadd.s32 127, %v3000_v41  ;;  %v3010_v17 = vsub.s32 4, %v16996_v49 }
 0x1f2   : > { %v12274_v21 = vsel %vm21934_vm9, %v12230_v46, %v14325_v40  ;;  %v11039_v30 = vsel %vm21965_vm0, %v5852_v10, %v10940_v31  ;;  %v12162_v47 = vcombine.low %v17069_v27, %v17069_v27  ;;  %v12365_v3 = vsel %vm17005_vm7, %v12330_v38, %v16993_v5  ;;  %v17092_v10 = vld.sshfl [vmem:[%s15588_s15 + $0x10] sm:$0xff pattern:$0x76325410] }
 0x1f3   : > { %v489_v43 = vcombine.low %v388_v58, %v389_v18  ;;  %v11381_v14 = vmul.bf16 %v16039_v33, %v11039_v30  ;;  %v2999_v1 = vor.u32 %v2998_v63, %v2997_v7  ;;  %v3002_v32 = vshll.u32 %v3001_v11, 23  ;;  %22032 = vst [vmem:[#allocation21_spill] sm:$0xff] %v17092_v10 }
 0x1f4   : > { %v490_v22 = vcombine.low %v390_v20, %v391_v15  ;;  %v12014_v0 = vrot.slane %v12012_v45, 6  ;;  %v12017_v28 = vrot.slane %v12015_v35, 7  ;;  %v491_v48 = vcombine.low %v392_v9, %v393_v57 }
 0x1f5   : > { %v492_v12 = vcombine.low %v394_v26, %v395_v4  ;;  %13286 = vmatmul.mubr.bf16.gmra.mrb[8].mxu1 %v11381_v14  ;;  %v3003_v44 = vor.u32 4788187, %v3002_v32  ;;  %v3006_v40 = vcvt.s32.f32 %v2999_v1  ;;  %v17095_v2 = vrot.slane %v489_v43, %v15615_v62 }
 0x1f6   : > { %v17098_v29 = vrot.slane %v490_v22, %v15615_v62  ;;  %vm2926_vm15 = vcmp.lt.s32.totalorder %v16746_v23, 0  ;;  %13295 = vmatprep.mubr.bf16.mxu1 %v12450_v51  ;;  %v17102_v33 = vrot.slane %v491_v48, %v15615_v62  ;;  %v17109_v41 = vrot.slane %v17051_v56, %v15615_v62 }
 0x1f7   : > { %v17105_v50 = vrot.slane %v492_v12, %v15615_v62  ;;  %v3004_v7 = vand.u32 2147483647, %v3003_v44  ;;  %v12384_v38 = vsel %vm21932_vm12, %v12365_v3, %v12162_v47  ;;  %v22034_v18 = vand.u32 2147483647, %v16746_v23 }
 0x1f8   : > { %22033 = vst [vmem:[#allocation22_spill] sm:$0xff] %v17109_v41  ;;  %v521_v58 = vcombine.low %v17095_v2, %v17098_v29  ;;  %v3011_v31 = vsel %vm2926_vm15, %v3010_v17, %v16996_v49  ;;  %v17127_v35 = vcombine.high %v17092_v10, %v17092_v10  ;;  %v12018_v20 = vor.u32 %v12017_v28, %v12014_v0 }
 0x1f9   : > { %vm17116_vm4 = vcmp.le.f32.partialorder %v22034_v18, 0.7853982  ;;  %v523_v45 = vcombine.low %v17102_v33, %v17105_v50  ;;  %v3007_v46 = vmul.f32 %v3006_v40, %v3004_v7  ;;  %v11302_v9 = vshrl.u32 %v17092_v10, 16 }
 0x1fa   : > { %v17130_v15 = vrot.slane %v521_v58, %v15615_v62  ;;  %v12449_v63 = vsel %vm17035_vm6, %v12384_v38, 0  ;;  %v12133_v49 = vcombine.low %v17051_v56, %v17051_v56  ;;  %v11310_v17 = vshrl.u32 %v17127_v35, 16 }
 0x1fb   : > { %v17138_v11 = vrot.slane %v523_v45, %v15615_v62  ;;  %v3008_v57 = vxor.u32 2147483648, %v3007_v46  ;;  %v3013_v26 = vsel %vm17116_vm4, 0, %v3011_v31  ;;  %v12165_v4 = vcombine.low %v17109_v41, %v17109_v41 }
 0x1fc   : > { %v12370_v30 = vsel %vm17005_vm7, %v17025_v6, %v16993_v5  ;;  %v12307_v3 = vsel %vm21933_vm8, %v12274_v21, %v12018_v20  ;;  %v17156_v43 = vpack.i.b16 %v11310_v17, %v11310_v17  ;;  %v17158_v14 = vpack.i.b16 %v11302_v9, %v11302_v9 }
 0x1fd   : > { %v17151_v56 = vcombine.low %v17130_v15, %v17138_v11  ;;  %v3009_v47 = vsel %vm2926_vm15, %v3008_v57, %v3007_v46  ;;  %13296 = vmatmul.mubr.bf16.gmra.mrb[12].mxu1 %v12449_v63  ;;  %v3017_v32 = vadd.s32 3, %v3013_v26  ;;  %v17164_v6 = vrot.slane %v12133_v49, %v15615_v62 }
 0x1fe   : > { %v3012_v1 = vsel %vm17116_vm4, %v16746_v23, %v3009_v47  ;;  %v17168_v0 = vand.u32 3, %v3013_v26  ;;  %v17171_v21 = vsel %vm21932_vm12, %v12370_v30, %v12165_v4  ;;  %v12338_v48 = vsel %vm21965_vm0, %v12307_v3, %v12018_v20 }
 0x1ff   : > { %22037 = vst [vmem:[#allocation23_spill] sm:$0xff] %v17151_v56  ;;  %22038 = vst [vmem:[#allocation24_spill] sm:$0xff] %v17164_v6  ;;  %v659_v22 = vrot.slane %v17151_v56, %v15637_v24  ;;  %15090 = vcosq.f32 %v3012_v1  ;;  %v675_v28 = vrot.slane %v17151_v56, %v15640_v34  ;;  %v655_v44 = vrot.slane %v17151_v56, %v15632_v19 }
 0x200   : > { %15092 = vsinq.f32 %v3012_v1  ;;  %v11612_v40 = vrot.slane %v17156_v43, %v15632_v19  ;;  %v11608_v38 = vrot.slane %v17158_v14, %v15632_v19  ;;  %v12163_v18 = vcombine.low %v17164_v6, %v17164_v6 }
 0x201   : > { %v17177_v12 = vmul.f32 %v15661_v55, %v659_v22  ;;  %v17184_v7 = vmul.f32 %v15661_v55, %v675_v28  ;;  %v12369_v46 = vsel %vm17005_vm7, %v12338_v48, %v16993_v5  ;;  %vm3016_vm3 = vweird.f32 %v16746_v23 }
 0x202   : > { %v3018_v63 = vand.u32 3, %v3017_v32  ;;  %v17206_v57 = vmul.f32 %v15661_v55, %v655_v44  ;;  %vm8038_vm5 = vcmp.lt.s32.totalorder %v17168_v0, 2  ;;  %v17211_v30 = vcombine.low %v11608_v38, %v11612_v40  ;;  %v17220_v44 = vld.sshfl [vmem:[%s15588_s15 + $0x18] sm:$0xff pattern:$0x76325410] }
 0x203   : > { %v21909_v51 = vand.u32 2147483647, %v17177_v12  ;;  %v3447_v31 = vand.u32 2139095040, %v17177_v12  ;;  %v21908_v20 = vand.u32 2147483647, %v17184_v7  ;;  %v3863_v9 = vand.u32 2139095040, %v17184_v7 }
 0x204   : > { %22039 = vst [vmem:[#allocation25_spill] sm:$0xff] %v17211_v30  ;;  %vm8039_vm10 = vcmp.eq.s32.totalorder %v17168_v0, 0  ;;  %v17215_v47 = vsel %vm21932_vm12, %v12369_v46, %v12163_v18  ;;  %vm8042_vm11 = vcmp.eq.s32.totalorder %v17168_v0, 2  ;;  %v3343_v28 = vand.u32 2139095040, %v17206_v57 }
 0x205   : > { %v3448_v49 = vshrl.u32 %v3447_v31, 23  ;;  %v3451_v17 = vand.u32 8388607, %v21909_v51  ;;  %v3864_v26 = vshrl.u32 %v3863_v9, 23  ;;  %v3867_v4 = vand.u32 8388607, %v21908_v20 }
 0x206   : > { %vm3019_vm13 = vcmp.lt.s32.totalorder %v3018_v63, 2  ;;  %vm3020_vm14 = vcmp.eq.s32.totalorder %v3018_v63, 0  ;;  %vm3023_vm1 = vcmp.eq.s32.totalorder %v3018_v63, 2  ;;  %v3344_v31 = vshrl.u32 %v3343_v28, 23 }
 0x207   : > { %v13981_v3 = vadd.s32 4294967169, %v3448_v49  ;;  %v3452_v1 = vor.u32 8388608, %v3451_v17  ;;  %v13997_v32 = vadd.s32 4294967169, %v3864_v26  ;;  %v3868_v22 = vor.u32 8388608, %v3867_v4 }
 0x208   : > { %v22040_v6 = vmov 683565275  }
 0x209   : > { %v3454_v48 = vadd.s32 1, %v13981_v3  ;;  %v15091_v40 = vpop.eup %15090  ;;  %v3870_v18 = vadd.s32 1, %v13997_v32  ;;  %v17225_v49 = vshll.u32 %v3452_v1, 8  ;;  %v17228_v3 = vshll.u32 %v3868_v22, 8 }
 0x20a   : > { %v15093_v46 = vpop.eup %15092  ;;  %v3024_v9 = vxor.u32 2147483648, %v15091_v40  ;;  %v13977_v32 = vadd.s32 4294967169, %v3344_v31 }
 0x20b   : > { %vm3455_vm2 = vcmp.gt.s32.totalorder %v3454_v48, 0  ;;  %v3021_v26 = vxor.u32 2147483648, %v15093_v46  ;;  %vm3871_vm15 = vcmp.gt.s32.totalorder %v3870_v18, 0 }
 0x20c   : > { %v3456_v4 = vsel %vm3455_vm2, %v3454_v48, 0  ;;  %v3025_v58 = vsel %vm3023_vm1, %v3024_v9, %v15093_v46  ;;  %v8044_v20 = vsel %vm8042_vm11, %v3024_v9, %v15093_v46  ;;  %v3872_v45 = vsel %vm3871_vm15, %v3870_v18, 0 }
 0x20d   : > { %v3458_v51 = vand.u32 31, %v3456_v4  ;;  %v3022_v28 = vsel %vm3020_vm14, %v15091_v40, %v3021_v26  ;;  %v8041_v1 = vsel %vm8039_vm10, %v15091_v40, %v3021_v26  ;;  %v3457_v38 = vshrl.u32 %v3456_v4, 5 }
 0x20e   : > { %v3026_v17 = vsel %vm3019_vm13, %v3022_v28, %v3025_v58  ;;  %v8045_v22 = vsel %vm8038_vm5, %v8041_v1, %v8044_v20 }
 0x20f   : > { %v3459_v48 = vsub.s32 32, %v3458_v51  ;;  %v3461_v41 = vshll.u32 %v22040_v6, %v3458_v51  ;;  %v3027_v46 = vsel %vm3016_vm3, nan, %v3026_v17  ;;  %v8046_v31 = vsel %vm3016_vm3, nan, %v8045_v22 }
 0x210   : > { %v3464_v9 = vshll.u32 %v21991_v16, %v3458_v51  ;;  %v3467_v40 = vshll.u32 %v21992_v37, %v3458_v51  ;;  %v5856_v26 = vpack.c.bf16 %v3027_v46, %v3027_v46  ;;  %v10848_v18 = vpack.c.bf16 %v8046_v31, %v8046_v31 }
 0x211   : > { %v3460_v58 = vshrl.u32 %v22040_v6, %v3459_v48  ;;  %v3462_v0 = vshrl.u32 %v21991_v16, %v3459_v48  ;;  %v3465_v20 = vshrl.u32 %v21992_v37, %v3459_v48  ;;  %v3468_v63 = vshrl.u32 %v22004_v39, %v3459_v48 }
 0x212   : > { %v3470_v4 = vshll.u32 %v22004_v39, %v3458_v51  ;;  %v3471_v17 = vshrl.u32 %v22005_v59, %v3459_v48  ;;  %v10944_v23 = vrot.slane %v10848_v18, 4  ;;  %v3473_v1 = vshll.u32 %v22005_v59, %v3458_v51 }
 0x213   : > { %v3463_v28 = vor.u32 %v3462_v0, %v3461_v41  ;;  %v3474_v22 = vshrl.u32 %v21993_v13, %v3459_v48  ;;  %v3466_v46 = vor.u32 %v3465_v20, %v3464_v9  ;;  %v3469_v31 = vor.u32 %v3468_v63, %v3467_v40 }
 0x214   : > { %v3472_v27 = vor.u32 %v3471_v17, %v3470_v4  ;;  %vm3476_vm4 = vcmp.lt.s32.totalorder %v3457_v38, 1  ;;  %v11055_v60 = vsel %vm21965_vm0, %v5856_v26, %v10944_v23  ;;  %vm3477_vm3 = vcmp.lt.s32.totalorder %v3457_v38, 2 }
 0x215   : > { %v3475_v5 = vor.u32 %v3474_v22, %v3473_v1  ;;  %vm3478_vm5 = vcmp.lt.s32.totalorder %v3457_v38, 3  ;;  %v11385_v53 = vmul.bf16 %v16229_v8, %v11055_v60  ;;  %vm3479_vm10 = vcmp.lt.s32.totalorder %v3457_v38, 4 }
 0x216   : > { %v3480_v54 = vsel %vm3476_vm4, %v3460_v58, %v3463_v28  ;;  %v3484_v52 = vsel %vm3476_vm4, %v3463_v28, %v3466_v46  ;;  %v3481_v18 = vsel %vm3479_vm10, %v3469_v31, 2102212464  ;;  %v3485_v41 = vsel %vm3479_vm10, %v3472_v27, 920167782 }
 0x217   : > { %v3488_v0 = vsel %vm3476_vm4, %v3466_v46, %v3469_v31  ;;  %v3489_v51 = vsel %vm3479_vm10, %v3475_v5, 1326507024  ;;  %13512 = vmatmul.mubr.bf16.gmra.mrb[8].mxu0 %v11385_v53  ;;  %v3482_v48 = vsel %vm3478_vm5, %v3466_v46, %v3481_v18  ;;  %v3486_v9 = vsel %vm3478_vm5, %v3469_v31, %v3485_v41 }
 0x218   : > { %v3490_v40 = vsel %vm3478_vm5, %v3472_v27, %v3489_v51  ;;  %v3873_v20 = vshrl.u32 %v3872_v45, 5  ;;  %v22041_v26 = vsel %vm17035_vm6, %v17171_v21, 0  ;;  %v3483_v63 = vsel %vm3477_vm3, %v3480_v54, %v3482_v48 }
 0x219   : > { %13521 = vmatprep.mubr.bf16.mxu0 %v22041_v26  ;;  %v3487_v8 = vsel %vm3477_vm3, %v3484_v52, %v3486_v9  ;;  %v3491_v60 = vsel %vm3477_vm3, %v3488_v0, %v3490_v40  ;;  %v3874_v58 = vand.u32 31, %v3872_v45  ;;  %v3350_v54 = vadd.s32 1, %v13977_v32 }
 0x21a   : > { %v17264_v4 = vmul.u32.u64.low %v17225_v49, %v3491_v60  ;;  %v17265_v5 = vmul.u32.u64.high %v17225_v49, %v3491_v60, %v17264_v4  ;;  %v17268_v53 = vmul.u32.u64.low %v17225_v49, %v3487_v8  ;;  %v17269_v27 = vmul.u32.u64.high %v17225_v49, %v3487_v8, %v17268_v53 }
 0x21b   : > { %v3875_v17 = vsub.s32 32, %v3874_v58  ;;  %v3877_v21 = vshll.u32 %v22040_v6, %v3874_v58  ;;  %v3880_v23 = vshll.u32 %v21991_v16, %v3874_v58  ;;  %v3499_v52 = vmul.u32 %v17225_v49, %v3483_v63 }
 0x21c   : > { %v3883_v38 = vshll.u32 %v21992_v37, %v3874_v58  ;;  %v3886_v45 = vshll.u32 %v22004_v39, %v3874_v58  ;;  %v3889_v28 = vshll.u32 %v22005_v59, %v3874_v58  ;;  %vm3501_vm11 = vc.u32 %v17265_v5, %v17268_v53 }
 0x21d   : > { %v3876_v1 = vshrl.u32 %v22040_v6, %v3875_v17  ;;  %v3878_v22 = vshrl.u32 %v21991_v16, %v3875_v17  ;;  %v3881_v46 = vshrl.u32 %v21992_v37, %v3875_v17  ;;  %v3884_v31 = vshrl.u32 %v22004_v39, %v3875_v17 }
 0x21e   : > { %v3502_v32 = vadd.s32 1, %v17269_v27  ;;  %v3887_v49 = vshrl.u32 %v22005_v59, %v3875_v17  ;;  %vm3892_vm13 = vcmp.lt.s32.totalorder %v3873_v20, 1  ;;  %v3890_v51 = vshrl.u32 %v21993_v13, %v3875_v17 }
 0x21f   : > { %v3879_v18 = vor.u32 %v3878_v22, %v3877_v21  ;;  %v3882_v41 = vor.u32 %v3881_v46, %v3880_v23  ;;  %v3885_v0 = vor.u32 %v3884_v31, %v3883_v38  ;;  %v22042_v48 = vsel %vm17035_vm6, %v17215_v47, 0 }
 0x220   : > { %13522 = vmatmul.mubr.bf16.gmra.mrb[12].mxu0 %v22042_v48  ;;  %v3503_v9 = vsel %vm3501_vm11, %v3502_v32, %v17269_v27  ;;  %v3888_v40 = vor.u32 %v3887_v49, %v3886_v45  ;;  %vm3893_vm14 = vcmp.lt.s32.totalorder %v3873_v20, 2  ;;  %vm3894_vm1 = vcmp.lt.s32.totalorder %v3873_v20, 3 }
 0x221   : > { %v3504_v26 = vadd.s32 %v3503_v9, %v3499_v52  ;;  %v3891_v63 = vor.u32 %v3890_v51, %v3889_v28  ;;  %vm3895_vm2 = vcmp.lt.s32.totalorder %v3873_v20, 4  ;;  %v3896_v8 = vsel %vm3892_vm13, %v3876_v1, %v3879_v18 }
 0x222   : > { %v3897_v60 = vsel %vm3895_vm2, %v3885_v0, 2102212464  ;;  %v3900_v58 = vsel %vm3892_vm13, %v3879_v18, %v3882_v41  ;;  %v3901_v4 = vsel %vm3895_vm2, %v3888_v40, 920167782  ;;  %v3904_v17 = vsel %vm3892_vm13, %v3882_v41, %v3885_v0 }
 0x223   : > { %v3505_v21 = vadd.s32 536870912, %v3504_v26  ;;  %v3898_v23 = vsel %vm3894_vm1, %v3882_v41, %v3897_v60  ;;  %v3902_v47 = vsel %vm3894_vm1, %v3885_v0, %v3901_v4  ;;  %v3905_v38 = vsel %vm3895_vm2, %v3891_v63, 1326507024  ;;  %v15001_v60 = vld [vmem:[#allocation5 + $0x194] ss:$8 sps:$4 sm:$0xff]  }
 0x224   : > { %v3899_v27 = vsel %vm3893_vm14, %v3896_v8, %v3898_v23  ;;  %v3903_v45 = vsel %vm3893_vm14, %v3900_v58, %v3902_v47  ;;  %v3906_v22 = vsel %vm3894_vm1, %v3888_v40, %v3905_v38  ;;  %vm3351_vm15 = vcmp.gt.s32.totalorder %v3350_v54, 0  ;;  %v14999_v40 = vld [vmem:[#allocation5 + $0x190] ss:$8 sps:$4 sm:$0xff]   ;;  %v15004_v4 = vld [vmem:[#allocation5 + $0x394] ss:$8 sps:$4 sm:$0xff]   ;;  %13364 = vmatprep.subr.bf16.mxu1 %v15001_v60 }
 0x225   : > { %v3506_v52 = vshrl.u32 %v3505_v21, 30  ;;  %v3907_v28 = vsel %vm3893_vm14, %v3904_v17, %v3906_v22  ;;  %v17299_v1 = vmul.u32.u64.low %v17228_v3, %v3903_v45  ;;  %v17300_v46 = vmul.u32.u64.high %v17228_v3, %v3903_v45, %v17299_v1  ;;  %v15002_v58 = vld [vmem:[#allocation5 + $0x390] ss:$8 sps:$4 sm:$0xff]   ;;  %13590 = vmatprep.subr.bf16.mxu0 %v15004_v4  ;;  %13365 = vmatpush1.bf16.msra.mxu1 %v14999_v40 }
 0x226   : > { %v17303_v31 = vmul.u32.u64.low %v17228_v3, %v3907_v28  ;;  %v17304_v32 = vmul.u32.u64.high %v17228_v3, %v3907_v28, %v17303_v31  ;;  %v17308_v41 = vcombine.high %v17220_v44, %v17220_v44  ;;  %v3352_v0 = vsel %vm3351_vm15, %v3350_v54, 0  ;;  %13591 = vmatpush1.bf16.msra.mxu0 %v15002_v58 }
 0x227   : > { %v3507_v49 = vshll.u32 %v3506_v52, 30  ;;  %v3530_v18 = vsub.s32 4, %v3506_v52  ;;  %v3915_v51 = vmul.u32 %v17228_v3, %v3899_v27  ;;  %v22044_v20 = vand.u32 2147483647, %v17206_v57 }
 0x228   : > { %22043 = vst [vmem:[#allocation26_spill] sm:$0xff] %v17308_v41  ;;  %v671_v9 = vrot.slane %v17151_v56, %v15788_v61  ;;  %v3918_v8 = vadd.s32 1, %v17300_v46  ;;  %vm3446_vm4 = vcmp.lt.s32.totalorder %v17177_v12, 0  ;;  %vm3917_vm3 = vc.u32 %v17304_v32, %v17299_v1 }
 0x229   : > { %v3347_v48 = vand.u32 8388607, %v22044_v20  ;;  %v17315_v63 = vsub.s32 %v3504_v26, %v3507_v49  ;;  %v3354_v54 = vand.u32 31, %v3352_v0  ;;  %v3531_v17 = vsel %vm3446_vm4, %v3530_v18, %v3506_v52 }
 0x22a   : > { %v3919_v21 = vsel %vm3917_vm3, %v3918_v8, %v17300_v46  ;;  %v11342_v26 = vshrl.u32 %v17308_v41, 16  ;;  %v17326_v38 = vmul.f32 %v15661_v55, %v671_v9  ;;  %v22045_v27 = vand.u32 2147483647, %v17177_v12 }
 0x22b   : > { %v3510_v3 = vsub.s32 0, %v17315_v63  ;;  %v3920_v23 = vadd.s32 %v3919_v21, %v3915_v51  ;;  %v3348_v47 = vor.u32 8388608, %v3347_v48  ;;  %v3355_v46 = vsub.s32 32, %v3354_v54 }
 0x22c   : > { %vm17330_vm5 = vcmp.le.f32.partialorder %v22045_v27, 0.7853982  ;;  %v3500_v31 = vadd.s32 %v17268_v53, %v17265_v5  ;;  %v17339_v18 = vpack.i.b16 %v11342_v26, %v11342_v26  ;;  %v17341_v51 = vshrl.u32 %v3352_v0, 5 }
 0x22d   : > { %v13982_v22 = vmin.u32 %v3510_v3, %v17315_v63  ;;  %v3533_v52 = vsel %vm17330_vm5, 0, %v3531_v17  ;;  %v3921_v28 = vadd.s32 536870912, %v3920_v23  ;;  %v17343_v48 = vshll.u32 %v3348_v47, 8 }
 0x22e   : > { %v3537_v60 = vadd.s32 3, %v3533_v52  ;;  %v17348_v58 = vadd.s32 %v17299_v1, %v17304_v32  ;;  %v3357_v4 = vshll.u32 %v22040_v6, %v3354_v54  ;;  %v3358_v53 = vshrl.u32 %v21991_v16, %v3355_v46 }
 0x22f   : > { %v3512_v49 = vclz %v13982_v22  ;;  %v3922_v20 = vshrl.u32 %v3921_v28, 30  ;;  %v3360_v0 = vshll.u32 %v21991_v16, %v3354_v54  ;;  %v3361_v3 = vshrl.u32 %v21992_v37, %v3355_v46 }
 0x230   : > { %v3363_v17 = vshll.u32 %v21992_v37, %v3354_v54  ;;  %v3364_v21 = vshrl.u32 %v22004_v39, %v3355_v46  ;;  %v3366_v26 = vshll.u32 %v22004_v39, %v3354_v54  ;;  %v3367_v1 = vshrl.u32 %v22005_v59, %v3355_v46 }
 0x231   : > { %v13983_v8 = vadd.s32 4294967294, %v3512_v49  ;;  %v3923_v5 = vshll.u32 %v3922_v20, 30  ;;  %v3369_v32 = vshll.u32 %v22005_v59, %v3354_v54  ;;  %vm3862_vm11 = vcmp.lt.s32.totalorder %v17184_v7, 0 }
 0x232   : > { %v3370_v9 = vshrl.u32 %v21993_v13, %v3355_v46  ;;  %v17364_v40 = vand.u32 3, %v3537_v60  ;;  %v17366_v56 = vand.u32 3, %v3533_v52  ;;  %v3359_v42 = vor.u32 %v3358_v53, %v3357_v4 }
 0x233   : > { %vm13984_vm10 = vcmp.lt.s32.totalorder %v13983_v8, 0  ;;  %v17357_v27 = vsub.s32 %v3920_v23, %v3923_v5  ;;  %v3356_v23 = vshrl.u32 %v22040_v6, %v3355_v46  ;;  %v3362_v54 = vor.u32 %v3361_v3, %v3360_v0 }
 0x234   : > { %v3515_v47 = vsel %vm13984_vm10, 0, %v13983_v8  ;;  %vm3372_vm13 = vcmp.lt.s32.totalorder %v17341_v51, 1  ;;  %v3371_v60 = vor.u32 %v3370_v9, %v3369_v32  ;;  %vm3375_vm14 = vcmp.lt.s32.totalorder %v17341_v51, 4 }
 0x235   : > { %v3516_v22 = vsub.s32 32, %v3515_v47  ;;  %v3517_v28 = vshll.u32 %v17315_v63, %v3515_v47  ;;  %v3520_v49 = vsub.s32 4294967266, %v3515_v47  ;;  %v3926_v8 = vsub.s32 0, %v17357_v27 }
 0x236   : > { %v3365_v63 = vor.u32 %v3364_v21, %v3363_v17  ;;  %v3368_v47 = vor.u32 %v3367_v1, %v3366_v26  ;;  %v22048_v52 = vand.u32 2147483647, %v17184_v7  ;;  %vm3374_vm2 = vcmp.lt.s32.totalorder %v17341_v51, 3 }
 0x237   : > { %v3518_v5 = vshrl.u32 %v3500_v31, %v3516_v22  ;;  %v3521_v36 = vadd.s32 127, %v3520_v49  ;;  %v13998_v25 = vmin.u32 %v3926_v8, %v17357_v27  ;;  %v3946_v31 = vsub.s32 4, %v3922_v20 }
 0x238   : > { %vm17375_vm1 = vcmp.le.f32.partialorder %v22048_v52, 0.7853982  ;;  %v3377_v4 = vsel %vm3375_vm14, %v3365_v63, 2102212464  ;;  %vm3373_vm15 = vcmp.lt.s32.totalorder %v17341_v51, 2  ;;  %v3376_v3 = vsel %vm3372_vm13, %v3356_v23, %v3359_v42 }
 0x239   : > { %v3519_v30 = vor.u32 %v3518_v5, %v3517_v28  ;;  %v3522_v10 = vshll.u32 %v3521_v36, 23  ;;  %v3928_v46 = vclz %v13998_v25  ;;  %v3380_v36 = vsel %vm3372_vm13, %v3359_v42, %v3362_v54 }
 0x23a   : > { %v3381_v25 = vsel %vm3375_vm14, %v3368_v47, 920167782  ;;  %v3384_v17 = vsel %vm3372_vm13, %v3362_v54, %v3365_v63  ;;  %v3385_v26 = vsel %vm3375_vm14, %v3371_v60, 1326507024  ;;  %v3947_v42 = vsel %vm3862_vm11, %v3946_v31, %v3922_v20 }
 0x23b   : > { %v3523_v53 = vor.u32 4788187, %v3522_v10  ;;  %v3526_v0 = vcvt.s32.f32 %v3519_v30  ;;  %v13999_v9 = vadd.s32 4294967294, %v3928_v46  ;;  %v3378_v10 = vsel %vm3374_vm2, %v3362_v54, %v3377_v4 }
 0x23c   : > { %v3382_v30 = vsel %vm3374_vm2, %v3365_v63, %v3381_v25  ;;  %v3386_v32 = vsel %vm3374_vm2, %v3368_v47, %v3385_v26  ;;  %v22051_v8 = vand.u32 2139095040, %v17326_v38  ;;  %v3379_v20 = vsel %vm3373_vm15, %v3376_v3, %v3378_v10 }
 0x23d   : > { %v3524_v21 = vand.u32 2147483647, %v3523_v53  ;;  %vm14000_vm3 = vcmp.lt.s32.totalorder %v13999_v9, 0  ;;  %v3383_v1 = vsel %vm3373_vm15, %v3380_v36, %v3382_v30  ;;  %v3387_v49 = vsel %vm3373_vm15, %v3384_v17, %v3386_v32 }
 0x23e   : > { %v3931_v28 = vsel %vm14000_vm3, 0, %v13999_v9  ;;  %v3760_v23 = vshrl.u32 %v22051_v8, 23  ;;  %v17411_v52 = vmul.u32.u64.low %v17343_v48, %v3387_v49  ;;  %v17412_v46 = vmul.u32.u64.high %v17343_v48, %v3387_v49, %v17411_v52 }
 0x23f   : > { %v3527_v22 = vmul.f32 %v3526_v0, %v3524_v21  ;;  %v3932_v5 = vsub.s32 32, %v3931_v28  ;;  %v3933_v54 = vshll.u32 %v17357_v27, %v3931_v28  ;;  %v3936_v63 = vsub.s32 4294967266, %v3931_v28  ;;  %v15005_v52 = vld [vmem:[#allocation5 + $0x1a0] ss:$8 sps:$4 sm:$0xff]  }
 0x240   : > { %v13993_v47 = vadd.s32 4294967169, %v3760_v23  ;;  %v17416_v53 = vmul.u32.u64.low %v17343_v48, %v3383_v1  ;;  %v17417_v0 = vmul.u32.u64.high %v17343_v48, %v3383_v1, %v17416_v53  ;;  %v3949_v51 = vsel %vm17375_vm1, 0, %v3947_v42 }
 0x241   : > { %v3528_v60 = vxor.u32 2147483648, %v3527_v22  ;;  %v3934_v31 = vshrl.u32 %v17348_v58, %v3932_v5  ;;  %v3937_v4 = vadd.s32 127, %v3936_v63  ;;  %v3395_v36 = vmul.u32 %v17343_v48, %v3379_v20  ;;  %v15007_v63 = vld [vmem:[#allocation5 + $0x1a4] ss:$8 sps:$4 sm:$0xff]  }
 0x242   : > { %v3766_v9 = vadd.s32 1, %v13993_v47  ;;  %v22052_v17 = vand.u32 2147483647, %v17326_v38  ;;  %vm3397_vm10 = vc.u32 %v17412_v46, %v17416_v53  ;;  %v11334_v10 = vshrl.u32 %v17220_v44, 16  ;;  %13366 = vmatprep.subr.bf16.mxu1 %v15007_v63 }
 0x243   : > { %v3529_v27 = vsel %vm3446_vm4, %v3528_v60, %v3527_v22  ;;  %v3935_v25 = vor.u32 %v3934_v31, %v3933_v54  ;;  %v3938_v58 = vshll.u32 %v3937_v4, 23  ;;  %v3398_v48 = vadd.s32 1, %v17417_v0  ;;  %13367 = vmatpush1.bf16.msra.mxu1 %v15005_v52 }
 0x244   : > { %v3532_v3 = vsel %vm17330_vm5, %v17177_v12, %v3529_v27  ;;  %v3763_v21 = vand.u32 8388607, %v22052_v17  ;;  %vm3767_vm13 = vcmp.gt.s32.totalorder %v3766_v9, 0  ;;  %v17434_v45 = vrot.slane %v17156_v43, %v15637_v24 }
 0x245   : > { %15094 = vcosq.f32 %v3532_v3  ;;  %v3939_v30 = vor.u32 4788187, %v3938_v58  ;;  %v3942_v26 = vcvt.s32.f32 %v3935_v25  ;;  %v17438_v42 = vrot.slane %v17339_v18, %v15637_v24 }
 0x246   : > { %15096 = vsinq.f32 %v3532_v3  ;;  %v11628_v1 = vrot.slane %v17339_v18, %v15632_v19  ;;  %v3768_v32 = vsel %vm3767_vm13, %v3766_v9, 0  ;;  %v3953_v28 = vadd.s32 3, %v3949_v51 }
 0x247   : > { %v3940_v22 = vand.u32 2147483647, %v3939_v30  ;;  %v3399_v49 = vsel %vm3397_vm10, %v3398_v48, %v17417_v0  ;;  %v3764_v8 = vor.u32 8388608, %v3763_v21  ;;  %vm8553_vm4 = vcmp.lt.s32.totalorder %v17366_v56, 2 }
 0x248   : > { %vm8554_vm5 = vcmp.eq.s32.totalorder %v17366_v56, 0  ;;  %v3400_v23 = vadd.s32 %v3399_v49, %v3395_v36  ;;  %v3770_v43 = vand.u32 31, %v3768_v32  ;;  %vm3536_vm14 = vweird.f32 %v17177_v12 }
 0x249   : > { %vm3539_vm2 = vcmp.lt.s32.totalorder %v17364_v40, 2  ;;  %vm8557_vm15 = vcmp.eq.s32.totalorder %v17366_v56, 2  ;;  %v3943_v5 = vmul.f32 %v3942_v26, %v3940_v22  ;;  %v17448_v54 = vpack.i.b16 %v11334_v10, %v11334_v10 }
 0x24a   : > { %vm3540_vm3 = vcmp.eq.s32.totalorder %v17364_v40, 0  ;;  %vm3543_vm10 = vcmp.eq.s32.totalorder %v17364_v40, 2  ;;  %v17452_v20 = vand.u32 3, %v3949_v51  ;;  %v3401_v60 = vadd.s32 536870912, %v3400_v23 }
 0x24b   : > { %v3944_v47 = vxor.u32 2147483648, %v3943_v5  ;;  %v17454_v31 = vand.u32 3, %v3953_v28  ;;  %v17457_v4 = vadd.s32 %v17416_v53, %v17412_v46  ;;  %v17459_v0 = vshll.u32 %v3764_v8, 8 }
 0x24c   : > { %v17461_v27 = vshrl.u32 %v3401_v60, 30  ;;  %v17463_v36 = vshrl.u32 %v3768_v32, 5  ;;  %v3771_v9 = vsub.s32 32, %v3770_v43  ;;  %v524_v51 = vcombine.high %v17102_v33, %v17105_v50 }
 0x24d   : > { %v3945_v3 = vsel %vm3862_vm11, %v3944_v47, %v3943_v5  ;;  %v3773_v25 = vshll.u32 %v22040_v6, %v3770_v43  ;;  %v11624_v46 = vrot.slane %v17448_v54, %v15632_v19  ;;  %v22053_v53 = vcombine.high %v17095_v2, %v17098_v29 }
 0x24e   : > { %v3948_v21 = vsel %vm17375_vm1, %v17184_v7, %v3945_v3  ;;  %v3403_v10 = vshll.u32 %v17461_v27, 30  ;;  %v3776_v30 = vshll.u32 %v21991_v16, %v3770_v43  ;;  %v3779_v26 = vshll.u32 %v21992_v37, %v3770_v43 }
 0x24f   : > { %v17476_v58 = vrot.slane %v22053_v53, %v15615_v62  ;;  %v15095_v17 = vpop.eup %15094  ;;  %15098 = vcosq.f32 %v3948_v21  ;;  %v3782_v22 = vshll.u32 %v22004_v39, %v3770_v43  ;;  %v3785_v2 = vshll.u32 %v22005_v59, %v3770_v43 }
 0x250   : > { %v15097_v48 = vpop.eup %15096  ;;  %v3544_v32 = vxor.u32 2147483648, %v15095_v17  ;;  %15100 = vsinq.f32 %v3948_v21  ;;  %v17486_v28 = vsub.s32 %v3400_v23, %v3403_v10  ;;  %v3783_v41 = vshrl.u32 %v22005_v59, %v3771_v9 }
 0x251   : > { %v3541_v29 = vxor.u32 2147483648, %v15097_v48  ;;  %vm3959_vm11 = vcmp.eq.s32.totalorder %v17454_v31, 2  ;;  %vm8969_vm1 = vcmp.eq.s32.totalorder %v17452_v20, 2  ;;  %v3774_v5 = vshrl.u32 %v21991_v16, %v3771_v9 }
 0x252   : > { %v3545_v49 = vsel %vm3543_vm10, %v3544_v32, %v15097_v48  ;;  %v8559_v8 = vsel %vm8557_vm15, %v3544_v32, %v15097_v48  ;;  %v3777_v43 = vshrl.u32 %v21992_v37, %v3771_v9  ;;  %vm3956_vm13 = vcmp.eq.s32.totalorder %v17454_v31, 0 }
 0x253   : > { %v3542_v23 = vsel %vm3540_vm3, %v15095_v17, %v3541_v29  ;;  %v8556_v63 = vsel %vm8554_vm5, %v15095_v17, %v3541_v29  ;;  %vm8966_vm10 = vcmp.eq.s32.totalorder %v17452_v20, 0  ;;  %v3406_v60 = vsub.s32 0, %v17486_v28 }
 0x254   : > { %v3780_v52 = vshrl.u32 %v22004_v39, %v3771_v9  ;;  %v3546_v47 = vsel %vm3539_vm2, %v3542_v23, %v3545_v49  ;;  %v8560_v3 = vsel %vm8553_vm4, %v8556_v63, %v8559_v8  ;;  %vm3955_vm15 = vcmp.lt.s32.totalorder %v17454_v31, 2 }
 0x255   : > { %vm8965_vm3 = vcmp.lt.s32.totalorder %v17452_v20, 2  ;;  %v3772_v53 = vshrl.u32 %v22040_v6, %v3771_v9  ;;  %v3786_v17 = vshrl.u32 %v21993_v13, %v3771_v9  ;;  %v3547_v21 = vsel %vm3536_vm14, nan, %v3546_v47 }
 0x256   : > { %v8561_v10 = vsel %vm3536_vm14, nan, %v8560_v3  ;;  %vm3952_vm5 = vweird.f32 %v17184_v7  ;;  %v13978_v40 = vmin.u32 %v3406_v60, %v17486_v28  ;;  %v3784_v56 = vor.u32 %v3783_v41, %v3782_v22 }
 0x257   : > { %v5861_v48 = vpack.c.bf16 %v3547_v21, %v3547_v21  ;;  %v10853_v32 = vpack.c.bf16 %v8561_v10, %v8561_v10  ;;  %v3775_v29 = vor.u32 %v3774_v5, %v3773_v25  ;;  %v3778_v49 = vor.u32 %v3777_v43, %v3776_v30 }
 0x258   : > { %v3408_v8 = vclz %v13978_v40  ;;  %v3426_v23 = vsub.s32 4, %v17461_v27  ;;  %v3781_v63 = vor.u32 %v3780_v52, %v3779_v26  ;;  %vm3788_vm4 = vcmp.lt.s32.totalorder %v17463_v36, 1 }
 0x259   : > { %v10949_v9 = vrot.slane %v10853_v32, 4  ;;  %v3787_v47 = vor.u32 %v3786_v17, %v3785_v2  ;;  %vm3790_vm2 = vcmp.lt.s32.totalorder %v17463_v36, 3  ;;  %vm3791_vm14 = vcmp.lt.s32.totalorder %v17463_v36, 4  ;;  %v15099_v30 = vpop.eup %15098 }
 0x25a   : > { %v13979_v12 = vadd.s32 4294967294, %v3408_v8  ;;  %vm3789_vm12 = vcmp.lt.s32.totalorder %v17463_v36, 2  ;;  %v3793_v22 = vsel %vm3791_vm14, %v3781_v63, 2102212464  ;;  %v3797_v25 = vsel %vm3791_vm14, %v3784_v56, 920167782  ;;  %v15101_v43 = vpop.eup %15100 }
 0x25b   : > { %v11075_v26 = vsel %vm21965_vm0, %v5861_v48, %v10949_v9  ;;  %v3792_v41 = vsel %vm3788_vm4, %v3772_v53, %v3775_v29  ;;  %v3794_v2 = vsel %vm3790_vm2, %v3778_v49, %v3793_v22  ;;  %v3796_v5 = vsel %vm3788_vm4, %v3775_v29, %v3778_v49  ;;  %v15010_v8 = vld [vmem:[#allocation5 + $0x3a4] ss:$8 sps:$4 sm:$0xff]  }
 0x25c   : > { %v11390_v60 = vmul.bf16 %v17434_v45, %v11075_v26  ;;  %v3960_v52 = vxor.u32 2147483648, %v15099_v30  ;;  %vm13980_vm8 = vcmp.lt.s32.totalorder %v13979_v12, 0  ;;  %v3798_v3 = vsel %vm3790_vm2, %v3781_v63, %v3797_v25  ;;  %13592 = vmatprep.subr.bf16.mxu0 %v15010_v8 }
 0x25d   : > { %v3957_v17 = vxor.u32 2147483648, %v15101_v43  ;;  %v3411_v21 = vsel %vm13980_vm8, 0, %v13979_v12  ;;  %v3800_v10 = vsel %vm3788_vm4, %v3778_v49, %v3781_v63  ;;  %v3801_v53 = vsel %vm3791_vm14, %v3787_v47, 1326507024  ;;  %v15008_v12 = vld [vmem:[#allocation5 + $0x3a0] ss:$8 sps:$4 sm:$0xff]  }
 0x25e   : > { %13305 = vmatprep.mubr.bf16.mxu1 %v11390_v60  ;;  %v3961_v40 = vsel %vm3959_vm11, %v3960_v52, %v15101_v43  ;;  %v8971_v48 = vsel %vm8969_vm1, %v3960_v52, %v15101_v43  ;;  %v3412_v32 = vsub.s32 32, %v3411_v21  ;;  %v3413_v29 = vshll.u32 %v17486_v28, %v3411_v21  ;;  %13593 = vmatpush1.bf16.msra.mxu0 %v15008_v12 }
 0x25f   : > { %v3958_v9 = vsel %vm3956_vm13, %v15099_v30, %v3957_v17  ;;  %v8968_v49 = vsel %vm8966_vm10, %v15099_v30, %v3957_v17  ;;  %v3416_v63 = vsub.s32 4294967266, %v3411_v21  ;;  %v3802_v47 = vsel %vm3790_vm2, %v3784_v56, %v3801_v53 }
 0x260   : > { %v3962_v22 = vsel %vm3955_vm15, %v3958_v9, %v3961_v40  ;;  %v8972_v25 = vsel %vm8965_vm3, %v8968_v49, %v8971_v48  ;;  %v3414_v28 = vshrl.u32 %v17457_v4, %v3412_v32  ;;  %v3803_v26 = vsel %vm3789_vm12, %v3800_v10, %v3802_v47 }
 0x261   : > { %v3963_v30 = vsel %vm3952_vm5, nan, %v3962_v22  ;;  %v8973_v43 = vsel %vm3952_vm5, nan, %v8972_v25  ;;  %v3417_v56 = vadd.s32 127, %v3416_v63  ;;  %v3799_v31 = vsel %vm3789_vm12, %v3796_v5, %v3798_v3 }
 0x262   : > { %v5865_v60 = vpack.c.bf16 %v3963_v30, %v3963_v30  ;;  %v10857_v20 = vpack.c.bf16 %v8973_v43, %v8973_v43  ;;  %v3415_v52 = vor.u32 %v3414_v28, %v3413_v29  ;;  %v17572_v4 = vcombine.low %v11624_v46, %v11628_v1 }
 0x263   : > { %v3418_v17 = vshll.u32 %v3417_v56, 23  ;;  %v17575_v7 = vmul.u32.u64.low %v17459_v0, %v3803_v26  ;;  %v17576_v21 = vmul.u32.u64.high %v17459_v0, %v3803_v26, %v17575_v7  ;;  %v552_v5 = vrot.slane %v524_v51, %v15615_v62 }
 0x264   : > { %v10953_v3 = vrot.slane %v10857_v20, 4  ;;  %v3795_v10 = vsel %vm3789_vm12, %v3792_v41, %v3794_v2  ;;  %v17585_v18 = vmul.u32.u64.low %v17459_v0, %v3799_v31  ;;  %v17586_v53 = vmul.u32.u64.high %v17459_v0, %v3799_v31, %v17585_v18 }
 0x265   : > { %vm3342_vm8 = vcmp.lt.s32.totalorder %v17206_v57, 0  ;;  %v3419_v1 = vor.u32 4788187, %v3418_v17  ;;  %v3422_v46 = vcvt.s32.f32 %v3415_v52  ;;  %v17591_v40 = vcombine.low %v17476_v58, %v552_v5 }
 0x266   : > { %v11091_v48 = vsel %vm21965_vm0, %v5865_v60, %v10953_v3  ;;  %v3427_v33 = vsel %vm3342_vm8, %v3426_v23, %v17461_v27  ;;  %v3811_v51 = vmul.u32 %v17459_v0, %v3795_v10  ;;  %vm3813_vm12 = vc.u32 %v17576_v21, %v17585_v18 }
 0x267   : > { %22054 = vst [vmem:[#allocation27_spill] sm:$0xff] %v17591_v40  ;;  %v11394_v50 = vmul.bf16 %v17438_v42, %v11091_v48  ;;  %v3420_v36 = vand.u32 2147483647, %v3419_v1  ;;  %v3814_v41 = vadd.s32 1, %v17586_v53  ;;  %v691_v58 = vrot.slane %v17591_v40, %v15637_v24 }
 0x268   : > { %v707_v2 = vrot.slane %v17591_v40, %v15640_v34  ;;  %v22055_v32 = vand.u32 2147483647, %v17206_v57  ;;  %v17630_v17 = vrot.slane %v17158_v14, %v15637_v24  ;;  %vm3758_vm1 = vcmp.lt.s32.totalorder %v17326_v38, 0 }
 0x269   : > { %13531 = vmatprep.mubr.bf16.mxu0 %v11394_v50  ;;  %v3423_v27 = vmul.f32 %v3422_v46, %v3420_v36  ;;  %v3815_v29 = vsel %vm3813_vm12, %v3814_v41, %v17586_v53  ;;  %v17612_v0 = vmul.f32 %v15661_v55, %v691_v58  ;;  %v22056_v53 = vand.u32 2147483647, %v17326_v38 }
 0x26a   : > { %vm3341_vm11 = vcmp.le.f32.partialorder %v22055_v32, 0.7853982  ;;  %v3816_v9 = vadd.s32 %v3815_v29, %v3811_v51  ;;  %v17615_v49 = vmul.f32 %v15661_v55, %v707_v2  ;;  %v687_v14 = vrot.slane %v17591_v40, %v15632_v19 }
 0x26b   : > { %v3429_v23 = vsel %vm3341_vm11, 0, %v3427_v33  ;;  %v3424_v8 = vxor.u32 2147483648, %v3423_v27  ;;  %v4276_v63 = vand.u32 2147483647, %v17612_v0  ;;  %v4279_v47 = vand.u32 2139095040, %v17612_v0 }
 0x26c   : > { %v3433_v22 = vadd.s32 3, %v3429_v23  ;;  %v3817_v25 = vadd.s32 536870912, %v3816_v9  ;;  %v17622_v30 = vand.u32 3, %v3429_v23  ;;  %v4695_v56 = vand.u32 2139095040, %v17615_v49 }
 0x26d   : > { %v3425_v12 = vsel %vm3342_vm8, %v3424_v8, %v3423_v27  ;;  %v4280_v26 = vshrl.u32 %v4279_v47, 23  ;;  %v4283_v60 = vand.u32 8388607, %v4276_v63  ;;  %v4692_v20 = vand.u32 2147483647, %v17615_v49 }
 0x26e   : > { %v3428_v28 = vsel %vm3341_vm11, %v17206_v57, %v3425_v12  ;;  %v3818_v43 = vshrl.u32 %v3817_v25, 30  ;;  %v3434_v52 = vand.u32 3, %v3433_v22  ;;  %v4696_v10 = vshrl.u32 %v4695_v56, 23 }
 0x26f   : > { %15102 = vcosq.f32 %v3428_v28  ;;  %v14013_v31 = vadd.s32 4294967169, %v4280_v26  ;;  %vm8450_vm13 = vcmp.lt.s32.totalorder %v17622_v30, 2  ;;  %vm17636_vm10 = vcmp.le.f32.partialorder %v22056_v53, 0.7853982 }
 0x270   : > { %15104 = vsinq.f32 %v3428_v28  ;;  %v3819_v7 = vshll.u32 %v3818_v43, 30  ;;  %v3842_v5 = vsub.s32 4, %v3818_v43  ;;  %vm3432_vm15 = vweird.f32 %v17206_v57 }
 0x271   : > { %v4286_v3 = vadd.s32 1, %v14013_v31  ;;  %vm8451_vm3 = vcmp.eq.s32.totalorder %v17622_v30, 0  ;;  %v4284_v48 = vor.u32 8388608, %v4283_v60  ;;  %v17648_v33 = vand.u32 8388607, %v4692_v20 }
 0x272   : > { %v17640_v46 = vsub.s32 %v3816_v9, %v3819_v7  ;;  %vm3435_vm4 = vcmp.lt.s32.totalorder %v3434_v52, 2  ;;  %vm3436_vm2 = vcmp.eq.s32.totalorder %v3434_v52, 0  ;;  %vm3439_vm14 = vcmp.eq.s32.totalorder %v3434_v52, 2 }
 0x273   : > { %vm4287_vm5 = vcmp.gt.s32.totalorder %v4286_v3, 0  ;;  %v3843_v51 = vsel %vm3758_vm1, %v3842_v5, %v3818_v43  ;;  %v14029_v58 = vadd.s32 4294967169, %v4696_v10  ;;  %vm8454_vm8 = vcmp.eq.s32.totalorder %v17622_v30, 2 }
 0x274   : > { %v3822_v50 = vsub.s32 0, %v17640_v46  ;;  %v4288_v36 = vsel %vm4287_vm5, %v4286_v3, 0  ;;  %v3812_v2 = vadd.s32 %v17585_v18, %v17576_v21  ;;  %v17658_v27 = vmul.f32 %v15661_v55, %v687_v14 }
 0x275   : > { %v4290_v41 = vand.u32 31, %v4288_v36  ;;  %v17661_v8 = vshll.u32 %v4284_v48, 8  ;;  %v4700_v9 = vor.u32 8388608, %v17648_v33  ;;  %v17666_v22 = vsel %vm17636_vm10, 0, %v3843_v51 }
 0x276   : > { %v13994_v32 = vmin.u32 %v3822_v50, %v17640_v46  ;;  %v17668_v25 = vshrl.u32 %v4288_v36, 5  ;;  %v4702_v56 = vadd.s32 1, %v14029_v58 }
 0x277   : > { %v4291_v23 = vsub.s32 32, %v4290_v41  ;;  %v4293_v29 = vshll.u32 %v22040_v6, %v4290_v41  ;;  %v4296_v21 = vshll.u32 %v21991_v16, %v4290_v41  ;;  %v4299_v5 = vshll.u32 %v21992_v37, %v4290_v41 }
 0x278   : > { %v3824_v12 = vclz %v13994_v32  ;;  %vm4308_vm11 = vcmp.lt.s32.totalorder %v17668_v25, 1  ;;  %vm4703_vm5 = vcmp.gt.s32.totalorder %v4702_v56, 0 }
 0x279   : > { %v15103_v47 = vpop.eup %15102  ;;  %v4294_v26 = vshrl.u32 %v21991_v16, %v4291_v23  ;;  %v4297_v43 = vshrl.u32 %v21992_v37, %v4291_v23  ;;  %v4292_v7 = vshrl.u32 %v22040_v6, %v4291_v23  ;;  %v4300_v14 = vshrl.u32 %v22004_v39, %v4291_v23 }
 0x27a   : > { %v15105_v18 = vpop.eup %15104  ;;  %v3440_v28 = vxor.u32 2147483648, %v15103_v47  ;;  %v13995_v60 = vadd.s32 4294967294, %v3824_v12  ;;  %v4302_v12 = vshll.u32 %v22004_v39, %v4290_v41  ;;  %v4303_v52 = vshrl.u32 %v22005_v59, %v4291_v23 }
 0x27b   : > { %v3437_v31 = vxor.u32 2147483648, %v15105_v18  ;;  %v4295_v53 = vor.u32 %v4294_v26, %v4293_v29  ;;  %v4298_v36 = vor.u32 %v4297_v43, %v4296_v21  ;;  %v4301_v30 = vor.u32 %v4300_v14, %v4299_v5 }
 0x27c   : > { %v3441_v3 = vsel %vm3439_vm14, %v3440_v28, %v15105_v18  ;;  %v8456_v10 = vsel %vm8454_vm8, %v3440_v28, %v15105_v18  ;;  %vm13996_vm12 = vcmp.lt.s32.totalorder %v13995_v60, 0 }
 0x27d   : > { %v3438_v48 = vsel %vm3436_vm2, %v15103_v47, %v3437_v31  ;;  %v8453_v50 = vsel %vm8451_vm3, %v15103_v47, %v3437_v31  ;;  %v3827_v32 = vsel %vm13996_vm12, 0, %v13995_v60  ;;  %v4305_v60 = vshll.u32 %v22005_v59, %v4290_v41 }
 0x27e   : > { %v3442_v51 = vsel %vm3435_vm4, %v3438_v48, %v3441_v3  ;;  %v8457_v58 = vsel %vm8450_vm13, %v8453_v50, %v8456_v10  ;;  %v3828_v28 = vsub.s32 32, %v3827_v32  ;;  %v3829_v26 = vshll.u32 %v17640_v46, %v3827_v32 }
 0x27f   : > { %v3443_v29 = vsel %vm3432_vm15, nan, %v3442_v51  ;;  %v8458_v18 = vsel %vm3432_vm15, nan, %v8457_v58  ;;  %v3832_v21 = vsub.s32 4294967266, %v3827_v32  ;;  %v4306_v3 = vshrl.u32 %v21993_v13, %v4291_v23 }
 0x280   : > { %v5860_v47 = vpack.c.bf16 %v3443_v29, %v3443_v29  ;;  %v10852_v31 = vpack.c.bf16 %v8458_v18, %v8458_v18  ;;  %v3830_v43 = vshrl.u32 %v3812_v2, %v3828_v28  ;;  %v4304_v50 = vor.u32 %v4303_v52, %v4302_v12 }
 0x281   : > { %v3833_v48 = vadd.s32 127, %v3832_v21  ;;  %v4307_v51 = vor.u32 %v4306_v3, %v4305_v60  ;;  %vm4310_vm13 = vcmp.lt.s32.totalorder %v17668_v25, 3  ;;  %vm4311_vm15 = vcmp.lt.s32.totalorder %v17668_v25, 4 }
 0x282   : > { %v10948_v10 = vrot.slane %v10852_v31, 4  ;;  %v3831_v57 = vor.u32 %v3830_v43, %v3829_v26  ;;  %v4312_v2 = vsel %vm4308_vm11, %v4292_v7, %v4295_v53  ;;  %v4313_v41 = vsel %vm4311_vm15, %v4301_v30, 2102212464 }
 0x283   : > { %v3834_v58 = vshll.u32 %v3833_v48, 23  ;;  %vm4309_vm3 = vcmp.lt.s32.totalorder %v17668_v25, 2  ;;  %v4314_v5 = vsel %vm4310_vm13, %v4298_v36, %v4313_v41  ;;  %v4316_v14 = vsel %vm4308_vm11, %v4295_v53, %v4298_v36 }
 0x284   : > { %v11071_v46 = vsel %vm21965_vm0, %v5860_v47, %v10948_v10  ;;  %v3838_v12 = vcvt.s32.f32 %v3831_v57  ;;  %v4317_v29 = vsel %vm4311_vm15, %v4304_v50, 920167782  ;;  %v4320_v7 = vsel %vm4308_vm11, %v4298_v36, %v4301_v30 }
 0x285   : > { %v11389_v23 = vmul.bf16 %v17630_v17, %v11071_v46  ;;  %v3835_v32 = vor.u32 4788187, %v3834_v58  ;;  %v4315_v18 = vsel %vm4309_vm3, %v4312_v2, %v4314_v5  ;;  %v4318_v28 = vsel %vm4310_vm13, %v4301_v30, %v4317_v29 }
 0x286   : > { %v4321_v26 = vsel %vm4311_vm15, %v4307_v51, 1326507024  ;;  %v4319_v47 = vsel %vm4309_vm3, %v4316_v14, %v4318_v28  ;;  %v4704_v21 = vsel %vm4703_vm5, %v4702_v56, 0  ;;  %v3849_v57 = vadd.s32 3, %v17666_v22 }
 0x287   : > { %13306 = vmatmul.mubr.bf16.gmra.mrb[16].mxu1 %v11389_v23  ;;  %v3836_v53 = vand.u32 2147483647, %v3835_v32  ;;  %v4322_v31 = vsel %vm4310_vm13, %v4304_v50, %v4321_v26  ;;  %v17725_v52 = vmul.u32.u64.low %v17661_v8, %v4319_v47  ;;  %v17726_v43 = vmul.u32.u64.high %v17661_v8, %v4319_v47, %v17725_v52 }
 0x288   : > { %v4323_v36 = vsel %vm4309_vm3, %v4320_v7, %v4322_v31  ;;  %v17729_v30 = vshrl.u32 %v4704_v21, 5  ;;  %v4706_v48 = vand.u32 31, %v4704_v21  ;;  %v4331_v56 = vmul.u32 %v17661_v8, %v4315_v18 }
 0x289   : > { %v3839_v60 = vmul.f32 %v3838_v12, %v3836_v53  ;;  %v17732_v3 = vmul.u32.u64.low %v17661_v8, %v4323_v36  ;;  %v17733_v10 = vmul.u32.u64.high %v17661_v8, %v4323_v36, %v17732_v3  ;;  %v4175_v25 = vand.u32 2139095040, %v17658_v27 }
 0x28a   : > { %vm4724_vm4 = vcmp.lt.s32.totalorder %v17729_v30, 1  ;;  %v4707_v51 = vsub.s32 32, %v4706_v48  ;;  %vm4726_vm2 = vcmp.lt.s32.totalorder %v17729_v30, 3  ;;  %vm4727_vm14 = vcmp.lt.s32.totalorder %v17729_v30, 4 }
 0x28b   : > { %v3840_v50 = vxor.u32 2147483648, %v3839_v60  ;;  %v4334_v46 = vadd.s32 1, %v17726_v43  ;;  %v4709_v58 = vshll.u32 %v22040_v6, %v4706_v48  ;;  %v4712_v2 = vshll.u32 %v21991_v16, %v4706_v48 }
 0x28c   : > { %v4715_v41 = vshll.u32 %v21992_v37, %v4706_v48  ;;  %vm4333_vm8 = vc.u32 %v17733_v10, %v17725_v52  ;;  %v4718_v23 = vshll.u32 %v22004_v39, %v4706_v48  ;;  %v4721_v5 = vshll.u32 %v22005_v59, %v4706_v48 }
 0x28d   : > { %v3841_v8 = vsel %vm3758_vm1, %v3840_v50, %v3839_v60  ;;  %v4335_v32 = vsel %vm4333_vm8, %v4334_v46, %v17726_v43  ;;  %v4710_v12 = vshrl.u32 %v21991_v16, %v4707_v51  ;;  %v4713_v29 = vshrl.u32 %v21992_v37, %v4707_v51 }
 0x28e   : > { %v3844_v14 = vsel %vm17636_vm10, %v17326_v38, %v3841_v8  ;;  %v4336_v7 = vadd.s32 %v4335_v32, %v4331_v56  ;;  %v4716_v18 = vshrl.u32 %v22004_v39, %v4707_v51  ;;  %v4719_v28 = vshrl.u32 %v22005_v59, %v4707_v51 }
 0x28f   : > { %15106 = vcosq.f32 %v3844_v14  ;;  %v4711_v26 = vor.u32 %v4710_v12, %v4709_v58  ;;  %v4714_v53 = vor.u32 %v4713_v29, %v4712_v2  ;;  %v4722_v47 = vshrl.u32 %v21993_v13, %v4707_v51 }
 0x290   : > { %15108 = vsinq.f32 %v3844_v14  ;;  %v4337_v31 = vadd.s32 536870912, %v4336_v7  ;;  %v4717_v1 = vor.u32 %v4716_v18, %v4715_v41  ;;  %v4720_v21 = vor.u32 %v4719_v28, %v4718_v23 }
 0x291   : > { %v4176_v36 = vshrl.u32 %v4175_v25, 23  ;;  %v4723_v43 = vor.u32 %v4722_v47, %v4721_v5  ;;  %vm4725_vm1 = vcmp.lt.s32.totalorder %v17729_v30, 2  ;;  %v4732_v60 = vsel %vm4724_vm4, %v4711_v26, %v4714_v53 }
 0x292   : > { %v17765_v3 = vshll.u32 %v4700_v9, 8  ;;  %v3850_v48 = vand.u32 3, %v3849_v57  ;;  %v8861_v56 = vand.u32 3, %v17666_v22  ;;  %v17768_v50 = vshrl.u32 %v4337_v31, 30 }
 0x293   : > { %v4733_v46 = vsel %vm4727_vm14, %v4720_v21, 920167782  ;;  %v4708_v25 = vshrl.u32 %v22040_v6, %v4707_v51  ;;  %v4736_v2 = vsel %vm4724_vm4, %v4714_v53, %v4717_v1  ;;  %v4737_v33 = vsel %vm4727_vm14, %v4723_v43, 1326507024 }
 0x294   : > { %v4734_v58 = vsel %vm4726_vm2, %v4717_v1, %v4733_v46  ;;  %v4339_v9 = vshll.u32 %v17768_v50, 30  ;;  %v4729_v22 = vsel %vm4727_vm14, %v4717_v1, 2102212464  ;;  %v14009_v41 = vadd.s32 4294967169, %v4176_v36  ;;  %v15013_v46 = vld [vmem:[#allocation5 + $0x1b4] ss:$8 sps:$4 sm:$0xff]  }
 0x295   : > { %v4735_v57 = vsel %vm4725_vm1, %v4732_v60, %v4734_v58  ;;  %vm3848_vm10 = vweird.f32 %v17326_v38  ;;  %v4738_v51 = vsel %vm4726_vm2, %v4720_v21, %v4737_v33  ;;  %v17794_v5 = vrot.slane %v17448_v54, %v15637_v24  ;;  %v15011_v60 = vld [vmem:[#allocation5 + $0x1b0] ss:$8 sps:$4 sm:$0xff]   ;;  %13368 = vmatprep.subr.bf16.mxu1 %v15013_v46 }
 0x296   : > { %v17788_v8 = vmul.u32.u64.low %v17765_v3, %v4735_v57  ;;  %v17789_v23 = vmul.u32.u64.high %v17765_v3, %v4735_v57, %v17788_v8  ;;  %v17796_v14 = vsub.s32 %v4336_v7, %v4339_v9  ;;  %v4739_v32 = vsel %vm4725_vm1, %v4736_v2, %v4738_v51  ;;  %v15014_v33 = vld [vmem:[#allocation5 + $0x3b0] ss:$8 sps:$4 sm:$0xff]   ;;  %v15016_v9 = vld [vmem:[#allocation5 + $0x3b4] ss:$8 sps:$4 sm:$0xff]   ;;  %13369 = vmatpush1.bf16.msra.mxu1 %v15011_v60 }
 0x297   : > { %v17802_v12 = vcombine.high %v17130_v15, %v17138_v11  ;;  %v4728_v29 = vsel %vm4724_vm4, %v4708_v25, %v4711_v26  ;;  %v4730_v18 = vsel %vm4726_vm2, %v4714_v53, %v4729_v22  ;;  %vm3855_vm12 = vcmp.eq.s32.totalorder %v3850_v48, 2  ;;  %13594 = vmatprep.subr.bf16.mxu0 %v15016_v9 }
 0x298   : > { %v17809_v28 = vmul.u32.u64.low %v17765_v3, %v4739_v32  ;;  %v17810_v47 = vmul.u32.u64.high %v17765_v3, %v4739_v32, %v17809_v28  ;;  %vm8866_vm11 = vcmp.eq.s32.totalorder %v8861_v56, 2  ;;  %v4342_v7 = vsub.s32 0, %v17796_v14  ;;  %13595 = vmatpush1.bf16.msra.mxu0 %v15014_v33 }
 0x299   : > { %22059 = vst [vmem:[#allocation28_spill] sm:$0xff] %v17802_v12  ;;  %v15107_v54 = vpop.eup %15106  ;;  %v4182_v31 = vadd.s32 1, %v14009_v41  ;;  %vm3852_vm13 = vcmp.eq.s32.totalorder %v3850_v48, 0  ;;  %vm8862_vm15 = vcmp.lt.s32.totalorder %v8861_v56, 2  ;;  %vm8863_vm3 = vcmp.eq.s32.totalorder %v8861_v56, 0 }
 0x29a   : > { %v15109_v1 = vpop.eup %15108  ;;  %v3856_v15 = vxor.u32 2147483648, %v15107_v54  ;;  %vm3851_vm5 = vcmp.lt.s32.totalorder %v3850_v48, 2  ;;  %v14014_v26 = vmin.u32 %v4342_v7, %v17796_v14  ;;  %v4731_v53 = vsel %vm4725_vm1, %v4728_v29, %v4730_v18 }
 0x29b   : > { %v3853_v11 = vxor.u32 2147483648, %v15109_v1  ;;  %vm4278_vm4 = vcmp.lt.s32.totalorder %v17612_v0, 0  ;;  %v4750_v43 = vadd.s32 1, %v17789_v23  ;;  %vm4183_vm2 = vcmp.gt.s32.totalorder %v4182_v31, 0 }
 0x29c   : > { %v3857_v21 = vsel %vm3855_vm12, %v3856_v15, %v15109_v1  ;;  %v8868_v36 = vsel %vm8866_vm11, %v3856_v15, %v15109_v1  ;;  %v4344_v2 = vclz %v14014_v26  ;;  %v4362_v30 = vsub.s32 4, %v17768_v50 }
 0x29d   : > { %v3854_v25 = vsel %vm3852_vm13, %v15107_v54, %v3853_v11  ;;  %v8865_v58 = vsel %vm8863_vm3, %v15107_v54, %v3853_v11  ;;  %v4747_v41 = vmul.u32 %v17765_v3, %v4731_v53  ;;  %v4172_v18 = vand.u32 2147483647, %v17658_v27 }
 0x29e   : > { %v3858_v22 = vsel %vm3851_vm5, %v3854_v25, %v3857_v21  ;;  %v8869_v57 = vsel %vm8862_vm15, %v8865_v58, %v8868_v36  ;;  %v14015_v29 = vadd.s32 4294967294, %v4344_v2  ;;  %vm4749_vm14 = vc.u32 %v17810_v47, %v17788_v8 }
 0x29f   : > { %v3859_v51 = vsel %vm3848_vm10, nan, %v3858_v22  ;;  %v8870_v32 = vsel %vm3848_vm10, nan, %v8869_v57  ;;  %v4184_v56 = vsel %vm4183_vm2, %v4182_v31, 0  ;;  %v4332_v3 = vadd.s32 %v17725_v52, %v17733_v10 }
 0x2a0   : > { %v5864_v48 = vpack.c.bf16 %v3859_v51, %v3859_v51  ;;  %v10856_v28 = vpack.c.bf16 %v8870_v32, %v8870_v32  ;;  %vm14016_vm8 = vcmp.lt.s32.totalorder %v14015_v29, 0  ;;  %v4751_v38 = vsel %vm4749_vm14, %v4750_v43, %v17789_v23 }
 0x2a1   : > { %v4186_v54 = vand.u32 31, %v4184_v56  ;;  %v4347_v1 = vsel %vm14016_vm8, 0, %v14015_v29  ;;  %v4363_v15 = vsel %vm4278_vm4, %v4362_v30, %v17768_v50  ;;  %v4752_v11 = vadd.s32 %v4751_v38, %v4747_v41 }
 0x2a2   : > { %v10952_v7 = vrot.slane %v10856_v28, 4  ;;  %v4348_v26 = vsub.s32 32, %v4347_v1  ;;  %v4349_v53 = vshll.u32 %v17796_v14, %v4347_v1  ;;  %v4352_v21 = vsub.s32 4294967266, %v4347_v1 }
 0x2a3   : > { %v4187_v31 = vsub.s32 32, %v4186_v54  ;;  %v4753_v60 = vadd.s32 536870912, %v4752_v11  ;;  %v703_v52 = vrot.slane %v17591_v40, %v15788_v61  ;;  %v723_v10 = vrot.slane %v17802_v12, %v15637_v24 }
 0x2a4   : > { %v11087_v36 = vsel %vm21965_vm0, %v5864_v48, %v10952_v7  ;;  %vm17845_vm1 = vcmp.le.f32.partialorder %v4276_v63, 0.7853982  ;;  %v4350_v14 = vshrl.u32 %v4332_v3, %v4348_v26  ;;  %v4353_v43 = vadd.s32 127, %v4352_v21 }
 0x2a5   : > { %v11393_v23 = vmul.bf16 %v17794_v5, %v11087_v36  ;;  %v4365_v46 = vsel %vm17845_vm1, 0, %v4363_v15  ;;  %v17851_v25 = vshrl.u32 %v4753_v60, 30  ;;  %v4179_v58 = vand.u32 8388607, %v4172_v18 }
 0x2a6   : > { %v4189_v2 = vshll.u32 %v22040_v6, %v4186_v54  ;;  %v4351_v33 = vor.u32 %v4350_v14, %v4349_v53  ;;  %v4354_v9 = vshll.u32 %v4353_v43, 23  ;;  %v4190_v63 = vshrl.u32 %v21991_v16, %v4187_v31 }
 0x2a7   : > { %13532 = vmatmul.mubr.bf16.gmra.mrb[16].mxu0 %v11393_v23  ;;  %v4192_v22 = vshll.u32 %v21991_v16, %v4186_v54  ;;  %v4755_v57 = vshll.u32 %v17851_v25, 30  ;;  %v4193_v30 = vshrl.u32 %v21992_v37, %v4187_v31  ;;  %v4195_v41 = vshll.u32 %v21992_v37, %v4186_v54 }
 0x2a8   : > { %v4196_v51 = vshrl.u32 %v22004_v39, %v4187_v31  ;;  %v4355_v32 = vor.u32 4788187, %v4354_v9  ;;  %v4358_v29 = vcvt.s32.f32 %v4351_v33  ;;  %v4198_v48 = vshll.u32 %v22004_v39, %v4186_v54 }
 0x2a9   : > { %v4199_v28 = vshrl.u32 %v22005_v59, %v4187_v31  ;;  %v17864_v3 = vsub.s32 %v4752_v11, %v4755_v57  ;;  %v4185_v38 = vshrl.u32 %v4184_v56, 5  ;;  %v17867_v7 = vmul.f32 %v15661_v55, %v703_v52 }
 0x2aa   : > { %v17870_v1 = vmul.f32 %v15661_v55, %v723_v10  ;;  %v4356_v15 = vand.u32 2147483647, %v4355_v32  ;;  %v4180_v26 = vor.u32 8388608, %v4179_v58  ;;  %v4201_v53 = vshll.u32 %v22005_v59, %v4186_v54 }
 0x2ab   : > { %v4202_v21 = vshrl.u32 %v21993_v13, %v4187_v31  ;;  %v4369_v36 = vadd.s32 3, %v4365_v46  ;;  %v4758_v60 = vsub.s32 0, %v17864_v3  ;;  %v4188_v23 = vshrl.u32 %v22040_v6, %v4187_v31 }
 0x2ac   : > { %v4191_v11 = vor.u32 %v4190_v63, %v4189_v2  ;;  %v4359_v14 = vmul.f32 %v4358_v29, %v4356_v15  ;;  %v4194_v56 = vor.u32 %v4193_v30, %v4192_v22  ;;  %v4197_v43 = vor.u32 %v4196_v51, %v4195_v41  ;;  %v15017_v15 = vld [vmem:[#allocation5 + $0x1c0] ss:$8 sps:$4 sm:$0xff]  }
 0x2ad   : > { %v4200_v52 = vor.u32 %v4199_v28, %v4198_v48  ;;  %v17876_v33 = vand.u32 3, %v4365_v46  ;;  %v14030_v10 = vmin.u32 %v4758_v60, %v17864_v3  ;;  %vm4204_vm10 = vcmp.lt.s32.totalorder %v4185_v38, 1 }
 0x2ae   : > { %vm4207_vm12 = vcmp.lt.s32.totalorder %v4185_v38, 4  ;;  %v4360_v58 = vxor.u32 2147483648, %v4359_v14  ;;  %v4203_v54 = vor.u32 %v4202_v21, %v4201_v53  ;;  %vm4206_vm11 = vcmp.lt.s32.totalorder %v4185_v38, 3 }
 0x2af   : > { %v4209_v9 = vsel %vm4207_vm12, %v4197_v43, 2102212464  ;;  %v4748_v57 = vadd.s32 %v17788_v8, %v17810_v47  ;;  %v4760_v31 = vclz %v14030_v10  ;;  %vm4205_vm13 = vcmp.lt.s32.totalorder %v4185_v38, 2  ;;  %v15019_v47 = vld [vmem:[#allocation5 + $0x1c4] ss:$8 sps:$4 sm:$0xff]  }
 0x2b0   : > { %v4220_v2 = vshll.u32 %v4180_v26, 8  ;;  %v4361_v63 = vsel %vm4278_vm4, %v4360_v58, %v4359_v14  ;;  %v4208_v46 = vsel %vm4204_vm10, %v4188_v23, %v4191_v11  ;;  %v4212_v22 = vsel %vm4204_vm10, %v4191_v11, %v4194_v56  ;;  %13370 = vmatprep.subr.bf16.mxu1 %v15019_v47 }
 0x2b1   : > { %v4213_v30 = vsel %vm4207_vm12, %v4200_v52, 920167782  ;;  %v4364_v41 = vsel %vm17845_vm1, %v17612_v0, %v4361_v63  ;;  %v14031_v51 = vadd.s32 4294967294, %v4760_v31  ;;  %v4210_v32 = vsel %vm4206_vm11, %v4194_v56, %v4209_v9  ;;  %13371 = vmatpush1.bf16.msra.mxu1 %v15017_v15 }
 0x2b2   : > { %v4214_v8 = vsel %vm4206_vm11, %v4197_v43, %v4213_v30  ;;  %15110 = vcosq.f32 %v4364_v41  ;;  %v4216_v48 = vsel %vm4204_vm10, %v4194_v56, %v4197_v43  ;;  %v4217_v28 = vsel %vm4207_vm12, %v4203_v54, 1326507024 }
 0x2b3   : > { %v4215_v29 = vsel %vm4205_vm13, %v4212_v22, %v4214_v8  ;;  %15112 = vsinq.f32 %v4364_v41  ;;  %vm14032_vm15 = vcmp.lt.s32.totalorder %v14031_v51, 0  ;;  %v4778_v26 = vsub.s32 4, %v17851_v25 }
 0x2b4   : > { %v4218_v50 = vsel %vm4206_vm11, %v4200_v52, %v4217_v28  ;;  %v4763_v53 = vsel %vm14032_vm15, 0, %v14031_v51  ;;  %v17898_v60 = vmul.u32.u64.low %v4220_v2, %v4215_v29  ;;  %v17899_v23 = vmul.u32.u64.high %v4220_v2, %v4215_v29, %v17898_v60 }
 0x2b5   : > { %v4219_v21 = vsel %vm4205_vm13, %v4216_v48, %v4218_v50  ;;  %v4764_v11 = vsub.s32 32, %v4763_v53  ;;  %v4765_v14 = vshll.u32 %v17864_v3, %v4763_v53  ;;  %v4768_v56 = vsub.s32 4294967266, %v4763_v53 }
 0x2b6   : > { %v4211_v43 = vsel %vm4205_vm13, %v4208_v46, %v4210_v32  ;;  %vm4694_vm3 = vcmp.lt.s32.totalorder %v17615_v49, 0  ;;  %v17905_v10 = vmul.u32.u64.low %v4220_v2, %v4219_v21  ;;  %v17906_v58 = vmul.u32.u64.high %v4220_v2, %v4219_v21, %v17905_v10 }
 0x2b7   : > { %v4591_v52 = vand.u32 2139095040, %v17867_v7  ;;  %vm4368_vm5 = vweird.f32 %v17612_v0  ;;  %v4370_v54 = vand.u32 3, %v4369_v36  ;;  %v4766_v9 = vshrl.u32 %v4748_v57, %v4764_v11 }
 0x2b8   : > { %v4769_v31 = vadd.s32 127, %v4768_v56  ;;  %v4779_v63 = vsel %vm4694_vm3, %v4778_v26, %v17851_v25  ;;  %vm17915_vm4 = vcmp.le.f32.partialorder %v4692_v20, 0.7853982  ;;  %v4227_v38 = vmul.u32 %v4220_v2, %v4211_v43 }
 0x2b9   : > { %v4230_v46 = vadd.s32 1, %v17899_v23  ;;  %v4592_v22 = vshrl.u32 %v4591_v52, 23  ;;  %vm9377_vm2 = vcmp.lt.s32.totalorder %v17876_v33, 2  ;;  %vm9378_vm14 = vcmp.eq.s32.totalorder %v17876_v33, 0 }
 0x2ba   : > { %v4767_v36 = vor.u32 %v4766_v9, %v4765_v14  ;;  %v4770_v57 = vshll.u32 %v4769_v31, 23  ;;  %vm9381_vm8 = vcmp.eq.s32.totalorder %v17876_v33, 2  ;;  %v4781_v25 = vsel %vm17915_vm4, 0, %v4779_v63 }
 0x2bb   : > { %vm4229_vm1 = vc.u32 %v17906_v58, %v17898_v60  ;;  %v14025_v20 = vadd.s32 4294967169, %v4592_v22  ;;  %vm4371_vm10 = vcmp.lt.s32.totalorder %v4370_v54, 2  ;;  %vm4375_vm12 = vcmp.eq.s32.totalorder %v4370_v54, 2 }
 0x2bc   : > { %v4771_v2 = vor.u32 4788187, %v4770_v57  ;;  %v4774_v30 = vcvt.s32.f32 %v4767_v36  ;;  %v4231_v41 = vsel %vm4229_vm1, %v4230_v46, %v17899_v23  ;;  %v15111_v51 = vpop.eup %15110  ;;  %v4588_v8 = vand.u32 2147483647, %v17867_v7 }
 0x2bd   : > { %v4232_v32 = vadd.s32 %v4231_v41, %v4227_v38  ;;  %v4598_v47 = vadd.s32 1, %v14025_v20  ;;  %v15113_v29 = vpop.eup %15112  ;;  %vm4372_vm11 = vcmp.eq.s32.totalorder %v4370_v54, 0  ;;  %v4376_v48 = vxor.u32 2147483648, %v15111_v51 }
 0x2be   : > { %v4772_v28 = vand.u32 2147483647, %v4771_v2  ;;  %v4785_v15 = vadd.s32 3, %v4781_v25  ;;  %v4373_v26 = vxor.u32 2147483648, %v15113_v29  ;;  %v17929_v50 = vand.u32 3, %v4781_v25 }
 0x2bf   : > { %v4233_v53 = vadd.s32 536870912, %v4232_v32  ;;  %vm4599_vm13 = vcmp.gt.s32.totalorder %v4598_v47, 0  ;;  %v4377_v21 = vsel %vm4375_vm12, %v4376_v48, %v15113_v29  ;;  %v9383_v23 = vsel %vm9381_vm8, %v4376_v48, %v15113_v29 }
 0x2c0   : > { %v4775_v11 = vmul.f32 %v4774_v30, %v4772_v28  ;;  %v4600_v14 = vsel %vm4599_vm13, %v4598_v47, 0  ;;  %v4374_v56 = vsel %vm4372_vm11, %v15111_v51, %v4373_v26  ;;  %v9380_v43 = vsel %vm9378_vm14, %v15111_v51, %v4373_v26 }
 0x2c1   : > { %v4234_v10 = vshrl.u32 %v4233_v53, 30  ;;  %v4595_v52 = vand.u32 8388607, %v4588_v8  ;;  %v4378_v9 = vsel %vm4371_vm10, %v4374_v56, %v4377_v21  ;;  %v9384_v31 = vsel %vm9377_vm2, %v9380_v43, %v9383_v23 }
 0x2c2   : > { %v4776_v63 = vxor.u32 2147483648, %v4775_v11  ;;  %v4602_v38 = vand.u32 31, %v4600_v14  ;;  %v4379_v46 = vsel %vm4368_vm5, nan, %v4378_v9  ;;  %v9385_v22 = vsel %vm4368_vm5, nan, %v9384_v31 }
 0x2c3   : > { %v4235_v36 = vshll.u32 %v4234_v10, 30  ;;  %v5111_v57 = vand.u32 2139095040, %v17870_v1  ;;  %v5869_v25 = vpack.c.bf16 %v4379_v46, %v4379_v46  ;;  %v10861_v20 = vpack.c.bf16 %v9385_v22, %v9385_v22 }
 0x2c4   : > { %v4777_v54 = vsel %vm4694_vm3, %v4776_v63, %v4775_v11  ;;  %v4603_v2 = vsub.s32 32, %v4602_v38  ;;  %v17950_v30 = vand.u32 3, %v4785_v15  ;;  %vm4174_vm15 = vcmp.lt.s32.totalorder %v17658_v27, 0 }
 0x2c5   : > { %v4780_v33 = vsel %vm17915_vm4, %v17615_v49, %v4777_v54  ;;  %v17952_v41 = vsub.s32 %v4232_v32, %v4235_v36  ;;  %v10957_v51 = vrot.slane %v10861_v20, 4  ;;  %v4596_v0 = vor.u32 8388608, %v4595_v52 }
 0x2c6   : > { %15114 = vcosq.f32 %v4780_v33  ;;  %v4605_v29 = vshll.u32 %v22040_v6, %v4602_v38  ;;  %v5112_v48 = vshrl.u32 %v5111_v57, 23  ;;  %vm9793_vm3 = vcmp.eq.s32.totalorder %v17929_v50, 2 }
 0x2c7   : > { %15116 = vsinq.f32 %v4780_v33  ;;  %v4238_v47 = vsub.s32 0, %v17952_v41  ;;  %v11107_v28 = vsel %vm21965_vm0, %v5869_v25, %v10957_v51  ;;  %v4606_v3 = vshrl.u32 %v21991_v16, %v4603_v2  ;;  %v15022_v51 = vld [vmem:[#allocation5 + $0x3c4] ss:$8 sps:$4 sm:$0xff]  }
 0x2c8   : > { %v4608_v32 = vshll.u32 %v21991_v16, %v4602_v38  ;;  %v4609_v15 = vshrl.u32 %v21992_v37, %v4603_v2  ;;  %v11398_v26 = vmul.bf16 %v17434_v45, %v11107_v28  ;;  %vm4788_vm5 = vcmp.eq.s32.totalorder %v17950_v30, 0  ;;  %13596 = vmatprep.subr.bf16.mxu0 %v15022_v51 }
 0x2c9   : > { %vm9790_vm4 = vcmp.eq.s32.totalorder %v17929_v50, 0  ;;  %v14010_v53 = vmin.u32 %v4238_v47, %v17952_v41  ;;  %v4258_v21 = vsub.s32 4, %v4234_v10  ;;  %v17966_v23 = vshrl.u32 %v4600_v14, 5 }
 0x2ca   : > { %vm4787_vm2 = vcmp.lt.s32.totalorder %v17950_v30, 2  ;;  %vm4791_vm14 = vcmp.eq.s32.totalorder %v17950_v30, 2  ;;  %vm9789_vm8 = vcmp.lt.s32.totalorder %v17929_v50, 2  ;;  %v4228_v11 = vadd.s32 %v17898_v60, %v17906_v58  ;;  %13315 = vmatprep.mubr.bf16.mxu1 %v11398_v26 }
 0x2cb   : > { %v17973_v56 = vshll.u32 %v4596_v0, 8  ;;  %v5108_v43 = vand.u32 2147483647, %v17870_v1  ;;  %vm4784_vm1 = vweird.f32 %v17615_v49  ;;  %v4240_v52 = vclz %v14010_v53  ;;  %v15020_v0 = vld [vmem:[#allocation5 + $0x3c0] ss:$8 sps:$4 sm:$0xff]  }
 0x2cc   : > { %v4607_v9 = vor.u32 %v4606_v3, %v4605_v29  ;;  %v4610_v14 = vor.u32 %v4609_v15, %v4608_v32  ;;  %v14045_v31 = vadd.s32 4294967169, %v5112_v48  ;;  %v4611_v63 = vshll.u32 %v21992_v37, %v4602_v38  ;;  %13597 = vmatpush1.bf16.msra.mxu0 %v15020_v0 }
 0x2cd   : > { %v4612_v46 = vshrl.u32 %v22004_v39, %v4603_v2  ;;  %v4614_v22 = vshll.u32 %v22004_v39, %v4602_v38  ;;  %v4615_v36 = vshrl.u32 %v22005_v59, %v4603_v2  ;;  %v14011_v60 = vadd.s32 4294967294, %v4240_v52 }
 0x2ce   : > { %v4259_v58 = vsel %vm4174_vm15, %v4258_v21, %v4234_v10  ;;  %v4604_v57 = vshrl.u32 %v22040_v6, %v4603_v2  ;;  %vm4620_vm10 = vcmp.lt.s32.totalorder %v17966_v23, 1  ;;  %v4617_v54 = vshll.u32 %v22005_v59, %v4602_v38 }
 0x2cf   : > { %v4613_v25 = vor.u32 %v4612_v46, %v4611_v63  ;;  %v4616_v20 = vor.u32 %v4615_v36, %v4614_v22  ;;  %v4618_v33 = vshrl.u32 %v21993_v13, %v4603_v2  ;;  %vm14012_vm12 = vcmp.lt.s32.totalorder %v14011_v60, 0 }
 0x2d0   : > { %vm4621_vm11 = vcmp.lt.s32.totalorder %v17966_v23, 2  ;;  %vm4622_vm13 = vcmp.lt.s32.totalorder %v17966_v23, 3  ;;  %vm4623_vm9 = vcmp.lt.s32.totalorder %v17966_v23, 4  ;;  %v15115_v10 = vpop.eup %15114  ;;  %v4243_v47 = vsel %vm14012_vm12, 0, %v14011_v60 }
 0x2d1   : > { %v4625_v29 = vsel %vm4623_vm9, %v4613_v25, 2102212464  ;;  %v4628_v48 = vsel %vm4620_vm10, %v4607_v9, %v4610_v14  ;;  %v4629_v38 = vsel %vm4623_vm9, %v4616_v20, 920167782  ;;  %v15117_v2 = vpop.eup %15116  ;;  %v4792_v28 = vxor.u32 2147483648, %v15115_v10 }
 0x2d2   : > { %v4244_v3 = vsub.s32 32, %v4243_v47  ;;  %v4245_v32 = vshll.u32 %v17952_v41, %v4243_v47  ;;  %v4248_v15 = vsub.s32 4294967266, %v4243_v47  ;;  %v4789_v26 = vxor.u32 2147483648, %v15117_v2 }
 0x2d3   : > { %v4619_v53 = vor.u32 %v4618_v33, %v4617_v54  ;;  %v4624_v21 = vsel %vm4620_vm10, %v4604_v57, %v4607_v9  ;;  %v4630_v52 = vsel %vm4622_vm13, %v4613_v25, %v4629_v38  ;;  %v4793_v63 = vsel %vm4791_vm14, %v4792_v28, %v15117_v2 }
 0x2d4   : > { %v9795_v46 = vsel %vm9793_vm3, %v4792_v28, %v15117_v2  ;;  %v4246_v22 = vshrl.u32 %v4228_v11, %v4244_v3  ;;  %v4249_v36 = vadd.s32 127, %v4248_v15  ;;  %v4790_v41 = vsel %vm4788_vm5, %v15115_v10, %v4789_v26 }
 0x2d5   : > { %v9792_v60 = vsel %vm9790_vm4, %v15115_v10, %v4789_v26  ;;  %v4626_v9 = vsel %vm4622_vm13, %v4610_v14, %v4625_v29  ;;  %v4631_v57 = vsel %vm4621_vm11, %v4628_v48, %v4630_v52  ;;  %v4794_v54 = vsel %vm4787_vm2, %v4790_v41, %v4793_v63 }
 0x2d6   : > { %v9796_v33 = vsel %vm9789_vm8, %v9792_v60, %v9795_v46  ;;  %v4247_v11 = vor.u32 %v4246_v22, %v4245_v32  ;;  %v4250_v51 = vshll.u32 %v4249_v36, 23  ;;  %v4795_v0 = vsel %vm4784_vm1, nan, %v4794_v54 }
 0x2d7   : > { %v9797_v10 = vsel %vm4784_vm1, nan, %v9796_v33  ;;  %v4632_v47 = vsel %vm4620_vm10, %v4610_v14, %v4613_v25  ;;  %v4633_v29 = vsel %vm4623_vm9, %v4619_v53, 1326507024  ;;  %v5873_v48 = vpack.c.bf16 %v4795_v0, %v4795_v0 }
 0x2d8   : > { %v10865_v30 = vpack.c.bf16 %v9797_v10, %v9797_v10  ;;  %v4251_v38 = vor.u32 4788187, %v4250_v51  ;;  %v4254_v2 = vcvt.s32.f32 %v4247_v11  ;;  %v4627_v50 = vsel %vm4621_vm11, %v4624_v21, %v4626_v9 }
 0x2d9   : > { %v4634_v28 = vsel %vm4622_vm13, %v4616_v20, %v4633_v29  ;;  %v18030_v3 = vmul.u32.u64.low %v17973_v56, %v4631_v57  ;;  %v18031_v49 = vmul.u32.u64.high %v17973_v56, %v4631_v57, %v18030_v3  ;;  %v5118_v15 = vadd.s32 1, %v14045_v31 }
 0x2da   : > { %v10961_v32 = vrot.slane %v10865_v30, 4  ;;  %v4252_v14 = vand.u32 2147483647, %v4251_v38  ;;  %v4635_v25 = vsel %vm4621_vm11, %v4632_v47, %v4634_v28  ;;  %vm18038_vm9 = vcmp.le.f32.partialorder %v4172_v18, 0.7853982 }
 0x2db   : > { %v18043_v53 = vmul.u32.u64.low %v17973_v56, %v4635_v25  ;;  %v18044_v20 = vmul.u32.u64.high %v17973_v56, %v4635_v25, %v18043_v53  ;;  %v4261_v63 = vsel %vm18038_vm9, 0, %v4259_v58  ;;  %vm5119_vm3 = vcmp.gt.s32.totalorder %v5118_v15, 0 }
 0x2dc   : > { %v11123_v21 = vsel %vm21965_vm0, %v5873_v48, %v10961_v32  ;;  %v4255_v52 = vmul.f32 %v4254_v2, %v4252_v14  ;;  %v4643_v31 = vmul.u32 %v17973_v56, %v4627_v50  ;;  %v4646_v18 = vadd.s32 1, %v18031_v49 }
 0x2dd   : > { %v11402_v23 = vmul.bf16 %v17438_v42, %v11123_v21  ;;  %v5120_v46 = vsel %vm5119_vm3, %v5118_v15, 0  ;;  %v5115_v36 = vand.u32 8388607, %v5108_v43  ;;  %v739_v60 = vrot.slane %v17802_v12, %v15640_v34 }
 0x2de   : > { %v4256_v22 = vxor.u32 2147483648, %v4255_v52  ;;  %v5122_v41 = vand.u32 31, %v5120_v46  ;;  %v4265_v9 = vadd.s32 3, %v4261_v63  ;;  %v18056_v57 = vand.u32 3, %v4261_v63 }
 0x2df   : > { %13541 = vmatprep.mubr.bf16.mxu0 %v11402_v23  ;;  %vm4645_vm5 = vc.u32 %v18044_v20, %v18030_v3  ;;  %v18060_v58 = vshrl.u32 %v5120_v46, 5  ;;  %v5116_v47 = vor.u32 8388608, %v5115_v36  ;;  %v18084_v53 = vmul.f32 %v15661_v55, %v739_v60 }
 0x2e0   : > { %v4257_v56 = vsel %vm4174_vm15, %v4256_v22, %v4255_v52  ;;  %v4647_v54 = vsel %vm4645_vm5, %v4646_v18, %v18031_v49  ;;  %v5123_v33 = vsub.s32 32, %v5122_v41  ;;  %v5125_v11 = vshll.u32 %v22040_v6, %v5122_v41 }
 0x2e1   : > { %v4260_v34 = vsel %vm18038_vm9, %v17658_v27, %v4257_v56  ;;  %v4648_v51 = vadd.s32 %v4647_v54, %v4643_v31  ;;  %v5128_v0 = vshll.u32 %v21991_v16, %v5122_v41  ;;  %v5131_v10 = vshll.u32 %v21992_v37, %v5122_v41 }
 0x2e2   : > { %15118 = vcosq.f32 %v4260_v34  ;;  %v5126_v29 = vshrl.u32 %v21991_v16, %v5123_v33  ;;  %v5129_v48 = vshrl.u32 %v21992_v37, %v5123_v33  ;;  %v5132_v38 = vshrl.u32 %v22004_v39, %v5123_v33 }
 0x2e3   : > { %15120 = vsinq.f32 %v4260_v34  ;;  %v4649_v30 = vadd.s32 536870912, %v4648_v51  ;;  %v5134_v2 = vshll.u32 %v22004_v39, %v5122_v41  ;;  %v5135_v49 = vshrl.u32 %v22005_v59, %v5123_v33 }
 0x2e4   : > { %v5127_v50 = vor.u32 %v5126_v29, %v5125_v11  ;;  %v5130_v28 = vor.u32 %v5129_v48, %v5128_v0  ;;  %v5137_v32 = vshll.u32 %v22005_v59, %v5122_v41  ;;  %v5133_v25 = vor.u32 %v5132_v38, %v5131_v10 }
 0x2e5   : > { %v18077_v14 = vshrl.u32 %v4649_v30, 30  ;;  %v5138_v15 = vshrl.u32 %v21993_v13, %v5123_v33  ;;  %vm5140_vm15 = vcmp.lt.s32.totalorder %v18060_v58, 1  ;;  %v5136_v26 = vor.u32 %v5135_v49, %v5134_v2 }
 0x2e6   : > { %vm5142_vm4 = vcmp.lt.s32.totalorder %v18060_v58, 3  ;;  %vm5143_vm2 = vcmp.lt.s32.totalorder %v18060_v58, 4  ;;  %vm4264_vm14 = vweird.f32 %v17658_v27  ;;  %v4266_v21 = vand.u32 3, %v4265_v9 }
 0x2e7   : > { %v4651_v52 = vshll.u32 %v18077_v14, 30  ;;  %v5139_v63 = vor.u32 %v5138_v15, %v5137_v32  ;;  %vm5141_vm8 = vcmp.lt.s32.totalorder %v18060_v58, 2  ;;  %vm9274_vm1 = vcmp.lt.s32.totalorder %v18056_v57, 2 }
 0x2e8   : > { %v5148_v23 = vsel %vm5140_vm15, %v5127_v50, %v5130_v28  ;;  %v5149_v31 = vsel %vm5143_vm2, %v5136_v26, 920167782  ;;  %v18094_v18 = vshll.u32 %v5116_v47, 8  ;;  %vm9275_vm10 = vcmp.eq.s32.totalorder %v18056_v57, 0 }
 0x2e9   : > { %v18097_v46 = vsub.s32 %v4648_v51, %v4651_v52  ;;  %v5124_v22 = vshrl.u32 %v22040_v6, %v5123_v33  ;;  %v5150_v36 = vsel %vm5142_vm4, %v5133_v25, %v5149_v31  ;;  %vm9278_vm12 = vcmp.eq.s32.totalorder %v18056_v57, 2 }
 0x2ea   : > { %v5145_v41 = vsel %vm5143_vm2, %v5133_v25, 2102212464  ;;  %v5151_v60 = vsel %vm5141_vm8, %v5148_v23, %v5150_v36  ;;  %v5153_v9 = vsel %vm5143_vm2, %v5139_v63, 1326507024  ;;  %v5152_v54 = vsel %vm5140_vm15, %v5130_v28, %v5133_v25 }
 0x2eb   : > { %v4654_v56 = vsub.s32 0, %v18097_v46  ;;  %v5154_v33 = vsel %vm5142_vm4, %v5136_v26, %v5153_v9  ;;  %v5527_v11 = vand.u32 2139095040, %v18084_v53  ;;  %vm4268_vm11 = vcmp.eq.s32.totalorder %v4266_v21, 0 }
 0x2ec   : > { %v15119_v34 = vpop.eup %15118  ;;  %vm4271_vm13 = vcmp.eq.s32.totalorder %v4266_v21, 2  ;;  %v18116_v51 = vmul.u32.u64.low %v18094_v18, %v5151_v60  ;;  %v18117_v0 = vmul.u32.u64.high %v18094_v18, %v5151_v60, %v18116_v51  ;;  %v5144_v48 = vsel %vm5140_vm15, %v5124_v22, %v5127_v50 }
 0x2ed   : > { %v15121_v10 = vpop.eup %15120  ;;  %v4272_v47 = vxor.u32 2147483648, %v15119_v34  ;;  %v14026_v29 = vmin.u32 %v4654_v56, %v18097_v46  ;;  %v5146_v30 = vsel %vm5142_vm4, %v5130_v28, %v5145_v41  ;;  %vm4267_vm9 = vcmp.lt.s32.totalorder %v4266_v21, 2 }
 0x2ee   : > { %v4269_v38 = vxor.u32 2147483648, %v15121_v10  ;;  %v4644_v2 = vadd.s32 %v18030_v3, %v18044_v20  ;;  %v5155_v49 = vsel %vm5141_vm8, %v5152_v54, %v5154_v33  ;;  %v5528_v26 = vshrl.u32 %v5527_v11, 23 }
 0x2ef   : > { %v4273_v32 = vsel %vm4271_vm13, %v4272_v47, %v15121_v10  ;;  %v9280_v25 = vsel %vm9278_vm12, %v4272_v47, %v15121_v10  ;;  %v4656_v15 = vclz %v14026_v29  ;;  %v4674_v28 = vsub.s32 4, %v18077_v14 }
 0x2f0   : > { %v4270_v52 = vsel %vm4268_vm11, %v15119_v34, %v4269_v38  ;;  %v9277_v50 = vsel %vm9275_vm10, %v15119_v34, %v4269_v38  ;;  %v5147_v63 = vsel %vm5141_vm8, %v5144_v48, %v5146_v30  ;;  %v5166_v31 = vadd.s32 1, %v18117_v0 }
 0x2f1   : > { %v4274_v3 = vsel %vm4267_vm9, %v4270_v52, %v4273_v32  ;;  %v9281_v20 = vsel %vm9274_vm1, %v9277_v50, %v9280_v25  ;;  %v14027_v23 = vadd.s32 4294967294, %v4656_v15  ;;  %v14061_v9 = vadd.s32 4294967169, %v5528_v26 }
 0x2f2   : > { %v4275_v22 = vsel %vm4264_vm14, nan, %v4274_v3  ;;  %v9282_v21 = vsel %vm4264_vm14, nan, %v9281_v20  ;;  %v18145_v36 = vmul.u32.u64.low %v18094_v18, %v5155_v49  ;;  %v18146_v41 = vmul.u32.u64.high %v18094_v18, %v5155_v49, %v18145_v36 }
 0x2f3   : > { %v5868_v60 = vpack.c.bf16 %v4275_v22, %v4275_v22  ;;  %v10860_v58 = vpack.c.bf16 %v9282_v21, %v9282_v21  ;;  %vm14028_vm3 = vcmp.lt.s32.totalorder %v14027_v23, 0  ;;  %vm4590_vm5 = vcmp.lt.s32.totalorder %v17867_v7, 0 }
 0x2f4   : > { %v4659_v57 = vsel %vm14028_vm3, 0, %v14027_v23  ;;  %v5163_v56 = vmul.u32 %v18094_v18, %v5147_v63  ;;  %v4675_v27 = vsel %vm4590_vm5, %v4674_v28, %v18077_v14  ;;  %vm5165_vm15 = vc.u32 %v18146_v41, %v18116_v51 }
 0x2f5   : > { %v10956_v54 = vrot.slane %v10860_v58, 4  ;;  %v4660_v33 = vsub.s32 32, %v4659_v57  ;;  %v4661_v11 = vshll.u32 %v18097_v46, %v4659_v57  ;;  %v4664_v34 = vsub.s32 4294967266, %v4659_v57 }
 0x2f6   : > { %v5534_v10 = vadd.s32 1, %v14061_v9  ;;  %v5167_v30 = vsel %vm5165_vm15, %v5166_v31, %v18117_v0  ;;  %vm18161_vm4 = vcmp.le.f32.partialorder %v4588_v8, 0.7853982  ;;  %v5524_v32 = vand.u32 2147483647, %v18084_v53 }
 0x2f7   : > { %v11103_v47 = vsel %vm21965_vm0, %v5868_v60, %v10956_v54  ;;  %v4662_v29 = vshrl.u32 %v4644_v2, %v4660_v33  ;;  %v4665_v48 = vadd.s32 127, %v4664_v34  ;;  %v5168_v38 = vadd.s32 %v5167_v30, %v5163_v56 }
 0x2f8   : > { %v11397_v18 = vmul.bf16 %v17630_v17, %v11103_v47  ;;  %vm5535_vm2 = vcmp.gt.s32.totalorder %v5534_v10, 0  ;;  %v4677_v2 = vsel %vm18161_vm4, 0, %v4675_v27  ;;  %v5531_v20 = vand.u32 8388607, %v5524_v32 }
 0x2f9   : > { %v4663_v14 = vor.u32 %v4662_v29, %v4661_v11  ;;  %v4666_v49 = vshll.u32 %v4665_v48, 23  ;;  %v5536_v25 = vsel %vm5535_vm2, %v5534_v10, 0  ;;  %v5169_v0 = vadd.s32 536870912, %v5168_v38 }
 0x2fa   : > { %13316 = vmatmul.mubr.bf16.gmra.mrb[20].mxu1 %v11397_v18  ;;  %v5538_v15 = vand.u32 31, %v5536_v25  ;;  %v4681_v63 = vadd.s32 3, %v4677_v2  ;;  %v18170_v3 = vand.u32 3, %v4677_v2  ;;  %v5537_v56 = vshrl.u32 %v5536_v25, 5 }
 0x2fb   : > { %v4667_v26 = vor.u32 4788187, %v4666_v49  ;;  %v4670_v52 = vcvt.s32.f32 %v4663_v14  ;;  %v18168_v50 = vshrl.u32 %v5169_v0, 30  ;;  %v719_v10 = vrot.slane %v17802_v12, %v15632_v19 }
 0x2fc   : > { %v5539_v8 = vsub.s32 32, %v5538_v15  ;;  %v5541_v31 = vshll.u32 %v22040_v6, %v5538_v15  ;;  %v5544_v22 = vshll.u32 %v21991_v16, %v5538_v15  ;;  %v5547_v21 = vshll.u32 %v21992_v37, %v5538_v15 }
 0x2fd   : > { %v4668_v28 = vand.u32 2147483647, %v4667_v26  ;;  %v5171_v23 = vshll.u32 %v18168_v50, 30  ;;  %v5550_v54 = vshll.u32 %v22004_v39, %v5538_v15  ;;  %v5553_v34 = vshll.u32 %v22005_v59, %v5538_v15 }
 0x2fe   : > { %v5542_v60 = vshrl.u32 %v21991_v16, %v5539_v8  ;;  %v5545_v58 = vshrl.u32 %v21992_v37, %v5539_v8  ;;  %v5548_v9 = vshrl.u32 %v22004_v39, %v5539_v8  ;;  %v5551_v33 = vshrl.u32 %v22005_v59, %v5539_v8 }
 0x2ff   : > { %v4671_v36 = vmul.f32 %v4670_v52, %v4668_v28  ;;  %v18181_v57 = vsub.s32 %v5168_v38, %v5171_v23  ;;  %v5554_v27 = vshrl.u32 %v21993_v13, %v5539_v8  ;;  %v18189_v47 = vand.u32 3, %v4681_v63 }
 0x300   : > { %v5164_v29 = vadd.s32 %v18116_v51, %v18146_v41  ;;  %v5532_v30 = vor.u32 8388608, %v5531_v20  ;;  %vm5110_vm14 = vcmp.lt.s32.totalorder %v17870_v1, 0  ;;  %v5543_v38 = vor.u32 %v5542_v60, %v5541_v31 }
 0x301   : > { %v4672_v11 = vxor.u32 2147483648, %v4671_v36  ;;  %v5174_v48 = vsub.s32 0, %v18181_v57  ;;  %v5546_v14 = vor.u32 %v5545_v58, %v5544_v22  ;;  %v5549_v49 = vor.u32 %v5548_v9, %v5547_v21 }
 0x302   : > { %v5552_v0 = vor.u32 %v5551_v33, %v5550_v54  ;;  %vm5556_vm8 = vcmp.lt.s32.totalorder %v5537_v56, 1  ;;  %v5540_v51 = vshrl.u32 %v22040_v6, %v5539_v8  ;;  %v5555_v41 = vor.u32 %v5554_v27, %v5553_v34 }
 0x303   : > { %v4673_v18 = vsel %vm4590_vm5, %v4672_v11, %v4671_v36  ;;  %v14046_v2 = vmin.u32 %v5174_v48, %v18181_v57  ;;  %v18203_v15 = vmul.f32 %v15661_v55, %v719_v10  ;;  %vm18207_vm1 = vcmp.le.f32.partialorder %v5108_v43, 0.7853982 }
 0x304   : > { %v4676_v25 = vsel %vm18161_vm4, %v17867_v7, %v4673_v18  ;;  %vm5558_vm10 = vcmp.lt.s32.totalorder %v5537_v56, 3  ;;  %v18211_v52 = vshll.u32 %v5532_v30, 8  ;;  %vm9690_vm12 = vcmp.eq.s32.totalorder %v18170_v3, 2 }
 0x305   : > { %15122 = vcosq.f32 %v4676_v25  ;;  %v5176_v46 = vclz %v14046_v2  ;;  %v5194_v28 = vsub.s32 4, %v18168_v50  ;;  %vm5557_vm11 = vcmp.lt.s32.totalorder %v5537_v56, 2 }
 0x306   : > { %15124 = vsinq.f32 %v4676_v25  ;;  %vm5559_vm13 = vcmp.lt.s32.totalorder %v5537_v56, 4  ;;  %v5564_v8 = vsel %vm5556_vm8, %v5543_v38, %v5546_v14  ;;  %vm9687_vm9 = vcmp.eq.s32.totalorder %v18170_v3, 0 }
 0x307   : > { %v14047_v63 = vadd.s32 4294967294, %v5176_v46  ;;  %v5561_v20 = vsel %vm5559_vm13, %v5549_v49, 2102212464  ;;  %v5565_v43 = vsel %vm5559_vm13, %v5552_v0, 920167782  ;;  %v5568_v23 = vsel %vm5556_vm8, %v5546_v14, %v5549_v49 }
 0x308   : > { %vm4683_vm3 = vcmp.lt.s32.totalorder %v18189_v47, 2  ;;  %vm9686_vm5 = vcmp.lt.s32.totalorder %v18170_v3, 2  ;;  %v5560_v31 = vsel %vm5556_vm8, %v5540_v51, %v5543_v38  ;;  %v5566_v22 = vsel %vm5558_vm10, %v5549_v49, %v5565_v43 }
 0x309   : > { %v5569_v21 = vsel %vm5559_vm13, %v5555_v41, 1326507024  ;;  %v5007_v36 = vand.u32 2139095040, %v18203_v15  ;;  %vm4680_vm15 = vweird.f32 %v17867_v7  ;;  %vm14048_vm4 = vcmp.lt.s32.totalorder %v14047_v63, 0  ;;  %v15036_v7 = vld [vmem:[#allocation5 + $0x1f0] ss:$8 sps:$4 sm:$0xff]  }
 0x30a   : > { %v5562_v60 = vsel %vm5558_vm10, %v5546_v14, %v5561_v20  ;;  %v5567_v58 = vsel %vm5557_vm11, %v5564_v8, %v5566_v22  ;;  %v5570_v9 = vsel %vm5558_vm10, %v5552_v0, %v5569_v21  ;;  %v5179_v54 = vsel %vm14048_vm4, 0, %v14047_v63  ;;  %v15024_v20 = vld [vmem:[#allocation5 + $0x1d0] ss:$8 sps:$4 sm:$0xff]  }
 0x30b   : > { %v5571_v33 = vsel %vm5557_vm11, %v5568_v23, %v5570_v9  ;;  %v18229_v11 = vmul.u32.u64.low %v18211_v52, %v5567_v58  ;;  %v18230_v34 = vmul.u32.u64.high %v18211_v52, %v5567_v58, %v18229_v11  ;;  %v5180_v27 = vsub.s32 32, %v5179_v54  ;;  %v15027_v22 = vld [vmem:[#allocation5 + $0x3d0] ss:$8 sps:$4 sm:$0xff]  }
 0x30c   : > { %v5181_v10 = vshll.u32 %v18181_v57, %v5179_v54  ;;  %v5184_v48 = vsub.s32 4294967266, %v5179_v54  ;;  %v5195_v30 = vsel %vm5110_vm14, %v5194_v28, %v18168_v50  ;;  %v5563_v18 = vsel %vm5557_vm11, %v5560_v31, %v5562_v60  ;;  %v15026_v31 = vld [vmem:[#allocation5 + $0x1d4] ss:$8 sps:$4 sm:$0xff]  }
 0x30d   : > { %v18239_v38 = vmul.u32.u64.low %v18211_v52, %v5571_v33  ;;  %v18240_v14 = vmul.u32.u64.high %v18211_v52, %v5571_v33, %v18239_v38  ;;  %v5008_v49 = vshrl.u32 %v5007_v36, 23  ;;  %vm4684_vm2 = vcmp.eq.s32.totalorder %v18189_v47, 0  ;;  %13372 = vmatprep.subr.bf16.mxu1 %v15026_v31 }
 0x30e   : > { %vm4687_vm8 = vcmp.eq.s32.totalorder %v18189_v47, 2  ;;  %v5182_v25 = vshrl.u32 %v5164_v29, %v5180_v27  ;;  %v5185_v2 = vadd.s32 127, %v5184_v48  ;;  %v5197_v57 = vsel %vm18207_vm1, 0, %v5195_v30  ;;  %13373 = vmatpush1.bf16.msra.mxu1 %v15024_v20  ;;  %v15035_v38 = vld [vmem:[#allocation5 + $0x3e4] ss:$8 sps:$4 sm:$0xff]  }
 0x30f   : > { %v15123_v0 = vpop.eup %15122  ;;  %v5582_v51 = vadd.s32 1, %v18230_v34  ;;  %v5004_v50 = vand.u32 2147483647, %v18203_v15  ;;  %v14041_v56 = vadd.s32 4294967169, %v5008_v49  ;;  %v5579_v63 = vmul.u32 %v18211_v52, %v5563_v18  ;;  %v15029_v52 = vld [vmem:[#allocation5 + $0x3d4] ss:$8 sps:$4 sm:$0xff]  }
 0x310   : > { %v15125_v41 = vpop.eup %15124  ;;  %v4688_v46 = vxor.u32 2147483648, %v15123_v0  ;;  %v5183_v28 = vor.u32 %v5182_v25, %v5181_v10  ;;  %v5186_v8 = vshll.u32 %v5185_v2, 23  ;;  %vm5581_vm10 = vc.u32 %v18240_v14, %v18229_v11  ;;  %13598 = vmatprep.subr.bf16.mxu0 %v15029_v52  ;;  %v15030_v18 = vld [vmem:[#allocation5 + $0x1e0] ss:$8 sps:$4 sm:$0xff]  }
 0x311   : > { %v4685_v43 = vxor.u32 2147483648, %v15125_v41  ;;  %v5014_v29 = vadd.s32 1, %v14041_v56  ;;  %v735_v23 = vrot.slane %v17802_v12, %v15788_v61  ;;  %v5583_v33 = vsel %vm5581_vm10, %v5582_v51, %v18230_v34  ;;  %v15032_v61 = vld [vmem:[#allocation5 + $0x1e4] ss:$8 sps:$4 sm:$0xff]   ;;  %13599 = vmatpush1.bf16.msra.mxu0 %v15027_v22  ;;  %v15033_v47 = vld [vmem:[#allocation5 + $0x3e0] ss:$8 sps:$4 sm:$0xff]  }
 0x312   : > { %v4689_v21 = vsel %vm4687_vm8, %v4688_v46, %v15125_v41  ;;  %v9692_v36 = vsel %vm9690_vm12, %v4688_v46, %v15125_v41  ;;  %v5187_v60 = vor.u32 4788187, %v5186_v8  ;;  %v5190_v58 = vcvt.s32.f32 %v5183_v28  ;;  %13374 = vmatprep.subr.bf16.mxu1 %v15032_v61  ;;  %13600 = vmatprep.subr.bf16.mxu0 %v15035_v38  ;;  %v15038_v22 = vld [vmem:[#allocation5 + $0x1f4] ss:$8 sps:$4 sm:$0xff]  }
 0x313   : > { %v4686_v9 = vsel %vm4684_vm2, %v15123_v0, %v4685_v43  ;;  %v9689_v54 = vsel %vm9687_vm9, %v15123_v0, %v4685_v43  ;;  %vm5015_vm11 = vcmp.gt.s32.totalorder %v5014_v29, 0  ;;  %v5584_v30 = vadd.s32 %v5583_v33, %v5579_v63  ;;  %13375 = vmatpush1.bf16.msra.mxu1 %v15030_v18 }
 0x314   : > { %v4690_v27 = vsel %vm4683_vm3, %v4686_v9, %v4689_v21  ;;  %v9693_v10 = vsel %vm9686_vm5, %v9689_v54, %v9692_v36  ;;  %v5188_v48 = vand.u32 2147483647, %v5187_v60  ;;  %v5201_v25 = vadd.s32 3, %v5197_v57  ;;  %v15039_v60 = vld [vmem:[#allocation5 + $0x3f0] ss:$8 sps:$4 sm:$0xff]   ;;  %13376 = vmatprep.subr.bf16.mxu1 %v15038_v22 }
 0x315   : > { %v4691_v49 = vsel %vm4680_vm15, nan, %v4690_v27  ;;  %v9694_v34 = vsel %vm4680_vm15, nan, %v9693_v10  ;;  %v5016_v2 = vsel %vm5015_vm11, %v5014_v29, 0  ;;  %v5585_v56 = vadd.s32 536870912, %v5584_v30  ;;  %13601 = vmatpush1.bf16.msra.mxu0 %v15033_v47 }
 0x316   : > { %v5872_v0 = vpack.c.bf16 %v4691_v49, %v4691_v49  ;;  %v10864_v3 = vpack.c.bf16 %v9694_v34, %v9694_v34  ;;  %v5191_v51 = vmul.f32 %v5190_v58, %v5188_v48  ;;  %v5018_v41 = vand.u32 31, %v5016_v2  ;;  %v15041_v58 = vld [vmem:[#allocation5 + $0x3f4] ss:$8 sps:$4 sm:$0xff]  }
 0x317   : > { %v18272_v46 = vpack.i.b16 %v17127_v35, %v17127_v35  ;;  %v5586_v63 = vshrl.u32 %v5585_v56, 30  ;;  %v18274_v20 = vand.u32 3, %v5197_v57  ;;  %vm21935_vm12 = vcmp.lt.s32.totalorder %v18084_v53, 0  ;;  %13602 = vmatprep.subr.bf16.mxu0 %v15041_v58  ;;  %13377 = vmatpush1.bf16.msra.mxu1 %v15036_v7 }
 0x318   : > { %v10960_v28 = vrot.slane %v10864_v3, 4  ;;  %v5192_v8 = vxor.u32 2147483648, %v5191_v51  ;;  %v5011_v43 = vand.u32 8388607, %v5004_v50  ;;  %v5019_v29 = vsub.s32 32, %v5018_v41 }
 0x319   : > { %v18280_v31 = vmul.f32 %v15661_v55, %v735_v23  ;;  %v18285_v36 = vand.u32 3, %v5201_v25  ;;  %v5587_v57 = vshll.u32 %v5586_v63, 30  ;;  %v5021_v23 = vshll.u32 %v22040_v6, %v5018_v41  ;;  %13603 = vmatpush1.bf16.msra.mxu0 %v15039_v60 }
 0x31a   : > { %v11119_v35 = vsel %vm21965_vm0, %v5872_v0, %v10960_v28  ;;  %v5193_v21 = vsel %vm5110_vm14, %v5192_v8, %v5191_v51  ;;  %v5024_v54 = vshll.u32 %v21991_v16, %v5018_v41  ;;  %v5022_v61 = vshrl.u32 %v21991_v16, %v5019_v29 }
 0x31b   : > { %v11401_v52 = vmul.bf16 %v17794_v5, %v11119_v35  ;;  %v5196_v9 = vsel %vm18207_vm1, %v17870_v1, %v5193_v21  ;;  %v18293_v33 = vsub.s32 %v5584_v30, %v5587_v57  ;;  %v5025_v27 = vshrl.u32 %v21992_v37, %v5019_v29 }
 0x31c   : > { %15126 = vcosq.f32 %v5196_v9  ;;  %v5017_v10 = vshrl.u32 %v5016_v2, 5  ;;  %v5027_v26 = vshll.u32 %v21992_v37, %v5018_v41  ;;  %v5028_v48 = vshrl.u32 %v22004_v39, %v5019_v29 }
 0x31d   : > { %13542 = vmatmul.mubr.bf16.gmra.mrb[20].mxu0 %v11401_v52  ;;  %15128 = vsinq.f32 %v5196_v9  ;;  %vm5207_vm14 = vcmp.eq.s32.totalorder %v18285_v36, 2  ;;  %vm10205_vm1 = vcmp.eq.s32.totalorder %v18274_v20, 2  ;;  %v5590_v30 = vsub.s32 0, %v18293_v33 }
 0x31e   : > { %v5610_v18 = vsub.s32 4, %v5586_v63  ;;  %v5012_v38 = vor.u32 8388608, %v5011_v43  ;;  %vm5204_vm13 = vcmp.eq.s32.totalorder %v18285_v36, 0  ;;  %vm10202_vm9 = vcmp.eq.s32.totalorder %v18274_v20, 0 }
 0x31f   : > { %v5580_v49 = vadd.s32 %v18229_v11, %v18240_v14  ;;  %v5030_v34 = vshll.u32 %v22004_v39, %v5018_v41  ;;  %v5031_v25 = vshrl.u32 %v22005_v59, %v5019_v29  ;;  %v5033_v2 = vshll.u32 %v22005_v59, %v5018_v41 }
 0x320   : > { %vm5203_vm3 = vcmp.lt.s32.totalorder %v18285_v36, 2  ;;  %vm10201_vm5 = vcmp.lt.s32.totalorder %v18274_v20, 2  ;;  %v14062_v47 = vmin.u32 %v5590_v30, %v18293_v33  ;;  %v5020_v0 = vshrl.u32 %v22040_v6, %v5019_v29 }
 0x321   : > { %v5023_v3 = vor.u32 %v5022_v61, %v5021_v23  ;;  %v5026_v51 = vor.u32 %v5025_v27, %v5024_v54  ;;  %vm5200_vm15 = vweird.f32 %v17870_v1  ;;  %v5029_v56 = vor.u32 %v5028_v48, %v5027_v26 }
 0x322   : > { %v5032_v11 = vor.u32 %v5031_v25, %v5030_v34  ;;  %v5034_v14 = vshrl.u32 %v21993_v13, %v5019_v29  ;;  %vm5036_vm4 = vcmp.lt.s32.totalorder %v5017_v10, 1  ;;  %v5592_v28 = vclz %v14062_v47 }
 0x323   : > { %v5611_v41 = vsel %vm21935_vm12, %v5610_v18, %v5586_v63  ;;  %v18317_v8 = vshll.u32 %v5012_v38, 8  ;;  %v5423_v7 = vand.u32 2139095040, %v18280_v31  ;;  %vm5037_vm2 = vcmp.lt.s32.totalorder %v5017_v10, 2 }
 0x324   : > { %v5035_v43 = vor.u32 %v5034_v14, %v5033_v2  ;;  %vm5038_vm8 = vcmp.lt.s32.totalorder %v5017_v10, 3  ;;  %vm5039_vm10 = vcmp.lt.s32.totalorder %v5017_v10, 4  ;;  %vm18322_vm11 = vcmp.le.f32.partialorder %v5524_v32, 0.7853982 }
 0x325   : > { %v14063_v29 = vadd.s32 4294967294, %v5592_v28  ;;  %v5040_v35 = vsel %vm5036_vm4, %v5020_v0, %v5023_v3  ;;  %v5041_v21 = vsel %vm5039_vm10, %v5029_v56, 2102212464  ;;  %v5044_v63 = vsel %vm5036_vm4, %v5023_v3, %v5026_v51 }
 0x326   : > { %v5042_v57 = vsel %vm5038_vm8, %v5026_v51, %v5041_v21  ;;  %v5045_v60 = vsel %vm5039_vm10, %v5032_v11, 920167782  ;;  %v5048_v58 = vsel %vm5036_vm4, %v5026_v51, %v5029_v56  ;;  %v5049_v52 = vsel %vm5039_vm10, %v5035_v43, 1326507024  ;;  %v15127_v9 = vpop.eup %15126 }
 0x327   : > { %vm14064_vm12 = vcmp.lt.s32.totalorder %v14063_v29, 0  ;;  %v5043_v23 = vsel %vm5037_vm2, %v5040_v35, %v5042_v57  ;;  %v5046_v54 = vsel %vm5038_vm8, %v5029_v56, %v5045_v60  ;;  %v5050_v32 = vsel %vm5038_vm8, %v5032_v11, %v5049_v52  ;;  %v15129_v61 = vpop.eup %15128 }
 0x328   : > { %v5208_v27 = vxor.u32 2147483648, %v15127_v9  ;;  %v5595_v26 = vsel %vm14064_vm12, 0, %v14063_v29  ;;  %v5047_v48 = vsel %vm5037_vm2, %v5044_v63, %v5046_v54  ;;  %v5051_v30 = vsel %vm5037_vm2, %v5048_v58, %v5050_v32 }
 0x329   : > { %v5205_v18 = vxor.u32 2147483648, %v15129_v61  ;;  %v5596_v38 = vsub.s32 32, %v5595_v26  ;;  %v5597_v34 = vshll.u32 %v18293_v33, %v5595_v26  ;;  %v5600_v25 = vsub.s32 4294967266, %v5595_v26 }
 0x32a   : > { %v5209_v2 = vsel %vm5207_vm14, %v5208_v27, %v15129_v61  ;;  %v10207_v47 = vsel %vm10205_vm1, %v5208_v27, %v15129_v61  ;;  %v18338_v0 = vmul.u32.u64.low %v18317_v8, %v5051_v30  ;;  %v18339_v3 = vmul.u32.u64.high %v18317_v8, %v5051_v30, %v18338_v0  ;;  %v22073_v61 = vld [vmem:[#allocation21_spill] sm:$0xff] }
 0x32b   : > { %v5206_v51 = vsel %vm5204_vm13, %v15127_v9, %v5205_v18  ;;  %v10204_v10 = vsel %vm10202_vm9, %v15127_v9, %v5205_v18  ;;  %v5598_v56 = vshrl.u32 %v5580_v49, %v5596_v38  ;;  %v5601_v11 = vadd.s32 127, %v5600_v25  ;;  %v22072_v9 = vld [vmem:[#allocation26_spill] sm:$0xff] }
 0x32c   : > { %v5210_v33 = vsel %vm5203_vm3, %v5206_v51, %v5209_v2  ;;  %v10208_v14 = vsel %vm10201_vm5, %v10204_v10, %v10207_v47  ;;  %v18350_v28 = vmul.u32.u64.low %v18317_v8, %v5047_v48  ;;  %v18351_v43 = vmul.u32.u64.high %v18317_v8, %v5047_v48, %v18350_v28  ;;  %v22074_v10 = vld [vmem:[#allocation25_spill] sm:$0xff] }
 0x32d   : > { %v5211_v29 = vsel %vm5200_vm15, nan, %v5210_v33  ;;  %v10209_v35 = vsel %vm5200_vm15, nan, %v10208_v14  ;;  %v5599_v21 = vor.u32 %v5598_v56, %v5597_v34  ;;  %v5602_v49 = vshll.u32 %v5601_v11, 23 }
 0x32e   : > { %v5877_v63 = vpack.c.bf16 %v5211_v29, %v5211_v29  ;;  %v10869_v57 = vpack.c.bf16 %v10209_v35, %v10209_v35  ;;  %v5613_v36 = vsel %vm18322_vm11, 0, %v5611_v41  ;;  %v5059_v20 = vmul.u32 %v18317_v8, %v5043_v23  ;;  %v18369_v41 = vld [vmem:[%s16639_s17 + $0x20] sm:$0x77] }
 0x32f   : > { %v5603_v60 = vor.u32 4788187, %v5602_v49  ;;  %v5606_v58 = vcvt.s32.f32 %v5599_v21  ;;  %vm5061_vm12 = vc.u32 %v18339_v3, %v18350_v28  ;;  %v5424_v52 = vshrl.u32 %v5423_v7, 23 }
 0x330   : > { %v18363_v54 = vpack.i.b16 %v22072_v9, %v22072_v9  ;;  %v10965_v1 = vrot.slane %v10869_v57, 4  ;;  %v5062_v32 = vadd.s32 1, %v18351_v43  ;;  %v11469_v27 = vpack.i.b16 %v22073_v61, %v22073_v61 }
 0x331   : > { %v5604_v26 = vand.u32 2147483647, %v5603_v60  ;;  %v14057_v48 = vadd.s32 4294967169, %v5424_v52  ;;  %v5617_v23 = vadd.s32 3, %v5613_v36  ;;  %v5420_v7 = vand.u32 2147483647, %v18280_v31 }
 0x332   : > { %v11139_v8 = vsel %vm21965_vm0, %v5877_v63, %v10965_v1  ;;  %v5063_v30 = vsel %vm5061_vm12, %v5062_v32, %v18351_v43  ;;  %v11480_v2 = vrot.slane %v18272_v46, %v15632_v19  ;;  %v11732_v47 = vrot.slane %v18272_v46, %v15637_v24  ;;  %v15242_v46 = vld [vmem:[%s15612_s7 + $0x48] sm:$0xff] }
 0x333   : > { %v11406_v18 = vmul.bf16 %v17434_v45, %v11139_v8  ;;  %v5607_v38 = vmul.f32 %v5606_v58, %v5604_v26  ;;  %v5064_v34 = vadd.s32 %v5063_v30, %v5059_v20  ;;  %v5430_v25 = vadd.s32 1, %v14057_v48 }
 0x334   : > { %v11504_v0 = vrot.slane %v18363_v54, %v15632_v19  ;;  %v11474_v51 = vrot.slane %v11469_v27, %v15632_v19  ;;  %v18384_v56 = vmul.bf16 %v22074_v10, %v18369_v41  ;;  %v18386_v14 = vand.u32 3, %v5613_v36 }
 0x335   : > { %13325 = vmatprep.mubr.bf16.mxu1 %v11406_v18  ;;  %v5608_v11 = vxor.u32 2147483648, %v5607_v38  ;;  %v5065_v33 = vadd.s32 536870912, %v5064_v34  ;;  %vm5431_vm14 = vcmp.gt.s32.totalorder %v5430_v25, 0  ;;  %v5427_v43 = vand.u32 8388607, %v5420_v7 }
 0x336   : > { %v5432_v29 = vsel %vm5431_vm14, %v5430_v25, 0  ;;  %v11822_v35 = vpack.c.bf16 %v15242_v46, %v15242_v46  ;;  %vm22075_vm1 = vcmp.lt.s32.totalorder %v18084_v53, 0  ;;  %v18393_v49 = vand.u32 3, %v5617_v23 }
 0x337   : > { %v5609_v21 = vsel %vm22075_vm1, %v5608_v11, %v5607_v38  ;;  %v18395_v63 = vshrl.u32 %v5065_v33, 30  ;;  %v5434_v57 = vand.u32 31, %v5432_v29  ;;  %v11748_v20 = vrot.slane %v18363_v54, %v15637_v24 }
 0x338   : > { %v5612_v36 = vsel %vm18322_vm11, %v18084_v53, %v5609_v21  ;;  %v18403_v60 = vadd.s32 %v18350_v28, %v18339_v3  ;;  %v14269_v58 = vcombine.low %v11474_v51, %v11480_v2  ;;  %v11728_v1 = vrot.slane %v11469_v27, %v15637_v24 }
 0x339   : > { %15130 = vcosq.f32 %v5612_v36  ;;  %v5067_v52 = vshll.u32 %v18395_v63, 30  ;;  %v5435_v9 = vsub.s32 32, %v5434_v57  ;;  %v5428_v32 = vor.u32 8388608, %v5427_v43 }
 0x33a   : > { %15132 = vsinq.f32 %v5612_v36  ;;  %v18408_v61 = vmul.bf16 %v11822_v35, %v17434_v45  ;;  %v14314_v26 = vcombine.high %v18384_v56, %v18384_v56  ;;  %vm5623_vm13 = vcmp.eq.s32.totalorder %v18393_v49, 2 }
 0x33b   : > { %vm10617_vm9 = vcmp.eq.s32.totalorder %v18386_v14, 2  ;;  %v18414_v22 = vsub.s32 %v5064_v34, %v5067_v52  ;;  %v5437_v3 = vshll.u32 %v22040_v6, %v5434_v57  ;;  %v5438_v28 = vshrl.u32 %v21991_v16, %v5435_v9 }
 0x33c   : > { %v5440_v27 = vshll.u32 %v21991_v16, %v5434_v57  ;;  %vm5620_vm3 = vcmp.eq.s32.totalorder %v18393_v49, 0  ;;  %vm10614_vm5 = vcmp.eq.s32.totalorder %v18386_v14, 0  ;;  %v18421_v45 = vshrl.u32 %v5432_v29, 5 }
 0x33d   : > { %v5441_v48 = vshrl.u32 %v21992_v37, %v5435_v9  ;;  %v5446_v8 = vshll.u32 %v22004_v39, %v5434_v57  ;;  %v18426_v23 = vmul.bf16 %v14269_v58, %v18369_v41  ;;  %vm5619_vm15 = vcmp.lt.s32.totalorder %v18393_v49, 2 }
 0x33e   : > { %vm10613_vm4 = vcmp.lt.s32.totalorder %v18386_v14, 2  ;;  %v5070_v30 = vsub.s32 0, %v18414_v22  ;;  %v5443_v18 = vshll.u32 %v21992_v37, %v5434_v57  ;;  %v5444_v38 = vshrl.u32 %v22004_v39, %v5435_v9 }
 0x33f   : > { %v14285_v34 = vcombine.low %v11728_v1, %v11732_v47  ;;  %vm5616_vm2 = vweird.f32 %v18084_v53  ;;  %v5447_v25 = vshrl.u32 %v22005_v59, %v5435_v9  ;;  %v5449_v2 = vshll.u32 %v22005_v59, %v5434_v57 }
 0x340   : > { %v18436_v51 = vshll.u32 %v5428_v32, 8  ;;  %v18440_v10 = vpack.i.b16 %v17220_v44, %v17220_v44  ;;  %v14042_v11 = vmin.u32 %v5070_v30, %v18414_v22  ;;  %v5439_v33 = vor.u32 %v5438_v28, %v5437_v3 }
 0x341   : > { %v5442_v43 = vor.u32 %v5441_v48, %v5440_v27  ;;  %v12052_v29 = vshrl.u32 %v18408_v61, 16  ;;  %v5436_v47 = vshrl.u32 %v22040_v6, %v5435_v9  ;;  %v5448_v46 = vor.u32 %v5447_v25, %v5446_v8 }
 0x342   : > { %v5450_v35 = vshrl.u32 %v21993_v13, %v5435_v9  ;;  %vm5452_vm8 = vcmp.lt.s32.totalorder %v18421_v45, 1  ;;  %v5072_v21 = vclz %v14042_v11  ;;  %v5445_v57 = vor.u32 %v5444_v38, %v5443_v18 }
 0x343   : > { %v18448_v36 = vmul.bf16 %v14285_v34, %v18369_v41  ;;  %v14298_v44 = vcombine.high %v18426_v23, %v18426_v23  ;;  %v5090_v58 = vsub.s32 4, %v18395_v63  ;;  %vm5454_vm10 = vcmp.lt.s32.totalorder %v18421_v45, 3  ;;  %v15131_v1 = vpop.eup %15130 }
 0x344   : > { %v5451_v52 = vor.u32 %v5450_v35, %v5449_v2  ;;  %vm5455_vm11 = vcmp.lt.s32.totalorder %v18421_v45, 4  ;;  %v14043_v32 = vadd.s32 4294967294, %v5072_v21  ;;  %vm5453_vm12 = vcmp.lt.s32.totalorder %v18421_v45, 2  ;;  %v15133_v3 = vpop.eup %15132  ;;  %v11419_v45 = vld [vmem:[%s16639_s17 + $0x30] sm:$0x77] }
 0x345   : > { %v5457_v9 = vsel %vm5455_vm11, %v5445_v57, 2102212464  ;;  %v5460_v41 = vsel %vm5452_vm8, %v5439_v33, %v5442_v43  ;;  %v5624_v28 = vxor.u32 2147483648, %v15131_v1  ;;  %v5456_v27 = vsel %vm5452_vm8, %v5436_v47, %v5439_v33 }
 0x346   : > { %v5458_v48 = vsel %vm5454_vm10, %v5442_v43, %v5457_v9  ;;  %v5461_v8 = vsel %vm5455_vm11, %v5448_v46, 920167782  ;;  %v5621_v30 = vxor.u32 2147483648, %v15133_v3  ;;  %vm14044_vm14 = vcmp.lt.s32.totalorder %v14043_v32, 0 }
 0x347   : > { %v5462_v18 = vsel %vm5454_vm10, %v5445_v57, %v5461_v8  ;;  %v5464_v38 = vsel %vm5452_vm8, %v5442_v43, %v5445_v57  ;;  %v5625_v34 = vsel %vm5623_vm13, %v5624_v28, %v15133_v3  ;;  %v10619_v25 = vsel %vm10617_vm9, %v5624_v28, %v15133_v3 }
 0x348   : > { %v5075_v2 = vsel %vm14044_vm14, 0, %v14043_v32  ;;  %v5463_v11 = vsel %vm5453_vm12, %v5460_v41, %v5462_v18  ;;  %v5622_v33 = vsel %vm5620_vm3, %v15131_v1, %v5621_v30  ;;  %v10616_v47 = vsel %vm10614_vm5, %v15131_v1, %v5621_v30 }
 0x349   : > { %vm5006_vm1 = vcmp.lt.s32.totalorder %v18203_v15, 0  ;;  %v5076_v35 = vsub.s32 32, %v5075_v2  ;;  %v5077_v43 = vshll.u32 %v18414_v22, %v5075_v2  ;;  %v5626_v21 = vsel %vm5619_vm15, %v5622_v33, %v5625_v34 }
 0x34a   : > { %v10620_v57 = vsel %vm10613_vm4, %v10616_v47, %v10619_v25  ;;  %v5080_v32 = vsub.s32 4294967266, %v5075_v2  ;;  %v5465_v9 = vsel %vm5455_vm11, %v5451_v52, 1326507024  ;;  %v5627_v41 = vsel %vm5616_vm2, nan, %v5626_v21 }
 0x34b   : > { %v10621_v1 = vsel %vm5616_vm2, nan, %v10620_v57  ;;  %v5078_v3 = vshrl.u32 %v18403_v60, %v5076_v35  ;;  %v5466_v49 = vsel %vm5454_vm10, %v5448_v46, %v5465_v9  ;;  %v5881_v22 = vpack.c.bf16 %v5627_v41, %v5627_v41 }
 0x34c   : > { %v10873_v28 = vpack.c.bf16 %v10621_v1, %v10621_v1  ;;  %v5081_v14 = vadd.s32 127, %v5080_v32  ;;  %v5467_v8 = vsel %vm5453_vm12, %v5464_v38, %v5466_v49  ;;  %v5459_v52 = vsel %vm5453_vm12, %v5456_v27, %v5458_v48 }
 0x34d   : > { %v5079_v30 = vor.u32 %v5078_v3, %v5077_v43  ;;  %v18500_v18 = vmul.u32.u64.low %v18436_v51, %v5467_v8  ;;  %v18501_v53 = vmul.u32.u64.high %v18436_v51, %v5467_v8, %v18500_v18  ;;  %v14330_v33 = vcombine.high %v18448_v36, %v18448_v36  ;;  %v15243_v8 = vld [vmem:[%s15612_s7 + $0x68] sm:$0xff] }
 0x34e   : > { %v10969_v34 = vrot.slane %v10873_v28, 4  ;;  %v5082_v60 = vshll.u32 %v5081_v14, 23  ;;  %v18504_v25 = vmul.u32.u64.low %v18436_v51, %v5463_v11  ;;  %v18505_v2 = vmul.u32.u64.high %v18436_v51, %v5463_v11, %v18504_v25 }
 0x34f   : > { %v5086_v46 = vcvt.s32.f32 %v5079_v30  ;;  %v12054_v38 = vrot.slane %v12052_v29, 6  ;;  %v12055_v47 = vshll.u32 %v18408_v61, 16  ;;  %vm22076_vm13 = vcmask 1040384  }
 0x350   : > { %v11155_v27 = vsel %vm21965_vm0, %v5881_v22, %v10969_v34  ;;  %v5083_v48 = vor.u32 4788187, %v5082_v60  ;;  %v12245_v35 = vsel %vm22076_vm13, %v14298_v44, %v14314_v26  ;;  %v11498_v11 = vrot.slane %v18440_v10, %v15632_v19  ;;  %v11856_v44 = vpop.permute.xlu0 %11855  ;;  %v11858_v22 = vld [vmem:[%s16925_s10 + $0x8] sm:$0xff]  ;;  %vm22083_vm4 = vmmov %vm22076_vm13 }
 0x351   : > { %v11410_v43 = vmul.bf16 %v17438_v42, %v11155_v27  ;;  %v5475_v21 = vmul.u32 %v18436_v51, %v5459_v52  ;;  %vm5477_vm9 = vc.u32 %v18501_v53, %v18504_v25  ;;  %v12057_v61 = vrot.slane %v12055_v47, 7 }
 0x352   : > { %v5084_v29 = vand.u32 2147483647, %v5083_v48  ;;  %v5091_v57 = vsel %vm5006_vm1, %v5090_v58, %v18395_v63  ;;  %v5478_v32 = vadd.s32 1, %v18505_v2  ;;  %vm22077_vm3 = vcmask 1041408  }
 0x353   : > { %v12284_v26 = vsel %vm22077_vm3, %v12245_v35, %v14330_v33  ;;  %v18529_v9 = vmul.bf16 %v17572_v4, %v11419_v45  ;;  %13551 = vmatprep.mubr.bf16.mxu0 %v11410_v43  ;;  %v14271_v51 = vcombine.low %v11498_v11, %v11504_v0  ;;  %v11744_v41 = vrot.slane %v18440_v10, %v15637_v24  ;;  %vm22084_vm2 = vmmov %vm22077_vm3 }
 0x354   : > { %vm18538_vm5 = vcmp.le.f32.partialorder %v5004_v50, 0.7853982  ;;  %v5087_v58 = vmul.f32 %v5086_v46, %v5084_v29  ;;  %v5479_v1 = vsel %vm5477_vm9, %v5478_v32, %v18505_v2  ;;  %v12058_v4 = vor.u32 %v12057_v61, %v12054_v38 }
 0x355   : > { %v5093_v3 = vsel %vm18538_vm5, 0, %v5091_v57  ;;  %v5480_v49 = vadd.s32 %v5479_v1, %v5475_v21  ;;  %v18546_v28 = vmul.bf16 %v14271_v51, %v11419_v45  ;;  %v14287_v0 = vcombine.low %v11744_v41, %v11748_v20  ;;  %v18584_v21 = vld [vmem:[%s15588_s15] sm:$0xff] }
 0x356   : > { %v12110_v10 = vshll.u32 %v11856_v44, 16  ;;  %v5088_v50 = vxor.u32 2147483648, %v5087_v58  ;;  %v18552_v14 = vrot.slane %v11858_v22, %v15615_v62  ;;  %v11826_v30 = vpack.c.bf16 %v15243_v8, %v15243_v8  ;;  %v15245_v57 = vld [vmem:[%s15612_s7 + $0x40] sm:$0xff] }
 0x357   : > { %v5481_v52 = vadd.s32 536870912, %v5480_v49  ;;  %v18555_v18 = vmul.bf16 %v14287_v0, %v11419_v45  ;;  %v14302_v34 = vcombine.high %v18546_v28, %v18546_v28  ;;  %v14318_v60 = vcombine.high %v18529_v9, %v18529_v9 }
 0x358   : > { %v5089_v54 = vsel %vm5006_vm1, %v5088_v50, %v5087_v58  ;;  %v5097_v20 = vadd.s32 3, %v5093_v3  ;;  %vm22080_vm15 = vcmask 1042432   ;;  %v18571_v38 = vrot.slane %v18552_v14, %v15615_v62 }
 0x359   : > { %v12317_v2 = vsel %vm22080_vm15, %v12284_v26, %v12058_v4  ;;  %v5092_v46 = vsel %vm18538_vm5, %v18203_v15, %v5089_v54  ;;  %v18567_v33 = vshrl.u32 %v5481_v52, 30  ;;  %v14334_v47 = vcombine.high %v18555_v18, %v18555_v18  ;;  %v18593_v26 = vld [vmem:[%s15588_s15 + $0x8] sm:$0xff]  ;;  %vm22088_vm5 = vmmov %vm22083_vm4 }
 0x35a   : > { %22081 = vst [vmem:[#allocation26_spill] sm:$0xff] %v18571_v38  ;;  %v18575_v45 = vrot.slane %v12110_v10, 3  ;;  %15134 = vcosq.f32 %v5092_v46  ;;  %v18577_v27 = vand.u32 3, %v5093_v3  ;;  %v11842_v48 = vmul.bf16 %v11826_v30, %v17438_v42  ;;  %vm22090_vm15 = vmmov %vm22084_vm2 }
 0x35b   : > { %15136 = vsinq.f32 %v5092_v46  ;;  %v5483_v35 = vshll.u32 %v18567_v33, 30  ;;  %v12348_v11 = vsel %vm21965_vm0, %v12317_v2, %v12058_v4  ;;  %v12257_v43 = vsel %vm22083_vm4, %v14302_v34, %v14318_v60 }
 0x35c   : > { %22082 = vst [vmem:[#allocation21_spill] sm:$0xff] %v18575_v45  ;;  %v11169_v61 = vcombine.high %v18584_v21, %v18584_v21  ;;  %v18589_v29 = vsel %vm22084_vm2, %v12257_v43, %v14334_v47  ;;  %v11821_v32 = vpack.c.bf16 %v15245_v57, %v15245_v57  ;;  %v11186_v42 = vcombine.high %v18593_v26, %v18593_v26 }
 0x35d   : > { %v5098_v44 = vand.u32 3, %v5097_v20  ;;  %v18597_v51 = vsub.s32 %v5480_v49, %v5483_v35  ;;  %v12213_v41 = vcombine.low %v18571_v38, %v18571_v38  ;;  %v12374_v58 = vsel %vm17005_vm7, %v12348_v11, %v18575_v45 }
 0x35e   : > { %v12084_v1 = vshrl.u32 %v11842_v48, 16  ;;  %v12087_v4 = vshll.u32 %v11842_v48, 16  ;;  %v11837_v3 = vmul.bf16 %v11821_v32, %v17630_v17  ;;  %vm5096_vm8 = vweird.f32 %v18203_v15 }
 0x35f   : > { %vm10098_vm10 = vcmp.lt.s32.totalorder %v18577_v27, 2  ;;  %vm10099_vm11 = vcmp.eq.s32.totalorder %v18577_v27, 0  ;;  %v5486_v49 = vsub.s32 0, %v18597_v51  ;;  %v12166_v0 = vcombine.high %v11858_v22, %v11858_v22 }
 0x360   : > { %v14297_v10 = vcombine.low %v18426_v23, %v18426_v23  ;;  %v14313_v50 = vcombine.low %v18384_v56, %v18384_v56  ;;  %v12044_v8 = vshrl.u32 %v11837_v3, 16  ;;  %v12047_v30 = vshll.u32 %v11837_v3, 16 }
 0x361   : > { %vm10102_vm12 = vcmp.eq.s32.totalorder %v18577_v27, 2  ;;  %v14058_v52 = vmin.u32 %v5486_v49, %v18597_v51  ;;  %vm22086_vm14 = vcmask 1045504   ;;  %v14329_v60 = vcombine.low %v18448_v36, %v18448_v36 }
 0x362   : > { %v18616_v34 = vsel %vm22086_vm14, %v12374_v58, %v12213_v41  ;;  %vm5099_vm1 = vcmp.lt.s32.totalorder %v5098_v44, 2  ;;  %vm5100_vm13 = vcmp.eq.s32.totalorder %v5098_v44, 0  ;;  %v12086_v22 = vrot.slane %v12084_v1, 6 }
 0x363   : > { %v12089_v54 = vrot.slane %v12087_v4, 7  ;;  %v5488_v23 = vclz %v14058_v52  ;;  %v18621_v20 = vrot.slane %v12166_v0, %v15615_v62  ;;  %v12046_v56 = vrot.slane %v12044_v8, 6 }
 0x364   : > { %v12049_v2 = vrot.slane %v12047_v30, 7  ;;  %v15135_v46 = vpop.eup %15134  ;;  %vm5103_vm9 = vcmp.eq.s32.totalorder %v5098_v44, 2  ;;  %vm5422_vm3 = vcmp.lt.s32.totalorder %v18280_v31, 0  ;;  %v5476_v47 = vadd.s32 %v18504_v25, %v18501_v53  ;;  %v15247_v30 = vld [vmem:[%s15612_s7 + $0x60] sm:$0xff] }
 0x365   : > { %v12458_v36 = vsel %vm17035_vm6, %v18616_v34, 0  ;;  %v12242_v35 = vsel %vm22088_vm5, %v14297_v10, %v14313_v50  ;;  %v15137_v11 = vpop.eup %15136  ;;  %v5104_v43 = vxor.u32 2147483648, %v15135_v46  ;;  %v14059_v57 = vadd.s32 4294967294, %v5488_v23 }
 0x366   : > { %v18632_v32 = vrot.slane %v18621_v20, %v15615_v62  ;;  %v12282_v41 = vsel %vm22090_vm15, %v12242_v35, %v14329_v60  ;;  %v5101_v58 = vxor.u32 2147483648, %v15137_v11  ;;  %v5506_v1 = vsub.s32 4, %v18567_v33 }
 0x367   : > { %v12090_v53 = vor.u32 %v12089_v54, %v12086_v22  ;;  %v12181_v25 = vcombine.low %v18552_v14, %v18552_v14  ;;  %v5105_v4 = vsel %vm5103_vm9, %v5104_v43, %v15137_v11  ;;  %v10104_v3 = vsel %vm10102_vm12, %v5104_v43, %v15137_v11 }
 0x368   : > { %22089 = vst [vmem:[#allocation25_spill] sm:$0xff] %v18632_v32  ;;  %vm14060_vm4 = vcmp.lt.s32.totalorder %v14059_v57, 0  ;;  %v12050_v49 = vor.u32 %v12049_v2, %v12046_v56  ;;  %v5102_v0 = vsel %vm5100_vm13, %v15135_v46, %v5101_v58  ;;  %v10101_v10 = vsel %vm10099_vm11, %v15135_v46, %v5101_v58  ;;  %v22094_v58 = vld [vmem:[#allocation11_spill] sm:$0xff] }
 0x369   : > { %vm18645_vm2 = vcmp.le.f32.partialorder %v5420_v7, 0.7853982  ;;  %v5491_v8 = vsel %vm14060_vm4, 0, %v14059_v57  ;;  %v11825_v14 = vpack.c.bf16 %v15247_v30, %v15247_v30  ;;  %v5106_v52 = vsel %vm5099_vm1, %v5102_v0, %v5105_v4 }
 0x36a   : > { %v10105_v34 = vsel %vm10098_vm10, %v10101_v10, %v10104_v3  ;;  %v5492_v60 = vsub.s32 32, %v5491_v8  ;;  %v5493_v22 = vshll.u32 %v18597_v51, %v5491_v8  ;;  %v5107_v54 = vsel %vm5096_vm8, nan, %v5106_v52  ;;  %vm22097_vm10 = vmmov %vm22090_vm15 }
 0x36b   : > { %v10106_v7 = vsel %vm5096_vm8, nan, %v10105_v34  ;;  %v5496_v23 = vsub.s32 4294967266, %v5491_v8  ;;  %v14301_v56 = vcombine.low %v18546_v28, %v18546_v28  ;;  %v5876_v2 = vpack.c.bf16 %v5107_v54, %v5107_v54  ;;  %vm22096_vm8 = vmmov %vm22088_vm5  ;;  %v22099_v34 = vld [vmem:[#allocation13_spill] sm:$0xff] }
 0x36c   : > { %v10868_v46 = vpack.c.bf16 %v10106_v7, %v10106_v7  ;;  %v5494_v44 = vshrl.u32 %v5476_v47, %v5492_v60  ;;  %vm22093_vm11 = vcmask 1042432   ;;  %v11841_v11 = vmul.bf16 %v11825_v14, %v17794_v5  ;;  %vm22103_vm5 = vmmov %vm22086_vm14 }
 0x36d   : > { %v12315_v35 = vsel %vm22093_vm11, %v12282_v41, %v12050_v49  ;;  %v5497_v27 = vadd.s32 127, %v5496_v23  ;;  %v14317_v51 = vcombine.low %v18529_v9, %v18529_v9  ;;  %v14333_v43 = vcombine.low %v18555_v18, %v18555_v18  ;;  %vm22098_vm12 = vmmov %vm22093_vm11 }
 0x36e   : > { %v10964_v15 = vrot.slane %v10868_v46, 4  ;;  %v5495_v57 = vor.u32 %v5494_v44, %v5493_v22  ;;  %v5507_v28 = vsel %vm5422_vm3, %v5506_v1, %v18567_v33  ;;  %v18670_v4 = vsub.s32 3, %v22094_v58  ;;  %vm22102_vm1 = vmmov %vm22093_vm11 }
 0x36f   : > { %v5498_v47 = vshll.u32 %v5497_v27, 23  ;;  %v18673_v41 = vrot.slane %v12181_v25, %v15615_v62  ;;  %v12076_v3 = vshrl.u32 %v11841_v11, 16  ;;  %v12254_v0 = vsel %vm22096_vm8, %v14301_v56, %v14317_v51 }
 0x370   : > { %v11135_v9 = vsel %vm21965_vm0, %v5876_v2, %v10964_v15  ;;  %v12346_v18 = vsel %vm21965_vm0, %v12315_v35, %v12050_v49  ;;  %v12079_v10 = vshll.u32 %v11841_v11, 16  ;;  %v12290_v8 = vsel %vm22097_vm10, %v12254_v0, %v14333_v43  ;;  %v22100_v49 = vld [vmem:[#allocation12_spill] sm:$0xff] }
 0x371   : > { %22095 = vst [vmem:[#allocation18_spill] sm:$0xff] %v18673_v41  ;;  %v11405_v30 = vmul.bf16 %v17630_v17, %v11135_v9  ;;  %v5499_v33 = vor.u32 4788187, %v5498_v47  ;;  %v5502_v1 = vcvt.s32.f32 %v5495_v57  ;;  %v12214_v14 = vcombine.low %v18632_v32, %v18632_v32 }
 0x372   : > { %v5509_v25 = vsel %vm18645_vm2, 0, %v5507_v28  ;;  %v12325_v52 = vsel %vm22098_vm12, %v18589_v29, %v12090_v53  ;;  %v571_v60 = vrot.slane %v22099_v34, %v18670_v4  ;;  %v18692_v22 = vrot.slane %v11169_v61, %v22100_v49 }
 0x373   : > { %13326 = vmatmul.mubr.bf16.gmra.mrb[24].mxu1 %v11405_v30  ;;  %v5500_v17 = vand.u32 2147483647, %v5499_v33  ;;  %v12211_v54 = vcombine.low %v18673_v41, %v18673_v41  ;;  %v12373_v7 = vsel %vm17005_vm7, %v12346_v18, %v18575_v45  ;;  %v12078_v23 = vrot.slane %v12076_v3, 6 }
 0x374   : > { %13335 = vmatprep.mubr.bf16.mxu1 %v12458_v36  ;;  %v12081_v29 = vrot.slane %v12079_v10, 7  ;;  %v18700_v56 = vmul.f32 %v15661_v55, %v571_v60  ;;  %v11254_v2 = vshrl.u32 %v18692_v22, 16  ;;  %v18704_v21 = vsub.s32 7, %v22094_v58 }
 0x375   : > { %v5503_v61 = vmul.f32 %v5502_v1, %v5500_v17  ;;  %v12356_v46 = vsel %vm21965_vm0, %v12325_v52, %v12090_v53  ;;  %v18709_v44 = vcombine.high %v18692_v22, %v18692_v22  ;;  %v18715_v36 = vrot.slane %v11186_v42, %v22100_v49 }
 0x376   : > { %v5513_v35 = vadd.s32 3, %v5509_v25  ;;  %v18717_v27 = vand.u32 3, %v5509_v25  ;;  %v21936_v11 = vand.u32 2147483647, %v18700_v56  ;;  %v1159_v51 = vand.u32 2139095040, %v18700_v56 }
 0x377   : > { %v5504_v43 = vxor.u32 2147483648, %v5503_v61  ;;  %v12416_v53 = vsel %vm22086_vm14, %v12373_v7, %v12211_v54  ;;  %v12182_v15 = vcombine.low %v18621_v20, %v18621_v20  ;;  %v18724_v57 = vpack.i.b16 %v11254_v2, %v11254_v2 }
 0x378   : > { %v12378_v26 = vsel %vm17005_vm7, %v12356_v46, %v18575_v45  ;;  %v12082_v42 = vor.u32 %v12081_v29, %v12078_v23  ;;  %v1160_v28 = vshrl.u32 %v1159_v51, 23  ;;  %v587_v47 = vrot.slane %v22099_v34, %v18704_v21 }
 0x379   : > { %v5505_v3 = vsel %vm5422_vm3, %v5504_v43, %v5503_v61  ;;  %v1163_v0 = vand.u32 8388607, %v21936_v11  ;;  %v11262_v9 = vshrl.u32 %v18709_v44, 16  ;;  %v18738_v20 = vcombine.high %v18715_v36, %v18715_v36 }
 0x37a   : > { %v5508_v18 = vsel %vm18645_vm2, %v18280_v31, %v5505_v3  ;;  %v18743_v10 = vand.u32 3, %v5513_v35  ;;  %v12457_v30 = vsel %vm17035_vm6, %v12416_v53, 0  ;;  %v13893_v33 = vadd.s32 4294967169, %v1160_v28 }
 0x37b   : > { %15138 = vcosq.f32 %v5508_v18  ;;  %13336 = vmatmul.mubr.bf16.gmra.mrb[28].mxu1 %v12457_v30  ;;  %v18748_v1 = vrot.slane %v12182_v15, %v15615_v62  ;;  %v18750_v25 = vpack.i.b16 %v11262_v9, %v11262_v9  ;;  %v11584_v52 = vrot.slane %v18724_v57, %v15632_v19 }
 0x37c   : > { %15140 = vsinq.f32 %v5508_v18  ;;  %v12323_v50 = vsel %vm22102_vm1, %v12290_v8, %v12082_v42  ;;  %v1166_v60 = vadd.s32 1, %v13893_v33  ;;  %v18756_v17 = vmul.f32 %v15661_v55, %v587_v47 }
 0x37d   : > { %22101 = vst [vmem:[#allocation11_spill] sm:$0xff] %v18748_v1  ;;  %v1164_v54 = vor.u32 8388608, %v1163_v0  ;;  %v11588_v7 = vrot.slane %v18750_v25, %v15632_v19  ;;  %v11286_v23 = vshrl.u32 %v18715_v36, 16  ;;  %v11294_v62 = vshrl.u32 %v18738_v20, 16 }
 0x37e   : > { %vm5516_vm13 = vcmp.eq.s32.totalorder %v18743_v10, 0  ;;  %vm10511_vm9 = vcmp.eq.s32.totalorder %v18717_v27, 0  ;;  %vm10514_vm3 = vcmp.eq.s32.totalorder %v18717_v27, 2  ;;  %v18766_v8 = vsel %vm22103_vm5, %v12378_v26, %v12214_v14 }
 0x37f   : > { %vm1167_vm15 = vcmp.gt.s32.totalorder %v1166_v60, 0  ;;  %vm5515_vm4 = vcmp.lt.s32.totalorder %v18743_v10, 2  ;;  %vm5519_vm2 = vcmp.eq.s32.totalorder %v18743_v10, 2  ;;  %vm10510_vm11 = vcmp.lt.s32.totalorder %v18717_v27, 2 }
 0x380   : > { %v1168_v29 = vsel %vm1167_vm15, %v1166_v60, 0  ;;  %v18771_v2 = vcombine.low %v11584_v52, %v11588_v7  ;;  %v1575_v61 = vand.u32 2139095040, %v18756_v17  ;;  %vm5512_vm8 = vweird.f32 %v18280_v31 }
 0x381   : > { %v18778_v14 = vsel %vm21965_vm0, %v12323_v50, %v12082_v42  ;;  %v1169_v35 = vshrl.u32 %v1168_v29, 5  ;;  %v1170_v51 = vand.u32 31, %v1168_v29  ;;  %v18780_v43 = vshll.u32 %v1164_v54, 8 }
 0x382   : > { %v18783_v15 = vpack.i.b16 %v11286_v23, %v11286_v23  ;;  %v18785_v26 = vpack.i.b16 %v11294_v62, %v11294_v62  ;;  %v1576_v18 = vshrl.u32 %v1575_v61, 23 }
 0x383   : > { %v1171_v28 = vsub.s32 32, %v1170_v51  ;;  %v1173_v47 = vshll.u32 %v22040_v6, %v1170_v51  ;;  %v1176_v3 = vshll.u32 %v21991_v16, %v1170_v51  ;;  %v1179_v0 = vshll.u32 %v21992_v37, %v1170_v51 }
 0x384   : > { %v1182_v42 = vshll.u32 %v22004_v39, %v1170_v51  ;;  %v1185_v9 = vshll.u32 %v22005_v59, %v1170_v51  ;;  %vm1188_vm10 = vcmp.lt.s32.totalorder %v1169_v35, 1  ;;  %vm1189_vm12 = vcmp.lt.s32.totalorder %v1169_v35, 2 }
 0x385   : > { %v1174_v30 = vshrl.u32 %v21991_v16, %v1171_v28  ;;  %v1177_v33 = vshrl.u32 %v21992_v37, %v1171_v28  ;;  %v1180_v52 = vshrl.u32 %v22004_v39, %v1171_v28  ;;  %v15139_v50 = vpop.eup %15138  ;;  %v1172_v60 = vshrl.u32 %v22040_v6, %v1171_v28 }
 0x386   : > { %v1183_v54 = vshrl.u32 %v22005_v59, %v1171_v28  ;;  %v1186_v7 = vshrl.u32 %v21993_v13, %v1171_v28  ;;  %vm1190_vm14 = vcmp.lt.s32.totalorder %v1169_v35, 3  ;;  %v15141_v23 = vpop.eup %15140  ;;  %v5520_v62 = vxor.u32 2147483648, %v15139_v50 }
 0x387   : > { %v1175_v29 = vor.u32 %v1174_v30, %v1173_v47  ;;  %v1178_v51 = vor.u32 %v1177_v33, %v1176_v3  ;;  %v1181_v61 = vor.u32 %v1180_v52, %v1179_v0  ;;  %v5517_v11 = vxor.u32 2147483648, %v15141_v23 }
 0x388   : > { %v1184_v46 = vor.u32 %v1183_v54, %v1182_v42  ;;  %v1187_v53 = vor.u32 %v1186_v7, %v1185_v9  ;;  %vm1191_vm1 = vcmp.lt.s32.totalorder %v1169_v35, 4  ;;  %v5521_v32 = vsel %vm5519_vm2, %v5520_v62, %v15141_v23 }
 0x389   : > { %v10516_v41 = vsel %vm10514_vm3, %v5520_v62, %v15141_v23  ;;  %v1193_v38 = vsel %vm1191_vm1, %v1181_v61, 2102212464  ;;  %v13909_v12 = vadd.s32 4294967169, %v1576_v18  ;;  %v5518_v28 = vsel %vm5516_vm13, %v15139_v50, %v5517_v11  ;;  %vm22106_vm13 = vmmov %vm22103_vm5 }
 0x38a   : > { %v10513_v47 = vsel %vm10511_vm9, %v15139_v50, %v5517_v11  ;;  %v1192_v3 = vsel %vm1188_vm10, %v1172_v60, %v1175_v29  ;;  %v1196_v0 = vsel %vm1188_vm10, %v1175_v29, %v1178_v51  ;;  %v5522_v42 = vsel %vm5515_vm4, %v5518_v28, %v5521_v32 }
 0x38b   : > { %v10517_v9 = vsel %vm10510_vm11, %v10513_v47, %v10516_v41  ;;  %v1194_v30 = vsel %vm1190_vm14, %v1178_v51, %v1193_v38  ;;  %v1197_v18 = vsel %vm1191_vm1, %v1184_v46, 920167782  ;;  %v5523_v33 = vsel %vm5512_vm8, nan, %v5522_v42 }
 0x38c   : > { %v10518_v11 = vsel %vm5512_vm8, nan, %v10517_v9  ;;  %v1198_v52 = vsel %vm1190_vm14, %v1181_v61, %v1197_v18  ;;  %v1200_v50 = vsel %vm1188_vm10, %v1178_v51, %v1181_v61  ;;  %v5880_v60 = vpack.c.bf16 %v5523_v33, %v5523_v33 }
 0x38d   : > { %v10872_v10 = vpack.c.bf16 %v10518_v11, %v10518_v11  ;;  %v1199_v32 = vsel %vm1189_vm12, %v1196_v0, %v1198_v52  ;;  %v1201_v41 = vsel %vm1191_vm1, %v1187_v53, 1326507024  ;;  %v12377_v38 = vsel %vm17005_vm7, %v18778_v14, %v18575_v45 }
 0x38e   : > { %v1202_v27 = vsel %vm1190_vm14, %v1184_v46, %v1201_v41  ;;  %v18829_v31 = vmul.u32.u64.low %v18780_v43, %v1199_v32  ;;  %v18830_v54 = vmul.u32.u64.high %v18780_v43, %v1199_v32, %v18829_v31  ;;  %v1195_v23 = vsel %vm1189_vm12, %v1192_v3, %v1194_v30 }
 0x38f   : > { %v10968_v7 = vrot.slane %v10872_v10, 4  ;;  %v1203_v62 = vsel %vm1189_vm12, %v1200_v50, %v1202_v27  ;;  %v1582_v29 = vadd.s32 1, %v13909_v12  ;;  %v22104_v61 = vand.u32 2147483647, %v18756_v17 }
 0x390   : > { %v18836_v53 = vmul.u32.u64.low %v18780_v43, %v1203_v62  ;;  %v18837_v51 = vmul.u32.u64.high %v18780_v43, %v1203_v62, %v18836_v53  ;;  %v11600_v46 = vrot.slane %v18783_v15, %v15632_v19  ;;  %v22105_v47 = vcombine.low %v18748_v1, %v18748_v1 }
 0x391   : > { %v1579_v14 = vand.u32 8388607, %v22104_v61  ;;  %v11151_v28 = vsel %vm21965_vm0, %v5880_v60, %v10968_v7  ;;  %vm1583_vm9 = vcmp.gt.s32.totalorder %v1582_v29, 0  ;;  %v11604_v12 = vrot.slane %v18785_v26, %v15632_v19 }
 0x392   : > { %v12432_v3 = vsel %vm22106_vm13, %v12377_v38, %v22105_v47  ;;  %v11409_v35 = vmul.bf16 %v17794_v5, %v11151_v28  ;;  %v1211_v0 = vmul.u32 %v18780_v43, %v1195_v23  ;;  %v1214_v42 = vadd.s32 1, %v18830_v54 }
 0x393   : > { %v1584_v9 = vsel %vm1583_vm9, %v1582_v29, 0  ;;  %v12462_v30 = vsel %vm17035_vm6, %v18766_v8, 0  ;;  %v18856_v33 = vcombine.low %v11600_v46, %v11604_v12  ;;  %v18859_v11 = vsub.s32 2, %v22094_v58 }
 0x394   : > { %v1586_v18 = vand.u32 31, %v1584_v9  ;;  %13552 = vmatmul.mubr.bf16.gmra.mrb[24].mxu0 %v11409_v35  ;;  %v12461_v52 = vsel %vm17035_vm6, %v12432_v3, 0  ;;  %vm1213_vm3 = vc.u32 %v18837_v51, %v18829_v31  ;;  %v1580_v5 = vor.u32 8388608, %v1579_v14 }
 0x395   : > { %v1585_v43 = vshrl.u32 %v1584_v9, 5  ;;  %13561 = vmatprep.mubr.bf16.mxu0 %v12462_v30  ;;  %v1215_v50 = vsel %vm1213_vm3, %v1214_v42, %v18830_v54  ;;  %v567_v42 = vrot.slane %v22099_v34, %v18859_v11  ;;  %vm1158_vm8 = vcmp.lt.s32.totalorder %v18700_v56, 0 }
 0x396   : > { %v1587_v60 = vsub.s32 32, %v1586_v18  ;;  %v1589_v8 = vshll.u32 %v22040_v6, %v1586_v18  ;;  %v1592_v10 = vshll.u32 %v21991_v16, %v1586_v18  ;;  %v1216_v32 = vadd.s32 %v1215_v50, %v1211_v0 }
 0x397   : > { %v1595_v41 = vshll.u32 %v21992_v37, %v1586_v18  ;;  %v1598_v38 = vshll.u32 %v22004_v39, %v1586_v18  ;;  %v1601_v27 = vshll.u32 %v22005_v59, %v1586_v18  ;;  %vm1604_vm5 = vcmp.lt.s32.totalorder %v1585_v43, 1 }
 0x398   : > { %v1588_v7 = vshrl.u32 %v22040_v6, %v1587_v60  ;;  %v1590_v23 = vshrl.u32 %v21991_v16, %v1587_v60  ;;  %v1593_v62 = vshrl.u32 %v21992_v37, %v1587_v60  ;;  %v1596_v54 = vshrl.u32 %v22004_v39, %v1587_v60 }
 0x399   : > { %v1217_v29 = vadd.s32 536870912, %v1216_v32  ;;  %v1599_v53 = vshrl.u32 %v22005_v59, %v1587_v60  ;;  %v1602_v61 = vshrl.u32 %v21993_v13, %v1587_v60  ;;  %v1620_v47 = vshll.u32 %v1580_v5, 8 }
 0x39a   : > { %v1591_v14 = vor.u32 %v1590_v23, %v1589_v8  ;;  %v1594_v46 = vor.u32 %v1593_v62, %v1592_v10  ;;  %v1597_v28 = vor.u32 %v1596_v54, %v1595_v41  ;;  %vm1606_vm15 = vcmp.lt.s32.totalorder %v1585_v43, 3 }
 0x39b   : > { %v1218_v3 = vshrl.u32 %v1217_v29, 30  ;;  %v1600_v12 = vor.u32 %v1599_v53, %v1598_v38  ;;  %v1603_v35 = vor.u32 %v1602_v61, %v1601_v27  ;;  %vm1605_vm4 = vcmp.lt.s32.totalorder %v1585_v43, 2 }
 0x39c   : > { %vm1607_vm2 = vcmp.lt.s32.totalorder %v1585_v43, 4  ;;  %v1612_v0 = vsel %vm1604_vm5, %v1591_v14, %v1594_v46  ;;  %13562 = vmatmul.mubr.bf16.gmra.mrb[28].mxu0 %v12461_v52  ;;  %v1608_v30 = vsel %vm1604_vm5, %v1588_v7, %v1591_v14  ;;  %v1616_v8 = vsel %vm1604_vm5, %v1594_v46, %v1597_v28 }
 0x39d   : > { %v1219_v9 = vshll.u32 %v1218_v3, 30  ;;  %v1609_v18 = vsel %vm1607_vm2, %v1597_v28, 2102212464  ;;  %v1613_v50 = vsel %vm1607_vm2, %v1600_v12, 920167782  ;;  %v18895_v61 = vmul.f32 %v15661_v55, %v567_v42 }
 0x39e   : > { %v1610_v60 = vsel %vm1606_vm15, %v1594_v46, %v1609_v18  ;;  %v1614_v5 = vsel %vm1606_vm15, %v1597_v28, %v1613_v50  ;;  %v1617_v10 = vsel %vm1607_vm2, %v1603_v35, 1326507024  ;;  %v18899_v28 = vsub.s32 6, %v22094_v58 }
 0x39f   : > { %v1220_v41 = vsub.s32 %v1216_v32, %v1219_v9  ;;  %v1615_v38 = vsel %vm1605_vm4, %v1612_v0, %v1614_v5  ;;  %v1618_v27 = vsel %vm1606_vm15, %v1600_v12, %v1617_v10  ;;  %v1611_v7 = vsel %vm1605_vm4, %v1608_v30, %v1610_v60 }
 0x3a0   : > { %v18886_v23 = vmul.u32.u64.low %v1620_v47, %v1615_v38  ;;  %v18887_v62 = vmul.u32.u64.high %v1620_v47, %v1615_v38, %v18886_v23  ;;  %v1619_v54 = vsel %vm1605_vm4, %v1616_v8, %v1618_v27  ;;  %v1627_v32 = vmul.u32 %v1620_v47, %v1611_v7 }
 0x3a1   : > { %v1222_v52 = vsub.s32 0, %v1220_v41  ;;  %v18891_v29 = vmul.u32.u64.low %v1620_v47, %v1619_v54  ;;  %v18892_v53 = vmul.u32.u64.high %v1620_v47, %v1619_v54, %v18891_v29  ;;  %v1242_v35 = vsub.s32 4, %v1218_v3 }
 0x3a2   : > { %v1630_v46 = vadd.s32 1, %v18887_v62  ;;  %v1055_v43 = vand.u32 2139095040, %v18895_v61  ;;  %v21942_v30 = vand.u32 2147483647, %v18895_v61  ;;  %v583_v18 = vrot.slane %v22099_v34, %v18899_v28 }
 0x3a3   : > { %v13894_v14 = vmin.u32 %v1222_v52, %v1220_v41  ;;  %vm1629_vm11 = vc.u32 %v18892_v53, %v18886_v23  ;;  %v1212_v58 = vadd.s32 %v18829_v31, %v18837_v51  ;;  %v1243_v50 = vsel %vm1158_vm8, %v1242_v35, %v1218_v3 }
 0x3a4   : > { %v1631_v9 = vsel %vm1629_vm11, %v1630_v46, %v18887_v62  ;;  %v1056_v47 = vshrl.u32 %v1055_v43, 23  ;;  %v18913_v10 = vmul.f32 %v15661_v55, %v583_v18  ;;  %v22107_v38 = vand.u32 2147483647, %v18700_v56 }
 0x3a5   : > { %v1224_v12 = vclz %v13894_v14  ;;  %v1632_v42 = vadd.s32 %v1631_v9, %v1627_v32  ;;  %v1059_v3 = vand.u32 8388607, %v21942_v30  ;;  %vm1574_vm1 = vcmp.lt.s32.totalorder %v18756_v17, 0 }
 0x3a6   : > { %v13889_v8 = vadd.s32 4294967169, %v1056_v47  ;;  %vm18917_vm12 = vcmp.le.f32.partialorder %v22107_v38, 0.7853982  ;;  %v1471_v32 = vand.u32 2139095040, %v18913_v10  ;;  %vm1248_vm11 = vweird.f32 %v18700_v56 }
 0x3a7   : > { %v13895_v0 = vadd.s32 4294967294, %v1224_v12  ;;  %v1633_v5 = vadd.s32 536870912, %v1632_v42  ;;  %v1245_v31 = vsel %vm18917_vm12, 0, %v1243_v50  ;;  %v18933_v50 = vrot.slane %v18750_v25, %v15637_v24 }
 0x3a8   : > { %v1062_v7 = vadd.s32 1, %v13889_v8  ;;  %v1472_v8 = vshrl.u32 %v1471_v32, 23 }
 0x3a9   : > { %vm13896_vm10 = vcmp.lt.s32.totalorder %v13895_v0, 0  ;;  %v18923_v51 = vshrl.u32 %v1633_v5, 30 }
 0x3aa   : > { %v1227_v60 = vsel %vm13896_vm10, 0, %v13895_v0  ;;  %vm1063_vm14 = vcmp.gt.s32.totalorder %v1062_v7, 0  ;;  %v1060_v0 = vor.u32 8388608, %v1059_v3 }
 0x3ab   : > { %v1228_v34 = vsub.s32 32, %v1227_v60  ;;  %v1229_v62 = vshll.u32 %v1220_v41, %v1227_v60  ;;  %v1232_v52 = vsub.s32 4294967266, %v1227_v60  ;;  %v1635_v14 = vshll.u32 %v18923_v51, 30 }
 0x3ac   : > { %v1249_v41 = vadd.s32 3, %v1245_v31  ;;  %v1064_v35 = vsel %vm1063_vm14, %v1062_v7, 0  ;;  %v18938_v60 = vrot.slane %v18785_v26, %v15637_v24  ;;  %v1658_v3 = vsub.s32 4, %v18923_v51 }
 0x3ad   : > { %v1230_v54 = vshrl.u32 %v1212_v58, %v1228_v34  ;;  %v1233_v29 = vadd.s32 127, %v1232_v52  ;;  %v18929_v43 = vsub.s32 %v1632_v42, %v1635_v14  ;;  %v1066_v9 = vand.u32 31, %v1064_v35 }
 0x3ae   : > { %v18940_v34 = vand.u32 3, %v1249_v41  ;;  %v18942_v42 = vand.u32 3, %v1245_v31  ;;  %v1628_v52 = vadd.s32 %v18886_v23, %v18892_v53  ;;  %v18948_v7 = vshll.u32 %v1060_v0, 8 }
 0x3af   : > { %v1231_v46 = vor.u32 %v1230_v54, %v1229_v62  ;;  %v1234_v12 = vshll.u32 %v1233_v29, 23  ;;  %v1638_v58 = vsub.s32 0, %v18929_v43  ;;  %v1067_v5 = vsub.s32 32, %v1066_v9 }
 0x3b0   : > { %v1069_v62 = vshll.u32 %v22040_v6, %v1066_v9  ;;  %v1072_v29 = vshll.u32 %v21991_v16, %v1066_v9  ;;  %v1075_v14 = vshll.u32 %v21992_v37, %v1066_v9  ;;  %v1065_v31 = vshrl.u32 %v1064_v35, 5 }
 0x3b1   : > { %v1235_v47 = vor.u32 4788187, %v1234_v12  ;;  %v1238_v18 = vcvt.s32.f32 %v1231_v46  ;;  %v13910_v25 = vmin.u32 %v1638_v58, %v18929_v43  ;;  %v1070_v26 = vshrl.u32 %v21991_v16, %v1067_v5 }
 0x3b2   : > { %v1068_v46 = vshrl.u32 %v22040_v6, %v1067_v5  ;;  %v13905_v12 = vadd.s32 4294967169, %v1472_v8  ;;  %v1073_v53 = vshrl.u32 %v21992_v37, %v1067_v5  ;;  %v1076_v0 = vshrl.u32 %v22004_v39, %v1067_v5 }
 0x3b3   : > { %v1236_v38 = vand.u32 2147483647, %v1235_v47  ;;  %v1640_v32 = vclz %v13910_v25  ;;  %v1071_v23 = vor.u32 %v1070_v26, %v1069_v62  ;;  %v1079_v58 = vshrl.u32 %v22005_v59, %v1067_v5 }
 0x3b4   : > { %v1074_v25 = vor.u32 %v1073_v53, %v1072_v29  ;;  %v1077_v8 = vor.u32 %v1076_v0, %v1075_v14  ;;  %v1082_v30 = vshrl.u32 %v21993_v13, %v1067_v5  ;;  %v22110_v26 = vand.u32 2147483647, %v18756_v17 }
 0x3b5   : > { %v1239_v54 = vmul.f32 %v1238_v18, %v1236_v38  ;;  %v13911_v47 = vadd.s32 4294967294, %v1640_v32  ;;  %v1078_v18 = vshll.u32 %v22004_v39, %v1066_v9  ;;  %v1081_v38 = vshll.u32 %v22005_v59, %v1066_v9 }
 0x3b6   : > { %vm18968_vm13 = vcmp.le.f32.partialorder %v22110_v26, 0.7853982  ;;  %vm1084_vm3 = vcmp.lt.s32.totalorder %v1065_v31, 1  ;;  %vm1085_vm5 = vcmp.lt.s32.totalorder %v1065_v31, 2  ;;  %vm1086_vm15 = vcmp.lt.s32.totalorder %v1065_v31, 3 }
 0x3b7   : > { %v1240_v41 = vxor.u32 2147483648, %v1239_v54  ;;  %vm13912_vm9 = vcmp.lt.s32.totalorder %v13911_v47, 0  ;;  %v1080_v1 = vor.u32 %v1079_v58, %v1078_v18  ;;  %vm1087_vm4 = vcmp.lt.s32.totalorder %v1065_v31, 4 }
 0x3b8   : > { %v1643_v9 = vsel %vm13912_vm9, 0, %v13911_v47  ;;  %v1088_v27 = vsel %vm1084_vm3, %v1068_v46, %v1071_v23  ;;  %vm6287_vm2 = vcmp.lt.s32.totalorder %v18942_v42, 2  ;;  %v1096_v58 = vsel %vm1084_vm3, %v1074_v25, %v1077_v8 }
 0x3b9   : > { %v1241_v35 = vsel %vm1158_vm8, %v1240_v41, %v1239_v54  ;;  %v1083_v54 = vor.u32 %v1082_v30, %v1081_v38  ;;  %v1644_v29 = vsub.s32 32, %v1643_v9  ;;  %v1645_v5 = vshll.u32 %v18929_v43, %v1643_v9 }
 0x3ba   : > { %v1244_v62 = vsel %vm18917_vm12, %v18700_v56, %v1241_v35  ;;  %v1648_v14 = vsub.s32 4294967266, %v1643_v9  ;;  %v1092_v41 = vsel %vm1084_vm3, %v1071_v23, %v1074_v25  ;;  %v1089_v35 = vsel %vm1087_vm4, %v1077_v8, 2102212464 }
 0x3bb   : > { %15142 = vcosq.f32 %v1244_v62  ;;  %v1646_v53 = vshrl.u32 %v1628_v52, %v1644_v29  ;;  %v1093_v18 = vsel %vm1087_vm4, %v1080_v1, 920167782  ;;  %v1090_v30 = vsel %vm1086_vm15, %v1074_v25, %v1089_v35 }
 0x3bc   : > { %15144 = vsinq.f32 %v1244_v62  ;;  %v1649_v0 = vadd.s32 127, %v1648_v14  ;;  %v1094_v47 = vsel %vm1086_vm15, %v1077_v8, %v1093_v18  ;;  %v1097_v43 = vsel %vm1087_vm4, %v1083_v54, 1326507024 }
 0x3bd   : > { %v1647_v38 = vor.u32 %v1646_v53, %v1645_v5  ;;  %v1659_v52 = vsel %vm1574_vm1, %v1658_v3, %v18923_v51  ;;  %v1095_v46 = vsel %vm1085_vm5, %v1092_v41, %v1094_v47  ;;  %vm6288_vm8 = vcmp.eq.s32.totalorder %v18942_v42, 0 }
 0x3be   : > { %v1650_v62 = vshll.u32 %v1649_v0, 23  ;;  %v1098_v23 = vsel %vm1086_vm15, %v1080_v1, %v1097_v43  ;;  %v18987_v26 = vmul.u32.u64.low %v18948_v7, %v1095_v46  ;;  %v18988_v9 = vmul.u32.u64.high %v18948_v7, %v1095_v46, %v18987_v26 }
 0x3bf   : > { %v1654_v8 = vcvt.s32.f32 %v1647_v38  ;;  %v1091_v54 = vsel %vm1085_vm5, %v1088_v27, %v1090_v30  ;;  %v1099_v29 = vsel %vm1085_vm5, %v1096_v58, %v1098_v23  ;;  %v1661_v51 = vsel %vm18968_vm13, 0, %v1659_v52 }
 0x3c0   : > { %v1651_v25 = vor.u32 4788187, %v1650_v62  ;;  %v18996_v3 = vmul.u32.u64.low %v18948_v7, %v1099_v29  ;;  %v18997_v5 = vmul.u32.u64.high %v18948_v7, %v1099_v29, %v18996_v3  ;;  %v1478_v14 = vadd.s32 1, %v13905_v12 }
 0x3c1   : > { %vm1251_vm10 = vcmp.lt.s32.totalorder %v18940_v34, 2  ;;  %vm1252_vm12 = vcmp.eq.s32.totalorder %v18940_v34, 0  ;;  %vm6291_vm14 = vcmp.eq.s32.totalorder %v18942_v42, 2  ;;  %vm1255_vm9 = vcmp.eq.s32.totalorder %v18940_v34, 2 }
 0x3c2   : > { %v1652_v1 = vand.u32 2147483647, %v1651_v25  ;;  %v1107_v31 = vmul.u32 %v18948_v7, %v1091_v54  ;;  %v1110_v27 = vadd.s32 1, %v18988_v9  ;;  %vm1479_vm3 = vcmp.gt.s32.totalorder %v1478_v14, 0 }
 0x3c3   : > { %v1665_v18 = vadd.s32 3, %v1661_v51  ;;  %v1480_v12 = vsel %vm1479_vm3, %v1478_v14, 0  ;;  %v19005_v47 = vand.u32 3, %v1661_v51  ;;  %vm1109_vm5 = vc.u32 %v18997_v5, %v18987_v26 }
 0x3c4   : > { %v1655_v35 = vmul.f32 %v1654_v8, %v1652_v1  ;;  %v21944_v58 = vand.u32 2147483647, %v18913_v10  ;;  %v1111_v62 = vsel %vm1109_vm5, %v1110_v27, %v18988_v9  ;;  %v1482_v25 = vand.u32 31, %v1480_v12 }
 0x3c5   : > { %v15143_v41 = vpop.eup %15142  ;;  %v1112_v23 = vadd.s32 %v1111_v62, %v1107_v31  ;;  %v19023_v51 = vand.u32 3, %v1665_v18  ;;  %vm6699_vm4 = vcmp.lt.s32.totalorder %v19005_v47, 2  ;;  %vm1054_vm5 = vcmp.lt.s32.totalorder %v18895_v61, 0 }
 0x3c6   : > { %v15145_v53 = vpop.eup %15144  ;;  %v1256_v0 = vxor.u32 2147483648, %v15143_v41  ;;  %v1656_v38 = vxor.u32 2147483648, %v1655_v35  ;;  %v1483_v42 = vsub.s32 32, %v1482_v25  ;;  %v1475_v27 = vand.u32 8388607, %v21944_v58 }
 0x3c7   : > { %v1253_v30 = vxor.u32 2147483648, %v15145_v53  ;;  %v1113_v34 = vadd.s32 536870912, %v1112_v23  ;;  %v1485_v32 = vshll.u32 %v22040_v6, %v1482_v25  ;;  %vm1667_vm15 = vcmp.lt.s32.totalorder %v19023_v51, 2 }
 0x3c8   : > { %v1257_v43 = vsel %vm1255_vm9, %v1256_v0, %v15145_v53  ;;  %v6293_v7 = vsel %vm6291_vm14, %v1256_v0, %v15145_v53  ;;  %v1657_v29 = vsel %vm1574_vm1, %v1656_v38, %v1655_v35  ;;  %v22113_v53 = vld [vmem:[#allocation15_spill] sm:$0xff]  ;;  %vm6703_vm1 = vcmp.eq.s32.totalorder %v19005_v47, 2 }
 0x3c9   : > { %v1254_v52 = vsel %vm1252_vm12, %v15143_v41, %v1253_v30  ;;  %v6290_v46 = vsel %vm6288_vm8, %v15143_v41, %v1253_v30  ;;  %v1660_v14 = vsel %vm18968_vm13, %v18756_v17, %v1657_v29  ;;  %v19032_v31 = vshrl.u32 %v1113_v34, 30 }
 0x3ca   : > { %v1258_v8 = vsel %vm1251_vm10, %v1254_v52, %v1257_v43  ;;  %v6294_v54 = vsel %vm6287_vm2, %v6290_v46, %v6293_v7  ;;  %15146 = vcosq.f32 %v1660_v14  ;;  %v603_v0 = vrot.slane %v22113_v53, %v18670_v4 }
 0x3cb   : > { %v1259_v9 = vsel %vm1248_vm11, nan, %v1258_v8  ;;  %v6295_v3 = vsel %vm1248_vm11, nan, %v6294_v54  ;;  %15148 = vsinq.f32 %v1660_v14  ;;  %vm6700_vm13 = vcmp.eq.s32.totalorder %v19005_v47, 0 }
 0x3cc   : > { %v5839_v1 = vpack.c.bf16 %v1259_v9, %v1259_v9  ;;  %v10831_v41 = vpack.c.bf16 %v6295_v3, %v6295_v3  ;;  %v1115_v18 = vshll.u32 %v19032_v31, 30  ;;  %v1486_v30 = vshrl.u32 %v21991_v16, %v1483_v42 }
 0x3cd   : > { %v1488_v43 = vshll.u32 %v21991_v16, %v1482_v25  ;;  %v1489_v7 = vshrl.u32 %v21992_v37, %v1483_v42  ;;  %v1491_v62 = vshll.u32 %v21992_v37, %v1482_v25  ;;  %v1492_v52 = vshrl.u32 %v22004_v39, %v1483_v42 }
 0x3ce   : > { %v10927_v56 = vrot.slane %v10831_v41, 4  ;;  %v1494_v46 = vshll.u32 %v22004_v39, %v1482_v25  ;;  %vm1664_vm2 = vweird.f32 %v18756_v17  ;;  %v19055_v54 = vsub.s32 %v1112_v23, %v1115_v18 }
 0x3cf   : > { %v1476_v29 = vor.u32 8388608, %v1475_v27  ;;  %v1481_v9 = vshrl.u32 %v1480_v12, 5  ;;  %vm1668_vm11 = vcmp.eq.s32.totalorder %v19023_v51, 0  ;;  %vm1671_vm8 = vcmp.eq.s32.totalorder %v19023_v51, 2 }
 0x3d0   : > { %v10987_v38 = vsel %vm21965_vm0, %v5839_v1, %v10927_v56  ;;  %v1495_v3 = vshrl.u32 %v22005_v59, %v1483_v42  ;;  %v19061_v14 = vmul.f32 %v15661_v55, %v603_v0  ;;  %v1118_v34 = vsub.s32 0, %v19055_v54 }
 0x3d1   : > { %v11368_v8 = vmul.bf16 %v18933_v50, %v10987_v38  ;;  %v1484_v1 = vshrl.u32 %v22040_v6, %v1483_v42  ;;  %v1497_v41 = vshll.u32 %v22005_v59, %v1482_v25  ;;  %v1498_v23 = vshrl.u32 %v21993_v13, %v1483_v42 }
 0x3d2   : > { %v1487_v27 = vor.u32 %v1486_v30, %v1485_v32  ;;  %v1490_v12 = vor.u32 %v1489_v7, %v1488_v43  ;;  %v1493_v56 = vor.u32 %v1492_v52, %v1491_v62  ;;  %v1496_v18 = vor.u32 %v1495_v3, %v1494_v46 }
 0x3d3   : > { %13378 = vmatprep.mubr.bf16.mxu1 %v11368_v8  ;;  %v13890_v38 = vmin.u32 %v1118_v34, %v19055_v54  ;;  %vm1500_vm10 = vcmp.lt.s32.totalorder %v1481_v9, 1  ;;  %vm1503_vm12 = vcmp.lt.s32.totalorder %v1481_v9, 4  ;;  %v19068_v58 = vshll.u32 %v1476_v29, 8 }
 0x3d4   : > { %v15147_v0 = vpop.eup %15146  ;;  %v1108_v8 = vadd.s32 %v18987_v26, %v18997_v5  ;;  %v1138_v35 = vsub.s32 4, %v19032_v31  ;;  %vm1501_vm14 = vcmp.lt.s32.totalorder %v1481_v9, 2  ;;  %v1505_v25 = vsel %vm1503_vm12, %v1493_v56, 2102212464 }
 0x3d5   : > { %v15149_v42 = vpop.eup %15148  ;;  %v1672_v32 = vxor.u32 2147483648, %v15147_v0  ;;  %v1120_v30 = vclz %v13890_v38  ;;  %v1499_v43 = vor.u32 %v1498_v23, %v1497_v41  ;;  %vm1502_vm9 = vcmp.lt.s32.totalorder %v1481_v9, 3 }
 0x3d6   : > { %v1669_v7 = vxor.u32 2147483648, %v15149_v42  ;;  %v1504_v62 = vsel %vm1500_vm10, %v1484_v1, %v1487_v27  ;;  %v1508_v52 = vsel %vm1500_vm10, %v1487_v27, %v1490_v12  ;;  %v1509_v46 = vsel %vm1503_vm12, %v1496_v18, 920167782 }
 0x3d7   : > { %v1673_v26 = vsel %vm1671_vm8, %v1672_v32, %v15149_v42  ;;  %v6705_v5 = vsel %vm6703_vm1, %v1672_v32, %v15149_v42  ;;  %v13891_v29 = vadd.s32 4294967294, %v1120_v30  ;;  %v1506_v3 = vsel %vm1502_vm9, %v1490_v12, %v1505_v25 }
 0x3d8   : > { %v1670_v34 = vsel %vm1668_vm11, %v15147_v0, %v1669_v7  ;;  %v6702_v41 = vsel %vm6700_vm13, %v15147_v0, %v1669_v7  ;;  %v1510_v1 = vsel %vm1502_vm9, %v1493_v56, %v1509_v46  ;;  %v1512_v23 = vsel %vm1500_vm10, %v1490_v12, %v1493_v56 }
 0x3d9   : > { %v1674_v27 = vsel %vm1667_vm15, %v1670_v34, %v1673_v26  ;;  %v6706_v38 = vsel %vm6699_vm4, %v6702_v41, %v6705_v5  ;;  %vm13892_vm3 = vcmp.lt.s32.totalorder %v13891_v29, 0  ;;  %v1511_v42 = vsel %vm1501_vm14, %v1508_v52, %v1510_v1 }
 0x3da   : > { %v1675_v25 = vsel %vm1664_vm2, nan, %v1674_v27  ;;  %v6707_v32 = vsel %vm1664_vm2, nan, %v6706_v38  ;;  %v1123_v0 = vsel %vm13892_vm3, 0, %v13891_v29  ;;  %v1513_v30 = vsel %vm1503_vm12, %v1499_v43, 1326507024 }
 0x3db   : > { %v5843_v7 = vpack.c.bf16 %v1675_v25, %v1675_v25  ;;  %v10835_v12 = vpack.c.bf16 %v6707_v32, %v6707_v32  ;;  %v1124_v56 = vsub.s32 32, %v1123_v0  ;;  %v1125_v51 = vshll.u32 %v19055_v54, %v1123_v0 }
 0x3dc   : > { %v1128_v46 = vsub.s32 4294967266, %v1123_v0  ;;  %v1514_v47 = vsel %vm1502_vm9, %v1496_v18, %v1513_v30  ;;  %v19101_v26 = vmul.u32.u64.low %v19068_v58, %v1511_v42  ;;  %v19102_v52 = vmul.u32.u64.high %v19068_v58, %v1511_v42, %v19101_v26 }
 0x3dd   : > { %v10931_v5 = vrot.slane %v10835_v12, 4  ;;  %v1126_v34 = vshrl.u32 %v1108_v8, %v1124_v56  ;;  %v1507_v17 = vsel %vm1501_vm14, %v1504_v62, %v1506_v3  ;;  %v1515_v29 = vsel %vm1501_vm14, %v1512_v23, %v1514_v47 }
 0x3de   : > { %v1129_v43 = vadd.s32 127, %v1128_v46  ;;  %v19108_v41 = vmul.u32.u64.low %v19068_v58, %v1515_v29  ;;  %v19109_v1 = vmul.u32.u64.high %v19068_v58, %v1515_v29, %v19108_v41  ;;  %v1139_v27 = vsel %vm1054_vm5, %v1138_v35, %v19032_v31 }
 0x3df   : > { %v11003_v54 = vsel %vm21965_vm0, %v5843_v7, %v10931_v5  ;;  %v1127_v18 = vor.u32 %v1126_v34, %v1125_v51  ;;  %v1991_v8 = vand.u32 2139095040, %v19061_v14  ;;  %v1523_v3 = vmul.u32 %v19068_v58, %v1507_v17 }
 0x3e0   : > { %v11372_v62 = vmul.bf16 %v18938_v60, %v11003_v54  ;;  %v1130_v9 = vshll.u32 %v1129_v43, 23  ;;  %v1526_v23 = vadd.s32 1, %v19102_v52  ;;  %v22114_v42 = vrot.slane %v22113_v53, %v18704_v21 }
 0x3e1   : > { %v1992_v38 = vshrl.u32 %v1991_v8, 23  ;;  %v22115_v32 = vand.u32 2147483647, %v18895_v61  ;;  %v1134_v0 = vcvt.s32.f32 %v1127_v18  ;;  %vm1525_vm13 = vc.u32 %v19109_v1, %v19101_v26 }
 0x3e2   : > { %v19123_v25 = vmul.f32 %v15661_v55, %v22114_v42  ;;  %13604 = vmatprep.mubr.bf16.mxu0 %v11372_v62  ;;  %v1131_v35 = vor.u32 4788187, %v1130_v9  ;;  %v1527_v30 = vsel %vm1525_vm13, %v1526_v23, %v19102_v52  ;;  %v21946_v7 = vand.u32 2147483647, %v19061_v14 }
 0x3e3   : > { %vm19127_vm1 = vcmp.le.f32.partialorder %v22115_v32, 0.7853982  ;;  %v13925_v12 = vadd.s32 4294967169, %v1992_v38  ;;  %v1528_v51 = vadd.s32 %v1527_v30, %v1523_v3  ;;  %v19139_v29 = vrot.slane %v18724_v57, %v15637_v24 }
 0x3e4   : > { %v1141_v58 = vsel %vm19127_vm1, 0, %v1139_v27  ;;  %v1132_v56 = vand.u32 2147483647, %v1131_v35  ;;  %v2407_v47 = vand.u32 2139095040, %v19123_v25  ;;  %v1995_v43 = vand.u32 8388607, %v21946_v7 }
 0x3e5   : > { %v1998_v46 = vadd.s32 1, %v13925_v12  ;;  %v1145_v34 = vadd.s32 3, %v1141_v58  ;;  %v1529_v17 = vadd.s32 536870912, %v1528_v51  ;;  %v21945_v18 = vand.u32 2147483647, %v19123_v25 }
 0x3e6   : > { %v1135_v5 = vmul.f32 %v1134_v0, %v1132_v56  ;;  %vm21952_vm4 = vcmp.lt.s32.totalorder %v18913_v10, 0  ;;  %v2408_v8 = vshrl.u32 %v2407_v47, 23  ;;  %v599_v62 = vrot.slane %v22113_v53, %v18859_v11 }
 0x3e7   : > { %vm1999_vm15 = vcmp.gt.s32.totalorder %v1998_v46, 0  ;;  %v1530_v41 = vshrl.u32 %v1529_v17, 30  ;;  %v19149_v9 = vand.u32 3, %v1145_v34  ;;  %v19151_v3 = vand.u32 3, %v1141_v58 }
 0x3e8   : > { %v1136_v52 = vxor.u32 2147483648, %v1135_v5  ;;  %v2000_v54 = vsel %vm1999_vm15, %v1998_v46, 0  ;;  %v22118_v23 = vand.u32 2147483647, %v18913_v10  ;;  %v19163_v35 = vadd.s32 %v19101_v26, %v19109_v1 }
 0x3e9   : > { %v2002_v27 = vand.u32 31, %v2000_v54  ;;  %v1531_v42 = vshll.u32 %v1530_v41, 30  ;;  %v1996_v0 = vor.u32 8388608, %v1995_v43  ;;  %v1554_v58 = vsub.s32 4, %v1530_v41 }
 0x3ea   : > { %v1137_v57 = vsel %vm1054_vm5, %v1136_v52, %v1135_v5  ;;  %vm19155_vm2 = vcmp.le.f32.partialorder %v22118_v23, 0.7853982  ;;  %v19169_v56 = vand.u32 8388607, %v21945_v18  ;;  %v13941_v31 = vadd.s32 4294967169, %v2408_v8 }
 0x3eb   : > { %v1140_v32 = vsel %vm19127_vm1, %v18895_v61, %v1137_v57  ;;  %v2003_v30 = vsub.s32 32, %v2002_v27  ;;  %v19165_v12 = vsub.s32 %v1528_v51, %v1531_v42  ;;  %v2005_v46 = vshll.u32 %v22040_v6, %v2002_v27 }
 0x3ec   : > { %15150 = vcosq.f32 %v1140_v32  ;;  %v2008_v47 = vshll.u32 %v21991_v16, %v2002_v27  ;;  %vm1151_vm11 = vcmp.eq.s32.totalorder %v19149_v9, 2  ;;  %vm6188_vm8 = vcmp.eq.s32.totalorder %v19151_v3, 2 }
 0x3ed   : > { %15152 = vsinq.f32 %v1140_v32  ;;  %v1534_v26 = vsub.s32 0, %v19165_v12  ;;  %v2006_v1 = vshrl.u32 %v21991_v16, %v2003_v30  ;;  %v2009_v51 = vshrl.u32 %v21992_v37, %v2003_v30 }
 0x3ee   : > { %v2011_v5 = vshll.u32 %v21992_v37, %v2002_v27  ;;  %vm1148_vm10 = vcmp.eq.s32.totalorder %v19149_v9, 0  ;;  %vm6185_vm12 = vcmp.eq.s32.totalorder %v19151_v3, 0  ;;  %v19181_v34 = vshrl.u32 %v2000_v54, 5 }
 0x3ef   : > { %v2012_v17 = vshrl.u32 %v22004_v39, %v2003_v30  ;;  %v2014_v43 = vshll.u32 %v22004_v39, %v2002_v27  ;;  %v2015_v52 = vshrl.u32 %v22005_v59, %v2003_v30  ;;  %vm1147_vm14 = vcmp.lt.s32.totalorder %v19149_v9, 2 }
 0x3f0   : > { %vm6184_vm9 = vcmp.lt.s32.totalorder %v19151_v3, 2  ;;  %v13906_v8 = vmin.u32 %v1534_v26, %v19165_v12  ;;  %v1555_v57 = vsel %vm21952_vm4, %v1554_v58, %v1530_v41  ;;  %v2004_v23 = vshrl.u32 %v22040_v6, %v2003_v30 }
 0x3f1   : > { %v19192_v42 = vshll.u32 %v1996_v0, 8  ;;  %vm1144_vm3 = vweird.f32 %v18895_v61  ;;  %v2016_v54 = vor.u32 %v2015_v52, %v2014_v43  ;;  %v2412_v32 = vor.u32 8388608, %v19169_v56 }
 0x3f2   : > { %v2414_v18 = vadd.s32 1, %v13941_v31  ;;  %v19197_v7 = vmul.f32 %v15661_v55, %v599_v62  ;;  %v1536_v45 = vclz %v13906_v8  ;;  %v2007_v40 = vor.u32 %v2006_v1, %v2005_v46 }
 0x3f3   : > { %v2010_v49 = vor.u32 %v2009_v51, %v2008_v47  ;;  %v2013_v26 = vor.u32 %v2012_v17, %v2011_v5  ;;  %v19201_v41 = vsel %vm19155_vm2, 0, %v1555_v57  ;;  %v2017_v0 = vshll.u32 %v22005_v59, %v2002_v27 }
 0x3f4   : > { %v2018_v58 = vshrl.u32 %v21993_v13, %v2003_v30  ;;  %vm2020_vm5 = vcmp.lt.s32.totalorder %v19181_v34, 1  ;;  %v13907_v43 = vadd.s32 4294967294, %v1536_v45  ;;  %vm2022_vm1 = vcmp.lt.s32.totalorder %v19181_v34, 3 }
 0x3f5   : > { %vm2023_vm13 = vcmp.lt.s32.totalorder %v19181_v34, 4  ;;  %v2024_v62 = vsel %vm2020_vm5, %v2004_v23, %v2007_v40  ;;  %vm2021_vm15 = vcmp.lt.s32.totalorder %v19181_v34, 2  ;;  %v2028_v47 = vsel %vm2020_vm5, %v2007_v40, %v2010_v49 }
 0x3f6   : > { %v2019_v56 = vor.u32 %v2018_v58, %v2017_v0  ;;  %v2025_v46 = vsel %vm2023_vm13, %v2013_v26, 2102212464  ;;  %v2029_v27 = vsel %vm2023_vm13, %v2016_v54, 920167782  ;;  %v15151_v30 = vpop.eup %15150  ;;  %vm13908_vm4 = vcmp.lt.s32.totalorder %v13907_v43, 0 }
 0x3f7   : > { %v2026_v45 = vsel %vm2022_vm1, %v2010_v49, %v2025_v46  ;;  %v2030_v31 = vsel %vm2022_vm1, %v2013_v26, %v2029_v27  ;;  %v15153_v1 = vpop.eup %15152  ;;  %v1152_v51 = vxor.u32 2147483648, %v15151_v30  ;;  %v1539_v5 = vsel %vm13908_vm4, 0, %v13907_v43 }
 0x3f8   : > { %v2027_v17 = vsel %vm2021_vm15, %v2024_v62, %v2026_v45  ;;  %v2032_v52 = vsel %vm2020_vm5, %v2010_v49, %v2013_v26  ;;  %v1149_v8 = vxor.u32 2147483648, %v15153_v1  ;;  %v1540_v57 = vsub.s32 32, %v1539_v5 }
 0x3f9   : > { %v1541_v23 = vshll.u32 %v19165_v12, %v1539_v5  ;;  %v1544_v0 = vsub.s32 4294967266, %v1539_v5  ;;  %v1153_v40 = vsel %vm1151_vm11, %v1152_v51, %v15153_v1  ;;  %v6190_v58 = vsel %vm6188_vm8, %v1152_v51, %v15153_v1 }
 0x3fa   : > { %v2031_v43 = vsel %vm2021_vm15, %v2028_v47, %v2030_v31  ;;  %v2033_v62 = vsel %vm2023_vm13, %v2019_v56, 1326507024  ;;  %v1150_v49 = vsel %vm1148_vm10, %v15151_v30, %v1149_v8  ;;  %v6187_v26 = vsel %vm6185_vm12, %v15151_v30, %v1149_v8 }
 0x3fb   : > { %v1542_v12 = vshrl.u32 %v19163_v35, %v1540_v57  ;;  %v1545_v46 = vadd.s32 127, %v1544_v0  ;;  %v1154_v27 = vsel %vm1147_vm14, %v1150_v49, %v1153_v40  ;;  %v6191_v45 = vsel %vm6184_vm9, %v6187_v26, %v6190_v58 }
 0x3fc   : > { %v2034_v47 = vsel %vm2022_vm1, %v2016_v54, %v2033_v62  ;;  %vm2415_vm4 = vcmp.gt.s32.totalorder %v2414_v18, 0  ;;  %v1155_v56 = vsel %vm1144_vm3, nan, %v1154_v27  ;;  %v6192_v31 = vsel %vm1144_vm3, nan, %v6191_v45 }
 0x3fd   : > { %v1543_v30 = vor.u32 %v1542_v12, %v1541_v23  ;;  %v1546_v1 = vshll.u32 %v1545_v46, 23  ;;  %v5838_v35 = vpack.c.bf16 %v1155_v56, %v1155_v56  ;;  %v10830_v51 = vpack.c.bf16 %v6192_v31, %v6192_v31 }
 0x3fe   : > { %v2035_v9 = vsel %vm2021_vm15, %v2032_v52, %v2034_v47  ;;  %v2416_v5 = vsel %vm2415_vm4, %v2414_v18, 0  ;;  %v19256_v40 = vmul.u32.u64.low %v19192_v42, %v2031_v43  ;;  %v19257_v58 = vmul.u32.u64.high %v19192_v42, %v2031_v43, %v19256_v40 }
 0x3ff   : > { %v1547_v3 = vor.u32 4788187, %v1546_v1  ;;  %v1550_v8 = vcvt.s32.f32 %v1543_v30  ;;  %v19252_v57 = vmul.u32.u64.low %v19192_v42, %v2035_v9  ;;  %v19253_v54 = vmul.u32.u64.high %v19192_v42, %v2035_v9, %v19252_v57 }
 0x400   : > { %v10926_v0 = vrot.slane %v10830_v51, 4  ;;  %v19260_v61 = vshrl.u32 %v2416_v5, 5  ;;  %v2418_v62 = vand.u32 31, %v2416_v5  ;;  %v19262_v49 = vshll.u32 %v2412_v32, 8 }
 0x401   : > { %v1548_v23 = vand.u32 2147483647, %v1547_v3  ;;  %v1887_v18 = vand.u32 2139095040, %v19197_v7  ;;  %v1561_v52 = vadd.s32 3, %v19201_v41  ;;  %v2043_v26 = vmul.u32 %v19192_v42, %v2027_v17 }
 0x402   : > { %v10983_v34 = vsel %vm21965_vm0, %v5838_v35, %v10926_v0  ;;  %vm2436_vm11 = vcmp.lt.s32.totalorder %v19260_v61, 1  ;;  %vm2045_vm8 = vc.u32 %v19253_v54, %v19256_v40  ;;  %vm2438_vm10 = vcmp.lt.s32.totalorder %v19260_v61, 3 }
 0x403   : > { %v11367_v43 = vmul.bf16 %v19139_v29, %v10983_v34  ;;  %v1551_v12 = vmul.f32 %v1550_v8, %v1548_v23  ;;  %v2046_v32 = vadd.s32 1, %v19257_v58  ;;  %v2419_v46 = vsub.s32 32, %v2418_v62 }
 0x404   : > { %v2421_v27 = vshll.u32 %v22040_v6, %v2418_v62  ;;  %v2424_v45 = vshll.u32 %v21991_v16, %v2418_v62  ;;  %v2427_v42 = vshll.u32 %v21992_v37, %v2418_v62  ;;  %v2430_v17 = vshll.u32 %v22004_v39, %v2418_v62 }
 0x405   : > { %13379 = vmatmul.mubr.bf16.vlgmr.msra.gmra.mrb[0].mxu1 %v11367_v43  ;;  %v1552_v47 = vxor.u32 2147483648, %v1551_v12  ;;  %v2433_v56 = vshll.u32 %v22005_v59, %v2418_v62  ;;  %v2047_v31 = vsel %vm2045_vm8, %v2046_v32, %v19257_v58  ;;  %v2420_v30 = vshrl.u32 %v22040_v6, %v2419_v46 }
 0x406   : > { %v2422_v1 = vshrl.u32 %v21991_v16, %v2419_v46  ;;  %v2425_v35 = vshrl.u32 %v21992_v37, %v2419_v46  ;;  %vm22121_vm12 = vcmp.lt.s32.totalorder %v18913_v10, 0  ;;  %v2048_v9 = vadd.s32 %v2047_v31, %v2043_v26 }
 0x407   : > { %v1553_v51 = vsel %vm22121_vm12, %v1552_v47, %v1551_v12  ;;  %v2428_v5 = vshrl.u32 %v22004_v39, %v2419_v46  ;;  %v2431_v3 = vshrl.u32 %v22005_v59, %v2419_v46  ;;  %v2434_v58 = vshrl.u32 %v21993_v13, %v2419_v46 }
 0x408   : > { %v1556_v8 = vsel %vm19155_vm2, %v18913_v10, %v1553_v51  ;;  %v2423_v57 = vor.u32 %v2422_v1, %v2421_v27  ;;  %v2426_v0 = vor.u32 %v2425_v35, %v2424_v45  ;;  %v2049_v23 = vadd.s32 536870912, %v2048_v9 }
 0x409   : > { %15154 = vcosq.f32 %v1556_v8  ;;  %v2429_v62 = vor.u32 %v2428_v5, %v2427_v42  ;;  %v2432_v34 = vor.u32 %v2431_v3, %v2430_v17  ;;  %v2435_v43 = vor.u32 %v2434_v58, %v2433_v56 }
 0x40a   : > { %15156 = vsinq.f32 %v1556_v8  ;;  %vm2437_vm14 = vcmp.lt.s32.totalorder %v19260_v61, 2  ;;  %vm2439_vm9 = vcmp.lt.s32.totalorder %v19260_v61, 4  ;;  %v2050_v26 = vshrl.u32 %v2049_v23, 30 }
 0x40b   : > { %v2441_v12 = vsel %vm2439_vm9, %v2429_v62, 2102212464  ;;  %v2444_v38 = vsel %vm2436_vm11, %v2423_v57, %v2426_v0  ;;  %v2445_v32 = vsel %vm2439_vm9, %v2432_v34, 920167782  ;;  %v2448_v46 = vsel %vm2436_vm11, %v2426_v0, %v2429_v62 }
 0x40c   : > { %v2446_v27 = vsel %vm2438_vm10, %v2429_v62, %v2445_v32  ;;  %v2449_v45 = vsel %vm2439_vm9, %v2435_v43, 1326507024  ;;  %v1888_v47 = vshrl.u32 %v1887_v18, 23  ;;  %v2051_v42 = vshll.u32 %v2050_v26, 30 }
 0x40d   : > { %v2440_v17 = vsel %vm2436_vm11, %v2420_v30, %v2423_v57  ;;  %v2442_v56 = vsel %vm2438_vm10, %v2426_v0, %v2441_v12  ;;  %v2447_v31 = vsel %vm2437_vm14, %v2444_v38, %v2446_v27  ;;  %v6595_v1 = vand.u32 3, %v19201_v41 }
 0x40e   : > { %v2450_v35 = vsel %vm2438_vm10, %v2432_v34, %v2449_v45  ;;  %v19309_v51 = vmul.u32.u64.low %v19262_v49, %v2447_v31  ;;  %v19310_v5 = vmul.u32.u64.high %v19262_v49, %v2447_v31, %v19309_v51  ;;  %v1562_v18 = vand.u32 3, %v1561_v52 }
 0x40f   : > { %v19313_v3 = vsub.s32 %v2048_v9, %v2051_v42  ;;  %v2451_v30 = vsel %vm2437_vm14, %v2448_v46, %v2450_v35  ;;  %v2443_v8 = vsel %vm2437_vm14, %v2440_v17, %v2442_v56  ;;  %v13921_v0 = vadd.s32 4294967169, %v1888_v47 }
 0x410   : > { %v19320_v57 = vmul.u32.u64.low %v19262_v49, %v2451_v30  ;;  %v19321_v41 = vmul.u32.u64.high %v19262_v49, %v2451_v30, %v19320_v57  ;;  %vm1560_vm2 = vweird.f32 %v18913_v10  ;;  %vm1990_vm3 = vcmp.lt.s32.totalorder %v19061_v14, 0 }
 0x411   : > { %v2054_v58 = vsub.s32 0, %v19313_v3  ;;  %v1884_v52 = vand.u32 2147483647, %v19197_v7  ;;  %vm6596_vm5 = vcmp.lt.s32.totalorder %v6595_v1, 2  ;;  %vm6597_vm1 = vcmp.eq.s32.totalorder %v6595_v1, 0 }
 0x412   : > { %vm6600_vm13 = vcmp.eq.s32.totalorder %v6595_v1, 2  ;;  %v2462_v9 = vadd.s32 1, %v19310_v5  ;;  %vm1564_vm15 = vcmp.eq.s32.totalorder %v1562_v18, 0  ;;  %vm1567_vm4 = vcmp.eq.s32.totalorder %v1562_v18, 2 }
 0x413   : > { %v15155_v61 = vpop.eup %15154  ;;  %v22122_v23 = vand.u32 2147483647, %v19061_v14  ;;  %v13926_v34 = vmin.u32 %v2054_v58, %v19313_v3  ;;  %v2459_v43 = vmul.u32 %v19262_v49, %v2443_v8  ;;  %v2074_v32 = vsub.s32 4, %v2050_v26 }
 0x414   : > { %v15157_v12 = vpop.eup %15156  ;;  %v1568_v38 = vxor.u32 2147483648, %v15155_v61  ;;  %vm2461_vm8 = vc.u32 %v19321_v41, %v19309_v51  ;;  %v1894_v27 = vadd.s32 1, %v13921_v0  ;;  %vm1563_vm10 = vcmp.lt.s32.totalorder %v1562_v18, 2 }
 0x415   : > { %vm19330_vm11 = vcmp.le.f32.partialorder %v22122_v23, 0.7853982  ;;  %v1565_v46 = vxor.u32 2147483648, %v15157_v12  ;;  %v2056_v45 = vclz %v13926_v34  ;;  %v1891_v47 = vand.u32 8388607, %v1884_v52 }
 0x416   : > { %v1569_v42 = vsel %vm1567_vm4, %v1568_v38, %v15157_v12  ;;  %v6602_v17 = vsel %vm6600_vm13, %v1568_v38, %v15157_v12  ;;  %v2044_v56 = vadd.s32 %v19256_v40, %v19253_v54  ;;  %v2463_v49 = vsel %vm2461_vm8, %v2462_v9, %v19310_v5 }
 0x417   : > { %v1566_v31 = vsel %vm1564_vm15, %v15155_v61, %v1565_v46  ;;  %v6599_v35 = vsel %vm6597_vm1, %v15155_v61, %v1565_v46  ;;  %v13927_v30 = vadd.s32 4294967294, %v2056_v45  ;;  %v2464_v8 = vadd.s32 %v2463_v49, %v2459_v43 }
 0x418   : > { %v1570_v57 = vsel %vm1563_vm10, %v1566_v31, %v1569_v42  ;;  %v6603_v0 = vsel %vm6596_vm5, %v6599_v35, %v6602_v17  ;;  %v2075_v58 = vsel %vm1990_vm3, %v2074_v32, %v2050_v26  ;;  %vm1895_vm12 = vcmp.gt.s32.totalorder %v1894_v27, 0 }
 0x419   : > { %v1571_v23 = vsel %vm1560_vm2, nan, %v1570_v57  ;;  %v6604_v54 = vsel %vm1560_vm2, nan, %v6603_v0  ;;  %vm13928_vm14 = vcmp.lt.s32.totalorder %v13927_v30, 0  ;;  %v2465_v40 = vadd.s32 536870912, %v2464_v8 }
 0x41a   : > { %v5842_v5 = vpack.c.bf16 %v1571_v23, %v1571_v23  ;;  %v10834_v18 = vpack.c.bf16 %v6604_v54, %v6604_v54  ;;  %v2059_v9 = vsel %vm13928_vm14, 0, %v13927_v30  ;;  %v1896_v61 = vsel %vm1895_vm12, %v1894_v27, 0 }
 0x41b   : > { %v2060_v34 = vsub.s32 32, %v2059_v9  ;;  %v2061_v1 = vshll.u32 %v19313_v3, %v2059_v9  ;;  %v2064_v43 = vsub.s32 4294967266, %v2059_v9  ;;  %v2466_v12 = vshrl.u32 %v2465_v40, 30 }
 0x41c   : > { %v10930_v38 = vrot.slane %v10834_v18, 4  ;;  %v19356_v26 = vrot.slane %v18783_v15, %v15637_v24  ;;  %v2077_v10 = vsel %vm19330_vm11, 0, %v2075_v58  ;;  %v1898_v32 = vand.u32 31, %v1896_v61 }
 0x41d   : > { %v2062_v46 = vshrl.u32 %v2044_v56, %v2060_v34  ;;  %v2065_v45 = vadd.s32 127, %v2064_v43  ;;  %v2467_v42 = vshll.u32 %v2466_v12, 30  ;;  %v1892_v17 = vor.u32 8388608, %v1891_v47 }
 0x41e   : > { %v10999_v27 = vsel %vm21965_vm0, %v5842_v5, %v10930_v38  ;;  %vm2406_vm9 = vcmp.lt.s32.totalorder %v19123_v25, 0  ;;  %v1899_v3 = vsub.s32 32, %v1898_v32  ;;  %v2081_v15 = vadd.s32 3, %v2077_v10 }
 0x41f   : > { %v11371_v49 = vmul.bf16 %v19356_v26, %v10999_v27  ;;  %v2063_v31 = vor.u32 %v2062_v46, %v2061_v1  ;;  %v2066_v35 = vshll.u32 %v2065_v45, 23  ;;  %v19363_v30 = vsub.s32 %v2464_v8, %v2467_v42 }
 0x420   : > { %v19365_v57 = vand.u32 3, %v2077_v10  ;;  %v2490_v0 = vsub.s32 4, %v2466_v12  ;;  %v615_v56 = vrot.slane %v22113_v53, %v18899_v28  ;;  %v19370_v54 = vshll.u32 %v1892_v17, 8 }
 0x421   : > { %13605 = vmatmul.mubr.bf16.vlgmr.msra.gmra.mrb[0].mxu0 %v11371_v49  ;;  %v2067_v47 = vor.u32 4788187, %v2066_v35  ;;  %v2070_v58 = vcvt.s32.f32 %v2063_v31  ;;  %v2470_v23 = vsub.s32 0, %v19363_v30  ;;  %v1901_v40 = vshll.u32 %v22040_v6, %v1898_v32 }
 0x422   : > { %v1902_v5 = vshrl.u32 %v21991_v16, %v1899_v3  ;;  %v1904_v8 = vshll.u32 %v21991_v16, %v1898_v32  ;;  %v1905_v18 = vshrl.u32 %v21992_v37, %v1899_v3  ;;  %v1907_v53 = vshll.u32 %v21992_v37, %v1898_v32 }
 0x423   : > { %v2068_v9 = vand.u32 2147483647, %v2067_v47  ;;  %v13942_v34 = vmin.u32 %v2470_v23, %v19363_v30  ;;  %v1908_v1 = vshrl.u32 %v22004_v39, %v1899_v3  ;;  %v2460_v43 = vadd.s32 %v19309_v51, %v19321_v41 }
 0x424   : > { %v2491_v38 = vsel %vm2406_vm9, %v2490_v0, %v2466_v12  ;;  %v1897_v10 = vshrl.u32 %v1896_v61, 5  ;;  %v19384_v46 = vmul.f32 %v15661_v55, %v615_v56  ;;  %v22125_v42 = vand.u32 2147483647, %v19123_v25 }
 0x425   : > { %v2071_v45 = vmul.f32 %v2070_v58, %v2068_v9  ;;  %v2472_v27 = vclz %v13942_v34  ;;  %v1900_v49 = vshrl.u32 %v22040_v6, %v1899_v3  ;;  %v1910_v31 = vshll.u32 %v22004_v39, %v1898_v32 }
 0x426   : > { %vm19388_vm2 = vcmp.le.f32.partialorder %v22125_v42, 0.7853982  ;;  %v1903_v51 = vor.u32 %v1902_v5, %v1901_v40  ;;  %v1906_v41 = vor.u32 %v1905_v18, %v1904_v8  ;;  %v1909_v35 = vor.u32 %v1908_v1, %v1907_v53 }
 0x427   : > { %v1911_v61 = vshrl.u32 %v22005_v59, %v1899_v3  ;;  %v2072_v12 = vxor.u32 2147483648, %v2071_v45  ;;  %v13943_v0 = vadd.s32 4294967294, %v2472_v27  ;;  %v1913_v56 = vshll.u32 %v22005_v59, %v1898_v32 }
 0x428   : > { %v1914_v47 = vshrl.u32 %v21993_v13, %v1899_v3  ;;  %vm1916_vm5 = vcmp.lt.s32.totalorder %v1897_v10, 1  ;;  %vm1917_vm1 = vcmp.lt.s32.totalorder %v1897_v10, 2  ;;  %vm1918_vm13 = vcmp.lt.s32.totalorder %v1897_v10, 3 }
 0x429   : > { %v1912_v58 = vor.u32 %v1911_v61, %v1910_v31  ;;  %v2073_v23 = vsel %vm1990_vm3, %v2072_v12, %v2071_v45  ;;  %vm13944_vm15 = vcmp.lt.s32.totalorder %v13943_v0, 0  ;;  %vm1919_vm4 = vcmp.lt.s32.totalorder %v1897_v10, 4 }
 0x42a   : > { %v1915_v9 = vor.u32 %v1914_v47, %v1913_v56  ;;  %v2076_v40 = vsel %vm19330_vm11, %v19061_v14, %v2073_v23  ;;  %v2475_v5 = vsel %vm13944_vm15, 0, %v13943_v0  ;;  %v1920_v8 = vsel %vm1916_vm5, %v1900_v49, %v1903_v51 }
 0x42b   : > { %v1921_v32 = vsel %vm1919_vm4, %v1909_v35, 2102212464  ;;  %15158 = vcosq.f32 %v2076_v40  ;;  %v2476_v3 = vsub.s32 32, %v2475_v5  ;;  %v2477_v18 = vshll.u32 %v19363_v30, %v2475_v5 }
 0x42c   : > { %v2480_v34 = vsub.s32 4294967266, %v2475_v5  ;;  %15160 = vsinq.f32 %v2076_v40  ;;  %v1922_v53 = vsel %vm1918_vm13, %v1906_v41, %v1921_v32  ;;  %v1924_v1 = vsel %vm1916_vm5, %v1903_v51, %v1906_v41 }
 0x42d   : > { %v1925_v45 = vsel %vm1919_vm4, %v1912_v58, 920167782  ;;  %v2082_v42 = vand.u32 3, %v2081_v15  ;;  %v2478_v62 = vshrl.u32 %v2460_v43, %v2476_v3  ;;  %v2493_v49 = vsel %vm19388_vm2, 0, %v2491_v38 }
 0x42e   : > { %v2481_v27 = vadd.s32 127, %v2480_v34  ;;  %v1926_v31 = vsel %vm1918_vm13, %v1909_v35, %v1925_v45  ;;  %v1928_v30 = vsel %vm1916_vm5, %v1906_v41, %v1909_v35  ;;  %v1929_v12 = vsel %vm1919_vm4, %v1915_v9, 1326507024 }
 0x42f   : > { %v1927_v61 = vsel %vm1917_vm1, %v1924_v1, %v1926_v31  ;;  %v2479_v0 = vor.u32 %v2478_v62, %v2477_v18  ;;  %v1923_v51 = vsel %vm1917_vm1, %v1920_v8, %v1922_v53  ;;  %v1930_v47 = vsel %vm1918_vm13, %v1912_v58, %v1929_v12 }
 0x430   : > { %v2482_v56 = vshll.u32 %v2481_v27, 23  ;;  %v1931_v15 = vsel %vm1917_vm1, %v1928_v30, %v1930_v47  ;;  %v19418_v43 = vmul.u32.u64.low %v19370_v54, %v1927_v61  ;;  %v19419_v23 = vmul.u32.u64.high %v19370_v54, %v1927_v61, %v19418_v43 }
 0x431   : > { %v2303_v38 = vand.u32 2139095040, %v19384_v46  ;;  %v2486_v5 = vcvt.s32.f32 %v2479_v0  ;;  %v19424_v41 = vmul.u32.u64.low %v19370_v54, %v1931_v15  ;;  %v19425_v35 = vmul.u32.u64.high %v19370_v54, %v1931_v15, %v19424_v41 }
 0x432   : > { %v2483_v40 = vor.u32 4788187, %v2482_v56  ;;  %vm2080_vm3 = vweird.f32 %v19061_v14  ;;  %vm7111_vm11 = vcmp.lt.s32.totalorder %v19365_v57, 2  ;;  %vm7112_vm8 = vcmp.eq.s32.totalorder %v19365_v57, 0 }
 0x433   : > { %v2304_v10 = vshrl.u32 %v2303_v38, 23  ;;  %vm7115_vm10 = vcmp.eq.s32.totalorder %v19365_v57, 2  ;;  %v2497_v9 = vadd.s32 3, %v2493_v49  ;;  %v1939_v8 = vmul.u32 %v19370_v54, %v1923_v51 }
 0x434   : > { %v2484_v58 = vand.u32 2147483647, %v2483_v40  ;;  %vm2083_vm12 = vcmp.lt.s32.totalorder %v2082_v42, 2  ;;  %v1942_v32 = vadd.s32 1, %v19419_v23  ;;  %v21956_v3 = vand.u32 2147483647, %v19384_v46 }
 0x435   : > { %v13937_v18 = vadd.s32 4294967169, %v2304_v10  ;;  %v15159_v34 = vpop.eup %15158  ;;  %vm2084_vm14 = vcmp.eq.s32.totalorder %v2082_v42, 0  ;;  %vm2087_vm5 = vcmp.eq.s32.totalorder %v2082_v42, 2  ;;  %vm1941_vm1 = vc.u32 %v19425_v35, %v19418_v43  ;;  %v22128_v42 = vld [vmem:[#allocation14_spill] sm:$0xff] }
 0x436   : > { %v2487_v53 = vmul.f32 %v2486_v5, %v2484_v58  ;;  %v15161_v1 = vpop.eup %15160  ;;  %v2088_v45 = vxor.u32 2147483648, %v15159_v34  ;;  %v19436_v62 = vand.u32 3, %v2493_v49  ;;  %v1943_v27 = vsel %vm1941_vm1, %v1942_v32, %v19419_v23 }
 0x437   : > { %v2310_v54 = vadd.s32 1, %v13937_v18  ;;  %v2085_v31 = vxor.u32 2147483648, %v15161_v1  ;;  %v19439_v30 = vand.u32 3, %v2497_v9  ;;  %v1944_v12 = vadd.s32 %v1943_v27, %v1939_v8 }
 0x438   : > { %v2488_v61 = vxor.u32 2147483648, %v2487_v53  ;;  %v2089_v0 = vsel %vm2087_vm5, %v2088_v45, %v15161_v1  ;;  %v7117_v56 = vsel %vm7115_vm10, %v2088_v45, %v15161_v1  ;;  %v2307_v51 = vand.u32 8388607, %v21956_v3 }
 0x439   : > { %vm2311_vm13 = vcmp.gt.s32.totalorder %v2310_v54, 0  ;;  %v2086_v47 = vsel %vm2084_vm14, %v15159_v34, %v2085_v31  ;;  %v7114_v49 = vsel %vm7112_vm8, %v15159_v34, %v2085_v31  ;;  %v1945_v23 = vadd.s32 536870912, %v1944_v12 }
 0x43a   : > { %v2489_v15 = vsel %vm2406_vm9, %v2488_v61, %v2487_v53  ;;  %v2090_v38 = vsel %vm2083_vm12, %v2086_v47, %v2089_v0  ;;  %v7118_v40 = vsel %vm7111_vm11, %v7114_v49, %v7117_v56  ;;  %v2312_v41 = vsel %vm2311_vm13, %v2310_v54, 0 }
 0x43b   : > { %v2492_v5 = vsel %vm19388_vm2, %v19123_v25, %v2489_v15  ;;  %v2091_v10 = vsel %vm2080_vm3, nan, %v2090_v38  ;;  %v7119_v58 = vsel %vm2080_vm3, nan, %v7118_v40  ;;  %v1946_v9 = vshrl.u32 %v1945_v23, 30 }
 0x43c   : > { %15162 = vcosq.f32 %v2492_v5  ;;  %v5847_v8 = vpack.c.bf16 %v2091_v10, %v2091_v10  ;;  %v10839_v32 = vpack.c.bf16 %v7119_v58, %v7119_v58  ;;  %v635_v57 = vrot.slane %v22128_v42, %v18670_v4 }
 0x43d   : > { %15164 = vsinq.f32 %v2492_v5  ;;  %vm21953_vm9 = vcmp.lt.s32.totalorder %v19197_v7, 0  ;;  %v1947_v18 = vshll.u32 %v1946_v9, 30  ;;  %v2314_v17 = vand.u32 31, %v2312_v41 }
 0x43e   : > { %v10935_v34 = vrot.slane %v10839_v32, 4  ;;  %vm7524_vm2 = vcmp.eq.s32.totalorder %v19436_v62, 0  ;;  %vm7527_vm15 = vcmp.eq.s32.totalorder %v19436_v62, 2  ;;  %v2308_v53 = vor.u32 8388608, %v2307_v51 }
 0x43f   : > { %v651_v14 = vrot.slane %v22128_v42, %v18704_v21  ;;  %vm2499_vm4 = vcmp.lt.s32.totalorder %v19439_v30, 2  ;;  %vm7523_vm3 = vcmp.lt.s32.totalorder %v19436_v62, 2  ;;  %v19469_v1 = vsub.s32 %v1944_v12, %v1947_v18 }
 0x440   : > { %v19471_v45 = vshrl.u32 %v2312_v41, 5  ;;  %v2315_v27 = vsub.s32 32, %v2314_v17  ;;  %v11019_v54 = vsel %vm21965_vm0, %v5847_v8, %v10935_v34  ;;  %vm2496_vm11 = vweird.f32 %v19123_v25 }
 0x441   : > { %vm2500_vm8 = vcmp.eq.s32.totalorder %v19439_v30, 0  ;;  %vm2503_vm10 = vcmp.eq.s32.totalorder %v19439_v30, 2  ;;  %v19478_v31 = vmul.f32 %v15661_v55, %v635_v57  ;;  %v11376_v61 = vmul.bf16 %v18933_v50, %v11019_v54 }
 0x442   : > { %v1950_v0 = vsub.s32 0, %v19469_v1  ;;  %v1970_v12 = vsub.s32 4, %v1946_v9  ;;  %v2317_v56 = vshll.u32 %v22040_v6, %v2314_v17  ;;  %v1940_v51 = vadd.s32 %v19418_v43, %v19425_v35 }
 0x443   : > { %v2318_v47 = vshrl.u32 %v21991_v16, %v2315_v27  ;;  %v19486_v49 = vshll.u32 %v2308_v53, 8  ;;  %v19489_v15 = vmul.f32 %v15661_v55, %v651_v14  ;;  %13388 = vmatprep.mubr.bf16.mxu1 %v11376_v61  ;;  %v2320_v38 = vshll.u32 %v21991_v16, %v2314_v17 }
 0x444   : > { %v13922_v23 = vmin.u32 %v1950_v0, %v19469_v1  ;;  %v2321_v40 = vshrl.u32 %v21992_v37, %v2315_v27  ;;  %vm2332_vm12 = vcmp.lt.s32.totalorder %v19471_v45, 1  ;;  %v2323_v5 = vshll.u32 %v21992_v37, %v2314_v17 }
 0x445   : > { %v2324_v43 = vshrl.u32 %v22004_v39, %v2315_v27  ;;  %vm2333_vm14 = vcmp.lt.s32.totalorder %v19471_v45, 2  ;;  %vm2334_vm5 = vcmp.lt.s32.totalorder %v19471_v45, 3  ;;  %v1971_v10 = vsel %vm21953_vm9, %v1970_v12, %v1946_v9 }
 0x446   : > { %v15163_v35 = vpop.eup %15162  ;;  %v1952_v41 = vclz %v13922_v23  ;;  %v2316_v58 = vshrl.u32 %v22040_v6, %v2315_v27  ;;  %v2319_v8 = vor.u32 %v2318_v47, %v2317_v56  ;;  %v2326_v18 = vshll.u32 %v22004_v39, %v2314_v17 }
 0x447   : > { %v15165_v32 = vpop.eup %15164  ;;  %v2504_v57 = vxor.u32 2147483648, %v15163_v35  ;;  %v2327_v34 = vshrl.u32 %v22005_v59, %v2315_v27  ;;  %v2329_v53 = vshll.u32 %v22005_v59, %v2314_v17  ;;  %v2322_v61 = vor.u32 %v2321_v40, %v2320_v38 }
 0x448   : > { %v2501_v14 = vxor.u32 2147483648, %v15165_v32  ;;  %v13923_v54 = vadd.s32 4294967294, %v1952_v41  ;;  %v2330_v0 = vshrl.u32 %v21993_v13, %v2315_v27  ;;  %vm19512_vm1 = vcmp.le.f32.partialorder %v1884_v52, 0.7853982 }
 0x449   : > { %v2505_v23 = vsel %vm2503_vm10, %v2504_v57, %v15165_v32  ;;  %v7529_v9 = vsel %vm7527_vm15, %v2504_v57, %v15165_v32  ;;  %v2325_v56 = vor.u32 %v2324_v43, %v2323_v5  ;;  %vm2335_vm13 = vcmp.lt.s32.totalorder %v19471_v45, 4 }
 0x44a   : > { %v2502_v17 = vsel %vm2500_vm8, %v15163_v35, %v2501_v14  ;;  %v7526_v27 = vsel %vm7524_vm2, %v15163_v35, %v2501_v14  ;;  %vm13924_vm9 = vcmp.lt.s32.totalorder %v13923_v54, 0  ;;  %v2328_v47 = vor.u32 %v2327_v34, %v2326_v18 }
 0x44b   : > { %v2506_v38 = vsel %vm2499_vm4, %v2502_v17, %v2505_v23  ;;  %v7530_v52 = vsel %vm7523_vm3, %v7526_v27, %v7529_v9  ;;  %v1955_v40 = vsel %vm13924_vm9, 0, %v13923_v54  ;;  %v2331_v41 = vor.u32 %v2330_v0, %v2329_v53 }
 0x44c   : > { %v2507_v5 = vsel %vm2496_vm11, nan, %v2506_v38  ;;  %v7531_v43 = vsel %vm2496_vm11, nan, %v7530_v52  ;;  %v1956_v32 = vsub.s32 32, %v1955_v40  ;;  %v1957_v57 = vshll.u32 %v19469_v1, %v1955_v40 }
 0x44d   : > { %v5851_v35 = vpack.c.bf16 %v2507_v5, %v2507_v5  ;;  %v10843_v14 = vpack.c.bf16 %v7531_v43, %v7531_v43  ;;  %v1960_v18 = vsub.s32 4294967266, %v1955_v40  ;;  %v2337_v30 = vsel %vm2335_vm13, %v2325_v56, 2102212464 }
 0x44e   : > { %v1958_v34 = vshrl.u32 %v1940_v51, %v1956_v32  ;;  %v2336_v62 = vsel %vm2332_vm12, %v2316_v58, %v2319_v8  ;;  %v2340_v53 = vsel %vm2332_vm12, %v2319_v8, %v2322_v61  ;;  %v2341_v25 = vsel %vm2335_vm13, %v2328_v47, 920167782 }
 0x44f   : > { %v10939_v54 = vrot.slane %v10843_v14, 4  ;;  %v1961_v0 = vadd.s32 127, %v1960_v18  ;;  %v2342_v1 = vsel %vm2334_vm5, %v2325_v56, %v2341_v25  ;;  %v2344_v23 = vsel %vm2332_vm12, %v2322_v61, %v2325_v56 }
 0x450   : > { %v1959_v9 = vor.u32 %v1958_v34, %v1957_v57  ;;  %v2338_v51 = vsel %vm2334_vm5, %v2322_v61, %v2337_v30  ;;  %v2343_v58 = vsel %vm2333_vm14, %v2340_v53, %v2342_v1  ;;  %v2345_v8 = vsel %vm2335_vm13, %v2331_v41, 1326507024 }
 0x451   : > { %v11035_v17 = vsel %vm21965_vm0, %v5851_v35, %v10939_v54  ;;  %v1962_v27 = vshll.u32 %v1961_v0, 23  ;;  %v2346_v38 = vsel %vm2334_vm5, %v2328_v47, %v2345_v8  ;;  %v2823_v52 = vand.u32 2139095040, %v19478_v31 }
 0x452   : > { %v11380_v56 = vmul.bf16 %v18938_v60, %v11035_v17  ;;  %v1966_v40 = vcvt.s32.f32 %v1959_v9  ;;  %v1973_v61 = vsel %vm19512_vm1, 0, %v1971_v10  ;;  %v2347_v5 = vsel %vm2333_vm14, %v2344_v23, %v2346_v38 }
 0x453   : > { %v1963_v43 = vor.u32 4788187, %v1962_v27  ;;  %v19558_v41 = vmul.u32.u64.low %v19486_v49, %v2347_v5  ;;  %v19559_v32 = vmul.u32.u64.high %v19486_v49, %v2347_v5, %v19558_v41  ;;  %v2824_v57 = vshrl.u32 %v2823_v52, 23 }
 0x454   : > { %13614 = vmatprep.mubr.bf16.mxu0 %v11380_v56  ;;  %v2339_v47 = vsel %vm2333_vm14, %v2336_v62, %v2338_v51  ;;  %v19564_v35 = vmul.u32.u64.low %v19486_v49, %v2343_v58  ;;  %v19565_v14 = vmul.u32.u64.high %v19486_v49, %v2343_v58, %v19564_v35  ;;  %v21955_v10 = vand.u32 2147483647, %v19478_v31 }
 0x455   : > { %v19571_v18 = vpack.i.b16 %v18709_v44, %v18709_v44  ;;  %v1964_v30 = vand.u32 2147483647, %v1963_v43  ;;  %v13957_v34 = vadd.s32 4294967169, %v2824_v57  ;;  %v1977_v53 = vadd.s32 3, %v1973_v61 }
 0x456   : > { %v2355_v54 = vmul.u32 %v19486_v49, %v2339_v47  ;;  %vm2357_vm9 = vc.u32 %v19559_v32, %v19564_v35  ;;  %v2358_v62 = vadd.s32 1, %v19565_v14  ;;  %v2827_v0 = vand.u32 8388607, %v21955_v10 }
 0x457   : > { %v1967_v25 = vmul.f32 %v1966_v40, %v1964_v30  ;;  %v2830_v45 = vadd.s32 1, %v13957_v34  ;;  %v21954_v1 = vand.u32 2147483647, %v19489_v15  ;;  %v3239_v44 = vand.u32 2139095040, %v19489_v15 }
 0x458   : > { %v19583_v51 = vand.u32 3, %v1973_v61  ;;  %v2359_v49 = vsel %vm2357_vm9, %v2358_v62, %v19565_v14  ;;  %v631_v8 = vrot.slane %v22128_v42, %v18859_v11  ;;  %vm22131_vm15 = vcmp.lt.s32.totalorder %v19197_v7, 0 }
 0x459   : > { %v1968_v9 = vxor.u32 2147483648, %v1967_v25  ;;  %vm2831_vm2 = vcmp.gt.s32.totalorder %v2830_v45, 0  ;;  %v19590_v27 = vand.u32 3, %v1977_v53  ;;  %v2360_v38 = vadd.s32 %v2359_v49, %v2355_v54 }
 0x45a   : > { %v2832_v58 = vsel %vm2831_vm2, %v2830_v45, 0  ;;  %v2828_v40 = vor.u32 8388608, %v2827_v0  ;;  %v3240_v61 = vshrl.u32 %v3239_v44, 23  ;;  %v3243_v5 = vand.u32 8388607, %v21954_v1 }
 0x45b   : > { %v1969_v17 = vsel %vm22131_vm15, %v1968_v9, %v1967_v25  ;;  %v2834_v52 = vand.u32 31, %v2832_v58  ;;  %v2361_v43 = vadd.s32 536870912, %v2360_v38  ;;  %v19597_v41 = vshrl.u32 %v2832_v58, 5 }
 0x45c   : > { %v1972_v56 = vsel %vm19512_vm1, %v19197_v7, %v1969_v17  ;;  %vm7012_vm4 = vcmp.eq.s32.totalorder %v19583_v51, 2  ;;  %vm7009_vm3 = vcmp.eq.s32.totalorder %v19583_v51, 0  ;;  %vm1979_vm11 = vcmp.lt.s32.totalorder %v19590_v27, 2 }
 0x45d   : > { %15166 = vcosq.f32 %v1972_v56  ;;  %v2835_v57 = vsub.s32 32, %v2834_v52  ;;  %v2837_v47 = vshll.u32 %v22040_v6, %v2834_v52  ;;  %v2840_v14 = vshll.u32 %v21991_v16, %v2834_v52 }
 0x45e   : > { %15168 = vsinq.f32 %v1972_v56  ;;  %v2846_v30 = vshll.u32 %v22004_v39, %v2834_v52  ;;  %v2362_v12 = vshrl.u32 %v2361_v43, 30  ;;  %v2843_v25 = vshll.u32 %v21992_v37, %v2834_v52 }
 0x45f   : > { %v2838_v34 = vshrl.u32 %v21991_v16, %v2835_v57  ;;  %v2841_v53 = vshrl.u32 %v21992_v37, %v2835_v57  ;;  %v2844_v54 = vshrl.u32 %v22004_v39, %v2835_v57  ;;  %v2847_v45 = vshrl.u32 %v22005_v59, %v2835_v57 }
 0x460   : > { %v2849_v62 = vshll.u32 %v22005_v59, %v2834_v52  ;;  %v2850_v0 = vshrl.u32 %v21993_v13, %v2835_v57  ;;  %vm1980_vm8 = vcmp.eq.s32.totalorder %v19590_v27, 0  ;;  %vm1983_vm10 = vcmp.eq.s32.totalorder %v19590_v27, 2 }
 0x461   : > { %vm7008_vm12 = vcmp.lt.s32.totalorder %v19583_v51, 2  ;;  %vm2302_vm14 = vcmp.lt.s32.totalorder %v19384_v46, 0  ;;  %v2363_v44 = vshll.u32 %v2362_v12, 30  ;;  %vm1976_vm5 = vweird.f32 %v19197_v7 }
 0x462   : > { %v2848_v9 = vor.u32 %v2847_v45, %v2846_v30  ;;  %v19617_v49 = vshll.u32 %v2828_v40, 8  ;;  %v13973_v58 = vadd.s32 4294967169, %v3240_v61  ;;  %v19620_v17 = vmul.f32 %v15661_v55, %v631_v8 }
 0x463   : > { %v19622_v52 = vsub.s32 %v2360_v38, %v2363_v44  ;;  %v2836_v56 = vshrl.u32 %v22040_v6, %v2835_v57  ;;  %v2845_v43 = vor.u32 %v2844_v54, %v2843_v25  ;;  %v3244_v23 = vor.u32 8388608, %v3243_v5 }
 0x464   : > { %v2839_v1 = vor.u32 %v2838_v34, %v2837_v47  ;;  %v2842_v10 = vor.u32 %v2841_v53, %v2840_v14  ;;  %v2851_v3 = vor.u32 %v2850_v0, %v2849_v62  ;;  %vm2855_vm1 = vcmp.lt.s32.totalorder %v19597_v41, 4 }
 0x465   : > { %v2356_v30 = vadd.s32 %v19564_v35, %v19559_v32  ;;  %v2366_v40 = vsub.s32 0, %v19622_v52  ;;  %vm2852_vm13 = vcmp.lt.s32.totalorder %v19597_v41, 1  ;;  %v2857_v8 = vsel %vm2855_vm1, %v2845_v43, 2102212464 }
 0x466   : > { %v2386_v38 = vsub.s32 4, %v2362_v12  ;;  %vm2854_vm9 = vcmp.lt.s32.totalorder %v19597_v41, 3  ;;  %v2861_v61 = vsel %vm2855_vm1, %v2848_v9, 920167782  ;;  %v3246_v5 = vadd.s32 1, %v13973_v58 }
 0x467   : > { %v15167_v57 = vpop.eup %15166  ;;  %v13938_v47 = vmin.u32 %v2366_v40, %v19622_v52  ;;  %v2856_v32 = vsel %vm2852_vm13, %v2836_v56, %v2839_v1  ;;  %v2858_v35 = vsel %vm2854_vm9, %v2842_v10, %v2857_v8  ;;  %v19640_v14 = vshll.u32 %v3244_v23, 8 }
 0x468   : > { %v15169_v34 = vpop.eup %15168  ;;  %v1984_v53 = vxor.u32 2147483648, %v15167_v57  ;;  %vm2853_vm2 = vcmp.lt.s32.totalorder %v19597_v41, 2  ;;  %v2860_v25 = vsel %vm2852_vm13, %v2839_v1, %v2842_v10  ;;  %v2865_v54 = vsel %vm2855_vm1, %v2851_v3, 1326507024 }
 0x469   : > { %v1981_v45 = vxor.u32 2147483648, %v15169_v34  ;;  %v2368_v62 = vclz %v13938_v47  ;;  %v2862_v0 = vsel %vm2854_vm9, %v2845_v43, %v2861_v61  ;;  %v2864_v44 = vsel %vm2852_vm13, %v2842_v10, %v2845_v43 }
 0x46a   : > { %v1985_v23 = vsel %vm1983_vm10, %v1984_v53, %v15169_v34  ;;  %v7014_v58 = vsel %vm7012_vm4, %v1984_v53, %v15169_v34  ;;  %v2387_v1 = vsel %vm2302_vm14, %v2386_v38, %v2362_v12  ;;  %v2859_v3 = vsel %vm2853_vm2, %v2856_v32, %v2858_v35 }
 0x46b   : > { %v1982_v56 = vsel %vm1980_vm8, %v15167_v57, %v1981_v45  ;;  %v7011_v40 = vsel %vm7009_vm3, %v15167_v57, %v1981_v45  ;;  %v13939_v8 = vadd.s32 4294967294, %v2368_v62  ;;  %v2866_v10 = vsel %vm2854_vm9, %v2848_v9, %v2865_v54 }
 0x46c   : > { %v1986_v43 = vsel %vm1979_vm11, %v1982_v56, %v1985_v23  ;;  %v7015_v61 = vsel %vm7008_vm12, %v7011_v40, %v7014_v58  ;;  %v2863_v12 = vsel %vm2853_vm2, %v2860_v25, %v2862_v0  ;;  %v2867_v38 = vsel %vm2853_vm2, %v2864_v44, %v2866_v10 }
 0x46d   : > { %v1987_v47 = vsel %vm1976_vm5, nan, %v1986_v43  ;;  %v7016_v57 = vsel %vm1976_vm5, nan, %v7015_v61  ;;  %vm13940_vm15 = vcmp.lt.s32.totalorder %v13939_v8, 0  ;;  %vm3247_vm4 = vcmp.gt.s32.totalorder %v3246_v5, 0 }
 0x46e   : > { %v5846_v9 = vpack.c.bf16 %v1987_v47, %v1987_v47  ;;  %v10838_v27 = vpack.c.bf16 %v7016_v57, %v7016_v57  ;;  %v2371_v32 = vsel %vm13940_vm15, 0, %v13939_v8  ;;  %v3248_v35 = vsel %vm3247_vm4, %v3246_v5, 0 }
 0x46f   : > { %v2372_v51 = vsub.s32 32, %v2371_v32  ;;  %v2373_v34 = vshll.u32 %v19622_v52, %v2371_v32  ;;  %v2376_v53 = vsub.s32 4294967266, %v2371_v32  ;;  %v2875_v25 = vmul.u32 %v19617_v49, %v2859_v3 }
 0x470   : > { %v10934_v41 = vrot.slane %v10838_v27, 4  ;;  %v22132_v54 = vand.u32 2147483647, %v19384_v46  ;;  %v19686_v7 = vmul.u32.u64.low %v19617_v49, %v2867_v38  ;;  %v19687_v62 = vmul.u32.u64.high %v19617_v49, %v2867_v38, %v19686_v7 }
 0x471   : > { %v3250_v0 = vand.u32 31, %v3248_v35  ;;  %v2374_v44 = vshrl.u32 %v2356_v30, %v2372_v51  ;;  %v2377_v5 = vadd.s32 127, %v2376_v53  ;;  %v3249_v3 = vshrl.u32 %v3248_v35, 5 }
 0x472   : > { %vm19681_vm3 = vcmp.le.f32.partialorder %v22132_v54, 0.7853982  ;;  %v19690_v23 = vmul.u32.u64.low %v19617_v49, %v2863_v12  ;;  %v19691_v52 = vmul.u32.u64.high %v19617_v49, %v2863_v12, %v19690_v23  ;;  %v11015_v58 = vsel %vm21965_vm0, %v5846_v9, %v10934_v41 }
 0x473   : > { %v3251_v56 = vsub.s32 32, %v3250_v0  ;;  %v3253_v40 = vshll.u32 %v22040_v6, %v3250_v0  ;;  %v11375_v8 = vmul.bf16 %v19139_v29, %v11015_v58  ;;  %v2375_v10 = vor.u32 %v2374_v44, %v2373_v34 }
 0x474   : > { %v2378_v43 = vshll.u32 %v2377_v5, 23  ;;  %v3256_v61 = vshll.u32 %v21991_v16, %v3250_v0  ;;  %vm2877_vm11 = vc.u32 %v19687_v62, %v19690_v23  ;;  %v3259_v12 = vshll.u32 %v21992_v37, %v3250_v0 }
 0x475   : > { %v3252_v30 = vshrl.u32 %v22040_v6, %v3251_v56  ;;  %v3254_v49 = vshrl.u32 %v21991_v16, %v3251_v56  ;;  %13389 = vmatmul.mubr.bf16.gmra.mrb[4].mxu1 %v11375_v8  ;;  %v2382_v47 = vcvt.s32.f32 %v2375_v10  ;;  %v2878_v57 = vadd.s32 1, %v19691_v52 }
 0x476   : > { %v2379_v38 = vor.u32 4788187, %v2378_v43  ;;  %v3257_v9 = vshrl.u32 %v21992_v37, %v3251_v56  ;;  %v3260_v32 = vshrl.u32 %v22004_v39, %v3251_v56  ;;  %v3262_v35 = vshll.u32 %v22004_v39, %v3250_v0 }
 0x477   : > { %v3255_v27 = vor.u32 %v3254_v49, %v3253_v40  ;;  %v3263_v51 = vshrl.u32 %v22005_v59, %v3251_v56  ;;  %v2879_v53 = vsel %vm2877_vm11, %v2878_v57, %v19691_v52  ;;  %v3265_v54 = vshll.u32 %v22005_v59, %v3250_v0 }
 0x478   : > { %v2380_v34 = vand.u32 2147483647, %v2379_v38  ;;  %v3258_v41 = vor.u32 %v3257_v9, %v3256_v61  ;;  %v2880_v7 = vadd.s32 %v2879_v53, %v2875_v25  ;;  %v3261_v44 = vor.u32 %v3260_v32, %v3259_v12 }
 0x479   : > { %v3264_v5 = vor.u32 %v3263_v51, %v3262_v35  ;;  %v3266_v58 = vshrl.u32 %v21993_v13, %v3251_v56  ;;  %v2389_v40 = vsel %vm19681_vm3, 0, %v2387_v1  ;;  %vm3268_vm8 = vcmp.lt.s32.totalorder %v3249_v3, 1  ;;  %v19727_v51 = vld [vmem:[%s16639_s17 + $0x8] sm:$0x77] }
 0x47a   : > { %v2383_v8 = vmul.f32 %v2382_v47, %v2380_v34  ;;  %vm3270_vm10 = vcmp.lt.s32.totalorder %v3249_v3, 3  ;;  %v2881_v10 = vadd.s32 536870912, %v2880_v7  ;;  %vm3269_vm12 = vcmp.lt.s32.totalorder %v3249_v3, 2 }
 0x47b   : > { %v3267_v43 = vor.u32 %v3266_v58, %v3265_v54  ;;  %vm3271_vm5 = vcmp.lt.s32.totalorder %v3249_v3, 4  ;;  %v3276_v61 = vsel %vm3268_vm8, %v3255_v27, %v3258_v41  ;;  %v3272_v12 = vsel %vm3268_vm8, %v3252_v30, %v3255_v27 }
 0x47c   : > { %v2384_v49 = vxor.u32 2147483648, %v2383_v8  ;;  %v3273_v52 = vsel %vm3271_vm5, %v3261_v44, 2102212464  ;;  %v3277_v0 = vsel %vm3271_vm5, %v3264_v5, 920167782  ;;  %v2882_v25 = vshrl.u32 %v2881_v10, 30 }
 0x47d   : > { %v3278_v38 = vsel %vm3270_vm10, %v3261_v44, %v3277_v0  ;;  %v3280_v56 = vsel %vm3268_vm8, %v3258_v41, %v3261_v44  ;;  %v3274_v1 = vsel %vm3270_vm10, %v3258_v41, %v3273_v52  ;;  %v3281_v9 = vsel %vm3271_vm5, %v3267_v43, 1326507024 }
 0x47e   : > { %v2385_v47 = vsel %vm2302_vm14, %v2384_v49, %v2383_v8  ;;  %v3279_v57 = vsel %vm3269_vm12, %v3276_v61, %v3278_v38  ;;  %v19720_v32 = vpack.i.b16 %v18738_v20, %v18738_v20  ;;  %v2883_v30 = vshll.u32 %v2882_v25, 30 }
 0x47f   : > { %v2388_v35 = vsel %vm19681_vm3, %v19384_v46, %v2385_v47  ;;  %v3282_v27 = vsel %vm3270_vm10, %v3264_v5, %v3281_v9  ;;  %v19731_v53 = vmul.u32.u64.low %v19640_v14, %v3279_v57  ;;  %v19732_v41 = vmul.u32.u64.high %v19640_v14, %v3279_v57, %v19731_v53 }
 0x480   : > { %15170 = vcosq.f32 %v2388_v35  ;;  %v3283_v34 = vsel %vm3269_vm12, %v3280_v56, %v3282_v27  ;;  %v2393_v20 = vadd.s32 3, %v2389_v40  ;;  %v19735_v54 = vsub.s32 %v2880_v7, %v2883_v30 }
 0x481   : > { %15172 = vsinq.f32 %v2388_v35  ;;  %v3275_v45 = vsel %vm3269_vm12, %v3272_v12, %v3274_v1  ;;  %v2906_v44 = vsub.s32 4, %v2882_v25  ;;  %v2719_v8 = vand.u32 2139095040, %v19620_v17 }
 0x482   : > { %v19739_v58 = vmul.u32.u64.low %v19640_v14, %v3283_v34  ;;  %v19740_v5 = vmul.u32.u64.high %v19640_v14, %v3283_v34, %v19739_v58  ;;  %v19745_v10 = vmul.bf16 %v18771_v2, %v19727_v51  ;;  %v7419_v49 = vand.u32 3, %v2389_v40 }
 0x483   : > { %v2886_v7 = vsub.s32 0, %v19735_v54  ;;  %v3294_v61 = vadd.s32 1, %v19732_v41  ;;  %v2720_v0 = vshrl.u32 %v2719_v8, 23  ;;  %vm2392_vm14 = vweird.f32 %v19384_v46 }
 0x484   : > { %v2394_v12 = vand.u32 3, %v2393_v20  ;;  %vm2822_vm1 = vcmp.lt.s32.totalorder %v19478_v31, 0  ;;  %v3291_v40 = vmul.u32 %v19640_v14, %v3275_v45  ;;  %vm3293_vm13 = vc.u32 %v19740_v5, %v19731_v53 }
 0x485   : > { %v13958_v2 = vmin.u32 %v2886_v7, %v19735_v54  ;;  %v2907_v38 = vsel %vm2822_vm1, %v2906_v44, %v2882_v25  ;;  %v13953_v56 = vadd.s32 4294967169, %v2720_v0  ;;  %v647_v47 = vrot.slane %v22128_v42, %v18899_v28 }
 0x486   : > { %vm7420_vm9 = vcmp.lt.s32.totalorder %v7419_v49, 2  ;;  %v22135_v1 = vand.u32 2147483647, %v19478_v31  ;;  %v21957_v14 = vand.u32 2147483647, %v19620_v17  ;;  %vm7421_vm15 = vcmp.eq.s32.totalorder %v7419_v49, 0 }
 0x487   : > { %v2888_v9 = vclz %v13958_v2  ;;  %vm7424_vm4 = vcmp.eq.s32.totalorder %v7419_v49, 2  ;;  %v3295_v25 = vsel %vm3293_vm13, %v3294_v61, %v19732_v41  ;;  %v2726_v35 = vadd.s32 1, %v13953_v56 }
 0x488   : > { %vm19767_vm2 = vcmp.le.f32.partialorder %v22135_v1, 0.7853982  ;;  %vm2395_vm3 = vcmp.lt.s32.totalorder %v2394_v12, 2  ;;  %v3296_v27 = vadd.s32 %v3295_v25, %v3291_v40  ;;  %vm2396_vm11 = vcmp.eq.s32.totalorder %v2394_v12, 0 }
 0x489   : > { %v13959_v30 = vadd.s32 4294967294, %v2888_v9  ;;  %v2909_v42 = vsel %vm19767_vm2, 0, %v2907_v38  ;;  %vm2399_vm8 = vcmp.eq.s32.totalorder %v2394_v12, 2  ;;  %v2876_v20 = vadd.s32 %v19690_v23, %v19687_v62 }
 0x48a   : > { %v15171_v34 = vpop.eup %15170  ;;  %vm2727_vm10 = vcmp.gt.s32.totalorder %v2726_v35, 0  ;;  %v3297_v58 = vadd.s32 536870912, %v3296_v27  ;;  %v2913_v61 = vadd.s32 3, %v2909_v42  ;;  %vm3238_vm5 = vcmp.lt.s32.totalorder %v19489_v15, 0 }
 0x48b   : > { %v15173_v45 = vpop.eup %15172  ;;  %v2400_v44 = vxor.u32 2147483648, %v15171_v34  ;;  %vm13960_vm12 = vcmp.lt.s32.totalorder %v13959_v30, 0  ;;  %v2728_v8 = vsel %vm2727_vm10, %v2726_v35, 0  ;;  %v3292_v46 = vadd.s32 %v19731_v53, %v19740_v5 }
 0x48c   : > { %v2397_v41 = vxor.u32 2147483648, %v15173_v45  ;;  %v2891_v7 = vsel %vm13960_vm12, 0, %v13959_v30  ;;  %v2730_v0 = vand.u32 31, %v2728_v8  ;;  %v3298_v9 = vshrl.u32 %v3297_v58, 30 }
 0x48d   : > { %v2401_v2 = vsel %vm2399_vm8, %v2400_v44, %v15173_v45  ;;  %v7426_v38 = vsel %vm7424_vm4, %v2400_v44, %v15173_v45  ;;  %v2892_v40 = vsub.s32 32, %v2891_v7  ;;  %v2893_v56 = vshll.u32 %v19735_v54, %v2891_v7 }
 0x48e   : > { %v2398_v1 = vsel %vm2396_vm11, %v15171_v34, %v2397_v41  ;;  %v7423_v62 = vsel %vm7421_vm15, %v15171_v34, %v2397_v41  ;;  %v2896_v23 = vsub.s32 4294967266, %v2891_v7  ;;  %v2723_v30 = vand.u32 8388607, %v21957_v14 }
 0x48f   : > { %v2402_v25 = vsel %vm2395_vm3, %v2398_v1, %v2401_v2  ;;  %v7427_v35 = vsel %vm7420_vm9, %v7423_v62, %v7426_v38  ;;  %v2894_v52 = vshrl.u32 %v2876_v20, %v2892_v40  ;;  %v3299_v34 = vshll.u32 %v3298_v9, 30 }
 0x490   : > { %v2403_v45 = vsel %vm2392_vm14, nan, %v2402_v25  ;;  %v7428_v54 = vsel %vm2392_vm14, nan, %v7427_v35  ;;  %v2897_v44 = vadd.s32 127, %v2896_v23  ;;  %v2731_v7 = vsub.s32 32, %v2730_v0 }
 0x491   : > { %v5850_v41 = vpack.c.bf16 %v2403_v45, %v2403_v45  ;;  %v10842_v58 = vpack.c.bf16 %v7428_v54, %v7428_v54  ;;  %v2895_v12 = vor.u32 %v2894_v52, %v2893_v56  ;;  %v19790_v2 = vand.u32 3, %v2909_v42 }
 0x492   : > { %v2898_v49 = vshll.u32 %v2897_v44, 23  ;;  %v19792_v20 = vsub.s32 %v3296_v27, %v3299_v34  ;;  %v19795_v38 = vmul.f32 %v15661_v55, %v647_v47  ;;  %v19797_v1 = vand.u32 3, %v2913_v61 }
 0x493   : > { %v10938_v40 = vrot.slane %v10842_v58, 4  ;;  %v2724_v62 = vor.u32 8388608, %v2723_v30  ;;  %v2902_v25 = vcvt.s32.f32 %v2895_v12  ;;  %v3322_v56 = vsub.s32 4, %v3298_v9 }
 0x494   : > { %v2899_v23 = vor.u32 4788187, %v2898_v49  ;;  %v3302_v52 = vsub.s32 0, %v19792_v20  ;;  %v2733_v27 = vshll.u32 %v22040_v6, %v2730_v0  ;;  %v2734_v35 = vshrl.u32 %v21991_v16, %v2731_v7 }
 0x495   : > { %v11031_v42 = vsel %vm21965_vm0, %v5850_v41, %v10938_v40  ;;  %v2736_v47 = vshll.u32 %v21991_v16, %v2730_v0  ;;  %v2737_v53 = vshrl.u32 %v21992_v37, %v2731_v7  ;;  %v2729_v5 = vshrl.u32 %v2728_v8, 5 }
 0x496   : > { %v11379_v61 = vmul.bf16 %v19356_v26, %v11031_v42  ;;  %v2900_v45 = vand.u32 2147483647, %v2899_v23  ;;  %v13974_v54 = vmin.u32 %v3302_v52, %v19792_v20  ;;  %v19809_v30 = vshll.u32 %v2724_v62, 8 }
 0x497   : > { %v21958_v44 = vand.u32 2147483647, %v19795_v38  ;;  %v3135_v34 = vand.u32 2139095040, %v19795_v38  ;;  %v2732_v12 = vshrl.u32 %v22040_v6, %v2731_v7  ;;  %v2739_v49 = vshll.u32 %v21992_v37, %v2730_v0 }
 0x498   : > { %13615 = vmatmul.mubr.bf16.gmra.mrb[4].mxu0 %v11379_v61  ;;  %v2903_v41 = vmul.f32 %v2902_v25, %v2900_v45  ;;  %v3304_v58 = vclz %v13974_v54  ;;  %v22138_v40 = vand.u32 2147483647, %v19489_v15  ;;  %v3323_v8 = vsel %vm3238_vm5, %v3322_v56, %v3298_v9 }
 0x499   : > { %v2735_v62 = vor.u32 %v2734_v35, %v2733_v27  ;;  %v2738_v52 = vor.u32 %v2737_v53, %v2736_v47  ;;  %v2740_v42 = vshrl.u32 %v22004_v39, %v2731_v7  ;;  %v2742_v45 = vshll.u32 %v22004_v39, %v2730_v0 }
 0x49a   : > { %vm19817_vm14 = vcmp.le.f32.partialorder %v22138_v40, 0.7853982  ;;  %v2904_v61 = vxor.u32 2147483648, %v2903_v41  ;;  %v13975_v25 = vadd.s32 4294967294, %v3304_v58  ;;  %v2743_v54 = vshrl.u32 %v22005_v59, %v2731_v7 }
 0x49b   : > { %v2741_v14 = vor.u32 %v2740_v42, %v2739_v49  ;;  %v2745_v3 = vshll.u32 %v22005_v59, %v2730_v0  ;;  %v2746_v40 = vshrl.u32 %v21993_v13, %v2731_v7  ;;  %vm2748_vm13 = vcmp.lt.s32.totalorder %v2729_v5, 1 }
 0x49c   : > { %v2905_v43 = vsel %vm2822_vm1, %v2904_v61, %v2903_v41  ;;  %vm13976_vm9 = vcmp.lt.s32.totalorder %v13975_v25, 0  ;;  %v2744_v9 = vor.u32 %v2743_v54, %v2742_v45  ;;  %vm2749_vm15 = vcmp.lt.s32.totalorder %v2729_v5, 2 }
 0x49d   : > { %v2908_v56 = vsel %vm19767_vm2, %v19478_v31, %v2905_v43  ;;  %v3307_v27 = vsel %vm13976_vm9, 0, %v13975_v25  ;;  %v2747_v35 = vor.u32 %v2746_v40, %v2745_v3  ;;  %vm2750_vm4 = vcmp.lt.s32.totalorder %v2729_v5, 3 }
 0x49e   : > { %15174 = vcosq.f32 %v2908_v56  ;;  %v3308_v47 = vsub.s32 32, %v3307_v27  ;;  %v3309_v0 = vshll.u32 %v19792_v20, %v3307_v27  ;;  %v3312_v53 = vsub.s32 4294967266, %v3307_v27 }
 0x49f   : > { %15176 = vsinq.f32 %v2908_v56  ;;  %vm2751_vm3 = vcmp.lt.s32.totalorder %v2729_v5, 4  ;;  %v2752_v7 = vsel %vm2748_vm13, %v2732_v12, %v2735_v62  ;;  %v2756_v41 = vsel %vm2748_vm13, %v2735_v62, %v2738_v52 }
 0x4a0   : > { %v3310_v58 = vshrl.u32 %v3292_v46, %v3308_v47  ;;  %v3313_v49 = vadd.s32 127, %v3312_v53  ;;  %v2753_v42 = vsel %vm2751_vm3, %v2741_v14, 2102212464  ;;  %v2757_v61 = vsel %vm2751_vm3, %v2744_v9, 920167782 }
 0x4a1   : > { %v2754_v43 = vsel %vm2750_vm4, %v2738_v52, %v2753_v42  ;;  %v2758_v3 = vsel %vm2750_vm4, %v2741_v14, %v2757_v61  ;;  %v2760_v57 = vsel %vm2748_vm13, %v2738_v52, %v2741_v14  ;;  %v2761_v25 = vsel %vm2751_vm3, %v2747_v35, 1326507024 }
 0x4a2   : > { %v3311_v45 = vor.u32 %v3310_v58, %v3309_v0  ;;  %v3314_v20 = vshll.u32 %v3313_v49, 23  ;;  %v3325_v54 = vsel %vm19817_vm14, 0, %v3323_v8  ;;  %v2759_v12 = vsel %vm2749_vm15, %v2756_v41, %v2758_v3 }
 0x4a3   : > { %vm2912_vm1 = vweird.f32 %v19478_v31  ;;  %v2755_v46 = vsel %vm2749_vm15, %v2752_v7, %v2754_v43  ;;  %v2762_v62 = vsel %vm2750_vm4, %v2744_v9, %v2761_v25  ;;  %v3136_v35 = vshrl.u32 %v3135_v34, 23 }
 0x4a4   : > { %v19846_v40 = vmul.u32.u64.low %v19809_v30, %v2759_v12  ;;  %v19847_v56 = vmul.u32.u64.high %v19809_v30, %v2759_v12, %v19846_v40  ;;  %v3315_v14 = vor.u32 4788187, %v3314_v20  ;;  %v3318_v52 = vcvt.s32.f32 %v3311_v45 }
 0x4a5   : > { %v2763_v27 = vsel %vm2749_vm15, %v2760_v57, %v2762_v62  ;;  %vm7935_vm2 = vcmp.lt.s32.totalorder %v19790_v2, 2  ;;  %v3329_v8 = vadd.s32 3, %v3325_v54  ;;  %vm7936_vm11 = vcmp.eq.s32.totalorder %v19790_v2, 0 }
 0x4a6   : > { %v19853_v47 = vmul.u32.u64.low %v19809_v30, %v2763_v27  ;;  %v19854_v0 = vmul.u32.u64.high %v19809_v30, %v2763_v27, %v19853_v47  ;;  %vm7939_vm8 = vcmp.eq.s32.totalorder %v19790_v2, 2  ;;  %v3316_v9 = vand.u32 2147483647, %v3315_v14 }
 0x4a7   : > { %v13969_v53 = vadd.s32 4294967169, %v3136_v35  ;;  %vm2915_vm10 = vcmp.lt.s32.totalorder %v19797_v1, 2  ;;  %vm2916_vm12 = vcmp.eq.s32.totalorder %v19797_v1, 0  ;;  %v2771_v5 = vmul.u32 %v19809_v30, %v2755_v46 }
 0x4a8   : > { %v2774_v34 = vadd.s32 1, %v19847_v56  ;;  %v15175_v7 = vpop.eup %15174  ;;  %vm2919_vm13 = vcmp.eq.s32.totalorder %v19797_v1, 2  ;;  %v3319_v41 = vmul.f32 %v3318_v52, %v3316_v9  ;;  %v3139_v58 = vand.u32 8388607, %v21958_v44 }
 0x4a9   : > { %v3142_v49 = vadd.s32 1, %v13969_v53  ;;  %v15177_v42 = vpop.eup %15176  ;;  %v2920_v61 = vxor.u32 2147483648, %v15175_v7  ;;  %v19865_v43 = vand.u32 3, %v3329_v8  ;;  %v19867_v3 = vand.u32 3, %v3325_v54 }
 0x4aa   : > { %vm2773_vm9 = vc.u32 %v19854_v0, %v19846_v40  ;;  %v2917_v30 = vxor.u32 2147483648, %v15177_v42  ;;  %v3320_v57 = vxor.u32 2147483648, %v3319_v41  ;;  %v3140_v52 = vor.u32 8388608, %v3139_v58 }
 0x4ab   : > { %v2775_v25 = vsel %vm2773_vm9, %v2774_v34, %v19847_v56  ;;  %vm3143_vm15 = vcmp.gt.s32.totalorder %v3142_v49, 0  ;;  %v2921_v45 = vsel %vm2919_vm13, %v2920_v61, %v15177_v42  ;;  %v7941_v20 = vsel %vm7939_vm8, %v2920_v61, %v15177_v42 }
 0x4ac   : > { %v2776_v12 = vadd.s32 %v2775_v25, %v2771_v5  ;;  %v3144_v46 = vsel %vm3143_vm15, %v3142_v49, 0  ;;  %v2918_v62 = vsel %vm2916_vm12, %v15175_v7, %v2917_v30  ;;  %v7938_v54 = vsel %vm7936_vm11, %v15175_v7, %v2917_v30  ;;  %v15248_v7 = vld [vmem:[%s15612_s7 + $0x18] sm:$0xff] }
 0x4ad   : > { %v3321_v14 = vsel %vm3238_vm5, %v3320_v57, %v3319_v41  ;;  %v2922_v56 = vsel %vm2915_vm10, %v2918_v62, %v2921_v45  ;;  %v7942_v27 = vsel %vm7935_vm2, %v7938_v54, %v7941_v20  ;;  %v3146_v53 = vand.u32 31, %v3144_v46 }
 0x4ae   : > { %v3324_v35 = vsel %vm19817_vm14, %v19489_v15, %v3321_v14  ;;  %v2777_v8 = vadd.s32 536870912, %v2776_v12  ;;  %v2923_v47 = vsel %vm2912_vm1, nan, %v2922_v56  ;;  %v7943_v9 = vsel %vm2912_vm1, nan, %v7942_v27 }
 0x4af   : > { %15178 = vcosq.f32 %v3324_v35  ;;  %v5855_v5 = vpack.c.bf16 %v2923_v47, %v2923_v47  ;;  %v10847_v1 = vpack.c.bf16 %v7943_v9, %v7943_v9  ;;  %vm3335_vm5 = vcmp.eq.s32.totalorder %v19865_v43, 2 }
 0x4b0   : > { %15180 = vsinq.f32 %v3324_v35  ;;  %v19891_v34 = vshrl.u32 %v2777_v8, 30  ;;  %vm8351_vm4 = vcmp.eq.s32.totalorder %v19867_v3, 2  ;;  %v3147_v2 = vsub.s32 32, %v3146_v53 }
 0x4b1   : > { %v19897_v23 = vpack.i.b16 %v18692_v22, %v18692_v22  ;;  %v11816_v41 = vpack.c.bf16 %v15248_v7, %v15248_v7  ;;  %v10943_v31 = vrot.slane %v10847_v1, 4  ;;  %vm3332_vm14 = vcmp.eq.s32.totalorder %v19865_v43, 0 }
 0x4b2   : > { %vm8348_vm3 = vcmp.eq.s32.totalorder %v19867_v3, 0  ;;  %v2779_v58 = vshll.u32 %v19891_v34, 30  ;;  %v19903_v49 = vshll.u32 %v3140_v52, 8  ;;  %vm3331_vm1 = vcmp.lt.s32.totalorder %v19865_v43, 2 }
 0x4b3   : > { %vm8347_vm2 = vcmp.lt.s32.totalorder %v19867_v3, 2  ;;  %v19909_v22 = vshrl.u32 %v3144_v46, 5  ;;  %v3149_v61 = vshll.u32 %v22040_v6, %v3146_v53  ;;  %v3152_v30 = vshll.u32 %v21991_v16, %v3146_v53 }
 0x4b4   : > { %v3155_v57 = vshll.u32 %v21992_v37, %v3146_v53  ;;  %v11051_v25 = vsel %vm21965_vm0, %v5855_v5, %v10943_v31  ;;  %vm3328_vm11 = vweird.f32 %v19489_v15  ;;  %v19916_v45 = vsub.s32 %v2776_v12, %v2779_v58 }
 0x4b5   : > { %v3150_v20 = vshrl.u32 %v21991_v16, %v3147_v2  ;;  %v3158_v62 = vshll.u32 %v22004_v39, %v3146_v53  ;;  %v11384_v54 = vmul.bf16 %v18933_v50, %v11051_v25  ;;  %v3153_v46 = vshrl.u32 %v21992_v37, %v3147_v2 }
 0x4b6   : > { %v3156_v14 = vshrl.u32 %v22004_v39, %v3147_v2  ;;  %v3159_v52 = vshrl.u32 %v22005_v59, %v3147_v2  ;;  %v2782_v56 = vsub.s32 0, %v19916_v45  ;;  %v11438_v27 = vrot.slane %v19897_v23, %v15632_v19 }
 0x4b7   : > { %v11704_v12 = vrot.slane %v19897_v23, %v15637_v24  ;;  %v19931_v35 = vpack.i.b16 %v18715_v36, %v18715_v36  ;;  %13398 = vmatprep.mubr.bf16.mxu1 %v11384_v54  ;;  %v2772_v8 = vadd.s32 %v19846_v40, %v19854_v0  ;;  %v3148_v47 = vshrl.u32 %v22040_v6, %v3147_v2 }
 0x4b8   : > { %v3161_v9 = vshll.u32 %v22005_v59, %v3146_v53  ;;  %v3162_v5 = vshrl.u32 %v21993_v13, %v3147_v2  ;;  %v13954_v1 = vmin.u32 %v2782_v56, %v19916_v45  ;;  %v2802_v7 = vsub.s32 4, %v19891_v34 }
 0x4b9   : > { %v3151_v31 = vor.u32 %v3150_v20, %v3149_v61  ;;  %v19941_v58 = vmul.bf16 %v11816_v41, %v18933_v50  ;;  %v15179_v36 = vpop.eup %15178  ;;  %v3154_v25 = vor.u32 %v3153_v46, %v3152_v30  ;;  %v3157_v54 = vor.u32 %v3156_v14, %v3155_v57 }
 0x4ba   : > { %v3160_v44 = vor.u32 %v3159_v52, %v3158_v62  ;;  %vm3164_vm8 = vcmp.lt.s32.totalorder %v19909_v22, 1  ;;  %v15181_v40 = vpop.eup %15180  ;;  %v3336_v0 = vxor.u32 2147483648, %v15179_v36  ;;  %v2784_v42 = vclz %v13954_v1 }
 0x4bb   : > { %v3163_v53 = vor.u32 %v3162_v5, %v3161_v9  ;;  %vm3165_vm10 = vcmp.lt.s32.totalorder %v19909_v22, 2  ;;  %v3333_v2 = vxor.u32 2147483648, %v15181_v40  ;;  %vm3166_vm12 = vcmp.lt.s32.totalorder %v19909_v22, 3 }
 0x4bc   : > { %vm3167_vm13 = vcmp.lt.s32.totalorder %v19909_v22, 4  ;;  %v3168_v50 = vsel %vm3164_vm8, %v3148_v47, %v3151_v31  ;;  %v3337_v41 = vsel %vm3335_vm5, %v3336_v0, %v15181_v40  ;;  %v8353_v61 = vsel %vm8351_vm4, %v3336_v0, %v15181_v40 }
 0x4bd   : > { %v13955_v30 = vadd.s32 4294967294, %v2784_v42  ;;  %v3169_v57 = vsel %vm3167_vm13, %v3157_v54, 2102212464  ;;  %v3334_v20 = vsel %vm3332_vm14, %v15179_v36, %v3333_v2  ;;  %v8350_v62 = vsel %vm8348_vm3, %v15179_v36, %v3333_v2 }
 0x4be   : > { %v3170_v46 = vsel %vm3166_vm12, %v3154_v25, %v3169_v57  ;;  %v3172_v14 = vsel %vm3164_vm8, %v3151_v31, %v3154_v25  ;;  %v3338_v52 = vsel %vm3331_vm1, %v3334_v20, %v3337_v41  ;;  %v8354_v42 = vsel %vm8347_vm2, %v8350_v62, %v8353_v61 }
 0x4bf   : > { %vm13956_vm9 = vcmp.lt.s32.totalorder %v13955_v30, 0  ;;  %v3171_v56 = vsel %vm3165_vm10, %v3168_v50, %v3170_v46  ;;  %v3339_v47 = vsel %vm3328_vm11, nan, %v3338_v52  ;;  %v8355_v9 = vsel %vm3328_vm11, nan, %v8354_v42 }
 0x4c0   : > { %vm2718_vm15 = vcmp.lt.s32.totalorder %v19620_v17, 0  ;;  %v2787_v5 = vsel %vm13956_vm9, 0, %v13955_v30  ;;  %v3173_v43 = vsel %vm3167_vm13, %v3160_v44, 920167782  ;;  %v5859_v1 = vpack.c.bf16 %v3339_v47, %v3339_v47 }
 0x4c1   : > { %v10851_v31 = vpack.c.bf16 %v8355_v9, %v8355_v9  ;;  %v2788_v3 = vsub.s32 32, %v2787_v5  ;;  %v2789_v36 = vshll.u32 %v19916_v45, %v2787_v5  ;;  %v2792_v40 = vsub.s32 4294967266, %v2787_v5 }
 0x4c2   : > { %v3174_v0 = vsel %vm3166_vm12, %v3157_v54, %v3173_v43  ;;  %v3176_v2 = vsel %vm3164_vm8, %v3154_v25, %v3157_v54  ;;  %v3177_v15 = vsel %vm3167_vm13, %v3163_v53, 1326507024  ;;  %v22141_v22 = vrot.slane %v19571_v18, %v15632_v19 }
 0x4c3   : > { %v10947_v50 = vrot.slane %v10851_v31, 4  ;;  %v2790_v41 = vshrl.u32 %v2772_v8, %v2788_v3  ;;  %v3175_v61 = vsel %vm3165_vm10, %v3172_v14, %v3174_v0  ;;  %v3178_v30 = vsel %vm3166_vm12, %v3160_v44, %v3177_v15  ;;  %v11416_v31 = vld [vmem:[%s16639_s17 + $0x18] sm:$0x77] }
 0x4c4   : > { %v2793_v57 = vadd.s32 127, %v2792_v40  ;;  %v3179_v45 = vsel %vm3165_vm10, %v3176_v2, %v3178_v30  ;;  %v19990_v20 = vmul.u32.u64.low %v19903_v49, %v3175_v61  ;;  %v19991_v62 = vmul.u32.u64.high %v19903_v49, %v3175_v61, %v19990_v20 }
 0x4c5   : > { %v11067_v25 = vsel %vm21965_vm0, %v5859_v1, %v10947_v50  ;;  %v2791_v54 = vor.u32 %v2790_v41, %v2789_v36  ;;  %v19996_v8 = vmul.u32.u64.low %v19903_v49, %v3179_v45  ;;  %v19997_v53 = vmul.u32.u64.high %v19903_v49, %v3179_v45, %v19996_v8 }
 0x4c6   : > { %v11388_v46 = vmul.bf16 %v18938_v60, %v11067_v25  ;;  %v2794_v44 = vshll.u32 %v2793_v57, 23  ;;  %v3187_v14 = vmul.u32 %v19903_v49, %v3171_v56  ;;  %v14266_v52 = vcombine.low %v11438_v27, %v22141_v22 }
 0x4c7   : > { %v2798_v42 = vcvt.s32.f32 %v2791_v54  ;;  %v22142_v47 = vrot.slane %v19571_v18, %v15637_v24  ;;  %v12004_v5 = vshrl.u32 %v19941_v58, 16  ;;  %v12007_v43 = vshll.u32 %v19941_v58, 16 }
 0x4c8   : > { %13624 = vmatprep.mubr.bf16.mxu0 %v11388_v46  ;;  %v2795_v49 = vor.u32 4788187, %v2794_v44  ;;  %v3190_v56 = vadd.s32 1, %v19991_v62  ;;  %v20017_v1 = vmul.bf16 %v14266_v52, %v19727_v51  ;;  %v11462_v27 = vrot.slane %v19931_v35, %v15632_v19  ;;  %v15249_v52 = vld [vmem:[%s15612_s7 + $0x38] sm:$0xff] }
 0x4c9   : > { %v14282_v9 = vcombine.low %v11704_v12, %v22142_v47  ;;  %v2803_v18 = vsel %vm2718_vm15, %v2802_v7, %v19891_v34  ;;  %vm3189_vm5 = vc.u32 %v19997_v53, %v19990_v20  ;;  %v12006_v12 = vrot.slane %v12004_v5, 6 }
 0x4ca   : > { %v2796_v58 = vand.u32 2147483647, %v2795_v49  ;;  %v3191_v3 = vsel %vm3189_vm5, %v3190_v56, %v19991_v62  ;;  %v14292_v36 = vcombine.high %v20017_v1, %v20017_v1  ;;  %v12009_v40 = vrot.slane %v12007_v43, 7 }
 0x4cb   : > { %v20030_v23 = vmul.bf16 %v14282_v9, %v19727_v51  ;;  %v3192_v0 = vadd.s32 %v3191_v3, %v3187_v14  ;;  %v22143_v34 = vrot.slane %v19720_v32, %v15632_v19  ;;  %v11720_v51 = vrot.slane %v19931_v35, %v15637_v24 }
 0x4cc   : > { %v20043_v15 = vmul.bf16 %v18856_v33, %v11416_v31  ;;  %v22144_v50 = vand.u32 2147483647, %v19620_v17  ;;  %v2799_v61 = vmul.f32 %v2798_v42, %v2796_v58  ;;  %v22147_v30 = vcombine.high %v19745_v10, %v19745_v10  ;;  %v15250_v58 = vld [vmem:[%s15612_s7 + $0x10] sm:$0xff] }
 0x4cd   : > { %v14324_v2 = vcombine.high %v20030_v23, %v20030_v23  ;;  %v14268_v7 = vcombine.low %v11462_v27, %v22143_v34  ;;  %vm22148_vm14 = vcmask 1040384   ;;  %v3193_v45 = vadd.s32 536870912, %v3192_v0 }
 0x4ce   : > { %vm20047_vm4 = vcmp.le.f32.partialorder %v22144_v50, 0.7853982  ;;  %v12227_v57 = vsel %vm22148_vm14, %v14292_v36, %v22147_v30  ;;  %vm22149_vm3 = vcmask 1041408   ;;  %v22150_v33 = vrot.slane %v19720_v32, %v15637_v24  ;;  %vm22152_vm2 = vmmov %vm22148_vm14 }
 0x4cf   : > { %v12272_v62 = vsel %vm22149_vm3, %v12227_v57, %v14324_v2  ;;  %v20056_v25 = vmul.bf16 %v14268_v7, %v11416_v31  ;;  %v2800_v54 = vxor.u32 2147483648, %v2799_v61  ;;  %v2805_v8 = vsel %vm20047_vm4, 0, %v2803_v18  ;;  %vm22153_vm11 = vmmov %vm22149_vm3  ;;  %v22154_v57 = vld [vmem:[#allocation17_spill] sm:$0xff] }
 0x4d0   : > { %v14284_v35 = vcombine.low %v11720_v51, %v22150_v33  ;;  %v12010_v46 = vor.u32 %v12009_v40, %v12006_v12  ;;  %v20063_v44 = vshrl.u32 %v3193_v45, 30  ;;  %v11820_v42 = vpack.c.bf16 %v15249_v52, %v15249_v52  ;;  %v22156_v52 = vld [vmem:[#allocation16_spill] sm:$0xff] }
 0x4d1   : > { %v2801_v22 = vsel %vm2718_vm15, %v2800_v54, %v2799_v61  ;;  %v14296_v47 = vcombine.high %v20056_v25, %v20056_v25  ;;  %v14312_v32 = vcombine.high %v20043_v15, %v20043_v15  ;;  %v2809_v5 = vadd.s32 3, %v2805_v8 }
 0x4d2   : > { %v20065_v14 = vmul.bf16 %v14284_v35, %v11416_v31  ;;  %v2804_v9 = vsel %vm20047_vm4, %v19620_v17, %v2801_v22  ;;  %v3195_v43 = vshll.u32 %v20063_v44, 30  ;;  %vm22151_vm1 = vcmask 1042432   ;;  %vm22155_vm4 = vmmov %vm22152_vm2 }
 0x4d3   : > { %15182 = vcosq.f32 %v2804_v9  ;;  %v12305_v49 = vsel %vm22151_vm1, %v12272_v62, %v12010_v46  ;;  %v7831_v27 = vand.u32 3, %v2805_v8  ;;  %v11836_v18 = vmul.bf16 %v11820_v42, %v18938_v60 }
 0x4d4   : > { %v14328_v56 = vcombine.high %v20065_v14, %v20065_v14  ;;  %15184 = vsinq.f32 %v2804_v9  ;;  %v20081_v31 = vsub.s32 %v3192_v0, %v3195_v43  ;;  %v12239_v12 = vsel %vm22152_vm2, %v14296_v47, %v14312_v32  ;;  %v15251_v32 = vld [vmem:[%s15612_s7 + $0x30] sm:$0xff] }
 0x4d5   : > { %v11815_v3 = vpack.c.bf16 %v15250_v58, %v15250_v58  ;;  %v2810_v36 = vand.u32 3, %v2809_v5  ;;  %v12336_v2 = vsel %vm21965_vm0, %v12305_v49, %v12010_v46  ;;  %v14291_v0 = vcombine.low %v20017_v1, %v20017_v1 }
 0x4d6   : > { %v3198_v40 = vsub.s32 0, %v20081_v31  ;;  %v20089_v34 = vsel %vm22153_vm11, %v12239_v12, %v14328_v56  ;;  %v14307_v60 = vcombine.low %v19745_v10, %v19745_v10  ;;  %vm2808_vm8 = vweird.f32 %v19620_v17  ;;  %vm22158_vm11 = vmmov %vm22155_vm4 }
 0x4d7   : > { %v11831_v7 = vmul.bf16 %v11815_v3, %v19139_v29  ;;  %vm7832_vm10 = vcmp.lt.s32.totalorder %v7831_v27, 2  ;;  %vm7833_vm12 = vcmp.eq.s32.totalorder %v7831_v27, 0  ;;  %v14323_v50 = vcombine.low %v20030_v23, %v20030_v23 }
 0x4d8   : > { %v13970_v51 = vmin.u32 %v3198_v40, %v20081_v31  ;;  %vm7836_vm13 = vcmp.eq.s32.totalorder %v7831_v27, 2  ;;  %v12036_v41 = vshrl.u32 %v11836_v18, 16  ;;  %vm2811_vm9 = vcmp.lt.s32.totalorder %v2810_v36, 2 }
 0x4d9   : > { %v11996_v61 = vshrl.u32 %v11831_v7, 16  ;;  %v11999_v30 = vshll.u32 %v11831_v7, 16  ;;  %vm3134_vm15 = vcmp.lt.s32.totalorder %v19795_v38, 0  ;;  %v12368_v10 = vsel %vm17005_vm7, %v12336_v2, %v22154_v57 }
 0x4da   : > { %v3200_v1 = vclz %v13970_v51  ;;  %v12039_v45 = vshll.u32 %v11836_v18, 16  ;;  %vm2812_vm5 = vcmp.eq.s32.totalorder %v2810_v36, 0  ;;  %v12224_v35 = vsel %vm22155_vm4, %v14291_v0, %v14307_v60 }
 0x4db   : > { %v11998_v62 = vrot.slane %v11996_v61, 6  ;;  %v12001_v33 = vrot.slane %v11999_v30, 7  ;;  %vm2815_vm14 = vcmp.eq.s32.totalorder %v2810_v36, 2  ;;  %v3188_v23 = vadd.s32 %v19990_v20, %v19997_v53 }
 0x4dc   : > { %v13971_v54 = vadd.s32 4294967294, %v3200_v1  ;;  %v12270_v8 = vsel %vm22149_vm3, %v12224_v35, %v14323_v50  ;;  %v3218_v22 = vsub.s32 4, %v20063_v44  ;;  %vm22157_vm1 = vcmask 1045504  }
 0x4dd   : > { %v15183_v46 = vpop.eup %15182  ;;  %v12396_v42 = vsel %vm22157_vm1, %v12368_v10, %v22156_v52  ;;  %v12038_v47 = vrot.slane %v12036_v41, 6  ;;  %v11819_v9 = vpack.c.bf16 %v15251_v32, %v15251_v32  ;;  %v12041_v49 = vrot.slane %v12039_v45, 7 }
 0x4de   : > { %v15185_v5 = vpop.eup %15184  ;;  %v2816_v43 = vxor.u32 2147483648, %v15183_v46  ;;  %vm13972_vm2 = vcmp.lt.s32.totalorder %v13971_v54, 0  ;;  %v12002_v56 = vor.u32 %v12001_v33, %v11998_v62  ;;  %v14295_v20 = vcombine.low %v20056_v25, %v20056_v25 }
 0x4df   : > { %v2813_v18 = vxor.u32 2147483648, %v15185_v5  ;;  %v3203_v12 = vsel %vm13972_vm2, 0, %v13971_v54  ;;  %v14311_v53 = vcombine.low %v20043_v15, %v20043_v15  ;;  %v11835_v51 = vmul.bf16 %v11819_v9, %v19356_v26 }
 0x4e0   : > { %v2817_v58 = vsel %vm2815_vm14, %v2816_v43, %v15185_v5  ;;  %v7838_v3 = vsel %vm7836_vm13, %v2816_v43, %v15185_v5  ;;  %v3204_v40 = vsub.s32 32, %v3203_v12  ;;  %v3205_v2 = vshll.u32 %v20081_v31, %v3203_v12 }
 0x4e1   : > { %v2814_v7 = vsel %vm2812_vm5, %v15183_v46, %v2813_v18  ;;  %v7835_v0 = vsel %vm7833_vm12, %v15183_v46, %v2813_v18  ;;  %v3208_v60 = vsub.s32 4294967266, %v3203_v12  ;;  %v14327_v15 = vcombine.low %v20065_v14, %v20065_v14  ;;  %vm22160_vm12 = vmmov %vm22149_vm3  ;;  %v22161_v46 = vld [vmem:[#allocation23_spill] sm:$0xff] }
 0x4e2   : > { %v2818_v50 = vsel %vm2811_vm9, %v2814_v7, %v2817_v58  ;;  %v7839_v25 = vsel %vm7832_vm10, %v7835_v0, %v7838_v3  ;;  %v3206_v41 = vshrl.u32 %v3188_v23, %v3204_v40  ;;  %v3219_v1 = vsel %vm3134_vm15, %v3218_v22, %v20063_v44  ;;  %vm22167_vm9 = vmmov %vm22157_vm1 }
 0x4e3   : > { %v2819_v61 = vsel %vm2808_vm8, nan, %v2818_v50  ;;  %v7840_v31 = vsel %vm2808_vm8, nan, %v7839_v25  ;;  %v3209_v30 = vadd.s32 127, %v3208_v60  ;;  %v12042_v27 = vor.u32 %v12041_v49, %v12038_v47 }
 0x4e4   : > { %v5854_v10 = vpack.c.bf16 %v2819_v61, %v2819_v61  ;;  %v10846_v36 = vpack.c.bf16 %v7840_v31, %v7840_v31  ;;  %v3207_v45 = vor.u32 %v3206_v41, %v3205_v2  ;;  %v12028_v33 = vshrl.u32 %v11835_v51, 16  ;;  %v22166_v31 = vld [vmem:[#allocation20_spill] sm:$0xff] }
 0x4e5   : > { %v3210_v62 = vshll.u32 %v3209_v30, 23  ;;  %v12031_v35 = vshll.u32 %v11835_v51, 16  ;;  %v12236_v14 = vsel %vm22158_vm11, %v14295_v20, %v14311_v53  ;;  %vm22159_vm10 = vcmask 1042432   ;;  %v15252_v51 = vld [vmem:[%s15588_s15 + $0x10] sm:$0xff] }
 0x4e6   : > { %v10942_v23 = vrot.slane %v10846_v36, 4  ;;  %v12303_v54 = vsel %vm22159_vm10, %v12270_v8, %v12002_v56  ;;  %v12278_v17 = vsel %vm22160_vm12, %v12236_v14, %v14327_v15  ;;  %v667_v52 = vrot.slane %v22161_v46, %v18670_v4  ;;  %vm22165_vm13 = vmmov %vm22159_vm10  ;;  %v22171_v14 = vld [vmem:[#allocation12_spill] sm:$0xff] }
 0x4e7   : > { %v3211_v32 = vor.u32 4788187, %v3210_v62  ;;  %v3214_v9 = vcvt.s32.f32 %v3207_v45  ;;  %v12030_v44 = vrot.slane %v12028_v33, 6  ;;  %v12033_v22 = vrot.slane %v12031_v35, 7  ;;  %vm22168_vm5 = vmmov %vm22159_vm10  ;;  %v22169_v33 = vld [vmem:[#allocation22_spill] sm:$0xff] }
 0x4e8   : > { %v11047_v5 = vsel %vm21965_vm0, %v5854_v10, %v10942_v23  ;;  %v22162_v47 = vand.u32 2147483647, %v19795_v38  ;;  %v12313_v8 = vsel %vm22165_vm13, %v20089_v34, %v12042_v27  ;;  %v20148_v49 = vmul.f32 %v15661_v55, %v667_v52 }
 0x4e9   : > { %v11383_v18 = vmul.bf16 %v19139_v29, %v11047_v5  ;;  %v3212_v12 = vand.u32 2147483647, %v3211_v32  ;;  %v12334_v53 = vsel %vm21965_vm0, %v12303_v54, %v12002_v56  ;;  %v12452_v58 = vsel %vm17035_vm6, %v12396_v42, 0 }
 0x4ea   : > { %vm20141_vm8 = vcmp.le.f32.partialorder %v22162_v47, 0.7853982  ;;  %v3655_v3 = vand.u32 2139095040, %v20148_v49  ;;  %v12344_v34 = vsel %vm21965_vm0, %v12313_v8, %v12042_v27  ;;  %v12034_v2 = vor.u32 %v12033_v22, %v12030_v44 }
 0x4eb   : > { %v3221_v20 = vsel %vm20141_vm8, 0, %v3219_v1  ;;  %13399 = vmatmul.mubr.bf16.gmra.mrb[8].mxu1 %v11383_v18  ;;  %v3215_v40 = vmul.f32 %v3214_v9, %v3212_v12  ;;  %v3652_v7 = vand.u32 2147483647, %v20148_v49  ;;  %v12367_v0 = vsel %vm17005_vm7, %v12334_v53, %v22154_v57 }
 0x4ec   : > { %v3225_v29 = vadd.s32 3, %v3221_v20  ;;  %13408 = vmatprep.mubr.bf16.mxu1 %v12452_v58  ;;  %v3656_v60 = vshrl.u32 %v3655_v3, 23  ;;  %v683_v56 = vrot.slane %v22161_v46, %v18704_v21  ;;  %v11203_v50 = vcombine.high %v15252_v51, %v15252_v51 }
 0x4ed   : > { %v3216_v42 = vxor.u32 2147483648, %v3215_v40  ;;  %v20165_v25 = vand.u32 3, %v3221_v20  ;;  %v12372_v41 = vsel %vm17005_vm7, %v12344_v34, %v22154_v57  ;;  %v12392_v30 = vsel %vm22167_vm9, %v12367_v0, %v22166_v31 }
 0x4ee   : > { %v13989_v15 = vadd.s32 4294967169, %v3656_v60  ;;  %v12311_v1 = vsel %vm22168_vm5, %v12278_v17, %v12034_v2  ;;  %v3659_v10 = vand.u32 8388607, %v3652_v7  ;;  %v20180_v45 = vand.u32 3, %v3225_v29 }
 0x4ef   : > { %v3217_v61 = vsel %vm3134_vm15, %v3216_v42, %v3215_v40  ;;  %v20183_v62 = vmul.f32 %v15661_v55, %v683_v56  ;;  %vm22170_vm15 = vmmov %vm22157_vm1  ;;  %v20190_v23 = vrot.slane %v11203_v50, %v22171_v14  ;;  %v12451_v54 = vsel %vm17035_vm6, %v12392_v30, 0 }
 0x4f0   : > { %v3220_v36 = vsel %vm20141_vm8, %v19795_v38, %v3217_v61  ;;  %v3662_v27 = vadd.s32 1, %v13989_v15  ;;  %v20187_v35 = vsel %vm22170_vm15, %v12372_v41, %v22169_v33  ;;  %v20195_v17 = vsel %vm21965_vm0, %v12311_v1, %v12034_v2 }
 0x4f1   : > { %15186 = vcosq.f32 %v3220_v36  ;;  %vm8248_vm14 = vcmp.eq.s32.totalorder %v20165_v25, 2  ;;  %v3660_v52 = vor.u32 8388608, %v3659_v10  ;;  %vm3228_vm3 = vcmp.eq.s32.totalorder %v20180_v45, 0 }
 0x4f2   : > { %15188 = vsinq.f32 %v3220_v36  ;;  %vm3663_vm4 = vcmp.gt.s32.totalorder %v3662_v27, 0  ;;  %vm3231_vm1 = vcmp.eq.s32.totalorder %v20180_v45, 2  ;;  %vm8245_vm2 = vcmp.eq.s32.totalorder %v20165_v25, 0 }
 0x4f3   : > { %13409 = vmatmul.mubr.bf16.gmra.mrb[12].mxu1 %v12451_v54  ;;  %v3664_v32 = vsel %vm3663_vm4, %v3662_v27, 0  ;;  %v4071_v44 = vand.u32 2139095040, %v20183_v62  ;;  %vm3227_vm11 = vcmp.lt.s32.totalorder %v20180_v45, 2  ;;  %vm8244_vm10 = vcmp.lt.s32.totalorder %v20165_v25, 2 }
 0x4f4   : > { %v3666_v9 = vand.u32 31, %v3664_v32  ;;  %v12456_v22 = vsel %vm17035_vm6, %v20187_v35, 0  ;;  %v12371_v5 = vsel %vm17005_vm7, %v20195_v17, %v22154_v57  ;;  %v3665_v47 = vshrl.u32 %v3664_v32, 5 }
 0x4f5   : > { %v20213_v43 = vcombine.high %v20190_v23, %v20190_v23  ;;  %vm3224_vm12 = vweird.f32 %v19795_v38  ;;  %v20221_v3 = vshll.u32 %v3660_v52, 8  ;;  %v4068_v40 = vand.u32 2147483647, %v20183_v62 }
 0x4f6   : > { %v3667_v8 = vsub.s32 32, %v3666_v9  ;;  %v3669_v18 = vshll.u32 %v22040_v6, %v3666_v9  ;;  %v3672_v12 = vshll.u32 %v21991_v16, %v3666_v9  ;;  %v3675_v20 = vshll.u32 %v21992_v37, %v3666_v9 }
 0x4f7   : > { %v3678_v53 = vshll.u32 %v22004_v39, %v3666_v9  ;;  %v3681_v58 = vshll.u32 %v22005_v59, %v3666_v9  ;;  %v4072_v0 = vshrl.u32 %v4071_v44, 23  ;;  %vm3684_vm8 = vcmp.lt.s32.totalorder %v3665_v47, 1 }
 0x4f8   : > { %v3670_v34 = vshrl.u32 %v21991_v16, %v3667_v8  ;;  %v3673_v2 = vshrl.u32 %v21992_v37, %v3667_v8  ;;  %v3676_v29 = vshrl.u32 %v22004_v39, %v3667_v8  ;;  %v3668_v60 = vshrl.u32 %v22040_v6, %v3667_v8 }
 0x4f9   : > { %v3679_v56 = vshrl.u32 %v22005_v59, %v3667_v8  ;;  %v3682_v42 = vshrl.u32 %v21993_v13, %v3667_v8  ;;  %vm3687_vm13 = vcmp.lt.s32.totalorder %v3665_v47, 4  ;;  %vm3686_vm9 = vcmp.lt.s32.totalorder %v3665_v47, 3 }
 0x4fa   : > { %v3671_v51 = vor.u32 %v3670_v34, %v3669_v18  ;;  %v3674_v50 = vor.u32 %v3673_v2, %v3672_v12  ;;  %v3677_v41 = vor.u32 %v3676_v29, %v3675_v20  ;;  %v4075_v30 = vand.u32 8388607, %v4068_v40 }
 0x4fb   : > { %v15187_v15 = vpop.eup %15186  ;;  %v3680_v61 = vor.u32 %v3679_v56, %v3678_v53  ;;  %v3683_v31 = vor.u32 %v3682_v42, %v3681_v58  ;;  %vm3685_vm5 = vcmp.lt.s32.totalorder %v3665_v47, 2  ;;  %v14005_v27 = vadd.s32 4294967169, %v4072_v0 }
 0x4fc   : > { %v15189_v1 = vpop.eup %15188  ;;  %v3232_v10 = vxor.u32 2147483648, %v15187_v15  ;;  %v3689_v36 = vsel %vm3687_vm13, %v3677_v41, 2102212464  ;;  %v3688_v54 = vsel %vm3684_vm8, %v3668_v60, %v3671_v51  ;;  %v3692_v52 = vsel %vm3684_vm8, %v3671_v51, %v3674_v50 }
 0x4fd   : > { %v3229_v33 = vxor.u32 2147483648, %v15189_v1  ;;  %v3693_v32 = vsel %vm3687_vm13, %v3680_v61, 920167782  ;;  %v3696_v18 = vsel %vm3684_vm8, %v3674_v50, %v3677_v41  ;;  %v3690_v53 = vsel %vm3686_vm9, %v3674_v50, %v3689_v36  ;;  %v15253_v36 = vld [vmem:[%s15588_s15 + $0x18] sm:$0xff]  ;;  %s13871_s15 = sshll.u32 %s15584_s16, 8 }
 0x4fe   : > { %v3233_v9 = vsel %vm3231_vm1, %v3232_v10, %v15189_v1  ;;  %v8250_v44 = vsel %vm8248_vm14, %v3232_v10, %v15189_v1  ;;  %v3694_v8 = vsel %vm3686_vm9, %v3677_v41, %v3693_v32  ;;  %v3697_v58 = vsel %vm3687_vm13, %v3683_v31, 1326507024  ;;  %s21715_s11 = scalar_lea.vmem [#allocation7], %s13871_s15 }
 0x4ff   : > { %v3230_v12 = vsel %vm3228_vm3, %v15187_v15, %v3229_v33  ;;  %v8247_v20 = vsel %vm8245_vm2, %v15187_v15, %v3229_v33  ;;  %v3695_v29 = vsel %vm3685_vm5, %v3692_v52, %v3694_v8  ;;  %v3698_v0 = vsel %vm3686_vm9, %v3680_v61, %v3697_v58  ;;  %v22172_v33 = vld [vmem:[#allocation24_spill] sm:$0xff]  ;;  %s13732_s20 = sshll.u32 %s21715_s11, 4  ;;  %s21833_s20 = int_to_ptr.vmem [resolvable:$true] %s13732_s20 }
 0x500   : > { %v3234_v34 = vsel %vm3227_vm11, %v3230_v12, %v3233_v9  ;;  %v8251_v2 = vsel %vm8244_vm10, %v8247_v20, %v8250_v44  ;;  %v3699_v42 = vsel %vm3685_vm5, %v3696_v18, %v3698_v0  ;;  %v4078_v51 = vadd.s32 1, %v14005_v27  ;;  %s15320_s26 = scalar_lea.vmem %s21833_s20, 4096 }
 0x501   : > { %v3235_v60 = vsel %vm3224_vm12, nan, %v3234_v34  ;;  %v8252_v56 = vsel %vm3224_vm12, nan, %v8251_v2  ;;  %v20260_v41 = vmul.u32.u64.low %v20221_v3, %v3699_v42  ;;  %v20261_v25 = vmul.u32.u64.high %v20221_v3, %v3699_v42, %v20260_v41  ;;  %p15321_p6 = scmp.ne.s32.totalorder %s21833_s20, %s15320_s26 }
 0x502   : > { %v5858_v50 = vpack.c.bf16 %v3235_v60, %v3235_v60  ;;  %v10850_v45 = vpack.c.bf16 %v8252_v56, %v8252_v56  ;;  %v3691_v15 = vsel %vm3685_vm5, %v3688_v54, %v3690_v53  ;;  %vm4079_vm15 = vcmp.gt.s32.totalorder %v4078_v51, 0 }
 0x503   : > { %v20265_v31 = vmul.u32.u64.low %v20221_v3, %v3695_v29  ;;  %v20266_v61 = vmul.u32.u64.high %v20221_v3, %v3695_v29, %v20265_v31  ;;  %v11326_v38 = vshrl.u32 %v20213_v43, 16  ;;  %v4080_v10 = vsel %vm4079_vm15, %v4078_v51, 0  ;;  %p15322_p8 = pnand %p15321_p6, %p15536_p12 }
 0x504   : > { %v10946_v1 = vrot.slane %v10850_v45, 4  ;;  %v11220_v27 = vcombine.high %v15253_v36, %v15253_v36  ;;  %vm22173_vm4 = vcmask 1045504   ;;  %v4076_v54 = vor.u32 8388608, %v4075_v30 }
 0x505   : > { %v12408_v47 = vsel %vm22173_vm4, %v12371_v5, %v22172_v33  ;;  %v4082_v52 = vand.u32 31, %v4080_v10  ;;  %v663_v32 = vrot.slane %v22161_v46, %v18859_v11  ;;  %v3707_v44 = vmul.u32 %v20221_v3, %v3691_v15  ;;  %p15323_p10 = pneg %p15322_p8 }
 0x506   : > { %v11063_v9 = vsel %vm21965_vm0, %v5858_v50, %v10946_v1  ;;  %vm3709_vm14 = vc.u32 %v20261_v25, %v20265_v31  ;;  %v4081_v8 = vshrl.u32 %v4080_v10, 5  ;;  %v3710_v12 = vadd.s32 1, %v20266_v61 }
 0x507   : > { %v11387_v18 = vmul.bf16 %v19356_v26, %v11063_v9  ;;  %v4083_v57 = vsub.s32 32, %v4082_v52  ;;  %v4085_v17 = vshll.u32 %v22040_v6, %v4082_v52  ;;  %v4088_v5 = vshll.u32 %v21991_v16, %v4082_v52 }
 0x508   : > { %v4091_v30 = vshll.u32 %v21992_v37, %v4082_v52  ;;  %v4094_v20 = vshll.u32 %v22004_v39, %v4082_v52  ;;  %v4097_v53 = vshll.u32 %v22005_v59, %v4082_v52  ;;  %v3711_v3 = vsel %vm3709_vm14, %v3710_v12, %v20266_v61 }
 0x509   : > { %13625 = vmatmul.mubr.bf16.gmra.mrb[8].mxu0 %v11387_v18  ;;  %v4086_v58 = vshrl.u32 %v21991_v16, %v4083_v57  ;;  %v4089_v26 = vshrl.u32 %v21992_v37, %v4083_v57  ;;  %v4116_v34 = vshll.u32 %v4076_v54, 8  ;;  %v3712_v2 = vadd.s32 %v3711_v3, %v3707_v44 }
 0x50a   : > { %13634 = vmatprep.mubr.bf16.mxu0 %v12456_v22  ;;  %v4092_v29 = vshrl.u32 %v22004_v39, %v4083_v57  ;;  %v4095_v0 = vshrl.u32 %v22005_v59, %v4083_v57  ;;  %v4098_v60 = vshrl.u32 %v21993_v13, %v4083_v57  ;;  %v4084_v56 = vshrl.u32 %v22040_v6, %v4083_v57 }
 0x50b   : > { %v4087_v42 = vor.u32 %v4086_v58, %v4085_v17  ;;  %v4090_v51 = vor.u32 %v4089_v26, %v4088_v5  ;;  %vm4100_vm3 = vcmp.lt.s32.totalorder %v4081_v8, 1  ;;  %v3713_v50 = vadd.s32 536870912, %v3712_v2 }
 0x50c   : > { %v4093_v45 = vor.u32 %v4092_v29, %v4091_v30  ;;  %v4096_v41 = vor.u32 %v4095_v0, %v4094_v20  ;;  %v4099_v15 = vor.u32 %v4098_v60, %v4097_v53  ;;  %vm4101_vm1 = vcmp.lt.s32.totalorder %v4081_v8, 2 }
 0x50d   : > { %vm4102_vm2 = vcmp.lt.s32.totalorder %v4081_v8, 3  ;;  %vm4103_vm11 = vcmp.lt.s32.totalorder %v4081_v8, 4  ;;  %v4108_v35 = vsel %vm4100_vm3, %v4087_v42, %v4090_v51  ;;  %v12455_v22 = vsel %vm17035_vm6, %v12408_v47, 0 }
 0x50e   : > { %v3714_v61 = vshrl.u32 %v3713_v50, 30  ;;  %v4105_v1 = vsel %vm4103_vm11, %v4093_v45, 2102212464  ;;  %v4109_v10 = vsel %vm4103_vm11, %v4096_v41, 920167782  ;;  %v4112_v33 = vsel %vm4100_vm3, %v4090_v51, %v4093_v45 }
 0x50f   : > { %v4110_v36 = vsel %vm4102_vm2, %v4093_v45, %v4109_v10  ;;  %v4113_v54 = vsel %vm4103_vm11, %v4099_v15, 1326507024  ;;  %v20308_v52 = vrot.slane %v11220_v27, %v22171_v14  ;;  %v4104_v44 = vsel %vm4100_vm3, %v4084_v56, %v4087_v42 }
 0x510   : > { %v3715_v9 = vshll.u32 %v3714_v61, 30  ;;  %v4106_v18 = vsel %vm4102_vm2, %v4090_v51, %v4105_v1  ;;  %v4111_v12 = vsel %vm4101_vm1, %v4108_v35, %v4110_v36  ;;  %v4114_v47 = vsel %vm4102_vm2, %v4096_v41, %v4113_v54 }
 0x511   : > { %13635 = vmatmul.mubr.bf16.gmra.mrb[12].mxu0 %v12455_v22  ;;  %v20314_v57 = vmul.u32.u64.low %v4116_v34, %v4111_v12  ;;  %v20315_v17 = vmul.u32.u64.high %v4116_v34, %v4111_v12, %v20314_v57  ;;  %v20319_v5 = vmul.f32 %v15661_v55, %v663_v32  ;;  %v4115_v14 = vsel %vm4101_vm1, %v4112_v33, %v4114_v47 }
 0x512   : > { %v3716_v30 = vsub.s32 %v3712_v2, %v3715_v9  ;;  %v4107_v27 = vsel %vm4101_vm1, %v4104_v44, %v4106_v18  ;;  %v20323_v20 = vmul.u32.u64.low %v4116_v34, %v4115_v14  ;;  %v20324_v53 = vmul.u32.u64.high %v4116_v34, %v4115_v14, %v20323_v20 }
 0x513   : > { %v11327_v58 = vpack.i.b16 %v11326_v38, %v11326_v38  ;;  %v4126_v26 = vadd.s32 1, %v20315_v17  ;;  %v20332_v29 = vcombine.high %v20308_v52, %v20308_v52  ;;  %v3551_v32 = vand.u32 2139095040, %v20319_v5 }
 0x514   : > { %v3718_v3 = vsub.s32 0, %v3716_v30  ;;  %v11318_v2 = vshrl.u32 %v20190_v23, 16  ;;  %v4123_v0 = vmul.u32 %v4116_v34, %v4107_v27  ;;  %vm4125_vm10 = vc.u32 %v20324_v53, %v20314_v57 }
 0x515   : > { %v3552_v60 = vshrl.u32 %v3551_v32, 23  ;;  %v679_v56 = vrot.slane %v22161_v46, %v18899_v28  ;;  %v3738_v42 = vsub.s32 4, %v3714_v61  ;;  %v11620_v51 = vrot.slane %v11327_v58, %v15632_v19 }
 0x516   : > { %v13990_v8 = vmin.u32 %v3718_v3, %v3716_v30  ;;  %v4127_v50 = vsel %vm4125_vm10, %v4126_v26, %v20315_v17  ;;  %v11358_v45 = vshrl.u32 %v20332_v29, 16  ;;  %v20343_v15 = vpack.i.b16 %v11318_v2, %v11318_v2 }
 0x517   : > { %v13985_v41 = vadd.s32 4294967169, %v3552_v60  ;;  %vm20347_vm12 = vcmp.le.f32.partialorder %v3652_v7, 0.7853982  ;;  %vm3654_vm8 = vcmp.lt.s32.totalorder %v20148_v49, 0  ;;  %v4128_v35 = vadd.s32 %v4127_v50, %v4123_v0 }
 0x518   : > { %v3720_v38 = vclz %v13990_v8  ;;  %v3548_v22 = vand.u32 2147483647, %v20319_v5  ;;  %v11616_v10 = vrot.slane %v20343_v15, %v15632_v19  ;;  %v20356_v36 = vmul.f32 %v15661_v55, %v679_v56 }
 0x519   : > { %v3558_v1 = vadd.s32 1, %v13985_v41  ;;  %v3708_v33 = vadd.s32 %v20265_v31, %v20261_v25  ;;  %v3739_v7 = vsel %vm3654_vm8, %v3738_v42, %v3714_v61  ;;  %v4129_v54 = vadd.s32 536870912, %v4128_v35 }
 0x51a   : > { %v13991_v46 = vadd.s32 4294967294, %v3720_v38  ;;  %v20362_v44 = vpack.i.b16 %v11358_v45, %v11358_v45  ;;  %v20364_v18 = vcombine.low %v11616_v10, %v11620_v51  ;;  %v3741_v27 = vsel %vm20347_vm12, 0, %v3739_v7 }
 0x51b   : > { %vm3559_vm9 = vcmp.gt.s32.totalorder %v3558_v1, 0  ;;  %v4130_v14 = vshrl.u32 %v4129_v54, 30  ;;  %v3555_v25 = vand.u32 8388607, %v3548_v22  ;;  %v3967_v61 = vand.u32 2139095040, %v20356_v36 }
 0x51c   : > { %vm13992_vm13 = vcmp.lt.s32.totalorder %v13991_v46, 0  ;;  %v3560_v31 = vsel %vm3559_vm9, %v3558_v1, 0  ;;  %v20372_v26 = vrot.slane %v11327_v58, %v15637_v24  ;;  %vm4070_vm5 = vcmp.lt.s32.totalorder %v20183_v62, 0 }
 0x51d   : > { %v3723_v9 = vsel %vm13992_vm13, 0, %v13991_v46  ;;  %v4131_v32 = vshll.u32 %v4130_v14, 30  ;;  %v11636_v2 = vrot.slane %v20362_v44, %v15632_v19  ;;  %v3562_v8 = vand.u32 31, %v3560_v31 }
 0x51e   : > { %v3724_v12 = vsub.s32 32, %v3723_v9  ;;  %v3725_v47 = vshll.u32 %v3716_v30, %v3723_v9  ;;  %v3728_v17 = vsub.s32 4294967266, %v3723_v9  ;;  %v20377_v30 = vrot.slane %v20362_v44, %v15637_v24 }
 0x51f   : > { %v3745_v56 = vadd.s32 3, %v3741_v27  ;;  %v20381_v38 = vsub.s32 %v4128_v35, %v4131_v32  ;;  %v20383_v42 = vand.u32 3, %v3741_v27  ;;  %v3556_v58 = vor.u32 8388608, %v3555_v25 }
 0x520   : > { %v3726_v20 = vshrl.u32 %v3708_v33, %v3724_v12  ;;  %v3729_v3 = vadd.s32 127, %v3728_v17  ;;  %v3563_v51 = vsub.s32 32, %v3562_v8  ;;  %v3968_v50 = vshrl.u32 %v3967_v61, 23 }
 0x521   : > { %v4134_v46 = vsub.s32 0, %v20381_v38  ;;  %v4154_v1 = vsub.s32 4, %v4130_v14  ;;  %v3565_v10 = vshll.u32 %v22040_v6, %v3562_v8  ;;  %v3568_v7 = vshll.u32 %v21991_v16, %v3562_v8 }
 0x522   : > { %v3727_v0 = vor.u32 %v3726_v20, %v3725_v47  ;;  %v3730_v60 = vshll.u32 %v3729_v3, 23  ;;  %v3566_v33 = vshrl.u32 %v21991_v16, %v3563_v51  ;;  %v3569_v54 = vshrl.u32 %v21992_v37, %v3563_v51 }
 0x523   : > { %v20390_v9 = vand.u32 3, %v3745_v56  ;;  %v4124_v12 = vadd.s32 %v20314_v57, %v20324_v53  ;;  %v14006_v47 = vmin.u32 %v4134_v46, %v20381_v38  ;;  %v3561_v17 = vshrl.u32 %v3560_v31, 5 }
 0x524   : > { %v3731_v45 = vor.u32 4788187, %v3730_v60  ;;  %v3734_v41 = vcvt.s32.f32 %v3727_v0  ;;  %v3571_v27 = vshll.u32 %v21992_v37, %v3562_v8  ;;  %v20396_v25 = vshll.u32 %v3556_v58, 8 }
 0x525   : > { %v14001_v61 = vadd.s32 4294967169, %v3968_v50  ;;  %vm20400_vm15 = vcmp.le.f32.partialorder %v4068_v40, 0.7853982  ;;  %v4136_v32 = vclz %v14006_v47  ;;  %v4155_v0 = vsel %vm4070_vm5, %v4154_v1, %v4130_v14 }
 0x526   : > { %v3732_v35 = vand.u32 2147483647, %v3731_v45  ;;  %v3564_v57 = vshrl.u32 %v22040_v6, %v3563_v51  ;;  %v3567_v53 = vor.u32 %v3566_v33, %v3565_v10  ;;  %v3570_v31 = vor.u32 %v3569_v54, %v3568_v7 }
 0x527   : > { %v3572_v60 = vshrl.u32 %v22004_v39, %v3563_v51  ;;  %v3574_v56 = vshll.u32 %v22004_v39, %v3562_v8  ;;  %v14007_v50 = vadd.s32 4294967294, %v4136_v32  ;;  %v3575_v45 = vshrl.u32 %v22005_v59, %v3563_v51 }
 0x528   : > { %v3735_v20 = vmul.f32 %v3734_v41, %v3732_v35  ;;  %v3577_v40 = vshll.u32 %v22005_v59, %v3562_v8  ;;  %v3578_v46 = vshrl.u32 %v21993_v13, %v3563_v51  ;;  %vm3580_vm4 = vcmp.lt.s32.totalorder %v3561_v17, 1 }
 0x529   : > { %v3573_v41 = vor.u32 %v3572_v60, %v3571_v27  ;;  %vm3581_vm14 = vcmp.lt.s32.totalorder %v3561_v17, 2  ;;  %vm14008_vm3 = vcmp.lt.s32.totalorder %v14007_v50, 0  ;;  %v3576_v1 = vor.u32 %v3575_v45, %v3574_v56 }
 0x52a   : > { %v3736_v58 = vxor.u32 2147483648, %v3735_v20  ;;  %vm3582_vm1 = vcmp.lt.s32.totalorder %v3561_v17, 3  ;;  %v4139_v33 = vsel %vm14008_vm3, 0, %v14007_v50  ;;  %v3579_v7 = vor.u32 %v3578_v46, %v3577_v40 }
 0x52b   : > { %vm3583_vm2 = vcmp.lt.s32.totalorder %v3561_v17, 4  ;;  %v4140_v8 = vsub.s32 32, %v4139_v33  ;;  %v4141_v54 = vshll.u32 %v20381_v38, %v4139_v33  ;;  %v4144_v51 = vsub.s32 4294967266, %v4139_v33 }
 0x52c   : > { %v3737_v14 = vsel %vm3654_vm8, %v3736_v58, %v3735_v20  ;;  %v3584_v35 = vsel %vm3580_vm4, %v3564_v57, %v3567_v53  ;;  %v3585_v47 = vsel %vm3583_vm2, %v3573_v41, 2102212464  ;;  %v3588_v27 = vsel %vm3580_vm4, %v3567_v53, %v3570_v31 }
 0x52d   : > { %v3740_v10 = vsel %vm20347_vm12, %v20148_v49, %v3737_v14  ;;  %v4142_v20 = vshrl.u32 %v4124_v12, %v4140_v8  ;;  %v4145_v32 = vadd.s32 127, %v4144_v51  ;;  %v3586_v34 = vsel %vm3582_vm1, %v3570_v31, %v3585_v47 }
 0x52e   : > { %15190 = vcosq.f32 %v3740_v10  ;;  %v3589_v60 = vsel %vm3583_vm2, %v3576_v1, 920167782  ;;  %v4157_v56 = vsel %vm20400_vm15, 0, %v4155_v0  ;;  %v3592_v38 = vsel %vm3580_vm4, %v3570_v31, %v3573_v41 }
 0x52f   : > { %15192 = vsinq.f32 %v3740_v10  ;;  %v3590_v58 = vsel %vm3582_vm1, %v3573_v41, %v3589_v60  ;;  %v3593_v50 = vsel %vm3583_vm2, %v3579_v7, 1326507024  ;;  %v4143_v57 = vor.u32 %v4142_v20, %v4141_v54 }
 0x530   : > { %v4146_v45 = vshll.u32 %v4145_v32, 23  ;;  %v3591_v40 = vsel %vm3581_vm14, %v3588_v27, %v3590_v58  ;;  %v3594_v12 = vsel %vm3582_vm1, %v3576_v1, %v3593_v50  ;;  %vm3744_vm11 = vweird.f32 %v20148_v49 }
 0x531   : > { %v3587_v53 = vsel %vm3581_vm14, %v3584_v35, %v3586_v34  ;;  %v3595_v46 = vsel %vm3581_vm14, %v3592_v38, %v3594_v12  ;;  %v20434_v0 = vmul.u32.u64.low %v20396_v25, %v3591_v40  ;;  %v20435_v14 = vmul.u32.u64.high %v20396_v25, %v3591_v40, %v20434_v0 }
 0x532   : > { %v4147_v31 = vor.u32 4788187, %v4146_v45  ;;  %v4150_v41 = vcvt.s32.f32 %v4143_v57  ;;  %v20439_v10 = vmul.u32.u64.low %v20396_v25, %v3595_v46  ;;  %v20440_v33 = vmul.u32.u64.high %v20396_v25, %v3595_v46, %v20439_v10 }
 0x533   : > { %vm8759_vm10 = vcmp.lt.s32.totalorder %v20383_v42, 2  ;;  %vm8760_vm12 = vcmp.eq.s32.totalorder %v20383_v42, 0  ;;  %vm8763_vm8 = vcmp.eq.s32.totalorder %v20383_v42, 2  ;;  %v3974_v1 = vadd.s32 1, %v14001_v61 }
 0x534   : > { %vm3747_vm13 = vcmp.lt.s32.totalorder %v20390_v9, 2  ;;  %v4148_v17 = vand.u32 2147483647, %v4147_v31  ;;  %v3603_v7 = vmul.u32 %v20396_v25, %v3587_v53  ;;  %v21959_v8 = vand.u32 2147483647, %v20356_v36 }
 0x535   : > { %vm3748_vm9 = vcmp.eq.s32.totalorder %v20390_v9, 0  ;;  %v4161_v54 = vadd.s32 3, %v4157_v56  ;;  %v3606_v51 = vadd.s32 1, %v20435_v14  ;;  %vm3975_vm4 = vcmp.gt.s32.totalorder %v3974_v1, 0 }
 0x536   : > { %vm3751_vm14 = vcmp.eq.s32.totalorder %v20390_v9, 2  ;;  %v4151_v47 = vmul.f32 %v4150_v41, %v4148_v17  ;;  %vm3605_vm3 = vc.u32 %v20440_v33, %v20434_v0  ;;  %v3976_v61 = vsel %vm3975_vm4, %v3974_v1, 0 }
 0x537   : > { %v3607_v25 = vsel %vm3605_vm3, %v3606_v51, %v20435_v14  ;;  %v3978_v32 = vand.u32 31, %v3976_v61  ;;  %v11350_v34 = vshrl.u32 %v20308_v52, 16  ;;  %v3971_v50 = vand.u32 8388607, %v21959_v8 }
 0x538   : > { %v15191_v35 = vpop.eup %15190  ;;  %v4152_v58 = vxor.u32 2147483648, %v4151_v47  ;;  %v3608_v38 = vadd.s32 %v3607_v25, %v3603_v7  ;;  %v20459_v40 = vand.u32 3, %v4161_v54  ;;  %v20461_v12 = vand.u32 3, %v4157_v56 }
 0x539   : > { %v15193_v27 = vpop.eup %15192  ;;  %v3752_v20 = vxor.u32 2147483648, %v15191_v35  ;;  %v3979_v1 = vsub.s32 32, %v3978_v32  ;;  %v3972_v9 = vor.u32 8388608, %v3971_v50  ;;  %v3981_v3 = vshll.u32 %v22040_v6, %v3978_v32  ;;  %v22178_v50 = vld [vmem:[#allocation27_spill] sm:$0xff] }
 0x53a   : > { %v3749_v60 = vxor.u32 2147483648, %v15193_v27  ;;  %v4153_v14 = vsel %vm4070_vm5, %v4152_v58, %v4151_v47  ;;  %v3609_v31 = vadd.s32 536870912, %v3608_v38  ;;  %vm3550_vm5 = vcmp.lt.s32.totalorder %v20319_v5, 0 }
 0x53b   : > { %v3753_v57 = vsel %vm3751_vm14, %v3752_v20, %v15193_v27  ;;  %v8765_v45 = vsel %vm8763_vm8, %v3752_v20, %v15193_v27  ;;  %v4156_v56 = vsel %vm20400_vm15, %v20183_v62, %v4153_v14  ;;  %vm4167_vm1 = vcmp.eq.s32.totalorder %v20459_v40, 2 }
 0x53c   : > { %v3750_v53 = vsel %vm3748_vm9, %v15191_v35, %v3749_v60  ;;  %v8762_v46 = vsel %vm8760_vm12, %v15191_v35, %v3749_v60  ;;  %15194 = vcosq.f32 %v4156_v56  ;;  %v3610_v54 = vshrl.u32 %v3609_v31, 30 }
 0x53d   : > { %v3754_v41 = vsel %vm3747_vm13, %v3750_v53, %v3753_v57  ;;  %v8766_v10 = vsel %vm8759_vm10, %v8762_v46, %v8765_v45  ;;  %15196 = vsinq.f32 %v4156_v56  ;;  %vm9175_vm2 = vcmp.eq.s32.totalorder %v20461_v12, 2 }
 0x53e   : > { %v3755_v17 = vsel %vm3744_vm11, nan, %v3754_v41  ;;  %v8767_v7 = vsel %vm3744_vm11, nan, %v8766_v10  ;;  %v3611_v42 = vshll.u32 %v3610_v54, 30  ;;  %v20484_v47 = vpack.i.b16 %v11350_v34, %v11350_v34 }
 0x53f   : > { %v5863_v51 = vpack.c.bf16 %v3755_v17, %v3755_v17  ;;  %v10855_v35 = vpack.c.bf16 %v8767_v7, %v8767_v7  ;;  %vm4164_vm15 = vcmp.eq.s32.totalorder %v20459_v40, 0  ;;  %vm9172_vm11 = vcmp.eq.s32.totalorder %v20461_v12, 0 }
 0x540   : > { %v3982_v49 = vshrl.u32 %v21991_v16, %v3979_v1  ;;  %v3984_v20 = vshll.u32 %v21991_v16, %v3978_v32  ;;  %v3985_v25 = vshrl.u32 %v21992_v37, %v3979_v1  ;;  %vm4163_vm10 = vcmp.lt.s32.totalorder %v20459_v40, 2 }
 0x541   : > { %v10951_v27 = vrot.slane %v10855_v35, 4  ;;  %vm9171_vm12 = vcmp.lt.s32.totalorder %v20461_v12, 2  ;;  %v20493_v60 = vsub.s32 %v3608_v38, %v3611_v42  ;;  %v20495_v58 = vshrl.u32 %v3976_v61, 5 }
 0x542   : > { %v3990_v34 = vshll.u32 %v22004_v39, %v3978_v32  ;;  %v699_v57 = vrot.slane %v22178_v50, %v18670_v4  ;;  %vm4160_vm8 = vweird.f32 %v20183_v62  ;;  %v3987_v53 = vshll.u32 %v21992_v37, %v3978_v32 }
 0x543   : > { %v11083_v45 = vsel %vm21965_vm0, %v5863_v51, %v10951_v27  ;;  %v3988_v46 = vshrl.u32 %v22004_v39, %v3979_v1  ;;  %v3991_v14 = vshrl.u32 %v22005_v59, %v3979_v1  ;;  %v3614_v61 = vsub.s32 0, %v20493_v60 }
 0x544   : > { %v11392_v38 = vmul.bf16 %v20372_v26, %v11083_v45  ;;  %v3634_v31 = vsub.s32 4, %v3610_v54  ;;  %v715_v41 = vrot.slane %v22178_v50, %v18704_v21  ;;  %v3983_v10 = vor.u32 %v3982_v49, %v3981_v3 }
 0x545   : > { %v3986_v56 = vor.u32 %v3985_v25, %v3984_v20  ;;  %v3993_v17 = vshll.u32 %v22005_v59, %v3978_v32  ;;  %v3994_v7 = vshrl.u32 %v21993_v13, %v3979_v1  ;;  %v13986_v51 = vmin.u32 %v3614_v61, %v20493_v60 }
 0x546   : > { %13418 = vmatprep.mubr.bf16.mxu1 %v11392_v38  ;;  %v3992_v35 = vor.u32 %v3991_v14, %v3990_v34  ;;  %vm3996_vm13 = vcmp.lt.s32.totalorder %v20495_v58, 1  ;;  %v20513_v42 = vshll.u32 %v3972_v9, 8  ;;  %v3604_v27 = vadd.s32 %v20434_v0, %v20440_v33  ;;  %v15195_v32 = vpop.eup %15194 }
 0x547   : > { %v3980_v45 = vshrl.u32 %v22040_v6, %v3979_v1  ;;  %v3989_v8 = vor.u32 %v3988_v46, %v3987_v53  ;;  %v11632_v3 = vrot.slane %v20484_v47, %v15632_v19  ;;  %v3616_v49 = vclz %v13986_v51  ;;  %v15197_v34 = vpop.eup %15196 }
 0x548   : > { %v3635_v20 = vsel %vm3550_vm5, %v3634_v31, %v3610_v54  ;;  %v3995_v25 = vor.u32 %v3994_v7, %v3993_v17  ;;  %vm3998_vm9 = vcmp.lt.s32.totalorder %v20495_v58, 3  ;;  %v4168_v9 = vxor.u32 2147483648, %v15195_v32 }
 0x549   : > { %vm3997_vm4 = vcmp.lt.s32.totalorder %v20495_v58, 2  ;;  %vm3999_vm14 = vcmp.lt.s32.totalorder %v20495_v58, 4  ;;  %v4004_v0 = vsel %vm3996_vm13, %v3983_v10, %v3986_v56  ;;  %v4165_v33 = vxor.u32 2147483648, %v15197_v34 }
 0x54a   : > { %v13987_v1 = vadd.s32 4294967294, %v3616_v49  ;;  %v4001_v53 = vsel %vm3999_vm14, %v3989_v8, 2102212464  ;;  %v4005_v54 = vsel %vm3999_vm14, %v3992_v35, 920167782  ;;  %v4169_v46 = vsel %vm4167_vm1, %v4168_v9, %v15197_v34 }
 0x54b   : > { %v9177_v14 = vsel %vm9175_vm2, %v4168_v9, %v15197_v34  ;;  %v4000_v38 = vsel %vm3996_vm13, %v3980_v45, %v3983_v10  ;;  %v4006_v61 = vsel %vm3998_vm9, %v3989_v8, %v4005_v54  ;;  %v4166_v31 = vsel %vm4164_vm15, %v15195_v32, %v4165_v33 }
 0x54c   : > { %v9174_v17 = vsel %vm9172_vm11, %v15195_v32, %v4165_v33  ;;  %vm13988_vm3 = vcmp.lt.s32.totalorder %v13987_v1, 0  ;;  %v4002_v7 = vsel %vm3998_vm9, %v3986_v56, %v4001_v53  ;;  %v4170_v51 = vsel %vm4163_vm10, %v4166_v31, %v4169_v46 }
 0x54d   : > { %v9178_v49 = vsel %vm9171_vm12, %v9174_v17, %v9177_v14  ;;  %v3619_v10 = vsel %vm13988_vm3, 0, %v13987_v1  ;;  %v4007_v45 = vsel %vm3997_vm4, %v4004_v0, %v4006_v61  ;;  %v4171_v34 = vsel %vm4160_vm8, nan, %v4170_v51 }
 0x54e   : > { %v9179_v32 = vsel %vm4160_vm8, nan, %v9178_v49  ;;  %v3620_v9 = vsub.s32 32, %v3619_v10  ;;  %v3621_v33 = vshll.u32 %v20493_v60, %v3619_v10  ;;  %v5867_v53 = vpack.c.bf16 %v4171_v34, %v4171_v34 }
 0x54f   : > { %v10859_v54 = vpack.c.bf16 %v9179_v32, %v9179_v32  ;;  %v3624_v40 = vsub.s32 4294967266, %v3619_v10  ;;  %v4008_v12 = vsel %vm3996_vm13, %v3986_v56, %v3989_v8  ;;  %v4009_v1 = vsel %vm3999_vm14, %v3995_v25, 1326507024 }
 0x550   : > { %v3622_v46 = vshrl.u32 %v3604_v27, %v3620_v9  ;;  %v20561_v0 = vmul.u32.u64.low %v20513_v42, %v4007_v45  ;;  %v20562_v14 = vmul.u32.u64.high %v20513_v42, %v4007_v45, %v20561_v0  ;;  %v4003_v60 = vsel %vm3997_vm4, %v4000_v38, %v4002_v7 }
 0x551   : > { %v10955_v62 = vrot.slane %v10859_v54, 4  ;;  %v3625_v61 = vadd.s32 127, %v3624_v40  ;;  %v4010_v31 = vsel %vm3998_vm9, %v3992_v35, %v4009_v1  ;;  %v20574_v56 = vcombine.low %v11632_v3, %v11636_v2 }
 0x552   : > { %v3623_v17 = vor.u32 %v3622_v46, %v3621_v33  ;;  %v4011_v8 = vsel %vm3997_vm4, %v4008_v12, %v4010_v31  ;;  %v20580_v27 = vmul.f32 %v15661_v55, %v699_v57  ;;  %vm20590_vm1 = vcmp.le.f32.partialorder %v3548_v22, 0.7853982 }
 0x553   : > { %v11099_v25 = vsel %vm21965_vm0, %v5867_v53, %v10955_v62  ;;  %v3626_v38 = vshll.u32 %v3625_v61, 23  ;;  %v20584_v35 = vmul.u32.u64.low %v20513_v42, %v4011_v8  ;;  %v20585_v7 = vmul.u32.u64.high %v20513_v42, %v4011_v8, %v20584_v35 }
 0x554   : > { %v11396_v58 = vmul.bf16 %v20377_v30, %v11099_v25  ;;  %v4022_v2 = vadd.s32 1, %v20562_v14  ;;  %v3630_v57 = vcvt.s32.f32 %v3623_v17  ;;  %v4019_v51 = vmul.u32 %v20513_v42, %v4003_v60 }
 0x555   : > { %v3627_v3 = vor.u32 4788187, %v3626_v38  ;;  %v4487_v49 = vand.u32 2139095040, %v20580_v27  ;;  %v3637_v10 = vsel %vm20590_vm1, 0, %v3635_v20  ;;  %v20603_v22 = vmul.f32 %v15661_v55, %v715_v41 }
 0x556   : > { %13644 = vmatprep.mubr.bf16.mxu0 %v11396_v58  ;;  %vm4021_vm2 = vc.u32 %v20585_v7, %v20561_v0  ;;  %v3641_v9 = vadd.s32 3, %v3637_v10  ;;  %v21961_v53 = vand.u32 2147483647, %v20580_v27  ;;  %v20610_v46 = vand.u32 3, %v3637_v10 }
 0x557   : > { %v3628_v45 = vand.u32 2147483647, %v3627_v3  ;;  %v4023_v34 = vsel %vm4021_vm2, %v4022_v2, %v20562_v14  ;;  %v4488_v32 = vshrl.u32 %v4487_v49, 23  ;;  %v4903_v20 = vand.u32 2139095040, %v20603_v22 }
 0x558   : > { %v4024_v33 = vadd.s32 %v4023_v34, %v4019_v51  ;;  %v20614_v62 = vand.u32 3, %v3641_v9  ;;  %v4491_v61 = vand.u32 8388607, %v21961_v53  ;;  %v695_v17 = vrot.slane %v22178_v50, %v18859_v11 }
 0x559   : > { %v3631_v42 = vmul.f32 %v3630_v57, %v3628_v45  ;;  %v14021_v54 = vadd.s32 4294967169, %v4488_v32  ;;  %v4904_v31 = vshrl.u32 %v4903_v20, 23  ;;  %v20625_v38 = vrot.slane %v20343_v15, %v15637_v24 }
 0x55a   : > { %v4025_v12 = vadd.s32 536870912, %v4024_v33  ;;  %vm3647_vm11 = vcmp.eq.s32.totalorder %v20614_v62, 2  ;;  %vm8660_vm10 = vcmp.eq.s32.totalorder %v20610_v46, 2  ;;  %v4492_v44 = vor.u32 8388608, %v4491_v61 }
 0x55b   : > { %v3632_v40 = vxor.u32 2147483648, %v3631_v42  ;;  %v4494_v41 = vadd.s32 1, %v14021_v54  ;;  %v21960_v2 = vand.u32 2147483647, %v20603_v22  ;;  %vm3644_vm12 = vcmp.eq.s32.totalorder %v20614_v62, 0 }
 0x55c   : > { %v4026_v14 = vshrl.u32 %v4025_v12, 30  ;;  %vm8657_vm8 = vcmp.eq.s32.totalorder %v20610_v46, 0  ;;  %v14037_v15 = vadd.s32 4294967169, %v4904_v31  ;;  %v20636_v51 = vmul.f32 %v15661_v55, %v695_v17 }
 0x55d   : > { %v3633_v1 = vsel %vm3550_vm5, %v3632_v40, %v3631_v42  ;;  %vm4495_vm15 = vcmp.gt.s32.totalorder %v4494_v41, 0  ;;  %vm21962_vm5 = vcmp.lt.s32.totalorder %v20356_v36, 0  ;;  %vm3643_vm13 = vcmp.lt.s32.totalorder %v20614_v62, 2 }
 0x55e   : > { %v3636_v60 = vsel %vm20590_vm1, %v20319_v5, %v3633_v1  ;;  %v4027_v8 = vshll.u32 %v4026_v14, 30  ;;  %v4496_v25 = vsel %vm4495_vm15, %v4494_v41, 0  ;;  %v4050_v3 = vsub.s32 4, %v4026_v14 }
 0x55f   : > { %15198 = vcosq.f32 %v3636_v60  ;;  %v4498_v35 = vand.u32 31, %v4496_v25  ;;  %vm8656_vm9 = vcmp.lt.s32.totalorder %v20610_v46, 2  ;;  %vm3640_vm4 = vweird.f32 %v20319_v5 }
 0x560   : > { %15200 = vsinq.f32 %v3636_v60  ;;  %v20630_v58 = vsub.s32 %v4024_v33, %v4027_v8  ;;  %v4020_v32 = vadd.s32 %v20561_v0, %v20585_v7  ;;  %v4497_v20 = vshrl.u32 %v4496_v25, 5 }
 0x561   : > { %v4499_v57 = vsub.s32 32, %v4498_v35  ;;  %v4501_v10 = vshll.u32 %v22040_v6, %v4498_v35  ;;  %v4504_v45 = vshll.u32 %v21991_v16, %v4498_v35  ;;  %v4507_v34 = vshll.u32 %v21992_v37, %v4498_v35 }
 0x562   : > { %v4030_v49 = vsub.s32 0, %v20630_v58  ;;  %v20651_v40 = vshll.u32 %v4492_v44, 8  ;;  %v20655_v12 = vand.u32 8388607, %v21960_v2  ;;  %v4051_v41 = vsel %vm21962_vm5, %v4050_v3, %v4026_v14 }
 0x563   : > { %v4502_v42 = vshrl.u32 %v21991_v16, %v4499_v57  ;;  %v4505_v9 = vshrl.u32 %v21992_v37, %v4499_v57  ;;  %v4508_v33 = vshrl.u32 %v22004_v39, %v4499_v57  ;;  %v4500_v0 = vshrl.u32 %v22040_v6, %v4499_v57 }
 0x564   : > { %v14002_v54 = vmin.u32 %v4030_v49, %v20630_v58  ;;  %v20660_v7 = vadd.s32 1, %v14037_v15  ;;  %v4510_v8 = vshll.u32 %v22004_v39, %v4498_v35  ;;  %v4511_v25 = vshrl.u32 %v22005_v59, %v4499_v57 }
 0x565   : > { %v4503_v60 = vor.u32 %v4502_v42, %v4501_v10  ;;  %v4506_v31 = vor.u32 %v4505_v9, %v4504_v45  ;;  %v4509_v17 = vor.u32 %v4508_v33, %v4507_v34  ;;  %v4513_v44 = vshll.u32 %v22005_v59, %v4498_v35 }
 0x566   : > { %v4032_v61 = vclz %v14002_v54  ;;  %v4514_v49 = vshrl.u32 %v21993_v13, %v4499_v57  ;;  %vm4516_vm14 = vcmp.lt.s32.totalorder %v4497_v20, 1  ;;  %vm4517_vm3 = vcmp.lt.s32.totalorder %v4497_v20, 2 }
 0x567   : > { %vm4518_vm1 = vcmp.lt.s32.totalorder %v4497_v20, 3  ;;  %v4512_v53 = vor.u32 %v4511_v25, %v4510_v8  ;;  %vm4519_vm2 = vcmp.lt.s32.totalorder %v4497_v20, 4  ;;  %v4520_v45 = vsel %vm4516_vm14, %v4500_v0, %v4503_v60 }
 0x568   : > { %v14003_v14 = vadd.s32 4294967294, %v4032_v61  ;;  %v4515_v54 = vor.u32 %v4514_v49, %v4513_v44  ;;  %v4521_v34 = vsel %vm4519_vm2, %v4509_v17, 2102212464  ;;  %v22181_v42 = vand.u32 2147483647, %v20356_v36 }
 0x569   : > { %v15199_v2 = vpop.eup %15198  ;;  %v4522_v61 = vsel %vm4518_vm1, %v4506_v31, %v4521_v34  ;;  %v4525_v62 = vsel %vm4519_vm2, %v4512_v53, 920167782 }
 0x56a   : > { %v15201_v3 = vpop.eup %15200  ;;  %v3648_v15 = vxor.u32 2147483648, %v15199_v2  ;;  %vm14004_vm15 = vcmp.lt.s32.totalorder %v14003_v14, 0  ;;  %vm20675_vm5 = vcmp.le.f32.partialorder %v22181_v42, 0.7853982  ;;  %v4526_v46 = vsel %vm4518_vm1, %v4509_v17, %v4525_v62 }
 0x56b   : > { %v3645_v10 = vxor.u32 2147483648, %v15201_v3  ;;  %v4035_v33 = vsel %vm14004_vm15, 0, %v14003_v14  ;;  %v4523_v14 = vsel %vm4517_vm3, %v4520_v45, %v4522_v61  ;;  %v4529_v45 = vsel %vm4519_vm2, %v4515_v54, 1326507024 }
 0x56c   : > { %v3649_v35 = vsel %vm3647_vm11, %v3648_v15, %v15201_v3  ;;  %v8662_v57 = vsel %vm8660_vm10, %v3648_v15, %v15201_v3  ;;  %v4036_v25 = vsub.s32 32, %v4035_v33  ;;  %v4037_v44 = vshll.u32 %v20630_v58, %v4035_v33 }
 0x56d   : > { %v3646_v0 = vsel %vm3644_vm12, %v15199_v2, %v3645_v10  ;;  %v8659_v8 = vsel %vm8657_vm8, %v15199_v2, %v3645_v10  ;;  %v4040_v15 = vsub.s32 4294967266, %v4035_v33  ;;  %v4524_v2 = vsel %vm4516_vm14, %v4503_v60, %v4506_v31 }
 0x56e   : > { %v3650_v49 = vsel %vm3643_vm13, %v3646_v0, %v3649_v35  ;;  %v8663_v3 = vsel %vm8656_vm9, %v8659_v8, %v8662_v57  ;;  %v4038_v1 = vshrl.u32 %v4020_v32, %v4036_v25  ;;  %v4528_v57 = vsel %vm4516_vm14, %v4506_v31, %v4509_v17 }
 0x56f   : > { %v3651_v34 = vsel %vm3640_vm4, nan, %v3650_v49  ;;  %v8664_v42 = vsel %vm3640_vm4, nan, %v8663_v3  ;;  %v4041_v48 = vadd.s32 127, %v4040_v15  ;;  %v4527_v5 = vsel %vm4517_vm3, %v4524_v2, %v4526_v46 }
 0x570   : > { %v5862_v10 = vpack.c.bf16 %v3651_v34, %v3651_v34  ;;  %v10854_v58 = vpack.c.bf16 %v8664_v42, %v8664_v42  ;;  %v4039_v35 = vor.u32 %v4038_v1, %v4037_v44  ;;  %v4530_v32 = vsel %vm4518_vm1, %v4512_v53, %v4529_v45 }
 0x571   : > { %v4042_v61 = vshll.u32 %v4041_v48, 23  ;;  %v4531_v60 = vsel %vm4517_vm3, %v4528_v57, %v4530_v32  ;;  %v20703_v8 = vmul.u32.u64.low %v20651_v40, %v4527_v5  ;;  %v20704_v25 = vmul.u32.u64.high %v20651_v40, %v4527_v5, %v20703_v8 }
 0x572   : > { %v10950_v33 = vrot.slane %v10854_v58, 4  ;;  %v4046_v0 = vcvt.s32.f32 %v4039_v35  ;;  %v20709_v31 = vmul.u32.u64.low %v20651_v40, %v4531_v60  ;;  %v20710_v17 = vmul.u32.u64.high %v20651_v40, %v4531_v60, %v20709_v31 }
 0x573   : > { %v4043_v44 = vor.u32 4788187, %v4042_v61  ;;  %v4053_v53 = vsel %vm20675_vm5, 0, %v4051_v41  ;;  %vm4911_vm11 = vcmp.gt.s32.totalorder %v20660_v7, 0  ;;  %v4539_v54 = vmul.u32 %v20651_v40, %v4523_v14 }
 0x574   : > { %v11079_v1 = vsel %vm21965_vm0, %v5862_v10, %v10950_v33  ;;  %v4912_v49 = vsel %vm4911_vm11, %v20660_v7, 0  ;;  %v4542_v3 = vadd.s32 1, %v20704_v25  ;;  %v4908_v15 = vor.u32 8388608, %v20655_v12 }
 0x575   : > { %v11391_v48 = vmul.bf16 %v20625_v38, %v11079_v1  ;;  %v4044_v20 = vand.u32 2147483647, %v4043_v44  ;;  %v4914_v34 = vand.u32 31, %v4912_v49  ;;  %v4057_v2 = vadd.s32 3, %v4053_v53 }
 0x576   : > { %vm4541_vm10 = vc.u32 %v20710_v17, %v20703_v8  ;;  %v22184_v41 = vand.u32 2139095040, %v20636_v51  ;;  %v4913_v57 = vshrl.u32 %v4912_v49, 5  ;;  %vm22185_vm12 = vcmp.lt.s32.totalorder %v20356_v36, 0 }
 0x577   : > { %13419 = vmatmul.mubr.bf16.gmra.mrb[16].mxu1 %v11391_v48  ;;  %v4047_v42 = vmul.f32 %v4046_v0, %v4044_v20  ;;  %v4543_v58 = vsel %vm4541_vm10, %v4542_v3, %v20704_v25  ;;  %v4915_v62 = vsub.s32 32, %v4914_v34  ;;  %v4917_v40 = vshll.u32 %v22040_v6, %v4914_v34 }
 0x578   : > { %v4384_v10 = vshrl.u32 %v22184_v41, 23  ;;  %v4920_v7 = vshll.u32 %v21991_v16, %v4914_v34  ;;  %v4544_v35 = vadd.s32 %v4543_v58, %v4539_v54  ;;  %v4923_v12 = vshll.u32 %v21992_v37, %v4914_v34 }
 0x579   : > { %v4048_v14 = vxor.u32 2147483648, %v4047_v42  ;;  %v4926_v46 = vshll.u32 %v22004_v39, %v4914_v34  ;;  %v4918_v45 = vshrl.u32 %v21991_v16, %v4915_v62  ;;  %v4921_v33 = vshrl.u32 %v21992_v37, %v4915_v62 }
 0x57a   : > { %v4924_v61 = vshrl.u32 %v22004_v39, %v4915_v62  ;;  %v4545_v32 = vadd.s32 536870912, %v4544_v35  ;;  %v4927_v0 = vshrl.u32 %v22005_v59, %v4915_v62  ;;  %v4929_v60 = vshll.u32 %v22005_v59, %v4914_v34 }
 0x57b   : > { %v4049_v5 = vsel %vm22185_vm12, %v4048_v14, %v4047_v42  ;;  %v4919_v1 = vor.u32 %v4918_v45, %v4917_v40  ;;  %v4922_v44 = vor.u32 %v4921_v33, %v4920_v7  ;;  %v4930_v54 = vshrl.u32 %v21993_v13, %v4915_v62 }
 0x57c   : > { %v4052_v25 = vsel %vm20675_vm5, %v20356_v36, %v4049_v5  ;;  %v4925_v31 = vor.u32 %v4924_v61, %v4923_v12  ;;  %v4546_v48 = vshrl.u32 %v4545_v32, 30  ;;  %v4928_v20 = vor.u32 %v4927_v0, %v4926_v46 }
 0x57d   : > { %15202 = vcosq.f32 %v4052_v25  ;;  %v4916_v49 = vshrl.u32 %v22040_v6, %v4915_v62  ;;  %vm4932_vm8 = vcmp.lt.s32.totalorder %v4913_v57, 1  ;;  %vm4934_vm13 = vcmp.lt.s32.totalorder %v4913_v57, 3 }
 0x57e   : > { %15204 = vsinq.f32 %v4052_v25  ;;  %v4547_v3 = vshll.u32 %v4546_v48, 30  ;;  %v4931_v42 = vor.u32 %v4930_v54, %v4929_v60  ;;  %vm4933_vm9 = vcmp.lt.s32.totalorder %v4913_v57, 2 }
 0x57f   : > { %vm4935_vm4 = vcmp.lt.s32.totalorder %v4913_v57, 4  ;;  %v4940_v9 = vsel %vm4932_vm8, %v4919_v1, %v4922_v44  ;;  %v20743_v41 = vshll.u32 %v4908_v15, 8  ;;  %v4380_v58 = vand.u32 2147483647, %v20636_v51 }
 0x580   : > { %v4941_v34 = vsel %vm4935_vm4, %v4928_v20, 920167782  ;;  %v9067_v40 = vand.u32 3, %v4053_v53  ;;  %v20746_v7 = vsub.s32 %v4544_v35, %v4547_v3  ;;  %v4937_v14 = vsel %vm4935_vm4, %v4925_v31, 2102212464 }
 0x581   : > { %v4942_v62 = vsel %vm4934_vm13, %v4925_v31, %v4941_v34  ;;  %vm4056_vm5 = vweird.f32 %v20356_v36  ;;  %v4058_v12 = vand.u32 3, %v4057_v2  ;;  %vm4486_vm14 = vcmp.lt.s32.totalorder %v20580_v27, 0 }
 0x582   : > { %v4943_v46 = vsel %vm4933_vm9, %v4940_v9, %v4942_v62  ;;  %v14017_v45 = vadd.s32 4294967169, %v4384_v10  ;;  %v4550_v15 = vsub.s32 0, %v20746_v7  ;;  %v4936_v33 = vsel %vm4932_vm8, %v4916_v49, %v4919_v1 }
 0x583   : > { %v4944_v53 = vsel %vm4932_vm8, %v4922_v44, %v4925_v31  ;;  %v4945_v35 = vsel %vm4935_vm4, %v4931_v42, 1326507024  ;;  %v4938_v61 = vsel %vm4934_vm13, %v4922_v44, %v4937_v14  ;;  %vm9068_vm3 = vcmp.lt.s32.totalorder %v9067_v40, 2 }
 0x584   : > { %v4946_v5 = vsel %vm4934_vm13, %v4928_v20, %v4945_v35  ;;  %v20760_v32 = vmul.u32.u64.low %v20743_v41, %v4943_v46  ;;  %v20761_v2 = vmul.u32.u64.high %v20743_v41, %v4943_v46, %v20760_v32  ;;  %vm9069_vm1 = vcmp.eq.s32.totalorder %v9067_v40, 0 }
 0x585   : > { %v14022_v10 = vmin.u32 %v4550_v15, %v20746_v7  ;;  %v20767_v0 = vand.u32 8388607, %v4380_v58  ;;  %vm9072_vm2 = vcmp.eq.s32.totalorder %v9067_v40, 2  ;;  %v4570_v60 = vsub.s32 4, %v4546_v48 }
 0x586   : > { %v4947_v25 = vsel %vm4933_vm9, %v4944_v53, %v4946_v5  ;;  %v4390_v1 = vadd.s32 1, %v14017_v45  ;;  %vm4059_vm15 = vcmp.lt.s32.totalorder %v4058_v12, 2  ;;  %vm4063_vm11 = vcmp.eq.s32.totalorder %v4058_v12, 2 }
 0x587   : > { %v15203_v44 = vpop.eup %15202  ;;  %v4552_v31 = vclz %v14022_v10  ;;  %v4939_v20 = vsel %vm4933_vm9, %v4936_v33, %v4938_v61  ;;  %vm4060_vm10 = vcmp.eq.s32.totalorder %v4058_v12, 0  ;;  %v4540_v34 = vadd.s32 %v20703_v8, %v20710_v17 }
 0x588   : > { %v15205_v54 = vpop.eup %15204  ;;  %v4064_v49 = vxor.u32 2147483648, %v15203_v44  ;;  %v20772_v3 = vmul.u32.u64.low %v20743_v41, %v4947_v25  ;;  %v20773_v42 = vmul.u32.u64.high %v20743_v41, %v4947_v25, %v20772_v3  ;;  %vm4391_vm12 = vcmp.gt.s32.totalorder %v4390_v1, 0 }
 0x589   : > { %v4061_v9 = vxor.u32 2147483648, %v15205_v54  ;;  %v14023_v14 = vadd.s32 4294967294, %v4552_v31  ;;  %v4571_v57 = vsel %vm4486_vm14, %v4570_v60, %v4546_v48  ;;  %v4955_v45 = vmul.u32 %v20743_v41, %v4939_v20 }
 0x58a   : > { %v4065_v62 = vsel %vm4063_vm11, %v4064_v49, %v15205_v54  ;;  %v9074_v46 = vsel %vm9072_vm2, %v4064_v49, %v15205_v54  ;;  %v4958_v53 = vadd.s32 1, %v20761_v2  ;;  %v4392_v61 = vsel %vm4391_vm12, %v4390_v1, 0 }
 0x58b   : > { %v4062_v15 = vsel %vm4060_vm10, %v15203_v44, %v4061_v9  ;;  %v9071_v33 = vsel %vm9069_vm1, %v15203_v44, %v4061_v9  ;;  %vm14024_vm8 = vcmp.lt.s32.totalorder %v14023_v14, 0  ;;  %vm4957_vm13 = vc.u32 %v20773_v42, %v20760_v32 }
 0x58c   : > { %v4066_v35 = vsel %vm4059_vm15, %v4062_v15, %v4065_v62  ;;  %v9075_v8 = vsel %vm9068_vm3, %v9071_v33, %v9074_v46  ;;  %v4555_v17 = vsel %vm14024_vm8, 0, %v14023_v14  ;;  %v20794_v40 = vrot.slane %v20484_v47, %v15637_v24 }
 0x58d   : > { %v4067_v5 = vsel %vm4056_vm5, nan, %v4066_v35  ;;  %v9076_v48 = vsel %vm4056_vm5, nan, %v9075_v8  ;;  %v4556_v10 = vsub.s32 32, %v4555_v17  ;;  %v4557_v41 = vshll.u32 %v20746_v7, %v4555_v17 }
 0x58e   : > { %v5866_v60 = vpack.c.bf16 %v4067_v5, %v4067_v5  ;;  %v10858_v25 = vpack.c.bf16 %v9076_v48, %v9076_v48  ;;  %v4560_v44 = vsub.s32 4294967266, %v4555_v17  ;;  %22186 = vst [vmem:[#allocation13_spill] sm:$0xff] %v20794_v40  ;;  %v4959_v1 = vsel %vm4957_vm13, %v4958_v53, %v20761_v2 }
 0x58f   : > { %v4558_v12 = vshrl.u32 %v4540_v34, %v4556_v10  ;;  %v4394_v31 = vand.u32 31, %v4392_v61  ;;  %v22187_v36 = vand.u32 2147483647, %v20580_v27  ;;  %v4960_v49 = vadd.s32 %v4959_v1, %v4955_v45 }
 0x590   : > { %v10954_v20 = vrot.slane %v10858_v25, 4  ;;  %v4561_v7 = vadd.s32 127, %v4560_v44  ;;  %v4388_v47 = vor.u32 8388608, %v20767_v0  ;;  %v4393_v46 = vshrl.u32 %v4392_v61, 5 }
 0x591   : > { %vm20799_vm9 = vcmp.le.f32.partialorder %v22187_v36, 0.7853982  ;;  %v4559_v3 = vor.u32 %v4558_v12, %v4557_v41  ;;  %v4395_v14 = vsub.s32 32, %v4394_v31  ;;  %v4961_v62 = vadd.s32 536870912, %v4960_v49 }
 0x592   : > { %v4573_v9 = vsel %vm20799_vm9, 0, %v4571_v57  ;;  %v11095_v34 = vsel %vm21965_vm0, %v5866_v60, %v10954_v20  ;;  %v4562_v2 = vshll.u32 %v4561_v7, 23  ;;  %v4397_v33 = vshll.u32 %v22040_v6, %v4394_v31 }
 0x593   : > { %v11395_v15 = vmul.bf16 %v20794_v40, %v11095_v34  ;;  %v4400_v53 = vshll.u32 %v21991_v16, %v4394_v31  ;;  %v4403_v45 = vshll.u32 %v21992_v37, %v4394_v31  ;;  %v4566_v8 = vcvt.s32.f32 %v4559_v3 }
 0x594   : > { %v4563_v35 = vor.u32 4788187, %v4562_v2  ;;  %v20811_v17 = vshrl.u32 %v4961_v62, 30  ;;  %v4404_v0 = vshrl.u32 %v22004_v39, %v4395_v14  ;;  %v4398_v57 = vshrl.u32 %v21991_v16, %v4395_v14 }
 0x595   : > { %13645 = vmatmul.mubr.bf16.gmra.mrb[16].mxu0 %v11395_v15  ;;  %v4401_v5 = vshrl.u32 %v21992_v37, %v4395_v14  ;;  %v4406_v61 = vshll.u32 %v22004_v39, %v4394_v31  ;;  %v4407_v48 = vshrl.u32 %v22005_v59, %v4395_v14  ;;  %v711_v60 = vrot.slane %v22178_v50, %v18899_v28 }
 0x596   : > { %v4564_v10 = vand.u32 2147483647, %v4563_v35  ;;  %v4963_v41 = vshll.u32 %v20811_v17, 30  ;;  %v4577_v25 = vadd.s32 3, %v4573_v9  ;;  %v4409_v44 = vshll.u32 %v22005_v59, %v4394_v31 }
 0x597   : > { %v4410_v12 = vshrl.u32 %v21993_v13, %v4395_v14  ;;  %v20823_v1 = vshll.u32 %v4388_v47, 8  ;;  %v4405_v7 = vor.u32 %v4404_v0, %v4403_v45  ;;  %v4408_v3 = vor.u32 %v4407_v48, %v4406_v61 }
 0x598   : > { %v4567_v20 = vmul.f32 %v4566_v8, %v4564_v10  ;;  %v20825_v36 = vsub.s32 %v4960_v49, %v4963_v41  ;;  %v4396_v34 = vshrl.u32 %v22040_v6, %v4395_v14  ;;  %v4399_v2 = vor.u32 %v4398_v57, %v4397_v33 }
 0x599   : > { %v4402_v62 = vor.u32 %v4401_v5, %v4400_v53  ;;  %vm4415_vm4 = vcmp.lt.s32.totalorder %v4393_v46, 4  ;;  %vm4902_vm5 = vcmp.lt.s32.totalorder %v20603_v22, 0  ;;  %vm4412_vm3 = vcmp.lt.s32.totalorder %v4393_v46, 1 }
 0x59a   : > { %v4568_v15 = vxor.u32 2147483648, %v4567_v20  ;;  %v4966_v50 = vsub.s32 0, %v20825_v36  ;;  %v4417_v31 = vsel %vm4415_vm4, %v4405_v7, 2102212464  ;;  %v20831_v47 = vand.u32 3, %v4577_v25 }
 0x59b   : > { %v20833_v35 = vand.u32 3, %v4573_v9  ;;  %v4411_v49 = vor.u32 %v4410_v12, %v4409_v44  ;;  %vm4413_vm1 = vcmp.lt.s32.totalorder %v4393_v46, 2  ;;  %vm4414_vm2 = vcmp.lt.s32.totalorder %v4393_v46, 3 }
 0x59c   : > { %v4569_v14 = vsel %vm4486_vm14, %v4568_v15, %v4567_v20  ;;  %v14038_v33 = vmin.u32 %v4966_v50, %v20825_v36  ;;  %v4421_v53 = vsel %vm4415_vm4, %v4408_v3, 920167782  ;;  %v22190_v8 = vand.u32 2147483647, %v20603_v22 }
 0x59d   : > { %v4572_v45 = vsel %vm20799_vm9, %v20580_v27, %v4569_v14  ;;  %v4416_v9 = vsel %vm4412_vm3, %v4396_v34, %v4399_v2  ;;  %v4418_v57 = vsel %vm4414_vm2, %v4402_v62, %v4417_v31  ;;  %v4420_v5 = vsel %vm4412_vm3, %v4399_v2, %v4402_v62 }
 0x59e   : > { %vm20844_vm15 = vcmp.le.f32.partialorder %v22190_v8, 0.7853982  ;;  %15206 = vcosq.f32 %v4572_v45  ;;  %v4968_v61 = vclz %v14038_v33  ;;  %v4424_v48 = vsel %vm4412_vm3, %v4402_v62, %v4405_v7 }
 0x59f   : > { %v20853_v10 = vmul.f32 %v15661_v55, %v711_v60  ;;  %15208 = vsinq.f32 %v4572_v45  ;;  %v4986_v54 = vsub.s32 4, %v20811_v17  ;;  %v4422_v41 = vsel %vm4414_vm2, %v4405_v7, %v4421_v53  ;;  %v22193_v45 = vld [vmem:[#allocation28_spill] sm:$0xff] }
 0x5a0   : > { %v4425_v25 = vsel %vm4415_vm4, %v4411_v49, 1326507024  ;;  %v14039_v44 = vadd.s32 4294967294, %v4968_v61  ;;  %v4419_v12 = vsel %vm4413_vm1, %v4416_v9, %v4418_v57  ;;  %v4423_v20 = vsel %vm4413_vm1, %v4420_v5, %v4422_v41 }
 0x5a1   : > { %v4426_v34 = vsel %vm4414_vm2, %v4408_v3, %v4425_v25  ;;  %v4956_v2 = vadd.s32 %v20760_v32, %v20773_v42  ;;  %v20865_v62 = vmul.u32.u64.low %v20823_v1, %v4423_v20  ;;  %v20866_v15 = vmul.u32.u64.high %v20823_v1, %v4423_v20, %v20865_v62 }
 0x5a2   : > { %v4427_v60 = vsel %vm4413_vm1, %v4424_v48, %v4426_v34  ;;  %vm9583_vm14 = vcmp.lt.s32.totalorder %v20833_v35, 2  ;;  %vm14040_vm11 = vcmp.lt.s32.totalorder %v14039_v44, 0  ;;  %v4799_v31 = vand.u32 2139095040, %v20853_v10 }
 0x5a3   : > { %v20871_v7 = vmul.u32.u64.low %v20823_v1, %v4427_v60  ;;  %v20872_v50 = vmul.u32.u64.high %v20823_v1, %v4427_v60, %v20871_v7  ;;  %vm4576_vm10 = vweird.f32 %v20580_v27  ;;  %vm9584_vm12 = vcmp.eq.s32.totalorder %v20833_v35, 0 }
 0x5a4   : > { %v4971_v32 = vsel %vm14040_vm11, 0, %v14039_v44  ;;  %v4987_v42 = vsel %vm4902_vm5, %v4986_v54, %v20811_v17  ;;  %v4435_v46 = vmul.u32 %v20823_v1, %v4419_v12  ;;  %v4800_v33 = vshrl.u32 %v4799_v31, 23 }
 0x5a5   : > { %v4972_v3 = vsub.s32 32, %v4971_v32  ;;  %v4973_v49 = vshll.u32 %v20825_v36, %v4971_v32  ;;  %v4976_v14 = vsub.s32 4294967266, %v4971_v32  ;;  %vm4579_vm8 = vcmp.lt.s32.totalorder %v20831_v47, 2 }
 0x5a6   : > { %vm9587_vm13 = vcmp.eq.s32.totalorder %v20833_v35, 2  ;;  %v4438_v53 = vadd.s32 1, %v20866_v15  ;;  %v731_v8 = vrot.slane %v22193_v45, %v18670_v4  ;;  %v4989_v17 = vsel %vm20844_vm15, 0, %v4987_v42 }
 0x5a7   : > { %v4974_v9 = vshrl.u32 %v4956_v2, %v4972_v3  ;;  %v4977_v57 = vadd.s32 127, %v4976_v14  ;;  %vm4437_vm9 = vc.u32 %v20872_v50, %v20865_v62  ;;  %vm4580_vm4 = vcmp.eq.s32.totalorder %v20831_v47, 0 }
 0x5a8   : > { %v4439_v1 = vsel %vm4437_vm9, %v4438_v53, %v20866_v15  ;;  %v4796_v36 = vand.u32 2147483647, %v20853_v10  ;;  %v14033_v5 = vadd.s32 4294967169, %v4800_v33  ;;  %v15207_v61 = vpop.eup %15206  ;;  %vm4583_vm3 = vcmp.eq.s32.totalorder %v20831_v47, 2 }
 0x5a9   : > { %v4975_v48 = vor.u32 %v4974_v9, %v4973_v49  ;;  %v4978_v4 = vshll.u32 %v4977_v57, 23  ;;  %v4440_v54 = vadd.s32 %v4439_v1, %v4435_v46  ;;  %v15209_v41 = vpop.eup %15208  ;;  %v4584_v25 = vxor.u32 2147483648, %v15207_v61 }
 0x5aa   : > { %v4993_v44 = vadd.s32 3, %v4989_v17  ;;  %v4806_v12 = vadd.s32 1, %v14033_v5  ;;  %v20896_v20 = vmul.f32 %v15661_v55, %v731_v8  ;;  %v4581_v34 = vxor.u32 2147483648, %v15209_v41 }
 0x5ab   : > { %v4979_v2 = vor.u32 4788187, %v4978_v4  ;;  %v4982_v60 = vcvt.s32.f32 %v4975_v48  ;;  %v4441_v15 = vadd.s32 536870912, %v4440_v54  ;;  %v4585_v7 = vsel %vm4583_vm3, %v4584_v25, %v15209_v41 }
 0x5ac   : > { %v9589_v31 = vsel %vm9587_vm13, %v4584_v25, %v15209_v41  ;;  %v4803_v32 = vand.u32 8388607, %v4796_v36  ;;  %vm4807_vm1 = vcmp.gt.s32.totalorder %v4806_v12, 0  ;;  %v4582_v42 = vsel %vm4580_vm4, %v15207_v61, %v4581_v34 }
 0x5ad   : > { %v9586_v46 = vsel %vm9584_vm12, %v15207_v61, %v4581_v34  ;;  %v4980_v3 = vand.u32 2147483647, %v4979_v2  ;;  %v4442_v49 = vshrl.u32 %v4441_v15, 30  ;;  %v4586_v14 = vsel %vm4579_vm8, %v4582_v42, %v4585_v7 }
 0x5ae   : > { %v9590_v33 = vsel %vm9583_vm14, %v9586_v46, %v9589_v31  ;;  %v4808_v53 = vsel %vm4807_vm1, %v4806_v12, 0  ;;  %v5319_v8 = vand.u32 2139095040, %v20896_v20  ;;  %v4587_v9 = vsel %vm4576_vm10, nan, %v4586_v14 }
 0x5af   : > { %v9591_v57 = vsel %vm4576_vm10, nan, %v9590_v33  ;;  %v4983_v1 = vmul.f32 %v4982_v60, %v4980_v3  ;;  %v4443_v5 = vshll.u32 %v4442_v49, 30  ;;  %v5871_v61 = vpack.c.bf16 %v4587_v9, %v4587_v9 }
 0x5b0   : > { %v10863_v48 = vpack.c.bf16 %v9591_v57, %v9591_v57  ;;  %vm21964_vm2 = vcmp.lt.s32.totalorder %v20636_v51, 0  ;;  %v20916_v4 = vand.u32 3, %v4989_v17  ;;  %v4810_v41 = vand.u32 31, %v4808_v53 }
 0x5b1   : > { %v4984_v47 = vxor.u32 2147483648, %v4983_v1  ;;  %v20918_v35 = vsub.s32 %v4440_v54, %v4443_v5  ;;  %v20920_v12 = vand.u32 3, %v4993_v44  ;;  %v4804_v34 = vor.u32 8388608, %v4803_v32 }
 0x5b2   : > { %v10959_v25 = vrot.slane %v10863_v48, 4  ;;  %v5320_v2 = vshrl.u32 %v5319_v8, 23  ;;  %v4811_v15 = vsub.s32 32, %v4810_v41  ;;  %v5316_v7 = vand.u32 2147483647, %v20896_v20 }
 0x5b3   : > { %v4985_v27 = vsel %vm4902_vm5, %v4984_v47, %v4983_v1  ;;  %v4446_v60 = vsub.s32 0, %v20918_v35  ;;  %v4466_v54 = vsub.s32 4, %v4442_v49  ;;  %v20930_v42 = vshrl.u32 %v4808_v53, 5 }
 0x5b4   : > { %v11115_v31 = vsel %vm21965_vm0, %v5871_v61, %v10959_v25  ;;  %v4988_v17 = vsel %vm20844_vm15, %v20603_v22, %v4985_v27  ;;  %vm20935_vm5 = vcmp.le.f32.partialorder %v4380_v58, 0.7853982  ;;  %v4436_v3 = vadd.s32 %v20865_v62, %v20872_v50 }
 0x5b5   : > { %v11400_v44 = vmul.bf16 %v20372_v26, %v11115_v31  ;;  %15210 = vcosq.f32 %v4988_v17  ;;  %v14018_v46 = vmin.u32 %v4446_v60, %v20918_v35  ;;  %v20942_v0 = vshll.u32 %v4804_v34, 8 }
 0x5b6   : > { %15212 = vsinq.f32 %v4988_v17  ;;  %v20944_v14 = vadd.s32 4294967169, %v5320_v2  ;;  %vm4999_vm15 = vcmp.eq.s32.totalorder %v20920_v12, 2  ;;  %vm9999_vm14 = vcmp.eq.s32.totalorder %v20916_v4, 2 }
 0x5b7   : > { %13428 = vmatprep.mubr.bf16.mxu1 %v11400_v44  ;;  %v4448_v33 = vclz %v14018_v46  ;;  %v4813_v58 = vshll.u32 %v22040_v6, %v4810_v41  ;;  %v4814_v53 = vshrl.u32 %v21991_v16, %v4811_v15  ;;  %v20952_v8 = vand.u32 8388607, %v5316_v7 }
 0x5b8   : > { %vm4996_vm11 = vcmp.eq.s32.totalorder %v20920_v12, 0  ;;  %vm9996_vm10 = vcmp.eq.s32.totalorder %v20916_v4, 0  ;;  %v4467_v62 = vsel %vm21964_vm2, %v4466_v54, %v4442_v49  ;;  %v4812_v50 = vshrl.u32 %v22040_v6, %v4811_v15 }
 0x5b9   : > { %v4816_v9 = vshll.u32 %v21991_v16, %v4810_v41  ;;  %vm4828_vm12 = vcmp.lt.s32.totalorder %v20930_v42, 1  ;;  %vm4995_vm8 = vcmp.lt.s32.totalorder %v20920_v12, 2  ;;  %vm9995_vm13 = vcmp.lt.s32.totalorder %v20916_v4, 2 }
 0x5ba   : > { %v14019_v57 = vadd.s32 4294967294, %v4448_v33  ;;  %v4815_v1 = vor.u32 %v4814_v53, %v4813_v58  ;;  %v4817_v5 = vshrl.u32 %v21992_v37, %v4811_v15  ;;  %v4819_v61 = vshll.u32 %v21992_v37, %v4810_v41 }
 0x5bb   : > { %vm4992_vm9 = vweird.f32 %v20603_v22  ;;  %v4820_v49 = vshrl.u32 %v22004_v39, %v4811_v15  ;;  %v4822_v48 = vshll.u32 %v22004_v39, %v4810_v41  ;;  %v4823_v47 = vshrl.u32 %v22005_v59, %v4811_v15 }
 0x5bc   : > { %v4825_v25 = vshll.u32 %v22005_v59, %v4810_v41  ;;  %vm14020_vm4 = vcmp.lt.s32.totalorder %v14019_v57, 0  ;;  %v4818_v34 = vor.u32 %v4817_v5, %v4816_v9  ;;  %v4826_v2 = vshrl.u32 %v21993_v13, %v4811_v15 }
 0x5bd   : > { %vm4830_vm3 = vcmp.lt.s32.totalorder %v20930_v42, 3  ;;  %v4451_v27 = vsel %vm14020_vm4, 0, %v14019_v57  ;;  %v4821_v60 = vor.u32 %v4820_v49, %v4819_v61  ;;  %v4824_v31 = vor.u32 %v4823_v47, %v4822_v48 }
 0x5be   : > { %vm4831_vm1 = vcmp.lt.s32.totalorder %v20930_v42, 4  ;;  %v4452_v17 = vsub.s32 32, %v4451_v27  ;;  %v4453_v54 = vshll.u32 %v20918_v35, %v4451_v27  ;;  %v4456_v44 = vsub.s32 4294967266, %v4451_v27 }
 0x5bf   : > { %v4827_v46 = vor.u32 %v4826_v2, %v4825_v25  ;;  %v4469_v33 = vsel %vm20935_vm5, 0, %v4467_v62  ;;  %vm4829_vm2 = vcmp.lt.s32.totalorder %v20930_v42, 2  ;;  %v4833_v41 = vsel %vm4831_vm1, %v4821_v60, 2102212464  ;;  %v15211_v58 = vpop.eup %15210 }
 0x5c0   : > { %v4837_v15 = vsel %vm4831_vm1, %v4824_v31, 920167782  ;;  %v4454_v53 = vshrl.u32 %v4436_v3, %v4452_v17  ;;  %v4457_v9 = vadd.s32 127, %v4456_v44  ;;  %v4832_v57 = vsel %vm4828_vm12, %v4812_v50, %v4815_v1  ;;  %v15213_v5 = vpop.eup %15212 }
 0x5c1   : > { %v4834_v35 = vsel %vm4830_vm3, %v4818_v34, %v4833_v41  ;;  %v5000_v61 = vxor.u32 2147483648, %v15211_v58  ;;  %v4836_v62 = vsel %vm4828_vm12, %v4815_v1, %v4818_v34  ;;  %v4838_v49 = vsel %vm4830_vm3, %v4821_v60, %v4837_v15 }
 0x5c2   : > { %v4840_v48 = vsel %vm4828_vm12, %v4818_v34, %v4821_v60  ;;  %v4997_v47 = vxor.u32 2147483648, %v15213_v5  ;;  %v4455_v3 = vor.u32 %v4454_v53, %v4453_v54  ;;  %v4458_v25 = vshll.u32 %v4457_v9, 23 }
 0x5c3   : > { %v4841_v50 = vsel %vm4831_vm1, %v4827_v46, 1326507024  ;;  %v5001_v2 = vsel %vm4999_vm15, %v5000_v61, %v15213_v5  ;;  %v10001_v27 = vsel %vm9999_vm14, %v5000_v61, %v15213_v5  ;;  %v4835_v1 = vsel %vm4829_vm2, %v4832_v57, %v4834_v35 }
 0x5c4   : > { %v4842_v17 = vsel %vm4830_vm3, %v4824_v31, %v4841_v50  ;;  %v4998_v34 = vsel %vm4996_vm11, %v15211_v58, %v4997_v47  ;;  %v9998_v60 = vsel %vm9996_vm10, %v15211_v58, %v4997_v47  ;;  %v4459_v54 = vor.u32 4788187, %v4458_v25 }
 0x5c5   : > { %v4462_v44 = vcvt.s32.f32 %v4455_v3  ;;  %v5002_v46 = vsel %vm4995_vm8, %v4998_v34, %v5001_v2  ;;  %v10002_v41 = vsel %vm9995_vm13, %v9998_v60, %v10001_v27  ;;  %v4839_v15 = vsel %vm4829_vm2, %v4836_v62, %v4838_v49 }
 0x5c6   : > { %v4843_v31 = vsel %vm4829_vm2, %v4840_v48, %v4842_v17  ;;  %v5003_v53 = vsel %vm4992_vm9, nan, %v5002_v46  ;;  %v10003_v58 = vsel %vm4992_vm9, nan, %v10002_v41  ;;  %v4460_v9 = vand.u32 2147483647, %v4459_v54 }
 0x5c7   : > { %v5326_v57 = vadd.s32 1, %v20944_v14  ;;  %v5875_v12 = vpack.c.bf16 %v5003_v53, %v5003_v53  ;;  %v10867_v35 = vpack.c.bf16 %v10003_v58, %v10003_v58  ;;  %v747_v22 = vrot.slane %v22193_v45, %v18704_v21 }
 0x5c8   : > { %v21019_v4 = vmul.u32.u64.low %v20942_v0, %v4843_v31  ;;  %v21020_v5 = vmul.u32.u64.high %v20942_v0, %v4843_v31, %v21019_v4  ;;  %v4463_v61 = vmul.f32 %v4462_v44, %v4460_v9  ;;  %v4473_v14 = vadd.s32 3, %v4469_v33 }
 0x5c9   : > { %v21023_v62 = vmul.u32.u64.low %v20942_v0, %v4839_v15  ;;  %v21024_v42 = vmul.u32.u64.high %v20942_v0, %v4839_v15, %v21023_v62  ;;  %vm5327_vm2 = vcmp.gt.s32.totalorder %v5326_v57, 0  ;;  %v10963_v49 = vrot.slane %v10867_v35, 4 }
 0x5ca   : > { %v5328_v48 = vsel %vm5327_vm2, %v5326_v57, 0  ;;  %v4464_v47 = vxor.u32 2147483648, %v4463_v61  ;;  %v21029_v3 = vand.u32 3, %v4469_v33  ;;  %v4851_v2 = vmul.u32 %v20942_v0, %v4835_v1 }
 0x5cb   : > { %v5330_v25 = vand.u32 31, %v5328_v48  ;;  %v11131_v50 = vsel %vm21965_vm0, %v5875_v12, %v10963_v49  ;;  %vm4853_vm15 = vc.u32 %v21020_v5, %v21023_v62  ;;  %v5324_v27 = vor.u32 8388608, %v20952_v8 }
 0x5cc   : > { %v11404_v17 = vmul.bf16 %v20377_v30, %v11131_v50  ;;  %vm22196_vm14 = vcmp.lt.s32.totalorder %v20636_v51, 0  ;;  %v4854_v60 = vadd.s32 1, %v21024_v42  ;;  %v21047_v46 = vshrl.u32 %v5328_v48, 5 }
 0x5cd   : > { %v4465_v34 = vsel %vm22196_vm14, %v4464_v47, %v4463_v61  ;;  %v5331_v54 = vsub.s32 32, %v5330_v25  ;;  %v5333_v44 = vshll.u32 %v22040_v6, %v5330_v25  ;;  %v5336_v0 = vshll.u32 %v21991_v16, %v5330_v25 }
 0x5ce   : > { %v4468_v33 = vsel %vm20935_vm5, %v20636_v51, %v4465_v34  ;;  %v5339_v1 = vshll.u32 %v21992_v37, %v5330_v25  ;;  %13654 = vmatprep.mubr.bf16.mxu0 %v11404_v17  ;;  %v4855_v8 = vsel %vm4853_vm15, %v4854_v60, %v21024_v42  ;;  %v5342_v58 = vshll.u32 %v22004_v39, %v5330_v25 }
 0x5cf   : > { %15214 = vcosq.f32 %v4468_v33  ;;  %v5334_v41 = vshrl.u32 %v21991_v16, %v5331_v54  ;;  %v4856_v15 = vadd.s32 %v4855_v8, %v4851_v2  ;;  %v5337_v31 = vshrl.u32 %v21992_v37, %v5331_v54 }
 0x5d0   : > { %15216 = vsinq.f32 %v4468_v33  ;;  %v5340_v32 = vshrl.u32 %v22004_v39, %v5331_v54  ;;  %v5343_v9 = vshrl.u32 %v22005_v59, %v5331_v54  ;;  %v5345_v57 = vshll.u32 %v22005_v59, %v5330_v25 }
 0x5d1   : > { %v5335_v53 = vor.u32 %v5334_v41, %v5333_v44  ;;  %v4857_v12 = vadd.s32 536870912, %v4856_v15  ;;  %v5338_v35 = vor.u32 %v5337_v31, %v5336_v0  ;;  %v5346_v61 = vshrl.u32 %v21993_v13, %v5331_v54 }
 0x5d2   : > { %v5341_v4 = vor.u32 %v5340_v32, %v5339_v1  ;;  %v4474_v42 = vand.u32 3, %v4473_v14  ;;  %v5344_v49 = vor.u32 %v5343_v9, %v5342_v58  ;;  %vm5348_vm5 = vcmp.lt.s32.totalorder %v21047_v46, 1 }
 0x5d3   : > { %vm5350_vm11 = vcmp.lt.s32.totalorder %v21047_v46, 3  ;;  %v21058_v48 = vshrl.u32 %v4857_v12, 30  ;;  %v5347_v47 = vor.u32 %v5346_v61, %v5345_v57  ;;  %vm5349_vm10 = vcmp.lt.s32.totalorder %v21047_v46, 2 }
 0x5d4   : > { %vm5351_vm12 = vcmp.lt.s32.totalorder %v21047_v46, 4  ;;  %vm9480_vm8 = vcmp.lt.s32.totalorder %v21029_v3, 2  ;;  %v5356_v25 = vsel %vm5348_vm5, %v5335_v53, %v5338_v35  ;;  %v21065_v2 = vshll.u32 %v5324_v27, 8 }
 0x5d5   : > { %v5357_v50 = vsel %vm5351_vm12, %v5344_v49, 920167782  ;;  %v4859_v14 = vshll.u32 %v21058_v48, 30  ;;  %v5332_v17 = vshrl.u32 %v22040_v6, %v5331_v54  ;;  %v5360_v60 = vsel %vm5348_vm5, %v5338_v35, %v5341_v4 }
 0x5d6   : > { %v5358_v34 = vsel %vm5350_vm11, %v5341_v4, %v5357_v50  ;;  %vm9481_vm13 = vcmp.eq.s32.totalorder %v21029_v3, 0  ;;  %vm9484_vm9 = vcmp.eq.s32.totalorder %v21029_v3, 2  ;;  %v5361_v44 = vsel %vm5351_vm12, %v5347_v47, 1326507024 }
 0x5d7   : > { %v5359_v33 = vsel %vm5349_vm10, %v5356_v25, %v5358_v34  ;;  %vm4475_vm4 = vcmp.lt.s32.totalorder %v4474_v42, 2  ;;  %v21077_v27 = vsub.s32 %v4856_v15, %v4859_v14  ;;  %v5353_v0 = vsel %vm5351_vm12, %v5341_v4, 2102212464 }
 0x5d8   : > { %v5362_v54 = vsel %vm5350_vm11, %v5344_v49, %v5361_v44  ;;  %vm4479_vm3 = vcmp.eq.s32.totalorder %v4474_v42, 2  ;;  %v21084_v41 = vmul.u32.u64.low %v21065_v2, %v5359_v33  ;;  %v21085_v31 = vmul.u32.u64.high %v21065_v2, %v5359_v33, %v21084_v41 }
 0x5d9   : > { %v15215_v1 = vpop.eup %15214  ;;  %v5363_v8 = vsel %vm5349_vm10, %v5360_v60, %v5362_v54  ;;  %vm4476_vm1 = vcmp.eq.s32.totalorder %v4474_v42, 0  ;;  %v4862_v15 = vsub.s32 0, %v21077_v27  ;;  %v5352_v9 = vsel %vm5348_vm5, %v5332_v17, %v5335_v53 }
 0x5da   : > { %v15217_v32 = vpop.eup %15216  ;;  %v4480_v58 = vxor.u32 2147483648, %v15215_v1  ;;  %v5354_v12 = vsel %vm5350_vm11, %v5338_v35, %v5353_v0  ;;  %v21094_v4 = vmul.u32.u64.low %v21065_v2, %v5363_v8  ;;  %v21095_v61 = vmul.u32.u64.high %v21065_v2, %v5363_v8, %v21094_v4 }
 0x5db   : > { %v4477_v57 = vxor.u32 2147483648, %v15217_v32  ;;  %vm4472_vm2 = vweird.f32 %v20636_v51  ;;  %v14034_v25 = vmin.u32 %v4862_v15, %v21077_v27  ;;  %v21107_v35 = vmul.f32 %v15661_v55, %v747_v22 }
 0x5dc   : > { %v4481_v49 = vsel %vm4479_vm3, %v4480_v58, %v15217_v32  ;;  %v9486_v47 = vsel %vm9484_vm9, %v4480_v58, %v15217_v32  ;;  %v5355_v34 = vsel %vm5349_vm10, %v5352_v9, %v5354_v12  ;;  %v727_v44 = vrot.slane %v22193_v45, %v18859_v11 }
 0x5dd   : > { %v4478_v50 = vsel %vm4476_vm1, %v15215_v1, %v4477_v57  ;;  %v9483_v53 = vsel %vm9481_vm13, %v15215_v1, %v4477_v57  ;;  %v4864_v17 = vclz %v14034_v25  ;;  %v4852_v22 = vadd.s32 %v21023_v62, %v21020_v5 }
 0x5de   : > { %v4482_v14 = vsel %vm4475_vm4, %v4478_v50, %v4481_v49  ;;  %v9487_v51 = vsel %vm9480_vm8, %v9483_v53, %v9486_v47  ;;  %v5371_v42 = vmul.u32 %v21065_v2, %v5355_v34  ;;  %vm5373_vm15 = vc.u32 %v21095_v61, %v21084_v41 }
 0x5df   : > { %v4483_v60 = vsel %vm4472_vm2, nan, %v4482_v14  ;;  %v9488_v33 = vsel %vm4472_vm2, nan, %v9487_v51  ;;  %v14035_v21 = vadd.s32 4294967294, %v4864_v17  ;;  %v5374_v3 = vadd.s32 1, %v21085_v31 }
 0x5e0   : > { %v5870_v0 = vpack.c.bf16 %v4483_v60, %v4483_v60  ;;  %v10862_v54 = vpack.c.bf16 %v9488_v33, %v9488_v33  ;;  %v4882_v1 = vsub.s32 4, %v21058_v48  ;;  %v5735_v8 = vand.u32 2139095040, %v21107_v35 }
 0x5e1   : > { %vm14036_vm14 = vcmp.lt.s32.totalorder %v14035_v21, 0  ;;  %v5375_v32 = vsel %vm5373_vm15, %v5374_v3, %v21085_v31  ;;  %v21967_v58 = vand.u32 2147483647, %v21107_v35  ;;  %v21127_v5 = vmul.f32 %v15661_v55, %v727_v44 }
 0x5e2   : > { %v10958_v46 = vrot.slane %v10862_v54, 4  ;;  %v4867_v11 = vsel %vm14036_vm14, 0, %v14035_v21  ;;  %vm4798_vm5 = vcmp.lt.s32.totalorder %v20853_v10, 0  ;;  %v5376_v12 = vadd.s32 %v5375_v32, %v5371_v42 }
 0x5e3   : > { %v4868_v2 = vsub.s32 32, %v4867_v11  ;;  %v4869_v15 = vshll.u32 %v21077_v27, %v4867_v11  ;;  %v4872_v9 = vsub.s32 4294967266, %v4867_v11  ;;  %v5736_v4 = vshrl.u32 %v5735_v8, 23 }
 0x5e4   : > { %v11111_v62 = vsel %vm21965_vm0, %v5870_v0, %v10958_v46  ;;  %v4883_v31 = vsel %vm4798_vm5, %v4882_v1, %v21058_v48  ;;  %v5377_v25 = vadd.s32 536870912, %v5376_v12  ;;  %v5215_v53 = vand.u32 2139095040, %v21127_v5 }
 0x5e5   : > { %v11399_v57 = vmul.bf16 %v20625_v38, %v11111_v62  ;;  %v4870_v49 = vshrl.u32 %v4852_v22, %v4868_v2  ;;  %v4873_v47 = vadd.s32 127, %v4872_v9  ;;  %v14069_v50 = vadd.s32 4294967169, %v5736_v4 }
 0x5e6   : > { %vm21139_vm11 = vcmp.le.f32.partialorder %v4796_v36, 0.7853982  ;;  %v5739_v17 = vand.u32 8388607, %v21967_v58  ;;  %v5378_v48 = vshrl.u32 %v5377_v25, 30  ;;  %v5216_v54 = vshrl.u32 %v5215_v53, 23 }
 0x5e7   : > { %13429 = vmatmul.mubr.bf16.gmra.mrb[20].mxu1 %v11399_v57  ;;  %v4871_v14 = vor.u32 %v4870_v49, %v4869_v15  ;;  %v4874_v51 = vshll.u32 %v4873_v47, 23  ;;  %v4885_v34 = vsel %vm21139_vm11, 0, %v4883_v31  ;;  %v5742_v60 = vadd.s32 1, %v14069_v50 }
 0x5e8   : > { %v5379_v0 = vshll.u32 %v5378_v48, 30  ;;  %v4889_v36 = vadd.s32 3, %v4885_v34  ;;  %v5740_v22 = vor.u32 8388608, %v5739_v17  ;;  %v5402_v46 = vsub.s32 4, %v5378_v48 }
 0x5e9   : > { %v4875_v33 = vor.u32 4788187, %v4874_v51  ;;  %v4878_v44 = vcvt.s32.f32 %v4871_v14  ;;  %vm5743_vm10 = vcmp.gt.s32.totalorder %v5742_v60, 0  ;;  %v21966_v8 = vand.u32 2147483647, %v21127_v5 }
 0x5ea   : > { %v5744_v42 = vsel %vm5743_vm10, %v5742_v60, 0  ;;  %v21147_v3 = vsub.s32 %v5376_v12, %v5379_v0  ;;  %v21152_v11 = vpack.i.b16 %v20213_v43, %v20213_v43  ;;  %vm5318_vm12 = vcmp.lt.s32.totalorder %v20896_v20, 0 }
 0x5eb   : > { %v4876_v21 = vand.u32 2147483647, %v4875_v33  ;;  %v5746_v1 = vand.u32 31, %v5744_v42  ;;  %v21155_v62 = vand.u32 3, %v4885_v34  ;;  %v14049_v9 = vadd.s32 4294967169, %v5216_v54 }
 0x5ec   : > { %v5382_v2 = vsub.s32 0, %v21147_v3  ;;  %v21158_v12 = vand.u32 3, %v4889_v36  ;;  %v5372_v4 = vadd.s32 %v21084_v41, %v21095_v61  ;;  %v5403_v47 = vsel %vm5318_vm12, %v5402_v46, %v5378_v48 }
 0x5ed   : > { %v4879_v32 = vmul.f32 %v4878_v44, %v4876_v21  ;;  %v5747_v15 = vsub.s32 32, %v5746_v1  ;;  %v5749_v49 = vshll.u32 %v22040_v6, %v5746_v1  ;;  %v21166_v31 = vshll.u32 %v5740_v22, 8 }
 0x5ee   : > { %v14054_v43 = vmin.u32 %v5382_v2, %v21147_v3  ;;  %v21170_v25 = vand.u32 8388607, %v21966_v8  ;;  %v5745_v53 = vshrl.u32 %v5744_v42, 5  ;;  %v5752_v41 = vshll.u32 %v21991_v16, %v5746_v1 }
 0x5ef   : > { %v4880_v57 = vxor.u32 2147483648, %v4879_v32  ;;  %v5750_v14 = vshrl.u32 %v21991_v16, %v5747_v15  ;;  %vm21181_vm8 = vcmp.le.f32.partialorder %v5316_v7, 0.7853982  ;;  %v5755_v34 = vshll.u32 %v21992_v37, %v5746_v1 }
 0x5f0   : > { %v5384_v17 = vclz %v14054_v43  ;;  %v5222_v48 = vadd.s32 1, %v14049_v9  ;;  %v5748_v60 = vshrl.u32 %v22040_v6, %v5747_v15  ;;  %v5753_v44 = vshrl.u32 %v21992_v37, %v5747_v15 }
 0x5f1   : > { %v4881_v50 = vsel %vm4798_vm5, %v4880_v57, %v4879_v32  ;;  %v5751_v33 = vor.u32 %v5750_v14, %v5749_v49  ;;  %v5756_v27 = vshrl.u32 %v22004_v39, %v5747_v15  ;;  %v5758_v54 = vshll.u32 %v22004_v39, %v5746_v1 }
 0x5f2   : > { %v4884_v61 = vsel %vm21139_vm11, %v20853_v10, %v4881_v50  ;;  %v14055_v0 = vadd.s32 4294967294, %v5384_v17  ;;  %vm4895_vm13 = vcmp.eq.s32.totalorder %v21158_v12, 2  ;;  %vm9896_vm9 = vcmp.eq.s32.totalorder %v21155_v62, 2 }
 0x5f3   : > { %15218 = vcosq.f32 %v4884_v61  ;;  %v5754_v7 = vor.u32 %v5753_v44, %v5752_v41  ;;  %v5759_v21 = vshrl.u32 %v22005_v59, %v5747_v15  ;;  %v5761_v36 = vshll.u32 %v22005_v59, %v5746_v1 }
 0x5f4   : > { %15220 = vsinq.f32 %v4884_v61  ;;  %v5762_v22 = vshrl.u32 %v21993_v13, %v5747_v15  ;;  %vm4892_vm4 = vcmp.eq.s32.totalorder %v21158_v12, 0  ;;  %vm9893_vm3 = vcmp.eq.s32.totalorder %v21155_v62, 0 }
 0x5f5   : > { %vm14056_vm1 = vcmp.lt.s32.totalorder %v14055_v0, 0  ;;  %v5757_v42 = vor.u32 %v5756_v27, %v5755_v34  ;;  %vm5764_vm2 = vcmp.lt.s32.totalorder %v5745_v53, 1  ;;  %vm5765_vm15 = vcmp.lt.s32.totalorder %v5745_v53, 2 }
 0x5f6   : > { %vm4891_vm14 = vcmp.lt.s32.totalorder %v21158_v12, 2  ;;  %vm9892_vm5 = vcmp.lt.s32.totalorder %v21155_v62, 2  ;;  %v5387_v46 = vsel %vm14056_vm1, 0, %v14055_v0  ;;  %v5760_v32 = vor.u32 %v5759_v21, %v5758_v54 }
 0x5f7   : > { %v5763_v2 = vor.u32 %v5762_v22, %v5761_v36  ;;  %vm5766_vm11 = vcmp.lt.s32.totalorder %v5745_v53, 3  ;;  %vm4888_vm10 = vweird.f32 %v20853_v10  ;;  %v5388_v1 = vsub.s32 32, %v5387_v46 }
 0x5f8   : > { %v5389_v15 = vshll.u32 %v21147_v3, %v5387_v46  ;;  %v5392_v9 = vsub.s32 4294967266, %v5387_v46  ;;  %vm5767_vm0 = vcmp.lt.s32.totalorder %v5745_v53, 4  ;;  %v5768_v57 = vsel %vm5764_vm2, %v5748_v60, %v5751_v33  ;;  %v21223_v53 = vpop.f32.mrb[0].mxu0 }
 0x5f9   : > { %v5769_v49 = vsel %vm5767_vm0, %v5757_v42, 2102212464  ;;  %v5772_v43 = vsel %vm5764_vm2, %v5751_v33, %v5754_v7  ;;  %v5773_v50 = vsel %vm5767_vm0, %v5760_v32, 920167782  ;;  %v5390_v14 = vshrl.u32 %v5372_v4, %v5388_v1 }
 0x5fa   : > { %v5393_v41 = vadd.s32 127, %v5392_v9  ;;  %v5770_v61 = vsel %vm5766_vm11, %v5754_v7, %v5769_v49  ;;  %v5774_v17 = vsel %vm5766_vm11, %v5757_v42, %v5773_v50  ;;  %v5405_v34 = vsel %vm21181_vm8, 0, %v5403_v47 }
 0x5fb   : > { %v5775_v44 = vsel %vm5765_vm15, %v5772_v43, %v5774_v17  ;;  %v5776_v3 = vsel %vm5764_vm2, %v5754_v7, %v5757_v42  ;;  %v5777_v0 = vsel %vm5767_vm0, %v5763_v2, 1326507024  ;;  %v5391_v27 = vor.u32 %v5390_v14, %v5389_v15  ;;  %v21217_v2 = vpop.f32.mrb[0].mxu1 }
 0x5fc   : > { %v5394_v60 = vshll.u32 %v5393_v41, 23  ;;  %v5771_v54 = vsel %vm5765_vm15, %v5768_v57, %v5770_v61  ;;  %v5778_v33 = vsel %vm5766_vm11, %v5760_v32, %v5777_v0  ;;  %vm5223_vm1 = vcmp.gt.s32.totalorder %v5222_v48, 0  ;;  %v21225_v49 = vpop.f32.mrb[1].mxu1  ;;  %v21231_v41 = vpop.f32.mrb[1].mxu0 }
 0x5fd   : > { %v15219_v4 = vpop.eup %15218  ;;  %v5779_v21 = vsel %vm5765_vm15, %v5776_v3, %v5778_v33  ;;  %v21213_v36 = vmul.u32.u64.low %v21166_v31, %v5775_v44  ;;  %v21214_v22 = vmul.u32.u64.high %v21166_v31, %v5775_v44, %v21213_v36  ;;  %v5398_v7 = vcvt.s32.f32 %v5391_v27  ;;  %v21233_v61 = vpop.f32.mrb[2].mxu1 }
 0x5fe   : > { %v15221_v47 = vpop.eup %15220  ;;  %v4896_v46 = vxor.u32 2147483648, %v15219_v4  ;;  %v5395_v1 = vor.u32 4788187, %v5394_v60  ;;  %v5224_v42 = vsel %vm5223_vm1, %v5222_v48, 0  ;;  %v5409_v9 = vadd.s32 3, %v5405_v34  ;;  %v21241_v27 = vpop.f32.mrb[2].mxu0 }
 0x5ff   : > { %v4893_v15 = vxor.u32 2147483648, %v15221_v47  ;;  %v21220_v32 = vmul.u32.u64.low %v21166_v31, %v5779_v21  ;;  %v21221_v57 = vmul.u32.u64.high %v21166_v31, %v5779_v21, %v21220_v32  ;;  %v5226_v48 = vand.u32 31, %v5224_v42  ;;  %v21243_v60 = vpop.f32.mrb[3].mxu1 }
 0x600   : > { %v4897_v43 = vsel %vm4895_vm13, %v4896_v46, %v15221_v47  ;;  %v9898_v50 = vsel %vm9896_vm9, %v4896_v46, %v15221_v47  ;;  %v5396_v14 = vand.u32 2147483647, %v5395_v1  ;;  %v5787_v3 = vmul.u32 %v21166_v31, %v5771_v54  ;;  %v21250_v1 = vpop.f32.mrb[3].mxu0 }
 0x601   : > { %v4894_v17 = vsel %vm4892_vm4, %v15219_v4, %v4893_v15  ;;  %v9895_v44 = vsel %vm9893_vm3, %v15219_v4, %v4893_v15  ;;  %v5790_v0 = vadd.s32 1, %v21214_v22  ;;  %v5220_v46 = vor.u32 8388608, %v21170_v25  ;;  %v21252_v4 = vpop.f32.mrb[4].mxu1  ;;  %v21262_v62 = vpop.f32.mrb[4].mxu0 }
 0x602   : > { %v4898_v33 = vsel %vm4891_vm14, %v4894_v17, %v4897_v43  ;;  %v9899_v21 = vsel %vm9892_vm5, %v9895_v44, %v9898_v50  ;;  %v5399_v47 = vmul.f32 %v5398_v7, %v5396_v14  ;;  %vm5789_vm0 = vc.u32 %v21221_v57, %v21213_v36  ;;  %v21264_v7 = vpop.f32.mrb[5].mxu1  ;;  %v21267_v50 = vpop.f32.mrb[5].mxu0 }
 0x603   : > { %v4899_v31 = vsel %vm4888_vm10, nan, %v4898_v33  ;;  %v9900_v54 = vsel %vm4888_vm10, nan, %v9899_v21  ;;  %v21260_v12 = vsub.s32 32, %v5226_v48  ;;  %v5791_v43 = vsel %vm5789_vm0, %v5790_v0, %v21214_v22  ;;  %22201 = vst [vmem:[#allocation15_spill] sm:$0xff] %v21267_v50  ;;  %v21269_v14 = vpop.f32.mrb[6].mxu1  ;;  %v21277_v21 = vpop.f32.mrb[6].mxu0 }
 0x604   : > { %v5874_v25 = vpack.c.bf16 %v4899_v31, %v4899_v31  ;;  %v10866_v15 = vpack.c.bf16 %v9900_v54, %v9900_v54  ;;  %v5400_v32 = vxor.u32 2147483648, %v5399_v47  ;;  %22202 = vst [vmem:[#allocation14_spill] sm:$0xff] %v21269_v14  ;;  %v21271_v10 = vand.u32 3, %v5409_v9  ;;  %22203 = vst [vmem:[#allocation17_spill] sm:$0xff] %v21277_v21  ;;  %v21279_v8 = vpop.f32.mrb[7].mxu1  ;;  %v21286_v9 = vpop.f32.mrb[7].mxu0 }
 0x605   : > { %v21273_v17 = vand.u32 3, %v5405_v34  ;;  %v5792_v44 = vadd.s32 %v5791_v43, %v5787_v3  ;;  %v743_v33 = vrot.slane %v22193_v45, %v18899_v28  ;;  %22204 = vst [vmem:[#allocation16_spill] sm:$0xff] %v21279_v8  ;;  %v21283_v0 = vshrl.u32 %v5224_v42, 5  ;;  %22205 = vst [vmem:[#allocation23_spill] sm:$0xff] %v21286_v9  ;;  %v21288_v34 = vpop.f32.mrb[8].mxu1  ;;  %v21296_v43 = vpop.f32.mrb[8].mxu0 }
 0x606   : > { %v10962_v31 = vrot.slane %v10866_v15, 4  ;;  %v5401_v22 = vsel %vm5318_vm12, %v5400_v32, %v5399_v47  ;;  %v5229_v54 = vshll.u32 %v22040_v6, %v5226_v48  ;;  %22206 = vst [vmem:[#allocation20_spill] sm:$0xff] %v21288_v34  ;;  %v5232_v3 = vshll.u32 %v21991_v16, %v5226_v48  ;;  %22207 = vst [vmem:[#allocation22_spill] sm:$0xff] %v21296_v43  ;;  %v21298_v42 = vpop.f32.mrb[9].mxu1  ;;  %v21304_v51 = vpop.f32.mrb[9].mxu0 }
 0x607   : > { %v5404_v28 = vsel %vm21181_vm8, %v20896_v20, %v5401_v22  ;;  %v5793_v45 = vadd.s32 536870912, %v5792_v44  ;;  %v5233_v15 = vshrl.u32 %v21992_v37, %v21260_v12  ;;  %22208 = vst [vmem:[#allocation12_spill] sm:$0xff] %v21298_v42  ;;  %vm22209_vm12 = vcmask 1043456   ;;  %22210 = vst [vmem:[#allocation24_spill] sm:$0xff] %v21304_v51  ;;  %v21306_v22 = vpop.f32.mrb[10].mxu1  ;;  %v21310_v8 = vpop.f32.mrb[10].mxu0 }
 0x608   : > { %v11127_v47 = vsel %vm22209_vm12, %v5874_v25, %v10962_v31  ;;  %15222 = vcosq.f32 %v5404_v28  ;;  %v5235_v32 = vshll.u32 %v21992_v37, %v5226_v48  ;;  %v5236_v58 = vshrl.u32 %v22004_v39, %v21260_v12  ;;  %22211 = vst [vmem:[#allocation27_spill] sm:$0xff] %v21306_v22  ;;  %22212 = vst [vmem:[#allocation28_spill] sm:$0xff] %v21310_v8  ;;  %v21312_v42 = vpop.f32.mrb[11].mxu1 }
 0x609   : > { %v11403_v34 = vmul.bf16 %v20794_v40, %v11127_v47  ;;  %15224 = vsinq.f32 %v5404_v28  ;;  %v5794_v9 = vshrl.u32 %v5793_v45, 30  ;;  %v5238_v43 = vshll.u32 %v22004_v39, %v5226_v48  ;;  %22213 = vst [vmem:[#allocation29_spill] sm:$0xff] %v21312_v42  ;;  %v21327_v40 = vpop.f32.mrb[11].mxu0  ;;  %v21329_v42 = vpop.f32.mrb[12].mxu1 }
 0x60a   : > { %v22214_v25 = vand.u32 2147483647, %v21107_v35  ;;  %v5230_v51 = vshrl.u32 %v21991_v16, %v21260_v12  ;;  %v5239_v47 = vshrl.u32 %v22005_v59, %v21260_v12  ;;  %v5241_v28 = vshll.u32 %v22005_v59, %v5226_v48  ;;  %22217 = vst [vmem:[#allocation30_spill] sm:$0xff] %v21327_v40  ;;  %22218 = vst [vmem:[#allocation31_spill] sm:$0xff] %v21329_v42  ;;  %v21337_v21 = vpop.f32.mrb[12].mxu0  ;;  %v21339_v14 = vpop.f32.mrb[13].mxu1 }
 0x60b   : > { %v5242_v45 = vshrl.u32 %v21993_v13, %v21260_v12  ;;  %13655 = vmatmul.mubr.bf16.gmra.mrb[20].mxu0 %v11403_v34  ;;  %vm5734_vm13 = vcmp.lt.s32.totalorder %v21107_v35, 0  ;;  %v21332_v8 = vshll.u32 %v5220_v46, 8  ;;  %v21335_v22 = vmul.f32 %v15661_v55, %v743_v33  ;;  %22219 = vst [vmem:[#allocation32_spill] sm:$0xff] %v21337_v21  ;;  %22220 = vst [vmem:[#allocation33_spill] sm:$0xff] %v21339_v14  ;;  %v21343_v34 = vpop.f32.mrb[13].mxu0  ;;  %v21345_v42 = vpop.f32.mrb[14].mxu1 }
 0x60c   : > { %vm21316_vm8 = vcmp.le.f32.partialorder %v22214_v25, 0.7853982  ;;  %v5795_v25 = vshll.u32 %v5794_v9, 30  ;;  %vm10407_vm9 = vcmp.lt.s32.totalorder %v21273_v17, 2  ;;  %v5818_v48 = vsub.s32 4, %v5794_v9  ;;  %22221 = vst [vmem:[#allocation34_spill] sm:$0xff] %v21345_v42 }
 0x60d   : > { %v5240_v50 = vor.u32 %v5239_v47, %v5238_v43  ;;  %v5243_v40 = vor.u32 %v5242_v45, %v5241_v28  ;;  %vm5247_vm4 = vcmp.lt.s32.totalorder %v21283_v0, 4  ;;  %vm5408_vm3 = vweird.f32 %v20896_v20  ;;  %v21351_v14 = vpop.f32.mrb[14].mxu0  ;;  %v21353_v21 = vpop.f32.mrb[15].mxu1 }
 0x60e   : > { %vm10408_vm2 = vcmp.eq.s32.totalorder %v21273_v17, 0  ;;  %v21349_v55 = vsub.s32 %v5792_v44, %v5795_v25  ;;  %v5234_v46 = vor.u32 %v5233_v15, %v5232_v3  ;;  %v5237_v33 = vor.u32 %v5236_v58, %v5235_v32  ;;  %22222 = vst [vmem:[#allocation35_spill] sm:$0xff] %v21351_v14  ;;  %22223 = vst [vmem:[#allocation36_spill] sm:$0xff] %v21353_v21  ;;  %v21358_v47 = vpop.f32.mrb[15].mxu0 }
 0x60f   : > { %vm5411_vm15 = vcmp.lt.s32.totalorder %v21271_v10, 2  ;;  %vm10411_vm14 = vcmp.eq.s32.totalorder %v21273_v17, 2  ;;  %v5231_v43 = vor.u32 %v5230_v51, %v5229_v54  ;;  %vm5244_vm5 = vcmp.lt.s32.totalorder %v21283_v0, 1  ;;  %22224 = vst [vmem:[#allocation37_spill] sm:$0xff] %v21358_v47 }
 0x610   : > { %v5798_v28 = vsub.s32 0, %v21349_v55  ;;  %v5228_v44 = vshrl.u32 %v22040_v6, %v21260_v12  ;;  %vm5246_vm11 = vcmp.lt.s32.totalorder %v21283_v0, 3  ;;  %v5253_v58 = vsel %vm5247_vm4, %v5240_v50, 920167782 }
 0x611   : > { %vm5412_vm10 = vcmp.eq.s32.totalorder %v21271_v10, 0  ;;  %vm5415_vm1 = vcmp.eq.s32.totalorder %v21271_v10, 2  ;;  %v5819_v54 = vsel %vm5734_vm13, %v5818_v48, %v5794_v9  ;;  %v5257_v3 = vsel %vm5247_vm4, %v5243_v40, 1326507024 }
 0x612   : > { %v14070_v15 = vmin.u32 %v5798_v28, %v21349_v55  ;;  %vm5245_vm0 = vcmp.lt.s32.totalorder %v21283_v0, 2  ;;  %v5249_v12 = vsel %vm5247_vm4, %v5237_v33, 2102212464  ;;  %v5256_v32 = vsel %vm5244_vm5, %v5234_v46, %v5237_v33  ;;  %v15223_v51 = vpop.eup %15222 }
 0x613   : > { %v5788_v45 = vadd.s32 %v21213_v36, %v21221_v57  ;;  %v5252_v9 = vsel %vm5244_vm5, %v5231_v43, %v5234_v46  ;;  %v5254_v40 = vsel %vm5246_vm11, %v5237_v33, %v5253_v58  ;;  %v5258_v25 = vsel %vm5246_vm11, %v5240_v50, %v5257_v3  ;;  %v15225_v48 = vpop.eup %15224 }
 0x614   : > { %v5416_v28 = vxor.u32 2147483648, %v15223_v51  ;;  %v5800_v47 = vclz %v14070_v15  ;;  %v5821_v21 = vsel %vm21316_vm8, 0, %v5819_v54  ;;  %v5248_v14 = vsel %vm5244_vm5, %v5228_v44, %v5231_v43 }
 0x615   : > { %v5413_v42 = vxor.u32 2147483648, %v15225_v48  ;;  %v5250_v36 = vsel %vm5246_vm11, %v5234_v46, %v5249_v12  ;;  %v5259_v57 = vsel %vm5245_vm0, %v5256_v32, %v5258_v25  ;;  %v5631_v33 = vand.u32 2139095040, %v21335_v22 }
 0x616   : > { %v5417_v50 = vsel %vm5415_vm1, %v5416_v28, %v15225_v48  ;;  %v10413_v58 = vsel %vm10411_vm14, %v5416_v28, %v15225_v48  ;;  %v14071_v3 = vadd.s32 4294967294, %v5800_v47  ;;  %v5255_v54 = vsel %vm5245_vm0, %v5252_v9, %v5254_v40 }
 0x617   : > { %v5414_v43 = vsel %vm5412_vm10, %v15223_v51, %v5413_v42  ;;  %v10410_v46 = vsel %vm10408_vm2, %v15223_v51, %v5413_v42  ;;  %v21406_v44 = vmul.u32.u64.low %v21332_v8, %v5259_v57  ;;  %v21407_v15 = vmul.u32.u64.high %v21332_v8, %v5259_v57, %v21406_v44 }
 0x618   : > { %v5418_v12 = vsel %vm5411_vm15, %v5414_v43, %v5417_v50  ;;  %v10414_v32 = vsel %vm10407_vm9, %v10410_v46, %v10413_v58  ;;  %vm14072_vm12 = vcmp.lt.s32.totalorder %v14071_v3, 0  ;;  %v5632_v47 = vshrl.u32 %v5631_v33, 23 }
 0x619   : > { %v5419_v9 = vsel %vm5408_vm3, nan, %v5418_v12  ;;  %v10415_v40 = vsel %vm5408_vm3, nan, %v10414_v32  ;;  %v5803_v25 = vsel %vm14072_vm12, 0, %v14071_v3  ;;  %v5251_v42 = vsel %vm5245_vm0, %v5248_v14, %v5250_v36  ;;  %v21437_v12 = vld [vmem:[%s16639_s17 + $0x28] sm:$0x77] }
 0x61a   : > { %v5879_v51 = vpack.c.bf16 %v5419_v9, %v5419_v9  ;;  %v10871_v48 = vpack.c.bf16 %v10415_v40, %v10415_v40  ;;  %v5804_v28 = vsub.s32 32, %v5803_v25  ;;  %v5805_v10 = vshll.u32 %v21349_v55, %v5803_v25 }
 0x61b   : > { %v5808_v17 = vsub.s32 4294967266, %v5803_v25  ;;  %v21421_v57 = vmul.u32.u64.low %v21332_v8, %v5255_v54  ;;  %v21422_v33 = vmul.u32.u64.high %v21332_v8, %v5255_v54, %v21421_v57  ;;  %v14065_v50 = vadd.s32 4294967169, %v5632_v47 }
 0x61c   : > { %v11492_v20 = vrot.slane %v21152_v11, %v15632_v19  ;;  %v21429_v0 = vpack.i.b16 %v20332_v29, %v20332_v29  ;;  %v10967_v14 = vrot.slane %v10871_v48, 4  ;;  %v5806_v36 = vshrl.u32 %v5788_v45, %v5804_v28 }
 0x61d   : > { %v5809_v58 = vadd.s32 127, %v5808_v17  ;;  %v5825_v3 = vadd.s32 3, %v5821_v21  ;;  %v21970_v55 = vand.u32 2147483647, %v21335_v22  ;;  %v5638_v43 = vadd.s32 1, %v14065_v50 }
 0x61e   : > { %vm22225_vm9 = vcmask 1043456   ;;  %v5807_v54 = vor.u32 %v5806_v36, %v5805_v10  ;;  %v5267_v44 = vmul.u32 %v21332_v8, %v5251_v42  ;;  %vm5269_vm4 = vc.u32 %v21407_v15, %v21421_v57 }
 0x61f   : > { %v11147_v46 = vsel %vm22225_vm9, %v5879_v51, %v10967_v14  ;;  %v5810_v32 = vshll.u32 %v5809_v58, 23  ;;  %v5270_v45 = vadd.s32 1, %v21422_v33  ;;  %vm5639_vm3 = vcmp.gt.s32.totalorder %v5638_v43, 0 }
 0x620   : > { %v11408_v29 = vmul.bf16 %v20372_v26, %v11147_v46  ;;  %v5640_v40 = vsel %vm5639_vm3, %v5638_v43, 0  ;;  %v5814_v42 = vcvt.s32.f32 %v5807_v54  ;;  %v21450_v28 = vmul.bf16 %v20364_v18, %v21437_v12 }
 0x621   : > { %v5811_v25 = vor.u32 4788187, %v5810_v32  ;;  %v5271_v51 = vsel %vm5269_vm4, %v5270_v45, %v21422_v33  ;;  %v5642_v48 = vand.u32 31, %v5640_v40  ;;  %v21452_v10 = vand.u32 3, %v5825_v3 }
 0x622   : > { %13438 = vmatprep.mubr.bf16.mxu1 %v11408_v29  ;;  %v21454_v17 = vand.u32 3, %v5821_v21  ;;  %v5272_v50 = vadd.s32 %v5271_v51, %v5267_v44  ;;  %v5635_v36 = vand.u32 8388607, %v21970_v55  ;;  %v11481_v43 = vpack.i.b16 %v20190_v23, %v20190_v23 }
 0x623   : > { %v5812_v14 = vand.u32 2147483647, %v5811_v25  ;;  %v5643_v58 = vsub.s32 32, %v5642_v48  ;;  %v21460_v33 = vshrl.u32 %v5640_v40, 5  ;;  %v5645_v54 = vshll.u32 %v22040_v6, %v5642_v48 }
 0x624   : > { %v5273_v46 = vadd.s32 536870912, %v5272_v50  ;;  %v5648_v18 = vshll.u32 %v21991_v16, %v5642_v48  ;;  %v5651_v44 = vshll.u32 %v21992_v37, %v5642_v48  ;;  %v5654_v29 = vshll.u32 %v22004_v39, %v5642_v48 }
 0x625   : > { %v5815_v3 = vmul.f32 %v5814_v42, %v5812_v14  ;;  %v5646_v21 = vshrl.u32 %v21991_v16, %v5643_v58  ;;  %v5649_v45 = vshrl.u32 %v21992_v37, %v5643_v58  ;;  %v5652_v23 = vshrl.u32 %v22004_v39, %v5643_v58 }
 0x626   : > { %v21467_v32 = vshrl.u32 %v5273_v46, 30  ;;  %v5655_v40 = vshrl.u32 %v22005_v59, %v5643_v58  ;;  %v5636_v51 = vor.u32 8388608, %v5635_v36  ;;  %v5657_v55 = vshll.u32 %v22005_v59, %v5642_v48 }
 0x627   : > { %v5816_v25 = vxor.u32 2147483648, %v5815_v3  ;;  %v5658_v42 = vshrl.u32 %v21993_v13, %v5643_v58  ;;  %v5644_v14 = vshrl.u32 %v22040_v6, %v5643_v58  ;;  %v11486_v8 = vrot.slane %v11481_v43, %v15632_v19 }
 0x628   : > { %v5275_v16 = vshll.u32 %v21467_v32, 30  ;;  %v11736_v46 = vrot.slane %v11481_v43, %v15637_v24  ;;  %v5647_v39 = vor.u32 %v5646_v21, %v5645_v54  ;;  %v5653_v9 = vor.u32 %v5652_v23, %v5651_v44 }
 0x629   : > { %v5817_v37 = vsel %vm5734_vm13, %v5816_v25, %v5815_v3  ;;  %v5656_v47 = vor.u32 %v5655_v40, %v5654_v29  ;;  %v5650_v13 = vor.u32 %v5649_v45, %v5648_v18  ;;  %vm5663_vm2 = vcmp.lt.s32.totalorder %v21460_v33, 4  ;;  %v15254_v40 = vld [vmem:[%s15612_s7 + $0x58] sm:$0xff] }
 0x62a   : > { %v5820_v59 = vsel %vm21316_vm8, %v21107_v35, %v5817_v37  ;;  %v21483_v48 = vsub.s32 %v5272_v50, %v5275_v16  ;;  %v5659_v6 = vor.u32 %v5658_v42, %v5657_v55  ;;  %vm5660_vm15 = vcmp.lt.s32.totalorder %v21460_v33, 1 }
 0x62b   : > { %15226 = vcosq.f32 %v5820_v59  ;;  %v5665_v36 = vsel %vm5663_vm2, %v5653_v9, 2102212464  ;;  %vm5214_vm13 = vcmp.lt.s32.totalorder %v21127_v5, 0  ;;  %vm5662_vm14 = vcmp.lt.s32.totalorder %v21460_v33, 3 }
 0x62c   : > { %15228 = vsinq.f32 %v5820_v59  ;;  %v5278_v58 = vsub.s32 0, %v21483_v48  ;;  %vm10823_vm8 = vcmp.eq.s32.totalorder %v21454_v17, 2  ;;  %vm5661_vm5 = vcmp.lt.s32.totalorder %v21460_v33, 2 }
 0x62d   : > { %v5669_v31 = vsel %vm5663_vm2, %v5656_v47, 920167782  ;;  %v21496_v55 = vshll.u32 %v5636_v51, 8  ;;  %v14270_v50 = vcombine.low %v11486_v8, %v11492_v20  ;;  %vm10820_vm11 = vcmp.eq.s32.totalorder %v21454_v17, 0 }
 0x62e   : > { %v14050_v43 = vmin.u32 %v5278_v58, %v21483_v48  ;;  %v5664_v54 = vsel %vm5660_vm15, %v5644_v14, %v5647_v39  ;;  %v5666_v18 = vsel %vm5662_vm14, %v5650_v13, %v5665_v36  ;;  %v5668_v3 = vsel %vm5660_vm15, %v5647_v39, %v5650_v13 }
 0x62f   : > { %vm5827_vm10 = vcmp.lt.s32.totalorder %v21452_v10, 2  ;;  %vm10819_vm1 = vcmp.lt.s32.totalorder %v21454_v17, 2  ;;  %v5670_v20 = vsel %vm5662_vm14, %v5653_v9, %v5669_v31  ;;  %v5672_v8 = vsel %vm5660_vm15, %v5650_v13, %v5653_v9 }
 0x630   : > { %v5673_v21 = vsel %vm5663_vm2, %v5659_v6, 1326507024  ;;  %v22226_v44 = vrot.slane %v21152_v11, %v15637_v24  ;;  %vm5824_vm0 = vweird.f32 %v21107_v35  ;;  %vm5828_vm12 = vcmp.eq.s32.totalorder %v21452_v10, 0 }
 0x631   : > { %v5280_v45 = vclz %v14050_v43  ;;  %v5298_v23 = vsub.s32 4, %v21467_v32  ;;  %v11824_v25 = vpack.c.bf16 %v15254_v40, %v15254_v40  ;;  %v5667_v51 = vsel %vm5661_vm5, %v5664_v54, %v5666_v18 }
 0x632   : > { %v14286_v29 = vcombine.low %v11736_v46, %v22226_v44  ;;  %v5671_v9 = vsel %vm5661_vm5, %v5668_v3, %v5670_v20  ;;  %v5674_v42 = vsel %vm5662_vm14, %v5656_v47, %v5673_v21  ;;  %v21531_v11 = vmul.bf16 %v14270_v50, %v21437_v12 }
 0x633   : > { %v14051_v16 = vadd.s32 4294967294, %v5280_v45  ;;  %v5675_v14 = vsel %vm5661_vm5, %v5672_v8, %v5674_v42  ;;  %v21536_v46 = vmul.u32.u64.low %v21496_v55, %v5671_v9  ;;  %v21537_v37 = vmul.u32.u64.high %v21496_v55, %v5671_v9, %v21536_v46 }
 0x634   : > { %vm5831_vm9 = vcmp.eq.s32.totalorder %v21452_v10, 2  ;;  %v21542_v39 = vmul.u32.u64.low %v21496_v55, %v5675_v14  ;;  %v21543_v59 = vmul.u32.u64.high %v21496_v55, %v5675_v14, %v21542_v39  ;;  %v21546_v47 = vmul.bf16 %v14286_v29, %v21437_v12 }
 0x635   : > { %v5268_v13 = vadd.s32 %v21421_v57, %v21407_v15  ;;  %vm14052_vm4 = vcmp.lt.s32.totalorder %v14051_v16, 0  ;;  %v5299_v33 = vsel %vm5214_vm13, %v5298_v23, %v21467_v32  ;;  %v11840_v6 = vmul.bf16 %v11824_v25, %v20372_v26  ;;  %v15227_v36 = vpop.eup %15226 }
 0x636   : > { %v5283_v58 = vsel %vm14052_vm4, 0, %v14051_v16  ;;  %v5683_v31 = vmul.u32 %v21496_v55, %v5667_v51  ;;  %v14300_v50 = vcombine.high %v21531_v11, %v21531_v11  ;;  %v14316_v12 = vcombine.high %v21450_v28, %v21450_v28  ;;  %v15229_v43 = vpop.eup %15228 }
 0x637   : > { %v5832_v54 = vxor.u32 2147483648, %v15227_v36  ;;  %v5284_v15 = vsub.s32 32, %v5283_v58  ;;  %v5285_v57 = vshll.u32 %v21483_v48, %v5283_v58  ;;  %v5288_v18 = vsub.s32 4294967266, %v5283_v58 }
 0x638   : > { %v5829_v3 = vxor.u32 2147483648, %v15229_v43  ;;  %vm5685_vm3 = vc.u32 %v21543_v59, %v21536_v46  ;;  %v5686_v26 = vadd.s32 1, %v21537_v37  ;;  %v14332_v32 = vcombine.high %v21546_v47, %v21546_v47 }
 0x639   : > { %v5833_v55 = vsel %vm5831_vm9, %v5832_v54, %v15229_v43  ;;  %v10825_v20 = vsel %vm10823_vm8, %v5832_v54, %v15229_v43  ;;  %v5286_v8 = vshrl.u32 %v5268_v13, %v5284_v15  ;;  %v5289_v21 = vadd.s32 127, %v5288_v18 }
 0x63a   : > { %v5830_v48 = vsel %vm5828_vm12, %v15227_v36, %v5829_v3  ;;  %v10822_v44 = vsel %vm10820_vm11, %v15227_v36, %v5829_v3  ;;  %v5687_v29 = vsel %vm5685_vm3, %v5686_v26, %v21537_v37  ;;  %v11505_v45 = vpack.i.b16 %v20308_v52, %v20308_v52  ;;  %v11420_v37 = vld [vmem:[%s16639_s17 + $0x38] sm:$0x77]  ;;  %s15324_s17 = sshll.u32 %s15407_s12, 4  ;;  %s15325_s17 = int_to_ptr.vmem [resolvable:$false] %s15324_s17 }
 0x63b   : > { %v5834_v23 = vsel %vm5827_vm10, %v5830_v48, %v5833_v55  ;;  %v10826_v40 = vsel %vm10819_vm1, %v10822_v44, %v10825_v20  ;;  %v5287_v25 = vor.u32 %v5286_v8, %v5285_v57  ;;  %v5290_v51 = vshll.u32 %v5289_v21, 23  ;;  %s15326_s8 = scalar_lea.vmem %s15325_s17, 8192  ;;  %p15327_p13 = scmp.lt.s32.totalorder %s21833_s20, %s15325_s17 }
 0x63c   : > { %v5835_v9 = vsel %vm5824_vm0, nan, %v5834_v23  ;;  %v10827_v42 = vsel %vm5824_vm0, nan, %v10826_v40  ;;  %v5688_v16 = vadd.s32 %v5687_v29, %v5683_v31  ;;  %v12068_v14 = vshrl.u32 %v11840_v6, 16  ;;  %p15328_p3 = scmp.lt.s32.totalorder %s15326_s8, %s15320_s26 }
 0x63d   : > { %v5883_v39 = vpack.c.bf16 %v5835_v9, %v5835_v9  ;;  %v10875_v13 = vpack.c.bf16 %v10827_v42, %v10827_v42  ;;  %v5291_v52 = vor.u32 4788187, %v5290_v51  ;;  %v5294_v36 = vcvt.s32.f32 %v5287_v25 }
 0x63e   : > { %v5689_v10 = vadd.s32 536870912, %v5688_v16  ;;  %v12071_v58 = vshll.u32 %v11840_v6, 16  ;;  %vm22227_vm2 = vcmask 1040384   ;;  %v11510_v43 = vrot.slane %v11505_v45, %v15632_v19  ;;  %p15329_p7 = por %p15328_p3, %p15327_p13 }
 0x63f   : > { %v12251_v17 = vsel %vm22227_vm2, %v14300_v50, %v14316_v12  ;;  %v10971_v54 = vrot.slane %v10875_v13, 4  ;;  %v5292_v15 = vand.u32 2147483647, %v5291_v52  ;;  %vm22228_vm15 = vcmask 1041408   ;;  %vm22235_vm5 = vmmov %vm22227_vm2 }
 0x640   : > { %v12288_v57 = vsel %vm22228_vm15, %v12251_v17, %v14332_v32  ;;  %v11752_v35 = vrot.slane %v11505_v45, %v15637_v24  ;;  %v21590_v31 = vmul.bf16 %v20574_v56, %v11420_v37  ;;  %v22229_v18 = vand.u32 2147483647, %v21127_v5  ;;  %vm22237_vm10 = vmmov %vm22228_vm15  ;;  %p15330_p9 = pnand %p15329_p7, %p15323_p10 }
 0x641   : > { %v21598_v6 = vshrl.u32 %v5689_v10, 30  ;;  %v22232_v50 = vrot.slane %v21429_v0, %v15632_v19  ;;  %vm22233_vm8 = vcmask 1043456   ;;  %v5295_v32 = vmul.f32 %v5294_v36, %v5292_v15  ;;  %v15255_v10 = vld [vmem:[%s15612_s7 + $0x50] sm:$0xff] }
 0x642   : > { %vm21594_vm14 = vcmp.le.f32.partialorder %v22229_v18, 0.7853982  ;;  %v11163_v26 = vsel %vm22233_vm8, %v5883_v39, %v10971_v54  ;;  %v22234_v56 = vrot.slane %v21429_v0, %v15637_v24  ;;  %v12070_v48 = vrot.slane %v12068_v14, 6  ;;  %vm22238_vm4 = vmmov %vm22233_vm8 }
 0x643   : > { %v14272_v12 = vcombine.low %v11510_v43, %v22232_v50  ;;  %v5301_v55 = vsel %vm21594_vm14, 0, %v5299_v33  ;;  %v11412_v8 = vmul.bf16 %v20377_v30, %v11163_v26  ;;  %v5691_v21 = vshll.u32 %v21598_v6, 30 }
 0x644   : > { %v14288_v20 = vcombine.low %v11752_v35, %v22234_v56  ;;  %v12073_v44 = vrot.slane %v12071_v58, 7  ;;  %v5296_v29 = vxor.u32 2147483648, %v5295_v32  ;;  %v14320_v33 = vcombine.high %v21590_v31, %v21590_v31 }
 0x645   : > { %v21611_v45 = vmul.bf16 %v14272_v12, %v11420_v37  ;;  %13664 = vmatprep.mubr.bf16.mxu0 %v11412_v8  ;;  %v21615_v23 = vsub.s32 %v5688_v16, %v5691_v21  ;;  %v5305_v0 = vadd.s32 3, %v5301_v55  ;;  %v21627_v42 = vand.u32 3, %v5301_v55  ;;  %v15256_v21 = vld [vmem:[%s15612_s7 + $0x78] sm:$0xff] }
 0x646   : > { %v21613_v19 = vmul.bf16 %v14288_v20, %v11420_v37  ;;  %v5297_v24 = vsel %vm5214_vm13, %v5296_v29, %v5295_v32  ;;  %v12074_v9 = vor.u32 %v12073_v44, %v12070_v48  ;;  %vm22236_vm13 = vcmask 1042432   ;;  %v22240_v20 = vld [vmem:[#allocation21_spill] sm:$0xff] }
 0x647   : > { %v14304_v40 = vcombine.high %v21611_v45, %v21611_v45  ;;  %v5300_v25 = vsel %vm21594_vm14, %v21127_v5, %v5297_v24  ;;  %v5694_v51 = vsub.s32 0, %v21615_v23  ;;  %v5306_v39 = vand.u32 3, %v5305_v0  ;;  %vm22239_vm14 = vmmov %vm22235_vm5 }
 0x648   : > { %15230 = vcosq.f32 %v5300_v25  ;;  %v14336_v16 = vcombine.high %v21613_v19, %v21613_v19  ;;  %v12321_v52 = vsel %vm22236_vm13, %v12288_v57, %v12074_v9  ;;  %vm10304_vm11 = vcmp.lt.s32.totalorder %v21627_v42, 2 }
 0x649   : > { %v12263_v14 = vsel %vm22235_vm5, %v14304_v40, %v14320_v33  ;;  %15232 = vsinq.f32 %v5300_v25  ;;  %v14066_v37 = vmin.u32 %v5694_v51, %v21615_v23  ;;  %v11823_v58 = vpack.c.bf16 %v15255_v10, %v15255_v10  ;;  %vm22241_vm5 = vmmov %vm22237_vm10 }
 0x64a   : > { %v21636_v36 = vsel %vm22237_vm10, %v12263_v14, %v14336_v16  ;;  %v14299_v17 = vcombine.low %v21531_v11, %v21531_v11  ;;  %vm5304_vm1 = vweird.f32 %v21127_v5  ;;  %vm10305_vm0 = vcmp.eq.s32.totalorder %v21627_v42, 0  ;;  %v21650_v18 = vpop.f32.mrb[16].mxu1 }
 0x64b   : > { %v5696_v13 = vclz %v14066_v37  ;;  %vm10308_vm12 = vcmp.eq.s32.totalorder %v21627_v42, 2  ;;  %v14315_v54 = vcombine.low %v21450_v28, %v21450_v28  ;;  %vm5307_vm9 = vcmp.lt.s32.totalorder %v5306_v39, 2  ;;  %v21656_v3 = vpop.f32.mrb[17].mxu1  ;;  %v22272_v42 = vld [vmem:[#allocation37_spill] sm:$0xff] }
 0x64c   : > { %v12352_v15 = vsel %vm22238_vm4, %v12321_v52, %v12074_v9  ;;  %v11839_v57 = vmul.bf16 %v11823_v58, %v20625_v38  ;;  %v14331_v35 = vcombine.low %v21546_v47, %v21546_v47  ;;  %vm5308_vm3 = vcmp.eq.s32.totalorder %v5306_v39, 0  ;;  %v21658_v32 = vpop.f32.mrb[18].mxu1  ;;  %v22242_v9 = vld [vmem:[#allocation26_spill] sm:$0xff] }
 0x64d   : > { %v14067_v43 = vadd.s32 4294967294, %v5696_v13  ;;  %vm5630_vm2 = vcmp.lt.s32.totalorder %v21335_v22, 0  ;;  %v5684_v11 = vadd.s32 %v21536_v46, %v21543_v59  ;;  %v12248_v28 = vsel %vm22239_vm14, %v14299_v17, %v14315_v54  ;;  %v21664_v46 = vpop.f32.mrb[19].mxu1 }
 0x64e   : > { %vm5311_vm8 = vcmp.eq.s32.totalorder %v5306_v39, 2  ;;  %v12060_v12 = vshrl.u32 %v11839_v57, 16  ;;  %v12063_v26 = vshll.u32 %v11839_v57, 16  ;;  %v12376_v8 = vsel %vm17005_vm7, %v12352_v15, %v22240_v20 }
 0x64f   : > { %vm14068_vm15 = vcmp.lt.s32.totalorder %v14067_v43, 0  ;;  %v11828_v48 = vpack.c.bf16 %v15256_v21, %v15256_v21  ;;  %v12286_v33 = vsel %vm22241_vm5, %v12248_v28, %v14331_v35  ;;  %vm22243_vm13 = vcmask 1045504  }
 0x650   : > { %v5699_v50 = vsel %vm14068_vm15, 0, %v14067_v43  ;;  %v12062_v44 = vrot.slane %v12060_v12, 6  ;;  %v12065_v29 = vrot.slane %v12063_v26, 7  ;;  %v21671_v16 = vsel %vm22243_vm13, %v12376_v8, %v22242_v9 }
 0x651   : > { %v5700_v47 = vsub.s32 32, %v5699_v50  ;;  %v5701_v55 = vshll.u32 %v21615_v23, %v5699_v50  ;;  %v5704_v56 = vsub.s32 4294967266, %v5699_v50  ;;  %v5714_v23 = vsub.s32 4, %v21598_v6 }
 0x652   : > { %v15231_v59 = vpop.eup %15230  ;;  %v14303_v14 = vcombine.low %v21611_v45, %v21611_v45  ;;  %v14319_v37 = vcombine.low %v21590_v31, %v21590_v31  ;;  %v12066_v54 = vor.u32 %v12065_v29, %v12062_v44  ;;  %v14335_v15 = vcombine.low %v21613_v19, %v21613_v19 }
 0x653   : > { %v15233_v24 = vpop.eup %15232  ;;  %v5312_v0 = vxor.u32 2147483648, %v15231_v59  ;;  %v5702_v40 = vshrl.u32 %v5684_v11, %v5700_v47  ;;  %v5705_v25 = vadd.s32 127, %v5704_v56  ;;  %v5715_v50 = vsel %vm5630_vm2, %v5714_v23, %v21598_v6 }
 0x654   : > { %v5309_v51 = vxor.u32 2147483648, %v15233_v24  ;;  %v11844_v19 = vmul.bf16 %v11828_v48, %v20377_v30  ;;  %v22244_v26 = vand.u32 2147483647, %v21335_v22  ;;  %v12460_v5 = vsel %vm17035_vm6, %v21671_v16, 0  ;;  %v22258_v16 = vld [vmem:[#allocation20_spill] sm:$0xff] }
 0x655   : > { %v5313_v13 = vsel %vm5311_vm8, %v5312_v0, %v15233_v24  ;;  %v10310_v52 = vsel %vm10308_vm12, %v5312_v0, %v15233_v24  ;;  %v5703_v10 = vor.u32 %v5702_v40, %v5701_v55  ;;  %v5706_v58 = vshll.u32 %v5705_v25, 23  ;;  %vm22251_vm12 = vmmov %vm22238_vm4 }
 0x656   : > { %v5310_v17 = vsel %vm5308_vm3, %v15231_v59, %v5309_v51  ;;  %v10307_v43 = vsel %vm10305_vm0, %v15231_v59, %v5309_v51  ;;  %vm21699_vm10 = vcmp.le.f32.partialorder %v22244_v26, 0.7853982  ;;  %v14477_v30 = vadd.f32 %v21223_v53, %v21217_v2  ;;  %vm22250_vm0 = vmmov %vm22241_vm5  ;;  %v22257_v51 = vld [vmem:[#allocation23_spill] sm:$0xff]  ;;  %v22271_v26 = vld [vmem:[#allocation36_spill] sm:$0xff] }
 0x657   : > { %v5314_v45 = vsel %vm5307_vm9, %v5310_v17, %v5313_v13  ;;  %v10311_v31 = vsel %vm10304_vm11, %v10307_v43, %v10310_v52  ;;  %v5707_v57 = vor.u32 4788187, %v5706_v58  ;;  %v5710_v35 = vcvt.s32.f32 %v5703_v10  ;;  %vm22252_vm9 = vmmov %vm22238_vm4  ;;  %v22260_v52 = vld [vmem:[#allocation12_spill] sm:$0xff]  ;;  %v22262_v17 = vld [vmem:[#allocation27_spill] sm:$0xff] }
 0x658   : > { %v5315_v11 = vsel %vm5304_vm1, nan, %v5314_v45  ;;  %v10312_v28 = vsel %vm5304_vm1, nan, %v10311_v31  ;;  %vm22248_vm11 = vcmask 1042432   ;;  %vm22249_vm1 = vmmov %vm22239_vm14  ;;  %v5717_v21 = vsel %vm21699_vm10, 0, %v5715_v50  ;;  %13685 = vst [vmem:[%s21715_s11] sm:$0xff] %v14477_v30  ;;  %v22261_v10 = vld [vmem:[#allocation24_spill] sm:$0xff]  ;;  %v22265_v45 = vld [vmem:[#allocation30_spill] sm:$0xff] }
 0x659   : > { %v5878_v12 = vpack.c.bf16 %v5315_v11, %v5315_v11  ;;  %v10870_v39 = vpack.c.bf16 %v10312_v28, %v10312_v28  ;;  %v5708_v47 = vand.u32 2147483647, %v5707_v57  ;;  %v12319_v56 = vsel %vm22248_vm11, %v12286_v33, %v12066_v54  ;;  %v22263_v43 = vld [vmem:[#allocation28_spill] sm:$0xff]  ;;  %v22266_v57 = vld [vmem:[#allocation31_spill] sm:$0xff]  ;;  %v22268_v28 = vld [vmem:[#allocation33_spill] sm:$0xff] }
 0x65a   : > { %v12260_v8 = vsel %vm22249_vm1, %v14303_v14, %v14319_v37  ;;  %v12100_v44 = vshrl.u32 %v11844_v19, 16  ;;  %v14478_v2 = vadd.f32 %v21231_v41, %v21225_v49  ;;  %v14479_v53 = vadd.f32 %v21241_v27, %v21233_v61  ;;  %v22253_v49 = vld [vmem:[#allocation15_spill] sm:$0xff]  ;;  %v22254_v61 = vld [vmem:[#allocation14_spill] sm:$0xff]  ;;  %v22255_v27 = vld [vmem:[#allocation17_spill] sm:$0xff] }
 0x65b   : > { %v10966_v6 = vrot.slane %v10870_v39, 4  ;;  %v5711_v59 = vmul.f32 %v5710_v35, %v5708_v47  ;;  %v21713_v48 = vsel %vm22250_vm0, %v12260_v8, %v14335_v15  ;;  %v14480_v29 = vadd.f32 %v21250_v1, %v21243_v60  ;;  %v22259_v14 = vld [vmem:[#allocation22_spill] sm:$0xff]  ;;  %v22264_v15 = vld [vmem:[#allocation29_spill] sm:$0xff]  ;;  %v22267_v35 = vld [vmem:[#allocation32_spill] sm:$0xff] }
 0x65c   : > { %v12350_v0 = vsel %vm22252_vm9, %v12319_v56, %v12066_v54  ;;  %v14481_v40 = vadd.f32 %v21262_v62, %v21252_v4  ;;  %v12103_v23 = vshll.u32 %v11844_v19, 16  ;;  %13686 = vst [vmem:[%s21715_s11 + $0x8] sm:$0xff] %v14478_v2  ;;  %13687 = vst [vmem:[%s21715_s11 + $0x10] sm:$0xff] %v14479_v53  ;;  %v14482_v41 = vadd.f32 %v22253_v49, %v21264_v7  ;;  %v15257_v4 = vld [vmem:[%s15612_s7 + $0x70] sm:$0xff]  ;;  %v22269_v19 = vld [vmem:[#allocation34_spill] sm:$0xff] }
 0x65d   : > { %v11143_v33 = vsel %vm22251_vm12, %v5878_v12, %v10966_v6  ;;  %v5712_v24 = vxor.u32 2147483648, %v5711_v59  ;;  %13688 = vst [vmem:[%s21715_s11 + $0x18] sm:$0xff] %v14480_v29  ;;  %v14483_v60 = vadd.f32 %v22255_v27, %v22254_v61  ;;  %v11827_v62 = vpack.c.bf16 %v15257_v4, %v15257_v4  ;;  %v22270_v12 = vld [vmem:[#allocation35_spill] sm:$0xff]  ;;  %v22273_v30 = vld [vmem:[#allocation18_spill] sm:$0xff]  ;;  %vm22274_vm4 = vmmov %vm22243_vm13 }
 0x65e   : > { %v11407_v25 = vmul.bf16 %v20625_v38, %v11143_v33  ;;  %13689 = vst [vmem:[%s21715_s11 + $0x20] sm:$0xff] %v14481_v40  ;;  %v22256_v38 = vld [vmem:[#allocation16_spill] sm:$0xff]  ;;  %v14485_v37 = vadd.f32 %v22259_v14, %v22258_v16  ;;  %v12375_v13 = vsel %vm17005_vm7, %v12350_v0, %v22240_v20  ;;  %13690 = vst [vmem:[%s21715_s11 + $0x28] sm:$0xff] %v14482_v41  ;;  %v12102_v56 = vrot.slane %v12100_v44, 6 }
 0x65f   : > { %v5713_v1 = vsel %vm5630_vm2, %v5712_v24, %v5711_v59  ;;  %v14484_v9 = vadd.f32 %v22257_v51, %v22256_v38  ;;  %13691 = vst [vmem:[%s21715_s11 + $0x30] sm:$0xff] %v14483_v60  ;;  %v14486_v58 = vadd.f32 %v22261_v10, %v22260_v52  ;;  %v14487_v54 = vadd.f32 %v22263_v43, %v22262_v17  ;;  %v22275_v59 = vld [vmem:[#allocation13_spill] sm:$0xff]  ;;  %vm22276_vm8 = vmmov %vm22248_vm11 }
 0x660   : > { %13439 = vmatmul.mubr.bf16.gmra.mrb[24].mxu1 %v11407_v25  ;;  %v5716_v7 = vsel %vm21699_vm10, %v21335_v22, %v5713_v1  ;;  %13693 = vst [vmem:[%s21715_s11 + $0x40] sm:$0xff] %v14485_v37  ;;  %v14488_v31 = vadd.f32 %v22265_v45, %v22264_v15  ;;  %v14489_v11 = vadd.f32 %v22267_v35, %v22266_v57  ;;  %v12105_v8 = vrot.slane %v12103_v23, 7  ;;  %vm22277_vm11 = vmmov %vm22252_vm9  ;;  %v22280_v15 = vld [vmem:[#allocation25_spill] sm:$0xff] }
 0x661   : > { %15234 = vcosq.f32 %v5716_v7  ;;  %13448 = vmatprep.mubr.bf16.mxu1 %v12460_v5  ;;  %13692 = vst [vmem:[%s21715_s11 + $0x38] sm:$0xff] %v14484_v9  ;;  %v14490_v50 = vadd.f32 %v21343_v34, %v22268_v28  ;;  %13694 = vst [vmem:[%s21715_s11 + $0x48] sm:$0xff] %v14486_v58  ;;  %v14491_v39 = vadd.f32 %v22270_v12, %v22269_v19  ;;  %v5721_v5 = vadd.s32 3, %v5717_v21 }
 0x662   : > { %15236 = vsinq.f32 %v5716_v7  ;;  %13695 = vst [vmem:[%s21715_s11 + $0x50] sm:$0xff] %v14487_v54  ;;  %v14492_v47 = vadd.f32 %v22272_v42, %v22271_v26  ;;  %13696 = vst [vmem:[%s21715_s11 + $0x58] sm:$0xff] %v14488_v31  ;;  %v12424_v6 = vsel %vm22274_vm4, %v12375_v13, %v22273_v30  ;;  %v11843_v34 = vmul.bf16 %v11827_v62, %v22275_v59 }
 0x663   : > { %13697 = vst [vmem:[%s21715_s11 + $0x60] sm:$0xff] %v14489_v11  ;;  %13698 = vst [vmem:[%s21715_s11 + $0x68] sm:$0xff] %v14490_v50  ;;  %v5722_v2 = vand.u32 3, %v5721_v5  ;;  %v10715_v53 = vand.u32 3, %v5717_v21  ;;  %v12459_v29 = vsel %vm17035_vm6, %v12424_v6, 0  ;;  %v12106_v33 = vor.u32 %v12105_v8, %v12102_v56 }
 0x664   : > { %13699 = vst [vmem:[%s21715_s11 + $0x70] sm:$0xff] %v14491_v39  ;;  %13700 = vst [vmem:[%s21715_s11 + $0x78] sm:$0xff] %v14492_v47  ;;  %v12092_v24 = vshrl.u32 %v11843_v34, 16  ;;  %v12095_v0 = vshll.u32 %v11843_v34, 16  ;;  %vm5720_vm10 = vweird.f32 %v21335_v22 }
 0x665   : > { %vm5724_vm3 = vcmp.eq.s32.totalorder %v5722_v2, 0  ;;  %vm5727_vm2 = vcmp.eq.s32.totalorder %v5722_v2, 2  ;;  %vm10717_vm15 = vcmp.eq.s32.totalorder %v10715_v53, 0  ;;  %vm10720_vm14 = vcmp.eq.s32.totalorder %v10715_v53, 2  ;;  %vm22278_vm1 = vmmov %vm22276_vm8 }
 0x666   : > { %v12329_v23 = vsel %vm22276_vm8, %v21636_v36, %v12106_v33  ;;  %v12094_v49 = vrot.slane %v12092_v24, 6  ;;  %v12097_v41 = vrot.slane %v12095_v0, 7  ;;  %vm5723_vm5 = vcmp.lt.s32.totalorder %v5722_v2, 2  ;;  %vm22279_vm0 = vmmov %vm22252_vm9 }
 0x667   : > { %vm10716_vm13 = vcmp.lt.s32.totalorder %v10715_v53, 2  ;;  %v12360_v36 = vsel %vm22277_vm11, %v12329_v23, %v12106_v33  ;;  %vm22281_vm12 = vmmov %vm22274_vm4 }
 0x668   : > { %13449 = vmatmul.mubr.bf16.gmra.mrb[28].mxu1 %v12459_v29  ;;  %v13646_v61 = vpop.f32.mrb[16].mxu0  ;;  %v12098_v37 = vor.u32 %v12097_v41, %v12094_v49  ;;  %v12380_v17 = vsel %vm17005_vm7, %v12360_v36, %v22240_v20  ;;  %vm22282_vm9 = vmmov %vm22279_vm0 }
 0x669   : > { %v14493_v1 = vadd.f32 %v13646_v61, %v21650_v18  ;;  %v13648_v4 = vpop.f32.mrb[17].mxu0  ;;  %v12444_v22 = vsel %vm22281_vm12, %v12380_v17, %v22280_v15 }
 0x66a   : > { %v14494_v51 = vadd.f32 %v13648_v4, %v21656_v3  ;;  %v13650_v9 = vpop.f32.mrb[18].mxu0  ;;  %v12464_v31 = vsel %vm17035_vm6, %v12444_v22, 0 }
 0x66b   : > { %v15235_v40 = vpop.eup %15234  ;;  %13701 = vst [vmem:[%s21715_s11 + $0x80] sm:$0xff] %v14493_v1  ;;  %v14495_v7 = vadd.f32 %v13650_v9, %v21658_v32  ;;  %v13652_v13 = vpop.f32.mrb[19].mxu0  ;;  %v12327_v32 = vsel %vm22278_vm1, %v21713_v48, %v12098_v37  ;;  %v22283_v48 = vld [vmem:[#allocation11_spill] sm:$0xff] }
 0x66c   : > { %v15237_v44 = vpop.eup %15236  ;;  %v5728_v25 = vxor.u32 2147483648, %v15235_v40  ;;  %13702 = vst [vmem:[%s21715_s11 + $0x88] sm:$0xff] %v14494_v51  ;;  %v14496_v10 = vadd.f32 %v13652_v13, %v21664_v46  ;;  %v12358_v46 = vsel %vm22282_vm9, %v12327_v32, %v12098_v37 }
 0x66d   : > { %v5725_v21 = vxor.u32 2147483648, %v15237_v44  ;;  %13703 = vst [vmem:[%s21715_s11 + $0x90] sm:$0xff] %v14495_v7  ;;  %v12379_v57 = vsel %vm17005_vm7, %v12358_v46, %v22240_v20 }
 0x66e   : > { %v5729_v27 = vsel %vm5727_vm2, %v5728_v25, %v15237_v44  ;;  %v10722_v60 = vsel %vm10720_vm14, %v5728_v25, %v15237_v44  ;;  %13704 = vst [vmem:[%s21715_s11 + $0x98] sm:$0xff] %v14496_v10  ;;  %v12440_v35 = vsel %vm22274_vm4, %v12379_v57, %v22283_v48 }
 0x66f   : > { %v5726_v62 = vsel %vm5724_vm3, %v15235_v40, %v5725_v21  ;;  %v10719_v38 = vsel %vm10717_vm15, %v15235_v40, %v5725_v21  ;;  %v12463_v11 = vsel %vm17035_vm6, %v12440_v35, 0 }
 0x670   : > { %v5730_v16 = vsel %vm5723_vm5, %v5726_v62, %v5729_v27  ;;  %v10723_v14 = vsel %vm10716_vm13, %v10719_v38, %v10722_v60 }
 0x671   : > { %v5731_v18 = vsel %vm5720_vm10, nan, %v5730_v16  ;;  %v10724_v52 = vsel %vm5720_vm10, nan, %v10723_v14 }
 0x672   : > { %v5882_v58 = vpack.c.bf16 %v5731_v18, %v5731_v18  ;;  %v10874_v3 = vpack.c.bf16 %v10724_v52, %v10724_v52 }
 0x674   : > { %v10970_v43 = vrot.slane %v10874_v3, 4 }
 0x676   : > { %v11159_v54 = vsel %vm22279_vm0, %v5882_v58, %v10970_v43 }
 0x677   : > { %v11411_v45 = vmul.bf16 %v22275_v59, %v11159_v54 }
 0x679   : > { %13665 = vmatmul.mubr.bf16.gmra.mrb[24].mxu0 %v11411_v45 }
 0x67a   : > { %13674 = vmatprep.mubr.bf16.mxu0 %v12464_v31 }
 0x681   : > { %13675 = vmatmul.mubr.bf16.gmra.mrb[28].mxu0 %v12463_v11 }
 0x6ba   : > { %v13430_v28 = vpop.f32.mrb[20].mxu1 }
 0x6bb   : > { %v13432_v50 = vpop.f32.mrb[21].mxu1 }
 0x6bc   : > { %v13434_v19 = vpop.f32.mrb[22].mxu1 }
 0x6bd   : > { %v13436_v12 = vpop.f32.mrb[23].mxu1 }
 0x6de   : > { %v13656_v39 = vpop.f32.mrb[20].mxu0 }
 0x6df   : > { %v14497_v26 = vadd.f32 %v13656_v39, %v13430_v28  ;;  %v13658_v42 = vpop.f32.mrb[21].mxu0 }
 0x6e0   : > { %v14498_v47 = vadd.f32 %v13658_v42, %v13432_v50  ;;  %v13660_v63 = vpop.f32.mrb[22].mxu0 }
 0x6e1   : > { %13705 = vst [vmem:[%s21715_s11 + $0xa0] sm:$0xff] %v14497_v26  ;;  %v14499_v20 = vadd.f32 %v13660_v63, %v13434_v19  ;;  %v13662_v5 = vpop.f32.mrb[23].mxu0 }
 0x6e2   : > { %13706 = vst [vmem:[%s21715_s11 + $0xa8] sm:$0xff] %v14498_v47  ;;  %v14500_v56 = vadd.f32 %v13662_v5, %v13436_v12 }
 0x6e3   : > { %13707 = vst [vmem:[%s21715_s11 + $0xb0] sm:$0xff] %v14499_v20 }
 0x6e4   : > { %13708 = vst [vmem:[%s21715_s11 + $0xb8] sm:$0xff] %v14500_v56 }
 0x733   : > { %v13440_v55 = vpop.f32.mrb[24].mxu1 }
 0x734   : > { %v13442_v8 = vpop.f32.mrb[25].mxu1 }
 0x735   : > { %v13444_v30 = vpop.f32.mrb[26].mxu1 }
 0x736   : > { %v13446_v6 = vpop.f32.mrb[27].mxu1 }
 0x73b   : > { %v13450_v59 = vpop.f32.mrb[28].mxu1 }
 0x73c   : > { %v13452_v34 = vpop.f32.mrb[29].mxu1 }
 0x73d   : > { %v13454_v2 = vpop.f32.mrb[30].mxu1 }
 0x73e   : > { %v13456_v53 = vpop.f32.mrb[31].mxu1 }
 0x74c   : > { %v13666_v29 = vpop.f32.mrb[24].mxu0 }
 0x74d   : > { %v14501_v33 = vadd.f32 %v13666_v29, %v13440_v55  ;;  %v13668_v24 = vpop.f32.mrb[25].mxu0 }
 0x74e   : > { %v14502_v0 = vadd.f32 %v13668_v24, %v13442_v8  ;;  %v13670_v40 = vpop.f32.mrb[26].mxu0 }
 0x74f   : > { %13709 = vst [vmem:[%s21715_s11 + $0xc0] sm:$0xff] %v14501_v33  ;;  %v14503_v44 = vadd.f32 %v13670_v40, %v13444_v30  ;;  %v13672_v25 = vpop.f32.mrb[27].mxu0 }
 0x750   : > { %13710 = vst [vmem:[%s21715_s11 + $0xc8] sm:$0xff] %v14502_v0  ;;  %v14504_v23 = vadd.f32 %v13672_v25, %v13446_v6 }
 0x751   : > { %13711 = vst [vmem:[%s21715_s11 + $0xd0] sm:$0xff] %v14503_v44 }
 0x752   : > { %13712 = vst [vmem:[%s21715_s11 + $0xd8] sm:$0xff] %v14504_v23 }
 0x754   : > { %v13676_v49 = vpop.f32.mrb[28].mxu0 }
 0x755   : > { %v14505_v41 = vadd.f32 %v13676_v49, %v13450_v59  ;;  %v13678_v21 = vpop.f32.mrb[29].mxu0 }
 0x756   : > { %v14506_v61 = vadd.f32 %v13678_v21, %v13452_v34  ;;  %v13680_v27 = vpop.f32.mrb[30].mxu0 }
 0x757   : > { %13713 = vst [vmem:[%s21715_s11 + $0xe0] sm:$0xff] %v14505_v41  ;;  %v14507_v60 = vadd.f32 %v13680_v27, %v13454_v2  ;;  %v13682_v1 = vpop.f32.mrb[31].mxu0 }
 0x758   : > { %13714 = vst [vmem:[%s21715_s11 + $0xe8] sm:$0xff] %v14506_v61  ;;  %v14508_v4 = vadd.f32 %v13682_v1, %v13456_v53 }
 0x759   : > { %13715 = vst [vmem:[%s21715_s11 + $0xf0] sm:$0xff] %v14507_v60 }
 0x75a   : > { %13716 = vst [vmem:[%s21715_s11 + $0xf8] sm:$0xff] %v14508_v4 }
 0x75b   : > { %15333 = shalt.err (!%p15330_p9)
}
 0x75c   : > { %s15334_s29 = scalar_lea.hbm %s21831_s30, 4096  ;;  %s15338_s15 = scalar_lea.hbm %s21886_s6, 8192 }
 0x75d   : > { %p15335_p2 = scmp.ne.s32.totalorder %s21831_s30, %s15334_s29  ;;  %p15339_p11 = scmp.lt.u32.totalorder %s21831_s30, %s21886_s6 }
 0x75e   : > { %p15340_p1 = scmp.lt.u32.totalorder %s15338_s15, %s15334_s29  ;;  %p15342_p6 = scmp.lt.u32.totalorder %s15334_s29, %s21831_s30 }
 0x75f   : > { %p15336_p0 = pnand %p15335_p2, %p15536_p12 }
 0x760   : > { %p15341_p4 = por %p15340_p1, %p15339_p11 }
 0x761   : > { %p15337_p5 = pneg %p15336_p0 }
 0x762   : > { %p15343_p8 = por %p15342_p6, %p15341_p4 }
 0x764   : > { %p15344_p10 = pnand %p15343_p8, %p15337_p5 }
 0x766   : > { %15347 = shalt.err (!%p15344_p10)
}
 0x767   : > { %s15408_s18 = smov 256   ;;  %s15409_s7 = smov 16  }
 0x768   : > { %14771 = dma.vmem_to_hbm [thread:$0]  (%p15536_p12), %s21833_s20, 4096, %s21831_s30, %s13718_s25, %s15408_s18, %s15408_s18, %s15409_s7  }
 0x769 PF: > { %s13747_s26 = sand.u32 1, %s15378_s21   ;;  %p22284_p13 = scmp.ne.s32.totalorder %s21972_s28, 0 }
 0x76a   : > { %p22285_p3 = scmp.ge.s32.totalorder %s15390_s24, 2  ;;  %s13748_s12 = scalar_lea.sflag [#allocation4], %s13747_s26 }
 0x76c   : > { %p14782_p7 = pnand %p22285_p3, %p22284_p13 }
 0x76e   : > { %15373 = dma.done.wait (!%p14782_p7), %s13748_s12, 4096  }
 0x76f   : > { %15375 = vsyncadd (!%p14782_p7), %s13748_s12, 4294963200  ;;  %p20_p9 = scmp.ge.s32.totalorder %s15501_s9, 4   ;;  %s22286_s21 = smov %s15382_s22 }
 0x770   : > { %s22287_s22 = smov %s15386_s23  ;;  %s22288_s23 = smov %s15532_s13 }
 0x771   : > { %s22289_s24 = smov %s15501_s9  ;;  %22 = sbr.rel (!%p20_p9) target bundleno = 6 (0x6), region = 105 }
 0x778   :  { %13753 = vsyncpa [#allocation3], 1 }
 0x779   :  { %13755 = vsyncpa [#allocation3 + $0x1], 1 }
 0x77a   :  { %13756 = vsyncpa [#allocation6], 1 }
 0x77b   :  { %13757 = vsyncpa [#allocation4], 1 }
 0x77c   :  { %13759 = vsyncpa [#allocation4 + $0x1], 1 }

</bundles_post_ra>
